<compile_context>
chip_gen: v7x
topology: tpu7x:2x2x1
jax: 0.10.0
libtpu: 0.0.40
codegen_flags: <defaults>
</compile_context>

<pallas_src>
import functools

import jax
import jax.numpy as jnp
from jax.experimental import pallas as pl
from jax.experimental.pallas import tpu as pltpu


# ------------------------------ Pallas kernel ------------------------------ #

def _fused_forward_kernel(x_ref, w1_ref, sc1_ref, sh1_ref, w2_ref, sc2_ref, sh2_ref,
                          w3_ref, sh3_ref, o_ref, feat_sc, acc2_sc):
    j = pl.program_id(0)

    # AdaptiveAvgPool2d((1,1)) + flatten, computed once at step 0.  x is (B, HW, C) with
    # channels on the lane axis, so this is a cheap sublane-reduce mean.
    @pl.when(j == 0)
    def _():
        feat_sc[...] = jnp.mean(x_ref[...], axis=1)           # (B, C) f32
        acc2_sc[...] = jnp.zeros_like(acc2_sc)

    # way1, output-feature tile j.  int8 weights dequantized on-chip; the per-output-channel
    # scale is applied to the f32 accumulator (folded with the BN/bias shift epilogue).
    w1_deq = w1_ref[...].astype(jnp.float32)                  # (K1, tn1)
    a1 = jnp.dot(feat_sc[...], w1_deq, preferred_element_type=jnp.float32)
    h1 = jnp.maximum(a1 * sc1_ref[...] + sh1_ref[...], 0.0)   # (B, tn1) f32

    # way2 partial product: layer-1 N == layer-2 K, so accumulate h1_tile @ w2[K-tile j].
    w2_deq = w2_ref[...].astype(jnp.float32)                  # (tn1, N2p)
    acc2_sc[...] += jnp.dot(h1, w2_deq, preferred_element_type=jnp.float32)

    # Last step: finish way2 (scale + shift + ReLU) and the classifier head.
    # NOTE: o_ref is written only here.  Its block index is constant across the grid, so
    # the output block stays resident and this single write is the one written back to HBM.
    @pl.when(j == pl.num_programs(0) - 1)
    def _():
        h2 = jnp.maximum(acc2_sc[...] * sc2_ref[...] + sh2_ref[...], 0.0)
        a3 = jnp.dot(h2, w3_ref[...].astype(jnp.float32),
                     preferred_element_type=jnp.float32)
        o_ref[...] = (a3 + sh3_ref[...]).astype(o_ref.dtype)


def _fused_forward(xhwc, w1q, sc1, sh1, w2q, sc2, sh2, w3, sh3):
    """xhwc: (B, HW, C) f32; w1q: (NT, K1, tn1) int8 pre-tiled; w2q: (tn1*NT, N2p) int8;
    w3: (N2p, NCp) bf16; sc*/sh*: (1, N) f32 per-feature scale / shift vectors."""
    B, HW, C = xhwc.shape
    NT, K1, tn1 = w1q.shape
    N1 = NT * tn1
    _, N2p = w2q.shape
    _, NCp = w3.shape
    assert K1 == C and w2q.shape[0] == N1

    flops = 2 * B * (C * N1 + N1 * N2p + N2p * NCp)
    bytes_accessed = (xhwc.size * 4 + w1q.size + w2q.size + w3.size * 2
                      + (sc1.size + sh1.size + sc2.size + sh2.size + sh3.size) * 4
                      + B * NCp * 4)

    return pl.pallas_call(
        _fused_forward_kernel,
        out_shape=jax.ShapeDtypeStruct((B, NCp), jnp.float32),
        grid_spec=pltpu.PrefetchScalarGridSpec(
            num_scalar_prefetch=0,
            grid=(NT,),
            in_specs=[
                pl.BlockSpec((B, HW, C), lambda j: (0, 0, 0)),               # x, resident, lane-dense
                pl.BlockSpec((pl.Squeezed(), K1, tn1), lambda j: (j, 0, 0)),  # w1 tile: contiguous slab
                pl.BlockSpec((1, tn1), lambda j: (0, j)),                    # scale1 tile
                pl.BlockSpec((1, tn1), lambda j: (0, j)),                    # shift1 tile
                pl.BlockSpec((tn1, N2p), lambda j: (j, 0)),                  # w2 K-tile, streamed
                pl.BlockSpec((1, N2p), lambda j: (0, 0)),                    # scale2, resident
                pl.BlockSpec((1, N2p), lambda j: (0, 0)),                    # shift2, resident
                pl.BlockSpec((N2p, NCp), lambda j: (0, 0)),                  # w3, resident (small)
                pl.BlockSpec((1, NCp), lambda j: (0, 0)),                    # shift3, resident
            ],
            out_specs=pl.BlockSpec((B, NCp), lambda j: (0, 0)),              # written at last step
            scratch_shapes=[
                pltpu.VMEM((B, C), jnp.float32),       # pooled features
                pltpu.VMEM((B, N2p), jnp.float32),     # layer-2 accumulator
            ],
        ),
        compiler_params=pltpu.CompilerParams(
            # cross-step dependence through the scratch accumulators -> reduction axis
            dimension_semantics=("arbitrary",),
            vmem_limit_bytes=32 * 1024 * 1024,         # ~9 MiB actually used; v5e default is 16 MiB
        ),
        cost_estimate=pl.CostEstimate(flops=flops, transcendentals=0,
                                      bytes_accessed=bytes_accessed),
    )(xhwc, w1q, sc1, sh1, w2q, sc2, sh2, w3, sh3)


# --------------------------- Parameter construction ------------------------- #

def _fold_bn_into_linear(w, b, gamma, beta, mean, var, eps=1e-5):
    """Fold Linear bias + BatchNorm1d(eval) into the weights and a per-feature shift.

    BN(x@W + b) = (x@W + b - mean) * s + beta,  s = gamma/sqrt(var+eps)
                = x @ (W * s) + ((b - mean) * s + beta)
    """
    scale = gamma / jnp.sqrt(var + eps)
    return w * scale[None, :], (b - mean) * scale + beta


def _quantize_int8_per_col(w):
    """Weight-only int8 quantization with one scale per output channel (column)."""
    absmax = jnp.max(jnp.abs(w), axis=0)
    scale = jnp.where(absmax > 0, absmax / 127.0, 1.0).astype(jnp.float32)
    q = jnp.clip(jnp.round(w / scale[None, :]), -127.0, 127.0).astype(jnp.int8)
    return q, scale


def _pad_axis(a, axis, target):
    pad = [(0, 0)] * a.ndim
    pad[axis] = (0, target - a.shape[axis])
    return jnp.pad(a, pad)


def make_params(in_size=2880, num_classes=20, seed=0, tn1=1024):
    h1, h2 = 2048, 1000
    h2p = 1024                                       # pad 1000 -> lane multiple
    ncp = ((num_classes + 127) // 128) * 128         # pad 20 -> 128
    dt = jnp.float32
    keys = jax.random.split(jax.random.PRNGKey(seed), 6)

    def lin(kw, kb, fan_in, fan_out):
        w = jax.random.normal(kw, (fan_in, fan_out), dt) * 0.02
        b = jax.random.normal(kb, (fan_out,), dt) * 0.01
        return w, b

    w1, b1 = lin(keys[0], keys[1], in_size, h1)
    w2, b2 = lin(keys[2], keys[3], h1, h2)
    w3, b3 = lin(keys[4], keys[5], h2, num_classes)

    def bn_stats(n):
        i = jnp.arange(n, dtype=dt)
        gamma = 1.0 + 0.1 * jnp.cos(i * 0.01)
        beta = 0.05 * jnp.sin(i * 0.02)
        mean = 0.01 * jnp.sin(i * 0.03)
        var = 1.0 + 0.2 * jnp.abs(jnp.sin(i * 0.05))
        return gamma, beta, mean, var

    w1f, sh1 = _fold_bn_into_linear(w1, b1, *bn_stats(h1))
    w2f, sh2 = _fold_bn_into_linear(w2, b2, *bn_stats(h2))

    # Pad ragged feature dims (zeros are exact: padded h2 cols stay 0 through ReLU and the
    # padded w3 rows/cols are zero, so padded logits are 0 and are sliced off).
    w2f = _pad_axis(w2f, 1, h2p)
    sh2 = _pad_axis(sh2, 0, h2p)
    w3p = _pad_axis(_pad_axis(w3, 0, h2p), 1, ncp)
    sh3 = _pad_axis(b3, 0, ncp)

    # int8 weight streaming (per-output-channel scales) for the two big matrices.
    assert h1 % tn1 == 0
    w1q, sc1 = _quantize_int8_per_col(w1f)
    w2q, sc2 = _quantize_int8_per_col(w2f)

    # Pre-tile w1 in HBM: (K1, N1) -> (N1//tn1, K1, tn1) so each grid step streams one
    # fully contiguous slab instead of 2880 strided ~1 KiB column chunks.
    w1q = w1q.reshape(in_size, h1 // tn1, tn1).transpose(1, 0, 2)

    return dict(
        w1q=w1q, sc1=sc1.reshape(1, -1), sh1=sh1.reshape(1, -1).astype(jnp.float32),
        w2q=w2q, sc2=sc2.reshape(1, -1), sh2=sh2.reshape(1, -1).astype(jnp.float32),
        w3=w3p.astype(jnp.bfloat16), sh3=sh3.reshape(1, -1).astype(jnp.float32),
    )


# ------------------------------- Forward pass ------------------------------- #

@functools.partial(jax.jit, static_argnames=("num_classes",))
def simple_classifier_forward(x, params, num_classes=20):
    B, C, H, W = x.shape
    # Lane-dense layout: channels last, so the pool / matmul-K axis maps to lanes.
    xhwc = x.reshape(B, C, H * W).transpose(0, 2, 1)           # (B, HW, C)
    padded_logits = _fused_forward(
        xhwc,
        params["w1q"], params["sc1"], params["sh1"],
        params["w2q"], params["sc2"], params["sh2"],
        params["w3"], params["sh3"],
    )
    return padded_logits[:, :num_classes]


if __name__ == "__main__":
    B, C, H, W = 2, 2880, 4, 4   # in_size=2880 is forced by the module's first Linear
    key = jax.random.PRNGKey(0)
    x = jax.random.normal(key, (B, C, H, W), jnp.float32)

    params = make_params(in_size=C, num_classes=20, seed=0, tn1=1024)

    logits = simple_classifier_forward(x, params, num_classes=20)
    logits = jax.block_until_ready(logits)

    assert logits.shape == (B, 20), logits.shape
    assert bool(jnp.all(jnp.isfinite(logits)))
    print("KERNEL_OK")
</pallas_src>

<mosaic_0001>
module attributes {stable_mosaic.version = 11 : i64} {
  func.func @_fused_forward_kernel(%arg0: i32, %arg1: memref<2x16x2880xf32, #tpu.memory_space<vmem>>, %arg2: memref<1x2880x1024xi8, #tpu.memory_space<vmem>>, %arg3: memref<1x1024xf32, #tpu.memory_space<vmem>>, %arg4: memref<1x1024xf32, #tpu.memory_space<vmem>>, %arg5: memref<1024x1024xi8, #tpu.memory_space<vmem>>, %arg6: memref<1x1024xf32, #tpu.memory_space<vmem>>, %arg7: memref<1x1024xf32, #tpu.memory_space<vmem>>, %arg8: memref<1024x128xbf16, #tpu.memory_space<vmem>>, %arg9: memref<1x128xf32, #tpu.memory_space<vmem>>, %arg10: memref<2x128xf32, #tpu.memory_space<vmem>>, %arg11: memref<2x2880xf32, #tpu.memory_space<vmem>>, %arg12: memref<2x1024xf32, #tpu.memory_space<vmem>>) attributes {dimension_semantics = [#tpu.dimension_semantics<arbitrary>], iteration_bounds = array<i64: 2>, scalar_prefetch = 0 : i64, scratch_operands = 2 : i64, tpu.core_type = #tpu.core_type<tc>, window_params = [{pipeline_mode = #tpu.pipeline_mode<synchronous>, transform_indices = @transform_0, window_bounds = array<i64: 2, 16, 2880>}, {transform_indices = @transform_1, window_bounds = array<i64: 1, 2880, 1024>}, {transform_indices = @transform_2, window_bounds = array<i64: 1, 1024>}, {transform_indices = @transform_3, window_bounds = array<i64: 1, 1024>}, {transform_indices = @transform_4, window_bounds = array<i64: 1024, 1024>}, {pipeline_mode = #tpu.pipeline_mode<synchronous>, transform_indices = @transform_5, window_bounds = array<i64: 1, 1024>}, {pipeline_mode = #tpu.pipeline_mode<synchronous>, transform_indices = @transform_6, window_bounds = array<i64: 1, 1024>}, {pipeline_mode = #tpu.pipeline_mode<synchronous>, transform_indices = @transform_7, window_bounds = array<i64: 1024, 128>}, {pipeline_mode = #tpu.pipeline_mode<synchronous>, transform_indices = @transform_8, window_bounds = array<i64: 1, 128>}, {pipeline_mode = #tpu.pipeline_mode<synchronous>, transform_indices = @transform_9, window_bounds = array<i64: 2, 128>}]} {
    %c0_i32 = arith.constant 0 : i32
    %0 = arith.cmpi eq, %arg0, %c0_i32 : i32
    %1 = arith.extui %0 : i1 to i32
    %c0_i32_0 = arith.constant 0 : i32
    %2 = arith.cmpi ne, %1, %c0_i32_0 : i32
    scf.if %2 {
      %c0_18 = arith.constant 0 : index
      %c0_19 = arith.constant 0 : index
      %c0_20 = arith.constant 0 : index
      %25 = vector.load %arg1[%c0_18, %c0_19, %c0_20] : memref<2x16x2880xf32, #tpu.memory_space<vmem>>, vector<2x16x2880xf32>
      %cst_21 = arith.constant dense<0.000000e+00> : vector<2x2880xf32>
      %26 = vector.multi_reduction <add>, %25, %cst_21 [1] : vector<2x16x2880xf32> to vector<2x2880xf32>
      %cst_22 = arith.constant 1.600000e+01 : f32
      %27 = vector.broadcast %cst_22 : f32 to vector<2x2880xf32>
      %28 = arith.divf %26, %27 : vector<2x2880xf32>
      %c0_23 = arith.constant 0 : index
      %c0_24 = arith.constant 0 : index
      %29 = vector.load %arg11[%c0_23, %c0_24] : memref<2x2880xf32, #tpu.memory_space<vmem>>, vector<2x2880xf32>
      tpu.vector_store %arg11[%c0_23, %c0_24], %28 {strides = array<i32>} : memref<2x2880xf32, #tpu.memory_space<vmem>>, vector<2x2880xf32>,
      %cst_25 = arith.constant 0.000000e+00 : f32
      %30 = vector.broadcast %cst_25 : f32 to vector<2x1024xf32>
      %c0_26 = arith.constant 0 : index
      %c0_27 = arith.constant 0 : index
      %31 = vector.load %arg12[%c0_26, %c0_27] : memref<2x1024xf32, #tpu.memory_space<vmem>>, vector<2x1024xf32>
      tpu.vector_store %arg12[%c0_26, %c0_27], %30 {strides = array<i32>} : memref<2x1024xf32, #tpu.memory_space<vmem>>, vector<2x1024xf32>,
    } else {
    }
    %c0 = arith.constant 0 : index
    %c0_1 = arith.constant 0 : index
    %c0_2 = arith.constant 0 : index
    %3 = vector.load %arg2[%c0, %c0_1, %c0_2] : memref<1x2880x1024xi8, #tpu.memory_space<vmem>>, vector<1x2880x1024xi8>
    %4 = vector.shape_cast %3 : vector<1x2880x1024xi8> to vector<2880x1024xi8>
    %5 = arith.sitofp %4 : vector<2880x1024xi8> to vector<2880x1024xf32>
    %c0_3 = arith.constant 0 : index
    %c0_4 = arith.constant 0 : index
    %6 = vector.load %arg11[%c0_3, %c0_4] : memref<2x2880xf32, #tpu.memory_space<vmem>>, vector<2x2880xf32>
    %cst = arith.constant dense<0.000000e+00> : vector<2x1024xf32>
    %7 = tpu.matmul %6, %5, %cst {dimension_numbers = #tpu.dot_dimension_numbers<[1], [0], [0], [1], [0, 0, 1, 1], [], []>} : vector<2x2880xf32>, vector<2880x1024xf32>, vector<2x1024xf32> -> vector<2x1024xf32>
    %c0_5 = arith.constant 0 : index
    %c0_6 = arith.constant 0 : index
    %8 = vector.load %arg3[%c0_5, %c0_6] : memref<1x1024xf32, #tpu.memory_space<vmem>>, vector<1x1024xf32>
    %9 = vector.broadcast %8 : vector<1x1024xf32> to vector<2x1024xf32>
    %10 = arith.mulf %7, %9 : vector<2x1024xf32>
    %c0_7 = arith.constant 0 : index
    %c0_8 = arith.constant 0 : index
    %11 = vector.load %arg4[%c0_7, %c0_8] : memref<1x1024xf32, #tpu.memory_space<vmem>>, vector<1x1024xf32>
    %12 = vector.broadcast %11 : vector<1x1024xf32> to vector<2x1024xf32>
    %13 = arith.addf %10, %12 : vector<2x1024xf32>
    %cst_9 = arith.constant 0.000000e+00 : f32
    %14 = vector.broadcast %cst_9 : f32 to vector<2x1024xf32>
    %15 = arith.maximumf %13, %14 : vector<2x1024xf32>
    %c0_10 = arith.constant 0 : index
    %c0_11 = arith.constant 0 : index
    %16 = vector.load %arg5[%c0_10, %c0_11] : memref<1024x1024xi8, #tpu.memory_space<vmem>>, vector<1024x1024xi8>
    %17 = arith.sitofp %16 : vector<1024x1024xi8> to vector<1024x1024xf32>
    %c0_12 = arith.constant 0 : index
    %c0_13 = arith.constant 0 : index
    %18 = vector.load %arg12[%c0_12, %c0_13] : memref<2x1024xf32, #tpu.memory_space<vmem>>, vector<2x1024xf32>
    %cst_14 = arith.constant dense<0.000000e+00> : vector<2x1024xf32>
    %19 = tpu.matmul %15, %17, %cst_14 {dimension_numbers = #tpu.dot_dimension_numbers<[1], [0], [0], [1], [0, 0, 1, 1], [], []>} : vector<2x1024xf32>, vector<1024x1024xf32>, vector<2x1024xf32> -> vector<2x1024xf32>
    %20 = arith.addf %18, %19 : vector<2x1024xf32>
    %c0_15 = arith.constant 0 : index
    %c0_16 = arith.constant 0 : index
    %21 = vector.load %arg12[%c0_15, %c0_16] : memref<2x1024xf32, #tpu.memory_space<vmem>>, vector<2x1024xf32>
    tpu.vector_store %arg12[%c0_15, %c0_16], %20 {strides = array<i32>} : memref<2x1024xf32, #tpu.memory_space<vmem>>, vector<2x1024xf32>,
    %c1_i32 = arith.constant 1 : i32
    %22 = arith.cmpi eq, %arg0, %c1_i32 : i32
    %23 = arith.extui %22 : i1 to i32
    %c0_i32_17 = arith.constant 0 : i32
    %24 = arith.cmpi ne, %23, %c0_i32_17 : i32
    scf.if %24 {
      %c0_18 = arith.constant 0 : index
      %c0_19 = arith.constant 0 : index
      %25 = vector.load %arg12[%c0_18, %c0_19] : memref<2x1024xf32, #tpu.memory_space<vmem>>, vector<2x1024xf32>
      %c0_20 = arith.constant 0 : index
      %c0_21 = arith.constant 0 : index
      %26 = vector.load %arg6[%c0_20, %c0_21] : memref<1x1024xf32, #tpu.memory_space<vmem>>, vector<1x1024xf32>
      %27 = vector.broadcast %26 : vector<1x1024xf32> to vector<2x1024xf32>
      %28 = arith.mulf %25, %27 : vector<2x1024xf32>
      %c0_22 = arith.constant 0 : index
      %c0_23 = arith.constant 0 : index
      %29 = vector.load %arg7[%c0_22, %c0_23] : memref<1x1024xf32, #tpu.memory_space<vmem>>, vector<1x1024xf32>
      %30 = vector.broadcast %29 : vector<1x1024xf32> to vector<2x1024xf32>
      %31 = arith.addf %28, %30 : vector<2x1024xf32>
      %cst_24 = arith.constant 0.000000e+00 : f32
      %32 = vector.broadcast %cst_24 : f32 to vector<2x1024xf32>
      %33 = arith.maximumf %31, %32 : vector<2x1024xf32>
      %c0_25 = arith.constant 0 : index
      %c0_26 = arith.constant 0 : index
      %34 = vector.load %arg8[%c0_25, %c0_26] : memref<1024x128xbf16, #tpu.memory_space<vmem>>, vector<1024x128xbf16>
      %35 = arith.extf %34 : vector<1024x128xbf16> to vector<1024x128xf32>
      %cst_27 = arith.constant dense<0.000000e+00> : vector<2x128xf32>
      %36 = tpu.matmul %33, %35, %cst_27 {dimension_numbers = #tpu.dot_dimension_numbers<[1], [0], [0], [1], [0, 0, 1, 1], [], []>} : vector<2x1024xf32>, vector<1024x128xf32>, vector<2x128xf32> -> vector<2x128xf32>
      %c0_28 = arith.constant 0 : index
      %c0_29 = arith.constant 0 : index
      %37 = vector.load %arg9[%c0_28, %c0_29] : memref<1x128xf32, #tpu.memory_space<vmem>>, vector<1x128xf32>
      %38 = vector.broadcast %37 : vector<1x128xf32> to vector<2x128xf32>
      %39 = arith.addf %36, %38 : vector<2x128xf32>
      %c0_30 = arith.constant 0 : index
      %c0_31 = arith.constant 0 : index
      %40 = vector.load %arg10[%c0_30, %c0_31] : memref<2x128xf32, #tpu.memory_space<vmem>>, vector<2x128xf32>
      tpu.vector_store %arg10[%c0_30, %c0_31], %39 {strides = array<i32>} : memref<2x128xf32, #tpu.memory_space<vmem>>, vector<2x128xf32>,
    } else {
    }
    return
  }
  func.func @transform_0(%arg0: i32) -> (i32, i32, i32) {
    %c0_i32 = arith.constant 0 : i32
    %c0_i32_0 = arith.constant 0 : i32
    %c0_i32_1 = arith.constant 0 : i32
    %c0_i32_2 = arith.constant 0 : i32
    return %c0_i32, %c0_i32_0, %c0_i32_1 : i32, i32, i32
  }
  func.func @transform_1(%arg0: i32) -> (i32, i32, i32) {
    %c0_i32 = arith.constant 0 : i32
    %c0_i32_0 = arith.constant 0 : i32
    %c0_i32_1 = arith.constant 0 : i32
    return %arg0, %c0_i32, %c0_i32_0 : i32, i32, i32
  }
  func.func @transform_2(%arg0: i32) -> (i32, i32) {
    %c0_i32 = arith.constant 0 : i32
    %c0_i32_0 = arith.constant 0 : i32
    return %c0_i32, %arg0 : i32, i32
  }
  func.func @transform_3(%arg0: i32) -> (i32, i32) {
    %c0_i32 = arith.constant 0 : i32
    %c0_i32_0 = arith.constant 0 : i32
    return %c0_i32, %arg0 : i32, i32
  }
  func.func @transform_4(%arg0: i32) -> (i32, i32) {
    %c0_i32 = arith.constant 0 : i32
    %c0_i32_0 = arith.constant 0 : i32
    return %arg0, %c0_i32 : i32, i32
  }
  func.func @transform_5(%arg0: i32) -> (i32, i32) {
    %c0_i32 = arith.constant 0 : i32
    %c0_i32_0 = arith.constant 0 : i32
    %c0_i32_1 = arith.constant 0 : i32
    return %c0_i32, %c0_i32_0 : i32, i32
  }
  func.func @transform_6(%arg0: i32) -> (i32, i32) {
    %c0_i32 = arith.constant 0 : i32
    %c0_i32_0 = arith.constant 0 : i32
    %c0_i32_1 = arith.constant 0 : i32
    return %c0_i32, %c0_i32_0 : i32, i32
  }
  func.func @transform_7(%arg0: i32) -> (i32, i32) {
    %c0_i32 = arith.constant 0 : i32
    %c0_i32_0 = arith.constant 0 : i32
    %c0_i32_1 = arith.constant 0 : i32
    return %c0_i32, %c0_i32_0 : i32, i32
  }
  func.func @transform_8(%arg0: i32) -> (i32, i32) {
    %c0_i32 = arith.constant 0 : i32
    %c0_i32_0 = arith.constant 0 : i32
    %c0_i32_1 = arith.constant 0 : i32
    return %c0_i32, %c0_i32_0 : i32, i32
  }
  func.func @transform_9(%arg0: i32) -> (i32, i32) {
    %c0_i32 = arith.constant 0 : i32
    %c0_i32_0 = arith.constant 0 : i32
    %c0_i32_1 = arith.constant 0 : i32
    return %c0_i32, %c0_i32_0 : i32, i32
  }
}

</mosaic_0001>

<bundles_post_ra>
// kernel: simple_classifier_forward.1
= control target key start
LH: loop header
LB: loop body
LE: loop exit
PB: predicated region body
PF: predicated region fallthrough
CT: control target
= control target key end

     0   :  { %s23274_s0 = inlined_call_operand.vmem [shape: f32[2,16,2880], index: 0, kind: input, shape index: {}]   ;;  %s23275_s1 = inlined_call_operand.hbm [shape: s8[2,2880,1024], index: 1, kind: input, shape index: {}]   ;;  %s23276_s2 = inlined_call_operand.hbm [shape: f32[1,2048], index: 2, kind: input, shape index: {}]   ;;  %s23277_s3 = inlined_call_operand.hbm [shape: f32[1,2048], index: 3, kind: input, shape index: {}]   ;;  %s23278_s4 = inlined_call_operand.hbm [shape: s8[2048,1024], index: 4, kind: input, shape index: {}]   ;;  %s23279_s5 = inlined_call_operand.hbm [shape: f32[1,1024], index: 5, kind: input, shape index: {}]   ;;  %s23280_s6 = inlined_call_operand.hbm [shape: f32[1,1024], index: 6, kind: input, shape index: {}]   ;;  %s23281_s7 = inlined_call_operand.hbm [shape: bf16[1024,128], index: 7, kind: input, shape index: {}]   ;;  %s23282_s8 = inlined_call_operand.hbm [shape: f32[1,128], index: 8, kind: input, shape index: {}]   ;;  %s23283_s9 = inlined_call_operand.hbm [shape: f32[2,128], index: 9, kind: output, shape index: {}]  }
   0x1   :  { %23307 = sst [smem:[#allocation37_spill]] %s23274_s0 }
   0x2   :  { %23308 = sst [smem:[#allocation38_spill]] %s23276_s2 }
   0x3   :  { %23309 = sst [smem:[#allocation39_spill]] %s23279_s5 }
   0x4   :  { %23310 = sst [smem:[#allocation40_spill]] %s23280_s6 }
   0x5   :  { %23311 = sst [smem:[#allocation41_spill]] %s23283_s9 }
   0x6   :  { %14 = vsyncpa [#allocation5], 0 }
   0x7   :  { %16 = vsyncpa [#allocation5 + $0x1], 0 }
   0x8   :  { %17 = vsyncpa [#allocation8], 0 }
   0x9   :  { %19 = vsyncpa [#allocation8 + $0x1], 0 }
   0xa   :  { %20 = vsyncpa [#allocation11], 0 }
   0xb   :  { %22 = vsyncpa [#allocation11 + $0x1], 0 }
   0xc   :  { %23 = vsyncpa [#allocation14], 0 }
   0xd   :  { %24 = vsyncpa [#allocation17], 0 }
   0xe   :  { %25 = vsyncpa [#allocation6], 0  ;;  %s20966_s30 = smov 0   ;;  %s20968_s10 = smov 0  }
   0xf   :  { %s20970_s11 = smov 0   ;;  %s20972_s12 = smov 0  }
  0x10 LB: > { %23312 = sst [smem:[#allocation26_spill]] %s20894_s11  ;;  %s20985_s13 = sadd.s32 4294967295, %s20898_s12   ;;  %s20898_s12 = sphi %s20972_s12, %s23362_s12   ;;  %s20894_s11 = sphi %s20970_s11, %s23364_s11   ;;  %s20890_s10 = sphi %s20968_s10, %s23366_s10   ;;  %s20886_s30 = sphi %s20966_s30, %s23365_s30  }
  0x11   : > { %23313 = sst [smem:[#allocation27_spill]] %s20985_s13  ;;  %p72_p0 = scmp.ne.s32.totalorder %s20890_s10, %s20886_s30 }
  0x12   : > { %p23284_p1 = scmp.eq.s32.totalorder %s20985_s13, 0  ;;  %p15819_p2 = scmp.ge.s32.totalorder %s20898_s12, 1 }
  0x13   : > { %p266_p3 = scmp.lt.s32.totalorder %s20898_s12, 3  ;;  %s20900_s16 = smov [#allocation12]  }
  0x14   : > { %p20994_p5 = por %p23284_p1, %p72_p0  ;;  %s282_s17 = sshll.u32 %s20900_s16, 4  ;;  %s283_s17 = int_to_ptr.vmem [resolvable:$true] %s282_s17 }
  0x15   : > { %p20998_p6 = pnand %p15819_p2, %p266_p3  ;;  %s20901_s18 = smov [#allocation13]  }
  0x16   : > { %s23314_s14 = scalar_select %p20994_p5, 1, 0 }
  0x17   : > { %s23315_s15 = scalar_select %p20998_p6, 1, 0 }
  0x18   : > { %p20493_p7 = pneg %p20998_p6  ;;  %s293_s19 = sshll.u32 %s20901_s18, 4  ;;  %s21010_s19 = int_to_ptr.vmem [resolvable:$true] %s293_s19 }
  0x19   : > { %s21013_s21 = sadd.s32 1, %s20898_s12   ;;  %s23318_s5 = sld [smem:[#allocation39_spill]] }
  0x1a   : > { %p21006_p8 = pnand %p20493_p7, %p23284_p1  ;;  %23317 = sst [smem:[#allocation28_spill]] %s21013_s21 }
  0x1b   : > { %s56_s22 = ssub.s32 %s20898_s12, %s21013_s21 }
  0x1c   : > { %s23316_s20 = scalar_select %p21006_p8, 1, 0 }
  0x1d   : > { %p21025_p10 = pneg %p21006_p8 }
  0x1f   : > { %s20582_s25 = scalar_lea.hbm %s23318_s5, 128 }
  0x20   : > { %p20583_p9 = scmp.ne.s32.totalorder %s23318_s5, %s20582_s25  ;;  %p20589_p13 = scmp.lt.u32.totalorder %s20582_s25, %s23318_s5 }
  0x21   : > { %s23319_s28 = scalar_select %p21025_p10, 1, 0 }
  0x22   : > { %p20585_p11 = pnand %p21025_p10, %p20583_p9 }
  0x24   : > { %p20586_p12 = pneg %p20585_p11 }
  0x26   : > { %p20591_p0 = pnand %p20589_p13, %p20586_p12 }
  0x28   : > { %20594 = shalt.err (!%p20591_p0)
}
  0x29   : > { %s20595_s16 = scalar_lea.vmem %s283_s17, 128  ;;  %p20603_p4 = scmp.lt.s32.totalorder %s283_s17, %s283_s17 }
  0x2a   : > { %p20596_p2 = scmp.ne.s32.totalorder %s283_s17, %s20595_s16  ;;  %p20604_p1 = scmp.lt.s32.totalorder %s20595_s16, %s20595_s16 }
  0x2c   : > { %p20598_p3 = pnand %p20596_p2, %p21025_p10  ;;  %p20605_p5 = por %p20604_p1, %p20603_p4 }
  0x2e   : > { %p20599_p7 = pneg %p20598_p3 }
  0x30   : > { %p20606_p6 = pnand %p20605_p5, %p20599_p7 }
  0x32   : > { %20609 = shalt.err (!%p20606_p6)
}
  0x33   : > { %20496 = dma.hbm_to_vmem [thread:$0]  (!%p21006_p8), %s23318_s5, 128, %s283_s17, [#allocation11]  }
  0x34   : > { %s23320_s6 = sld [smem:[#allocation40_spill]] }
  0x3a   : > { %s20610_s26 = scalar_lea.hbm %s23320_s6, 128 }
  0x3b   : > { %p20611_p9 = scmp.ne.s32.totalorder %s23320_s6, %s20610_s26  ;;  %p20617_p4 = scmp.lt.u32.totalorder %s20610_s26, %s23320_s6 }
  0x3d   : > { %p20613_p11 = pnand %p20611_p9, %p21025_p10 }
  0x3f   : > { %p20614_p1 = pneg %p20613_p11 }
  0x41   : > { %p20619_p5 = pnand %p20617_p4, %p20614_p1 }
  0x43   : > { %20622 = shalt.err (!%p20619_p5)
}
  0x44   : > { %s20623_s17 = scalar_lea.vmem %s21010_s19, 128  ;;  %p20631_p0 = scmp.lt.s32.totalorder %s21010_s19, %s21010_s19 }
  0x45   : > { %p20624_p6 = scmp.ne.s32.totalorder %s21010_s19, %s20623_s17  ;;  %p20632_p2 = scmp.lt.s32.totalorder %s20623_s17, %s20623_s17 }
  0x47   : > { %p20626_p12 = pnand %p20624_p6, %p21025_p10  ;;  %p20633_p3 = por %p20632_p2, %p20631_p0 }
  0x49   : > { %p20627_p13 = pneg %p20626_p12 }
  0x4b   : > { %p20634_p7 = pnand %p20633_p3, %p20627_p13 }
  0x4d   : > { %20637 = shalt.err (!%p20634_p7)
}
  0x4e   : > { %20499 = dma.hbm_to_vmem [thread:$0]  (!%p21006_p8), %s23320_s6, 128, %s21010_s19, [#allocation14]  }
  0x4f   : > { %p57_p9 = scmp.eq.s32.totalorder %s56_s22, 0  ;;  %s59_s24 = sadd.s32 1, %s20894_s11 }
  0x50   : > { %p66_p11 = scmp.ne.s32.totalorder %s20894_s11, %s20890_s10  ;;  %p67_p1 = scmp.eq.s32.totalorder %s20898_s12, 0 }
  0x51   : > { %s21072_s25 = scalar_select %p57_p9, %s20894_s11, %s59_s24  }
  0x52   : > { %p68_p4 = por %p67_p1, %p66_p11  ;;  %p20523_p5 = scmp.lt.s32.totalorder %s20898_s12, 2 }
  0x53   : > { %23321 = sst [smem:[#allocation29_spill]] %s21072_s25  ;;  %s21076_s26 = sand.u32 1, %s20894_s11  }
  0x54   : > { %s23289_s27 = sand.u32 1, %s20898_s12   ;;  %p21079_p6 = pnand %p20523_p5, %p68_p4 }
  0x55   : > { %s23287_s19 = sshll.u32 %s21076_s26, 3  ;;  %s23288_s22 = sshll.u32 %s20898_s12, 7 }
  0x56   : > { %s23322_s29 = scalar_select %p21079_p6, 1, 0 }
  0x57   : > { %s23323_s2 = sld [smem:[#allocation38_spill]]  ;;  %s353_s18 = scalar_lea.vmem [#allocation7], %s23287_s19 }
  0x58   : > { %s361_s23 = sshll.u32 %s353_s18, 4  ;;  %s21098_s24 = scalar_lea.sflag [#allocation8], %s23289_s27  ;;  %s21094_s23 = int_to_ptr.vmem [resolvable:$true] %s361_s23 }
  0x59   : > { %p21104_p13 = pneg %p21079_p6 }
  0x5b   : > { %s23324_s6 = scalar_select %p21104_p13, 1, 0 }
  0x5d   : > { %s21090_s17 = scalar_lea.hbm %s23323_s2, %s23288_s22  ;;  %s20643_s18 = scalar_lea.hbm %s23323_s2, 256 }
  0x5e   : > { %s20638_s5 = scalar_lea.hbm %s21090_s17, 128  ;;  %p20644_p3 = scmp.lt.u32.totalorder %s21090_s17, %s23323_s2 }
  0x5f   : > { %p20639_p12 = scmp.ne.s32.totalorder %s21090_s17, %s20638_s5  ;;  %p20645_p7 = scmp.lt.u32.totalorder %s20643_s18, %s20638_s5 }
  0x60   : > { %p20647_p11 = scmp.lt.u32.totalorder %s20638_s5, %s21090_s17 }
  0x61   : > { %p20641_p0 = pnand %p21104_p13, %p20639_p12  ;;  %p20646_p9 = por %p20645_p7, %p20644_p3 }
  0x63   : > { %p20642_p2 = pneg %p20641_p0  ;;  %p20648_p1 = por %p20647_p11, %p20646_p9 }
  0x65   : > { %p20649_p4 = pnand %p20648_p1, %p20642_p2 }
  0x67   : > { %20652 = shalt.err (!%p20649_p4)
}
  0x68   : > { %s20653_s27 = scalar_lea.vmem %s21094_s23, 128  ;;  %s20902_s30 = smov [#allocation7]  }
  0x69   : > { %p20654_p5 = scmp.ne.s32.totalorder %s21094_s23, %s20653_s27  ;;  %s20658_s16 = sshll.u32 %s20902_s30, 4  ;;  %s20659_s16 = int_to_ptr.vmem [resolvable:$false] %s20658_s16 }
  0x6a   : > { %s20660_s19 = scalar_lea.vmem %s20659_s16, 256  ;;  %p20661_p8 = scmp.lt.s32.totalorder %s21094_s23, %s20659_s16 }
  0x6b   : > { %p20656_p12 = pnand %p20654_p5, %p21104_p13  ;;  %p20662_p10 = scmp.lt.s32.totalorder %s20660_s19, %s20653_s27 }
  0x6d   : > { %p20657_p0 = pneg %p20656_p12  ;;  %p20663_p3 = por %p20662_p10, %p20661_p8 }
  0x6f   : > { %p20664_p7 = pnand %p20663_p3, %p20657_p0 }
  0x71   : > { %20667 = shalt.err (!%p20664_p7)
}
  0x72   : > { %20512 = dma.hbm_to_vmem [thread:$0]  (!%p21079_p6), %s21090_s17, 128, %s21094_s23, %s21098_s24  }
  0x73   : > { %s23325_s5 = sshll.u32 %s20898_s12, 7  ;;  %s20903_s2 = smov [#allocation15]  }
  0x74   : > { %s21133_s30 = scalar_lea.hbm %s23277_s3, %s23325_s5  ;;  %s303_s16 = sshll.u32 %s20903_s2, 4  ;;  %s304_s16 = int_to_ptr.vmem [resolvable:$true] %s303_s16 }
  0x75   : > { %s20668_s25 = scalar_lea.hbm %s23281_s7, 8192  ;;  %p23326_p10 = scmp.ne.s32.totalorder %s23319_s28, 0 }
  0x76   : > { %p20669_p8 = scmp.ne.s32.totalorder %s23281_s7, %s20668_s25  ;;  %p20675_p11 = scmp.lt.u32.totalorder %s20668_s25, %s23281_s7 }
  0x78   : > { %p20671_p2 = pnand %p20669_p8, %p23326_p10 }
  0x7a   : > { %p20672_p9 = pneg %p20671_p2 }
  0x7c   : > { %p20677_p1 = pnand %p20675_p11, %p20672_p9 }
  0x7e   : > { %20680 = shalt.err (!%p20677_p1)
}
  0x7f   : > { %s20681_s5 = scalar_lea.vmem %s304_s16, 8192  ;;  %p20689_p0 = scmp.lt.s32.totalorder %s304_s16, %s304_s16 }
  0x80   : > { %p20682_p4 = scmp.ne.s32.totalorder %s304_s16, %s20681_s5  ;;  %p20690_p3 = scmp.lt.s32.totalorder %s20681_s5, %s20681_s5 }
  0x82   : > { %p20684_p5 = pnand %p20682_p4, %p23326_p10  ;;  %p20691_p7 = por %p20690_p3, %p20689_p0 }
  0x84   : > { %p20685_p12 = pneg %p20684_p5 }
  0x86   : > { %p20692_p6 = pnand %p20691_p7, %p20685_p12 }
  0x88   : > { %20695 = shalt.err (!%p20692_p6)
}
  0x89   : > { %s20904_s2 = smov 64   ;;  %s20905_s11 = smov 4  }
  0x8a   : > { %p23327_p8 = scmp.ne.s32.totalorder %s23316_s20, 0  ;;  %s20906_s22 = smov [#allocation16]  }
  0x8b   : > { %s317_s18 = sshll.u32 %s20906_s22, 4  ;;  %s20462_s27 = smul.u32 5760, %s21076_s26  ;;  %s318_s18 = int_to_ptr.vmem [resolvable:$true] %s317_s18 }
  0x8c   : > { %20502 = dma.hbm_to_vmem [thread:$0]  (!%p23327_p8), %s23281_s7, 8192, %s304_s16, [#allocation14], %s20904_s2, %s20904_s2, %s20905_s11  }
  0x8d   : > { %s20696_s23 = scalar_lea.hbm %s23282_s8, 16 }
  0x8e   : > { %p20697_p6 = scmp.ne.s32.totalorder %s23282_s8, %s20696_s23  ;;  %p20703_p11 = scmp.lt.u32.totalorder %s20696_s23, %s23282_s8 }
  0x90   : > { %p20699_p2 = pnand %p20697_p6, %p23326_p10 }
  0x92   : > { %p20700_p9 = pneg %p20699_p2 }
  0x94   : > { %p20705_p1 = pnand %p20703_p11, %p20700_p9 }
  0x96   : > { %20708 = shalt.err (!%p20705_p1)
}
  0x97   : > { %s20709_s16 = scalar_lea.vmem %s318_s18, 16  ;;  %s20716_s11 = scalar_lea.vmem %s318_s18, 32 }
  0x98   : > { %p20710_p4 = scmp.ne.s32.totalorder %s318_s18, %s20709_s16  ;;  %p20717_p0 = scmp.lt.s32.totalorder %s318_s18, %s318_s18 }
  0x99   : > { %p20718_p3 = scmp.lt.s32.totalorder %s20716_s11, %s20709_s16 }
  0x9a   : > { %p20712_p5 = pnand %p20710_p4, %p23326_p10 }
  0x9b   : > { %p20719_p7 = por %p20718_p3, %p20717_p0 }
  0x9c   : > { %p20713_p12 = pneg %p20712_p5 }
  0x9e   : > { %p20720_p13 = pnand %p20719_p7, %p20713_p12 }
  0xa0   : > { %20723 = shalt.err (!%p20720_p13)
}
  0xa1   : > { %20505 = dma.hbm_to_vmem [thread:$0]  (!%p23327_p8), %s23282_s8, 16, %s318_s18, [#allocation17]  }
  0xa2   : > { %s20463_s0 = smul.u32 92160, %s20898_s12  ;;  %s332_s13 = scalar_lea.vmem [#allocation4], %s20462_s27 }
  0xa3   : > { %s339_s28 = sshll.u32 %s332_s13, 4  ;;  %s329_s20 = scalar_lea.sflag [#allocation5], %s21076_s26  ;;  %s21180_s28 = int_to_ptr.vmem [resolvable:$true] %s339_s28 }
  0xa4   : > { %s21178_s19 = scalar_lea.hbm %s23275_s1, %s20463_s0  ;;  %p23328_p10 = scmp.ne.s32.totalorder %s23324_s6, 0 }
  0xa5   : > { %s20724_s17 = scalar_lea.hbm %s21178_s19, 92160  ;;  %s20729_s23 = scalar_lea.hbm %s23275_s1, 184320 }
  0xa6   : > { %p20725_p13 = scmp.ne.s32.totalorder %s21178_s19, %s20724_s17  ;;  %p20730_p2 = scmp.lt.u32.totalorder %s21178_s19, %s23275_s1 }
  0xa7   : > { %p20731_p9 = scmp.lt.u32.totalorder %s20729_s23, %s20724_s17  ;;  %p20733_p1 = scmp.lt.u32.totalorder %s20724_s17, %s21178_s19 }
  0xa8   : > { %p20727_p6 = pnand %p20725_p13, %p23328_p10 }
  0xa9   : > { %p20732_p11 = por %p20731_p9, %p20730_p2 }
  0xaa   : > { %p20728_p8 = pneg %p20727_p6 }
  0xab   : > { %p20734_p4 = por %p20733_p1, %p20732_p11 }
  0xad   : > { %p20735_p5 = pnand %p20734_p4, %p20728_p8 }
  0xaf   : > { %20738 = shalt.err (!%p20735_p5)
}
  0xb0   : > { %s20739_s11 = scalar_lea.vmem %s21180_s28, 92160  ;;  %s20907_s9 = smov [#allocation4]  }
  0xb1   : > { %p20740_p12 = scmp.ne.s32.totalorder %s21180_s28, %s20739_s11  ;;  %s20744_s21 = sshll.u32 %s20907_s9, 4  ;;  %s20745_s21 = int_to_ptr.vmem [resolvable:$false] %s20744_s21 }
  0xb2   : > { %s20746_s0 = scalar_lea.vmem %s20745_s21, 184320  ;;  %p20747_p7 = scmp.lt.s32.totalorder %s21180_s28, %s20745_s21 }
  0xb3   : > { %p20742_p0 = pnand %p20740_p12, %p23328_p10  ;;  %p20748_p13 = scmp.lt.s32.totalorder %s20746_s0, %s20739_s11 }
  0xb5   : > { %p20743_p3 = pneg %p20742_p0  ;;  %p20749_p6 = por %p20748_p13, %p20747_p7 }
  0xb7   : > { %p20750_p2 = pnand %p20749_p6, %p20743_p3 }
  0xb9   : > { %20753 = shalt.err (!%p20750_p2)
}
  0xba   : > { %s20908_s13 = smov 1024   ;;  %p23329_p8 = scmp.ne.s32.totalorder %s23322_s29, 0 }
  0xbb   : > { %s23330_s25 = sshll.u32 %s21076_s26, 3  ;;  %s15832_s18 = sshll.u32 %s21076_s26, 11 }
  0xbc   : > { %20509 = dma.hbm_to_vmem [thread:$0]  (!%p23329_p8), %s21178_s19, 92160, %s21180_s28, %s329_s20, %s20908_s13, %s20908_s13, %s20904_s2  }
  0xbd   : > { %s372_s22 = scalar_lea.vmem [#allocation9], %s23330_s25  ;;  %s20754_s27 = scalar_lea.hbm %s21133_s30, 128 }
  0xbe   : > { %s380_s17 = sshll.u32 %s372_s22, 4  ;;  %p20755_p9 = scmp.ne.s32.totalorder %s21133_s30, %s20754_s27  ;;  %s381_s17 = int_to_ptr.vmem [resolvable:$true] %s380_s17 }
  0xbf   : > { %s20759_s16 = scalar_lea.hbm %s23277_s3, 256  ;;  %p20760_p4 = scmp.lt.u32.totalorder %s21133_s30, %s23277_s3 }
  0xc0   : > { %p20757_p11 = pnand %p20755_p9, %p23328_p10  ;;  %p20761_p5 = scmp.lt.u32.totalorder %s20759_s16, %s20754_s27 }
  0xc1   : > { %p20763_p0 = scmp.lt.u32.totalorder %s20754_s27, %s21133_s30 }
  0xc2   : > { %p20758_p1 = pneg %p20757_p11  ;;  %p20762_p12 = por %p20761_p5, %p20760_p4 }
  0xc4   : > { %p20764_p3 = por %p20763_p0, %p20762_p12 }
  0xc6   : > { %p20765_p7 = pnand %p20764_p3, %p20758_p1 }
  0xc8   : > { %20768 = shalt.err (!%p20765_p7)
}
  0xc9   : > { %s20769_s28 = scalar_lea.vmem %s381_s17, 128  ;;  %s20909_s19 = smov [#allocation9]  }
  0xca   : > { %p20770_p13 = scmp.ne.s32.totalorder %s381_s17, %s20769_s28  ;;  %s20774_s20 = sshll.u32 %s20909_s19, 4  ;;  %s20775_s20 = int_to_ptr.vmem [resolvable:$false] %s20774_s20 }
  0xcb   : > { %s20776_s21 = scalar_lea.vmem %s20775_s20, 256  ;;  %p20777_p9 = scmp.lt.s32.totalorder %s381_s17, %s20775_s20 }
  0xcc   : > { %p20772_p6 = pnand %p20770_p13, %p23328_p10  ;;  %p20778_p11 = scmp.lt.s32.totalorder %s20776_s21, %s20769_s28 }
  0xce   : > { %p20773_p2 = pneg %p20772_p6  ;;  %p20779_p8 = por %p20778_p11, %p20777_p9 }
  0xd0   : > { %p20780_p4 = pnand %p20779_p8, %p20773_p2 }
  0xd2   : > { %20783 = shalt.err (!%p20780_p4)
}
  0xd3   : > { %p23331_p5 = scmp.ne.s32.totalorder %s23322_s29, 0  ;;  %s15858_s0 = sshll.u32 %s20898_s12, 15 }
  0xd4   : > { %s391_s25 = scalar_lea.vmem [#allocation10], %s15832_s18  ;;  %s21236_s5 = scalar_lea.hbm %s23278_s4, %s15858_s0 }
  0xd5   : > { %20515 = dma.hbm_to_vmem [thread:$0]  (!%p23331_p5), %s21133_s30, 128, %s381_s17, %s21098_s24  }
  0xd6   : > { %s399_s22 = sshll.u32 %s391_s25, 4  ;;  %s23332_s16 = sand.u32 1, %s20898_s12   ;;  %s21238_s22 = int_to_ptr.vmem [resolvable:$true] %s399_s22 }
  0xd7   : > { %s21242_s11 = scalar_lea.sflag [#allocation11], %s23332_s16  ;;  %s20784_s9 = scalar_lea.hbm %s21236_s5, 32768 }
  0xd8   : > { %p20785_p8 = scmp.ne.s32.totalorder %s21236_s5, %s20784_s9  ;;  %s20789_s30 = scalar_lea.hbm %s23278_s4, 65536 }
  0xd9   : > { %p20790_p0 = scmp.lt.u32.totalorder %s21236_s5, %s23278_s4  ;;  %p20791_p3 = scmp.lt.u32.totalorder %s20789_s30, %s20784_s9 }
  0xda   : > { %p20787_p1 = pnand %p20785_p8, %p23328_p10  ;;  %p20793_p13 = scmp.lt.u32.totalorder %s20784_s9, %s21236_s5 }
  0xdb   : > { %p20792_p7 = por %p20791_p3, %p20790_p0 }
  0xdc   : > { %p20788_p12 = pneg %p20787_p1 }
  0xdd   : > { %p20794_p6 = por %p20793_p13, %p20792_p7 }
  0xdf   : > { %p20795_p2 = pnand %p20794_p6, %p20788_p12 }
  0xe1   : > { %20798 = shalt.err (!%p20795_p2)
}
  0xe2   : > { %s20799_s12 = scalar_lea.vmem %s21238_s22, 32768  ;;  %s20910_s28 = smov [#allocation10]  }
  0xe3   : > { %p20800_p9 = scmp.ne.s32.totalorder %s21238_s22, %s20799_s12  ;;  %s20804_s19 = sshll.u32 %s20910_s28, 4  ;;  %s20805_s19 = int_to_ptr.vmem [resolvable:$false] %s20804_s19 }
  0xe4   : > { %s20806_s20 = scalar_lea.vmem %s20805_s19, 65536  ;;  %p20807_p8 = scmp.lt.s32.totalorder %s21238_s22, %s20805_s19 }
  0xe5   : > { %p20802_p11 = pnand %p20800_p9, %p23328_p10  ;;  %p20808_p1 = scmp.lt.s32.totalorder %s20806_s20, %s20799_s12 }
  0xe7   : > { %p20803_p4 = pneg %p20802_p11  ;;  %p20809_p0 = por %p20808_p1, %p20807_p8 }
  0xe9   : > { %p20810_p3 = pnand %p20809_p0, %p20803_p4 }
  0xeb   : > { %20813 = shalt.err (!%p20810_p3)
}
  0xec   : > { %20518 = dma.hbm_to_vmem [thread:$0]  (!%p23331_p5), %s21236_s5, 32768, %s21238_s22, %s21242_s11, %s20908_s13, %s20908_s13, %s20904_s2  }
  0xed   : > { %p23333_p10 = scmp.ne.s32.totalorder %s23315_s15, 0 }
  0xee   : > { %s413_s6 = sand.u32 (!%p23333_p10), 1, %s20890_s10   ;;  %p23334_p12 = scmp.ne.s32.totalorder (!%p23333_p10), %s23314_s14, 0 }
  0xef   : > { %411 = sbr.rel (%p23333_p10) target bundleno = 2906 (0xb5a), region = 56  ;;  %s414_s0 = scalar_lea.sflag (!%p23333_p10), [#allocation5], %s413_s6 }
  0xf0   : > { %s20464_s21 = smul.u32 (!%p23333_p10), 5760, %s413_s6 }
  0xf2   : > { %s21272_s25 = scalar_lea.vmem (!%p23333_p10), [#allocation4], %s20464_s21 }
  0xf6   : > { %20857 = dma.done.wait (%p23334_p12), %s414_s0, 92160  }
  0xf7   : > { %20859 = vsyncadd (%p23334_p12), %s414_s0, 4294875136  ;;  %s23335_s29 = sld [smem:[#allocation27_spill]]  ;;  %s15837_s23 = sshll.u32 %s413_s6, 3 }
  0xf8   : > { %s21279_s13 = scalar_lea.vmem [#allocation7], %s15837_s23 }
  0xfd   : > { %s422_s27 = sand.u32 1, %s23335_s29  }
  0xfe   : > { %s423_s2 = scalar_lea.sflag [#allocation8], %s422_s27 }
  0xff   : > { %20861 = dma.done.wait (%p23334_p12), %s423_s2, 256  }
 0x100   : > { %20863 = vsyncadd (%p23334_p12), %s423_s2, 4294967040  ;;  %s15839_s15 = sshll.u32 %s413_s6, 11  ;;  %s21285_s22 = scalar_lea.vmem [#allocation9], %s15837_s23 }
 0x101   : > { %s441_s5 = scalar_lea.sflag [#allocation11], %s422_s27  ;;  %s21287_s16 = scalar_lea.vmem [#allocation10], %s15839_s15 }
 0x102   : > { %20865 = dma.done.wait (%p23334_p12), %s441_s5, 32768  }
 0x103   : > { %20867 = vsyncadd (%p23334_p12), %s441_s5, 4294934528  ;;  %p23336_p5 = scmp.eq.s32.totalorder %s23335_s29, 0 }
 0x105   : > { %20869 = dma.done.wait (%p23336_p5), [#allocation11], 128   ;;  %p23337_p7 = pmov %p23336_p5 }
 0x106   : > { %p23338_p13 = pmov %p23336_p5 }
 0x107   : > { %20871 = vsyncadd (%p23337_p7), [#allocation11], 4294967168 }
 0x108   : > { %20873 = dma.done.wait (%p23338_p13), [#allocation14], 8320   ;;  %p23339_p6 = pmov %p23336_p5 }
 0x109   : > { %p23340_p2 = pmov %p23336_p5 }
 0x10a   : > { %20875 = vsyncadd (%p23339_p6), [#allocation14], 4294958976 }
 0x10b   : > { %20877 = dma.done.wait (%p23340_p2), [#allocation17], 16   ;;  %p23341_p9 = pmov %p23340_p2 }
 0x10c   : > { %p23342_p11 = scmp.ne.s32.totalorder %s23335_s29, 0 }
 0x10d   : > { %20879 = vsyncadd (%p23341_p9), [#allocation17], 4294967280 }
 0x10e   : > { %511 = sbr.rel (%p23342_p11) target bundleno = 406 (0x196), region = 92 }
 0x115   : > { %v1029_v0 = vlaneseq  ;;  %v20911_v1 = vmov 0.0   ;;  %s23343_s9 = sld [smem:[#allocation37_spill]]  ;;  %v20912_v5 = vmov 1983009808   ;;  %vm758_vm0 = vcmask 523264  }
 0x116   : > { %1291 = vst [vmem:[#allocation3] sm:$0xff] %v20911_v1  ;;  %1292 = vst [vmem:[#allocation3 + $0x8] sm:$0xff] %v20911_v1  ;;  %v21316_v6 = vunpack.c.l.s4 %v20912_v5  ;;  %vm1231_vm1 = vcmask 1041409   ;;  %vm1233_vm2 = vcmask 1043459   ;;  %vm1235_vm3 = vcmask 1045509  }
 0x117   : > { %v21345_v17 = vshrl.u32 %v1029_v0, 7  ;;  %vm1237_vm4 = vcmask 1047559   ;;  %vm1285_vm5 = vcmask 1041408   ;;  %vm1286_vm6 = vcmask 1043458  }
 0x118   : > { %v1028_v24 = vunpack.c.0.s8 %v21316_v6  ;;  %vm1288_vm7 = vcmask 521220   ;;  %vm1287_vm8 = vmor %vm1286_vm6, %vm1285_vm5 }
 0x119   : > { %vm1289_vm9 = vmor %vm1288_vm7, %vm1287_vm8 }
 0x11b   : > { %v512_v2 = vld [vmem:[%s23343_s9] sm:$0xff]  ;;  %v513_v3 = vld [vmem:[%s23343_s9 + $0x8] sm:$0xff]  ;;  %v514_v4 = vld [vmem:[%s23343_s9 + $0x10] sm:$0xff] }
 0x11c   : > { %v515_v7 = vld [vmem:[%s23343_s9 + $0x18] sm:$0xff]  ;;  %v516_v8 = vld [vmem:[%s23343_s9 + $0x20] sm:$0xff]  ;;  %v517_v9 = vld [vmem:[%s23343_s9 + $0x28] sm:$0xff] }
 0x11d   : > { %v518_v10 = vld [vmem:[%s23343_s9 + $0x30] sm:$0xff]  ;;  %v519_v11 = vld [vmem:[%s23343_s9 + $0x38] sm:$0xff]  ;;  %v536_v13 = vld [vmem:[%s23343_s9 + $0xc0] sm:$0xff] }
 0x11e   : > { %v535_v12 = vld [vmem:[%s23343_s9 + $0xb8] sm:$0xff]  ;;  %v537_v14 = vld [vmem:[%s23343_s9 + $0xc8] sm:$0xff]  ;;  %v538_v15 = vld [vmem:[%s23343_s9 + $0xd0] sm:$0xff]  ;;  %v611_v21 = vadd.f32 %v536_v13, %v513_v3 }
 0x11f   : > { %v604_v16 = vadd.f32 %v535_v12, %v512_v2  ;;  %v539_v18 = vld [vmem:[%s23343_s9 + $0xd8] sm:$0xff]  ;;  %v540_v19 = vld [vmem:[%s23343_s9 + $0xe0] sm:$0xff]  ;;  %v541_v20 = vld [vmem:[%s23343_s9 + $0xe8] sm:$0xff]  ;;  %v618_v22 = vadd.f32 %v537_v14, %v514_v4  ;;  %v625_v23 = vadd.f32 %v538_v15, %v515_v7 }
 0x120   : > { %v542_v25 = vld [vmem:[%s23343_s9 + $0xf0] sm:$0xff]  ;;  %v632_v27 = vadd.f32 %v539_v18, %v516_v8  ;;  %v639_v28 = vadd.f32 %v540_v19, %v517_v9  ;;  %v646_v29 = vadd.f32 %v541_v20, %v518_v10  ;;  %v612_v30 = vrot.slane %v611_v21, 4  ;;  %v520_v54 = vld [vmem:[%s23343_s9 + $0x40] sm:$0xff]  ;;  %v521_v60 = vld [vmem:[%s23343_s9 + $0x48] sm:$0xff] }
 0x121   : > { %v605_v26 = vrot.slane %v604_v16, 4  ;;  %v619_v31 = vrot.slane %v618_v22, 4  ;;  %v626_v32 = vrot.slane %v625_v23, 4  ;;  %v653_v33 = vadd.f32 %v542_v25, %v519_v11  ;;  %v534_v55 = vld [vmem:[%s23343_s9 + $0xb0] sm:$0xff]  ;;  %v523_v62 = vld [vmem:[%s23343_s9 + $0x58] sm:$0xff]  ;;  %v524_v3 = vld [vmem:[%s23343_s9 + $0x60] sm:$0xff] }
 0x122   : > { %v633_v35 = vrot.slane %v632_v27, 4  ;;  %v640_v36 = vrot.slane %v639_v28, 4  ;;  %v647_v37 = vrot.slane %v646_v29, 4  ;;  %v613_v38 = vadd.f32 %v612_v30, %v611_v21  ;;  %v522_v61 = vld [vmem:[%s23343_s9 + $0x50] sm:$0xff]  ;;  %v525_v4 = vld [vmem:[%s23343_s9 + $0x68] sm:$0xff]  ;;  %v543_v6 = vld [vmem:[%s23343_s9 + $0xf8] sm:$0xff] }
 0x123   : > { %v606_v34 = vadd.f32 %v605_v26, %v604_v16  ;;  %v620_v39 = vadd.f32 %v619_v31, %v618_v22  ;;  %v627_v40 = vadd.f32 %v626_v32, %v625_v23  ;;  %v654_v41 = vrot.slane %v653_v33, 4  ;;  %v526_v5 = vld [vmem:[%s23343_s9 + $0x70] sm:$0xff]  ;;  %v544_v11 = vld [vmem:[%s23343_s9 + $0x100] sm:$0xff]  ;;  %v545_v12 = vld [vmem:[%s23343_s9 + $0x108] sm:$0xff] }
 0x124   : > { %v634_v43 = vadd.f32 %v633_v35, %v632_v27  ;;  %v641_v44 = vadd.f32 %v640_v36, %v639_v28  ;;  %v648_v45 = vadd.f32 %v647_v37, %v646_v29  ;;  %v614_v46 = vrot.slane %v613_v38, 2  ;;  %v546_v13 = vld [vmem:[%s23343_s9 + $0x110] sm:$0xff]  ;;  %v547_v19 = vld [vmem:[%s23343_s9 + $0x118] sm:$0xff]  ;;  %v548_v20 = vld [vmem:[%s23343_s9 + $0x120] sm:$0xff] }
 0x125   : > { %v607_v42 = vrot.slane %v606_v34, 2  ;;  %v621_v47 = vrot.slane %v620_v39, 2  ;;  %v628_v48 = vrot.slane %v627_v40, 2  ;;  %v655_v49 = vadd.f32 %v654_v41, %v653_v33  ;;  %v549_v21 = vld [vmem:[%s23343_s9 + $0x128] sm:$0xff]  ;;  %v550_v26 = vld [vmem:[%s23343_s9 + $0x130] sm:$0xff] }
 0x126   : > { %v635_v51 = vrot.slane %v634_v43, 2  ;;  %v642_v52 = vrot.slane %v641_v44, 2  ;;  %v649_v53 = vrot.slane %v648_v45, 2  ;;  %v615_v56 = vadd.f32 %v614_v46, %v613_v38 }
 0x127   : > { %v608_v50 = vadd.f32 %v607_v42, %v606_v34  ;;  %v622_v57 = vadd.f32 %v621_v47, %v620_v39  ;;  %v629_v58 = vadd.f32 %v628_v48, %v627_v40  ;;  %v656_v59 = vrot.slane %v655_v49, 2 }
 0x128   : > { %v636_v0 = vadd.f32 %v635_v51, %v634_v43  ;;  %v643_v1 = vadd.f32 %v642_v52, %v641_v44  ;;  %v21375_v2 = vadd.f32 %v649_v53, %v648_v45  ;;  %v616_v7 = vrot.slane %v615_v56, 1 }
 0x129   : > { %v609_v63 = vrot.slane %v608_v50, 1  ;;  %v623_v8 = vrot.slane %v622_v57, 1  ;;  %v630_v9 = vrot.slane %v629_v58, 1  ;;  %v21389_v10 = vadd.f32 %v656_v59, %v655_v49 }
 0x12a   : > { %v637_v14 = vrot.slane %v636_v0, 1  ;;  %v644_v15 = vrot.slane %v643_v1, 1  ;;  %v21401_v16 = vsel %vm758_vm0, %v534_v55, 0.0  ;;  %v21404_v18 = vsub.s32 %v1028_v24, %v21345_v17  ;;  %v527_v24 = vld [vmem:[%s23343_s9 + $0x78] sm:$0xff] }
 0x12b   : > { %v21415_v22 = vadd.f32 %v609_v63, %v608_v50  ;;  %v21417_v23 = vadd.f32 %v616_v7, %v615_v56  ;;  %v21419_v25 = vadd.f32 %v623_v8, %v622_v57  ;;  %v651_v17 = vrot.slane %v21375_v2, 1  ;;  %v528_v63 = vld [vmem:[%s23343_s9 + $0x80] sm:$0xff]  ;;  %v531_v7 = vld [vmem:[%s23343_s9 + $0x98] sm:$0xff] }
 0x12c   : > { %23344 = vst [vmem:[#allocation30_spill] sm:$0xff] %v21404_v18  ;;  %v21428_v27 = vadd.f32 %v630_v9, %v629_v58  ;;  %v21430_v28 = vadd.f32 %v637_v14, %v636_v0  ;;  %v658_v29 = vrot.slane %v21389_v10, 1  ;;  %v660_v30 = vadd.f32 %v543_v6, %v520_v54  ;;  %v530_v6 = vld [vmem:[%s23343_s9 + $0x90] sm:$0xff]  ;;  %v533_v14 = vld [vmem:[%s23343_s9 + $0xa8] sm:$0xff] }
 0x12d   : > { %v21433_v31 = vadd.f32 %v644_v15, %v643_v1  ;;  %v667_v32 = vadd.f32 %v544_v11, %v521_v60  ;;  %v674_v33 = vadd.f32 %v545_v12, %v522_v61  ;;  %v681_v34 = vadd.f32 %v546_v13, %v523_v62  ;;  %v532_v13 = vld [vmem:[%s23343_s9 + $0xa0] sm:$0xff]  ;;  %v551_v15 = vld [vmem:[%s23343_s9 + $0x138] sm:$0xff] }
 0x12e   : > { %v661_v35 = vrot.slane %v660_v30, 4  ;;  %v688_v36 = vadd.f32 %v547_v19, %v524_v3  ;;  %v695_v37 = vadd.f32 %v548_v20, %v525_v4  ;;  %v702_v38 = vadd.f32 %v549_v21, %v526_v5  ;;  %v529_v5 = vld [vmem:[%s23343_s9 + $0x88] sm:$0xff] }
 0x12f   : > { %v668_v39 = vrot.slane %v667_v32, 4  ;;  %v675_v40 = vrot.slane %v674_v33, 4  ;;  %v682_v41 = vrot.slane %v681_v34, 4  ;;  %v709_v42 = vadd.f32 %v550_v26, %v527_v24  ;;  %v552_v26 = vld [vmem:[%s23343_s9 + $0x140] sm:$0xff] }
 0x130   : > { %v662_v43 = vadd.f32 %v661_v35, %v660_v30  ;;  %v689_v44 = vrot.slane %v688_v36, 4  ;;  %v696_v45 = vrot.slane %v695_v37, 4  ;;  %v703_v46 = vrot.slane %v702_v38, 4  ;;  %v553_v30 = vld [vmem:[%s23343_s9 + $0x148] sm:$0xff] }
 0x131   : > { %v669_v47 = vadd.f32 %v668_v39, %v667_v32  ;;  %v676_v48 = vadd.f32 %v675_v40, %v674_v33  ;;  %v683_v49 = vadd.f32 %v682_v41, %v681_v34  ;;  %v710_v50 = vrot.slane %v709_v42, 4  ;;  %v554_v32 = vld [vmem:[%s23343_s9 + $0x150] sm:$0xff]  ;;  %v557_v39 = vld [vmem:[%s23343_s9 + $0x168] sm:$0xff] }
 0x132   : > { %v663_v51 = vrot.slane %v662_v43, 2  ;;  %v690_v52 = vadd.f32 %v689_v44, %v688_v36  ;;  %v697_v53 = vadd.f32 %v696_v45, %v695_v37  ;;  %v704_v54 = vadd.f32 %v703_v46, %v702_v38  ;;  %v555_v37 = vld [vmem:[%s23343_s9 + $0x158] sm:$0xff]  ;;  %v556_v38 = vld [vmem:[%s23343_s9 + $0x160] sm:$0xff]  ;;  %v558_v44 = vld [vmem:[%s23343_s9 + $0x170] sm:$0xff] }
 0x133   : > { %v670_v55 = vrot.slane %v669_v47, 2  ;;  %v677_v56 = vrot.slane %v676_v48, 2  ;;  %v684_v57 = vrot.slane %v683_v49, 2  ;;  %v711_v58 = vadd.f32 %v710_v50, %v709_v42  ;;  %v581_v45 = vld [vmem:[%s23343_s9 + $0x228] sm:$0xff] }
 0x134   : > { %v664_v59 = vadd.f32 %v663_v51, %v662_v43  ;;  %v691_v60 = vrot.slane %v690_v52, 2  ;;  %v698_v61 = vrot.slane %v697_v53, 2  ;;  %v705_v62 = vrot.slane %v704_v54, 2 }
 0x135   : > { %v671_v0 = vadd.f32 %v670_v55, %v669_v47  ;;  %v678_v1 = vadd.f32 %v677_v56, %v676_v48  ;;  %v685_v3 = vadd.f32 %v684_v57, %v683_v49  ;;  %v712_v4 = vrot.slane %v711_v58, 2 }
 0x136   : > { %v665_v8 = vrot.slane %v664_v59, 1  ;;  %v692_v9 = vadd.f32 %v691_v60, %v690_v52  ;;  %v699_v11 = vadd.f32 %v698_v61, %v697_v53  ;;  %v21447_v12 = vadd.f32 %v705_v62, %v704_v54 }
 0x137   : > { %v672_v19 = vrot.slane %v671_v0, 1  ;;  %v679_v20 = vrot.slane %v678_v1, 1  ;;  %v686_v21 = vrot.slane %v685_v3, 1  ;;  %v21458_v24 = vadd.f32 %v712_v4, %v711_v58 }
 0x138   : > { %v21470_v33 = vadd.f32 %v651_v17, %v21375_v2  ;;  %v21473_v34 = vadd.f32 %v658_v29, %v21389_v10  ;;  %v693_v35 = vrot.slane %v692_v9, 1  ;;  %v700_v36 = vrot.slane %v699_v11, 1 }
 0x139   : > { %v21484_v40 = vadd.f32 %v665_v8, %v664_v59  ;;  %v21486_v2 = vadd.f32 %v672_v19, %v671_v0  ;;  %v21488_v10 = vadd.f32 %v679_v20, %v678_v1  ;;  %v707_v17 = vrot.slane %v21447_v12, 1 }
 0x13a   : > { %v21491_v29 = vadd.f32 %v686_v21, %v685_v3  ;;  %v21493_v41 = vadd.f32 %v693_v35, %v692_v9  ;;  %v714_v42 = vrot.slane %v21458_v24, 1  ;;  %v716_v43 = vadd.f32 %v551_v15, %v528_v63  ;;  %v561_v35 = vld [vmem:[%s23343_s9 + $0x188] sm:$0xff] }
 0x13b   : > { %v21502_v46 = vadd.f32 %v700_v36, %v699_v11  ;;  %v723_v47 = vadd.f32 %v552_v26, %v529_v5  ;;  %v730_v48 = vadd.f32 %v553_v30, %v530_v6  ;;  %v737_v49 = vadd.f32 %v554_v32, %v531_v7  ;;  %v559_v30 = vld [vmem:[%s23343_s9 + $0x178] sm:$0xff]  ;;  %v560_v32 = vld [vmem:[%s23343_s9 + $0x180] sm:$0xff] }
 0x13c   : > { %v717_v50 = vrot.slane %v716_v43, 4  ;;  %v744_v51 = vadd.f32 %v555_v37, %v532_v13  ;;  %v751_v52 = vadd.f32 %v556_v38, %v533_v14  ;;  %v760_v53 = vsel %vm758_vm0, %v557_v39, 0.0 }
 0x13d   : > { %v724_v54 = vrot.slane %v723_v47, 4  ;;  %v731_v55 = vrot.slane %v730_v48, 4  ;;  %v738_v56 = vrot.slane %v737_v49, 4  ;;  %v761_v57 = vadd.f32 %v760_v53, %v21401_v16  ;;  %v585_v53 = vld [vmem:[%s23343_s9 + $0x248] sm:$0xff] }
 0x13e   : > { %v718_v58 = vadd.f32 %v717_v50, %v716_v43  ;;  %v745_v59 = vrot.slane %v744_v51, 4  ;;  %v752_v60 = vrot.slane %v751_v52, 4  ;;  %v768_v61 = vadd.f32 %v581_v45, %v558_v44  ;;  %v562_v43 = vld [vmem:[%s23343_s9 + $0x190] sm:$0xff]  ;;  %v563_v44 = vld [vmem:[%s23343_s9 + $0x198] sm:$0xff] }
 0x13f   : > { %v725_v62 = vadd.f32 %v724_v54, %v723_v47  ;;  %v732_v63 = vadd.f32 %v731_v55, %v730_v48  ;;  %v739_v0 = vadd.f32 %v738_v56, %v737_v49  ;;  %v762_v1 = vrot.slane %v761_v57, 4  ;;  %v582_v45 = vld [vmem:[%s23343_s9 + $0x230] sm:$0xff] }
 0x140   : > { %v719_v3 = vrot.slane %v718_v58, 2  ;;  %v746_v4 = vadd.f32 %v745_v59, %v744_v51  ;;  %v753_v5 = vadd.f32 %v752_v60, %v751_v52  ;;  %v769_v6 = vrot.slane %v768_v61, 4  ;;  %v583_v51 = vld [vmem:[%s23343_s9 + $0x238] sm:$0xff]  ;;  %v584_v52 = vld [vmem:[%s23343_s9 + $0x240] sm:$0xff]  ;;  %v586_v59 = vld [vmem:[%s23343_s9 + $0x250] sm:$0xff] }
 0x141   : > { %v726_v7 = vrot.slane %v725_v62, 2  ;;  %v733_v8 = vrot.slane %v732_v63, 2  ;;  %v740_v9 = vrot.slane %v739_v0, 2  ;;  %v763_v11 = vadd.f32 %v762_v1, %v761_v57  ;;  %v587_v60 = vld [vmem:[%s23343_s9 + $0x258] sm:$0xff] }
 0x142   : > { %v720_v13 = vadd.f32 %v719_v3, %v718_v58  ;;  %v747_v14 = vrot.slane %v746_v4, 2  ;;  %v754_v15 = vrot.slane %v753_v5, 2  ;;  %v770_v16 = vadd.f32 %v769_v6, %v768_v61  ;;  %v564_v58 = vld [vmem:[%s23343_s9 + $0x1a0] sm:$0xff] }
 0x143   : > { %v727_v19 = vadd.f32 %v726_v7, %v725_v62  ;;  %v734_v20 = vadd.f32 %v733_v8, %v732_v63  ;;  %v741_v21 = vadd.f32 %v740_v9, %v739_v0  ;;  %v764_v26 = vrot.slane %v763_v11, 2  ;;  %v565_v63 = vld [vmem:[%s23343_s9 + $0x1a8] sm:$0xff]  ;;  %v588_v0 = vld [vmem:[%s23343_s9 + $0x260] sm:$0xff] }
 0x144   : > { %v721_v36 = vrot.slane %v720_v13, 1  ;;  %v748_v37 = vadd.f32 %v747_v14, %v746_v4  ;;  %v755_v38 = vadd.f32 %v754_v15, %v753_v5  ;;  %v771_v39 = vrot.slane %v770_v16, 2  ;;  %v566_v4 = vld [vmem:[%s23343_s9 + $0x1b0] sm:$0xff]  ;;  %v589_v5 = vld [vmem:[%s23343_s9 + $0x268] sm:$0xff] }
 0x145   : > { %v728_v47 = vrot.slane %v727_v19, 1  ;;  %v735_v48 = vrot.slane %v734_v20, 1  ;;  %v742_v49 = vrot.slane %v741_v21, 1  ;;  %v21524_v50 = vadd.f32 %v764_v26, %v763_v11 }
 0x146   : > { %v21536_v54 = vadd.f32 %v707_v17, %v21447_v12  ;;  %v749_v55 = vrot.slane %v748_v37, 1  ;;  %v756_v56 = vrot.slane %v755_v38, 1  ;;  %v21538_v57 = vadd.f32 %v771_v39, %v770_v16 }
 0x147   : > { %v21552_v12 = vadd.f32 %v714_v42, %v21458_v24  ;;  %v21554_v17 = vadd.f32 %v721_v36, %v720_v13  ;;  %v21556_v61 = vadd.f32 %v728_v47, %v727_v19  ;;  %v21558_v62 = vadd.f32 %v735_v48, %v734_v20 }
 0x148   : > { %v21566_v1 = vadd.f32 %v742_v49, %v741_v21  ;;  %v21568_v3 = vadd.f32 %v749_v55, %v748_v37  ;;  %v766_v24 = vrot.slane %v21524_v50, 1  ;;  %v775_v42 = vadd.f32 %v582_v45, %v559_v30 }
 0x149   : > { %v21577_v6 = vadd.f32 %v756_v56, %v755_v38  ;;  %v782_v7 = vadd.f32 %v583_v51, %v560_v32  ;;  %v789_v8 = vadd.f32 %v584_v52, %v561_v35  ;;  %v796_v9 = vadd.f32 %v585_v53, %v562_v43 }
 0x14a   : > { %v773_v11 = vrot.slane %v21538_v57, 1  ;;  %v776_v13 = vrot.slane %v775_v42, 4  ;;  %v803_v14 = vadd.f32 %v586_v59, %v563_v44  ;;  %v810_v15 = vadd.f32 %v587_v60, %v564_v58 }
 0x14b   : > { %v783_v16 = vrot.slane %v782_v7, 4  ;;  %v790_v19 = vrot.slane %v789_v8, 4  ;;  %v797_v20 = vrot.slane %v796_v9, 4  ;;  %v817_v21 = vadd.f32 %v588_v0, %v565_v63 }
 0x14c   : > { %v777_v26 = vadd.f32 %v776_v13, %v775_v42  ;;  %v804_v30 = vrot.slane %v803_v14, 4  ;;  %v811_v36 = vrot.slane %v810_v15, 4  ;;  %v824_v37 = vadd.f32 %v589_v5, %v566_v4  ;;  %v567_v42 = vld [vmem:[%s23343_s9 + $0x1b8] sm:$0xff]  ;;  %v568_v4 = vld [vmem:[%s23343_s9 + $0x1c0] sm:$0xff]  ;;  %v569_v5 = vld [vmem:[%s23343_s9 + $0x1c8] sm:$0xff] }
 0x14d   : > { %v784_v39 = vadd.f32 %v783_v16, %v782_v7  ;;  %v791_v45 = vadd.f32 %v790_v19, %v789_v8  ;;  %v798_v38 = vadd.f32 %v797_v20, %v796_v9  ;;  %v818_v47 = vrot.slane %v817_v21, 4  ;;  %v590_v16 = vld [vmem:[%s23343_s9 + $0x270] sm:$0xff] }
 0x14e   : > { %v778_v32 = vrot.slane %v777_v26, 2  ;;  %v805_v35 = vadd.f32 %v804_v30, %v803_v14  ;;  %v812_v43 = vadd.f32 %v811_v36, %v810_v15  ;;  %v825_v48 = vrot.slane %v824_v37, 4  ;;  %v570_v14 = vld [vmem:[%s23343_s9 + $0x1d0] sm:$0xff]  ;;  %v571_v15 = vld [vmem:[%s23343_s9 + $0x1d8] sm:$0xff]  ;;  %v592_v36 = vld [vmem:[%s23343_s9 + $0x280] sm:$0xff] }
 0x14f   : > { %v785_v49 = vrot.slane %v784_v39, 2  ;;  %v792_v51 = vrot.slane %v791_v45, 2  ;;  %v799_v44 = vrot.slane %v798_v38, 2  ;;  %v819_v52 = vadd.f32 %v818_v47, %v817_v21  ;;  %v591_v30 = vld [vmem:[%s23343_s9 + $0x278] sm:$0xff] }
 0x150   : > { %v779_v53 = vadd.f32 %v778_v32, %v777_v26  ;;  %v806_v55 = vrot.slane %v805_v35, 2  ;;  %v813_v56 = vrot.slane %v812_v43, 2  ;;  %v826_v58 = vadd.f32 %v825_v48, %v824_v37  ;;  %v593_v37 = vld [vmem:[%s23343_s9 + $0x288] sm:$0xff]  ;;  %v572_v32 = vld [vmem:[%s23343_s9 + $0x1e0] sm:$0xff] }
 0x151   : > { %v786_v59 = vadd.f32 %v785_v49, %v784_v39  ;;  %v793_v60 = vadd.f32 %v792_v51, %v791_v45  ;;  %v800_v63 = vadd.f32 %v799_v44, %v798_v38  ;;  %v820_v0 = vrot.slane %v819_v52, 2  ;;  %v573_v51 = vld [vmem:[%s23343_s9 + $0x1e8] sm:$0xff]  ;;  %v596_v44 = vld [vmem:[%s23343_s9 + $0x2a0] sm:$0xff] }
 0x152   : > { %v780_v7 = vrot.slane %v779_v53, 1  ;;  %v807_v8 = vadd.f32 %v806_v55, %v805_v35  ;;  %v814_v9 = vadd.f32 %v813_v56, %v812_v43  ;;  %v827_v13 = vrot.slane %v826_v58, 2  ;;  %v594_v35 = vld [vmem:[%s23343_s9 + $0x290] sm:$0xff]  ;;  %v595_v43 = vld [vmem:[%s23343_s9 + $0x298] sm:$0xff]  ;;  %v597_v56 = vld [vmem:[%s23343_s9 + $0x2a8] sm:$0xff] }
 0x153   : > { %v787_v19 = vrot.slane %v786_v59, 1  ;;  %v794_v20 = vrot.slane %v793_v60, 1  ;;  %v801_v21 = vrot.slane %v800_v63, 1  ;;  %v21598_v26 = vadd.f32 %v820_v0, %v819_v52 }
 0x154   : > { %v21610_v39 = vadd.f32 %v766_v24, %v21524_v50  ;;  %v808_v45 = vrot.slane %v807_v8, 1  ;;  %v815_v38 = vrot.slane %v814_v9, 1  ;;  %v21612_v47 = vadd.f32 %v827_v13, %v826_v58 }
 0x155   : > { %v21624_v48 = vadd.f32 %v773_v11, %v21538_v57  ;;  %v21626_v50 = vadd.f32 %v780_v7, %v779_v53  ;;  %v21628_v24 = vadd.f32 %v787_v19, %v786_v59  ;;  %v21630_v49 = vadd.f32 %v794_v20, %v793_v60  ;;  %v574_v53 = vld [vmem:[%s23343_s9 + $0x1f0] sm:$0xff] }
 0x156   : > { %v21638_v52 = vadd.f32 %v801_v21, %v800_v63  ;;  %v21640_v55 = vadd.f32 %v808_v45, %v807_v8  ;;  %v822_v57 = vrot.slane %v21598_v26, 1  ;;  %v831_v11 = vadd.f32 %v590_v16, %v567_v42 }
 0x157   : > { %23345 = vst [vmem:[#allocation31_spill] sm:$0xff] %v21630_v49  ;;  %v21649_v58 = vadd.f32 %v815_v38, %v814_v9  ;;  %v838_v59 = vadd.f32 %v591_v30, %v568_v4  ;;  %v845_v60 = vadd.f32 %v592_v36, %v569_v5  ;;  %v852_v0 = vadd.f32 %v593_v37, %v570_v14 }
 0x158   : > { %23346 = vst [vmem:[#allocation32_spill] sm:$0xff] %v21638_v52  ;;  %23347 = vst [vmem:[#allocation33_spill] sm:$0xff] %v21640_v55  ;;  %v829_v63 = vrot.slane %v21612_v47, 1  ;;  %v832_v7 = vrot.slane %v831_v11, 4  ;;  %v859_v8 = vadd.f32 %v594_v35, %v571_v15  ;;  %v866_v13 = vadd.f32 %v595_v43, %v572_v32 }
 0x159   : > { %23348 = vst [vmem:[#allocation34_spill] sm:$0xff] %v21649_v58  ;;  %v839_v19 = vrot.slane %v838_v59, 4  ;;  %v846_v42 = vrot.slane %v845_v60, 4  ;;  %v853_v16 = vrot.slane %v852_v0, 4  ;;  %v873_v20 = vadd.f32 %v596_v44, %v573_v51 }
 0x15a   : > { %v833_v21 = vadd.f32 %v832_v7, %v831_v11  ;;  %v860_v45 = vrot.slane %v859_v8, 4  ;;  %v867_v18 = vrot.slane %v866_v13, 4  ;;  %v880_v55 = vadd.f32 %v597_v56, %v574_v53  ;;  %v575_v56 = vld [vmem:[%s23343_s9 + $0x1f8] sm:$0xff] }
 0x15b   : > { %v840_v52 = vadd.f32 %v839_v19, %v838_v59  ;;  %v847_v49 = vadd.f32 %v846_v42, %v845_v60  ;;  %v854_v9 = vadd.f32 %v853_v16, %v852_v0  ;;  %v874_v38 = vrot.slane %v873_v20, 4 }
 0x15c   : > { %v834_v4 = vrot.slane %v833_v21, 2  ;;  %v861_v5 = vadd.f32 %v860_v45, %v859_v8  ;;  %v868_v14 = vadd.f32 %v867_v18, %v866_v13  ;;  %v881_v30 = vrot.slane %v880_v55, 4  ;;  %v576_v18 = vld [vmem:[%s23343_s9 + $0x200] sm:$0xff] }
 0x15d   : > { %v841_v36 = vrot.slane %v840_v52, 2  ;;  %v848_v37 = vrot.slane %v847_v49, 2  ;;  %v855_v15 = vrot.slane %v854_v9, 2  ;;  %v875_v32 = vadd.f32 %v874_v38, %v873_v20  ;;  %v600_v20 = vld [vmem:[%s23343_s9 + $0x2c0] sm:$0xff] }
 0x15e   : > { %v835_v35 = vadd.f32 %v834_v4, %v833_v21  ;;  %v862_v43 = vrot.slane %v861_v5, 2  ;;  %v869_v58 = vrot.slane %v868_v14, 2  ;;  %v882_v51 = vadd.f32 %v881_v30, %v880_v55  ;;  %v577_v55 = vld [vmem:[%s23343_s9 + $0x208] sm:$0xff]  ;;  %v602_v30 = vld [vmem:[%s23343_s9 + $0x2d0] sm:$0xff] }
 0x15f   : > { %v842_v44 = vadd.f32 %v841_v36, %v840_v52  ;;  %v849_v11 = vadd.f32 %v848_v37, %v847_v49  ;;  %v856_v7 = vadd.f32 %v855_v15, %v854_v9  ;;  %v876_v53 = vrot.slane %v875_v32, 2  ;;  %v578_v49 = vld [vmem:[%s23343_s9 + $0x210] sm:$0xff]  ;;  %v601_v21 = vld [vmem:[%s23343_s9 + $0x2c8] sm:$0xff]  ;;  %v603_v15 = vld [vmem:[%s23343_s9 + $0x2d8] sm:$0xff] }
 0x160   : > { %v836_v59 = vrot.slane %v835_v35, 1  ;;  %v863_v60 = vadd.f32 %v862_v43, %v861_v5  ;;  %v870_v0 = vadd.f32 %v869_v58, %v868_v14  ;;  %v883_v8 = vrot.slane %v882_v51, 2  ;;  %v598_v52 = vld [vmem:[%s23343_s9 + $0x2b0] sm:$0xff]  ;;  %v599_v58 = vld [vmem:[%s23343_s9 + $0x2b8] sm:$0xff]  ;;  %v580_v14 = vld [vmem:[%s23343_s9 + $0x220] sm:$0xff] }
 0x161   : > { %v843_v13 = vrot.slane %v842_v44, 1  ;;  %v850_v19 = vrot.slane %v849_v11, 1  ;;  %v857_v42 = vrot.slane %v856_v7, 1  ;;  %v877_v16 = vadd.f32 %v876_v53, %v875_v32  ;;  %v579_v5 = vld [vmem:[%s23343_s9 + $0x218] sm:$0xff] }
 0x162   : > { %v21677_v45 = vadd.f32 %v822_v57, %v21598_v26  ;;  %v864_v9 = vrot.slane %v863_v60, 1  ;;  %v871_v38 = vrot.slane %v870_v0, 1  ;;  %v884_v4 = vadd.f32 %v883_v8, %v882_v51 }
 0x163   : > { %v21689_v36 = vadd.f32 %v829_v63, %v21612_v47  ;;  %v21691_v26 = vadd.f32 %v836_v59, %v835_v35  ;;  %v21693_v57 = vadd.f32 %v843_v13, %v842_v44  ;;  %v21695_v37 = vadd.f32 %v850_v19, %v849_v11 }
 0x164   : > { %23349 = vst [vmem:[#allocation35_spill] sm:$0xff] %v21677_v45  ;;  %v21700_v32 = vadd.f32 %v857_v42, %v856_v7  ;;  %v21702_v43 = vadd.f32 %v864_v9, %v863_v60  ;;  %v878_v51 = vrot.slane %v877_v16, 1  ;;  %v887_v53 = vadd.f32 %v598_v52, %v575_v56 }
 0x165   : > { %23350 = vst [vmem:[#allocation36_spill] sm:$0xff] %v21695_v37  ;;  %v885_v8 = vrot.slane %v884_v4, 1  ;;  %v894_v45 = vadd.f32 %v599_v58, %v576_v18  ;;  %v901_v47 = vadd.f32 %v600_v20, %v577_v55  ;;  %v908_v63 = vadd.f32 %v601_v21, %v578_v49 }
 0x166   : > { %v21704_v35 = vadd.f32 %v871_v38, %v870_v0  ;;  %v888_v44 = vrot.slane %v887_v53, 4  ;;  %v915_v59 = vadd.f32 %v602_v30, %v579_v5  ;;  %v922_v11 = vsel %vm758_vm0, %v580_v14, 0.0 }
 0x167   : > { %v895_v13 = vrot.slane %v894_v45, 4  ;;  %v902_v19 = vrot.slane %v901_v47, 4  ;;  %v909_v37 = vrot.slane %v908_v63, 4  ;;  %v923_v7 = vsel %vm758_vm0, %v603_v15, 0.0 }
 0x168   : > { %v21708_v42 = vadd.f32 %v878_v51, %v877_v16  ;;  %v889_v60 = vadd.f32 %v888_v44, %v887_v53  ;;  %v916_v9 = vrot.slane %v915_v59, 4  ;;  %v924_v56 = vadd.f32 %v923_v7, %v922_v11 }
 0x169   : > { %v21710_v52 = vadd.f32 %v885_v8, %v884_v4  ;;  %v896_v18 = vadd.f32 %v895_v13, %v894_v45  ;;  %v903_v55 = vadd.f32 %v902_v19, %v901_v47  ;;  %v910_v0 = vadd.f32 %v909_v37, %v908_v63 }
 0x16a   : > { %v890_v49 = vrot.slane %v889_v60, 2  ;;  %v917_v58 = vadd.f32 %v916_v9, %v915_v59  ;;  %v925_v20 = vrot.slane %v924_v56, 4  ;;  %v21713_v21 = vmul.f32 0.0625, %v21415_v22 }
 0x16b   : > { %v897_v38 = vrot.slane %v896_v18, 2  ;;  %v904_v5 = vrot.slane %v903_v55, 2  ;;  %v911_v14 = vrot.slane %v910_v0, 2  ;;  %v21716_v16 = vmul.f32 0.0625, %v21417_v23 }
 0x16c   : > { %v891_v30 = vadd.f32 %v890_v49, %v889_v60  ;;  %v918_v15 = vrot.slane %v917_v58, 2  ;;  %v926_v51 = vadd.f32 %v925_v20, %v924_v56  ;;  %v21719_v4 = vmul.f32 0.0625, %v21419_v25 }
 0x16d   : > { %v898_v45 = vadd.f32 %v897_v38, %v896_v18  ;;  %v905_v37 = vadd.f32 %v904_v5, %v903_v55  ;;  %v912_v53 = vadd.f32 %v911_v14, %v910_v0  ;;  %v21722_v8 = vmul.f32 0.0625, %v21428_v27 }
 0x16e   : > { %v892_v22 = vrot.slane %v891_v30, 1  ;;  %v919_v47 = vadd.f32 %v918_v15, %v917_v58  ;;  %v927_v63 = vrot.slane %v926_v51, 2  ;;  %v21725_v44 = vmul.f32 0.0625, %v21430_v28 }
 0x16f   : > { %v899_v23 = vrot.slane %v898_v45, 1  ;;  %v906_v59 = vrot.slane %v905_v37, 1  ;;  %v913_v11 = vrot.slane %v912_v53, 1  ;;  %v937_v13 = vmul.f32 0.0625, %v21433_v31 }
 0x170   : > { %v920_v19 = vrot.slane %v919_v47, 1  ;;  %v928_v25 = vadd.f32 %v927_v63, %v926_v51  ;;  %v938_v7 = vmul.f32 0.0625, %v21470_v33  ;;  %v939_v60 = vmul.f32 0.0625, %v21473_v34 }
 0x171   : > { %v893_v9 = vadd.f32 %v892_v22, %v891_v30  ;;  %v900_v27 = vadd.f32 %v899_v23, %v898_v45  ;;  %v907_v56 = vadd.f32 %v906_v59, %v905_v37  ;;  %v940_v18 = vmul.f32 0.0625, %v21484_v40  ;;  %v23354_v45 = vld [vmem:[#allocation34_spill] sm:$0xff]  ;;  %v23355_v37 = vld [vmem:[#allocation35_spill] sm:$0xff]  ;;  %v23356_v22 = vld [vmem:[#allocation36_spill] sm:$0xff] }
 0x172   : > { %v914_v55 = vadd.f32 %v913_v11, %v912_v53  ;;  %v921_v0 = vadd.f32 %v920_v19, %v919_v47  ;;  %v929_v28 = vrot.slane %v928_v25, 1  ;;  %v941_v49 = vmul.f32 0.0625, %v21486_v2 }
 0x173   : > { %v942_v58 = vmul.f32 0.0625, %v21488_v10  ;;  %v943_v31 = vmul.f32 0.0625, %v21491_v29  ;;  %v944_v20 = vmul.f32 0.0625, %v21493_v41  ;;  %v945_v33 = vmul.f32 0.0625, %v21502_v46 }
 0x174   : > { %v930_v38 = vadd.f32 %v929_v28, %v928_v25  ;;  %v946_v34 = vmul.f32 0.0625, %v21536_v54  ;;  %v947_v5 = vmul.f32 0.0625, %v21552_v12  ;;  %v948_v40 = vmul.f32 0.0625, %v21554_v17  ;;  %v23351_v17 = vld [vmem:[#allocation31_spill] sm:$0xff] }
 0x175   : > { %v949_v14 = vmul.f32 0.0625, %v21556_v61  ;;  %v21741_v30 = vmul.f32 0.0625, %v21558_v62  ;;  %v21744_v2 = vmul.f32 0.0625, %v21566_v1  ;;  %v21747_v10 = vmul.f32 0.0625, %v21568_v3  ;;  %v23352_v62 = vld [vmem:[#allocation32_spill] sm:$0xff]  ;;  %v23353_v1 = vld [vmem:[#allocation33_spill] sm:$0xff] }
 0x176   : > { %v953_v29 = vmul.f32 0.0625, %v21577_v6  ;;  %v21751_v41 = vmul.f32 0.0625, %v21610_v39  ;;  %v955_v46 = vmul.f32 0.0625, %v21624_v48  ;;  %v956_v54 = vmul.f32 0.0625, %v21626_v50 }
 0x177   : > { %v957_v12 = vmul.f32 0.0625, %v21628_v24  ;;  %v958_v61 = vmul.f32 0.0625, %v23351_v17  ;;  %v959_v15 = vmul.f32 0.0625, %v23352_v62  ;;  %v960_v51 = vmul.f32 0.0625, %v23353_v1 }
 0x178   : > { %v961_v3 = vmul.f32 0.0625, %v23354_v45  ;;  %v962_v53 = vmul.f32 0.0625, %v23355_v37  ;;  %v963_v6 = vmul.f32 0.0625, %v21689_v36  ;;  %v964_v39 = vmul.f32 0.0625, %v21691_v26 }
 0x179   : > { %v965_v48 = vmul.f32 0.0625, %v21693_v57  ;;  %v966_v50 = vmul.f32 0.0625, %v23356_v22  ;;  %v21766_v24 = vmul.f32 0.0625, %v21700_v32  ;;  %v21769_v47 = vmul.f32 0.0625, %v21702_v43 }
 0x17a   : > { %v21772_v63 = vmul.f32 0.0625, %v21704_v35  ;;  %v21775_v23 = vmul.f32 0.0625, %v21708_v42  ;;  %v21778_v36 = vmul.f32 0.0625, %v21710_v52  ;;  %v21780_v26 = vmul.f32 0.0625, %v893_v9  ;;  %v23357_v52 = vld [vmem:[#allocation30_spill] sm:$0xff] }
 0x17b   : > { %v21782_v57 = vmul.f32 0.0625, %v900_v27  ;;  %v21784_v59 = vmul.f32 0.0625, %v907_v56  ;;  %v21786_v32 = vmul.f32 0.0625, %v914_v55  ;;  %v1024_v43 = vcombine.low %v21713_v21, %v21716_v16 }
 0x17c   : > { %v1025_v35 = vcombine.low %v21719_v4, %v21722_v8  ;;  %v1041_v42 = vcombine.low %v21725_v44, %v937_v13  ;;  %v1042_v11 = vcombine.low %v938_v7, %v939_v60  ;;  %v1058_v19 = vcombine.low %v940_v18, %v941_v49 }
 0x17d   : > { %v21794_v25 = vrot.slane %v1024_v43, %v23357_v52  ;;  %v1059_v9 = vcombine.low %v942_v58, %v943_v31  ;;  %v1075_v27 = vcombine.low %v944_v20, %v945_v33  ;;  %v1076_v28 = vcombine.low %v946_v34, %v947_v5 }
 0x17e   : > { %v21797_v56 = vrot.slane %v1025_v35, %v23357_v52  ;;  %v21800_v55 = vrot.slane %v1041_v42, %v23357_v52  ;;  %v1056_v21 = vrot.slane %v1042_v11, %v23357_v52  ;;  %v21804_v16 = vrot.slane %v1058_v19, %v23357_v52 }
 0x17f   : > { %v21807_v4 = vrot.slane %v1059_v9, %v23357_v52  ;;  %v21810_v8 = vrot.slane %v1075_v27, %v23357_v52  ;;  %v21813_v44 = vrot.slane %v1076_v28, %v23357_v52  ;;  %v1092_v13 = vcombine.low %v948_v40, %v949_v14 }
 0x180   : > { %v976_v7 = vmul.f32 0.0625, %v921_v0  ;;  %v977_v60 = vmul.f32 0.0625, %v930_v38  ;;  %v1093_v18 = vcombine.low %v21741_v30, %v21744_v2  ;;  %v1109_v49 = vcombine.low %v21747_v10, %v953_v29 }
 0x181   : > { %v1040_v58 = vcombine.low %v21794_v25, %v21797_v56  ;;  %v1057_v31 = vcombine.low %v21800_v55, %v1056_v21  ;;  %v1074_v20 = vcombine.low %v21804_v16, %v21807_v4  ;;  %v1091_v33 = vcombine.low %v21810_v8, %v21813_v44 }
 0x182   : > { %v1100_v0 = vrot.slane %v1092_v13, %v23357_v52  ;;  %v1123_v38 = vrot.slane %v21751_v41, %v23357_v52  ;;  %v1125_v34 = vcombine.low %v955_v46, %v956_v54  ;;  %v1126_v5 = vcombine.low %v957_v12, %v958_v61 }
 0x183   : > { %v1142_v40 = vcombine.low %v959_v15, %v960_v51  ;;  %v1143_v14 = vcombine.low %v961_v3, %v962_v53  ;;  %v1159_v30 = vcombine.low %v963_v6, %v964_v39  ;;  %v1160_v2 = vcombine.low %v965_v48, %v966_v50 }
 0x184   : > { %v1107_v10 = vrot.slane %v1093_v18, %v23357_v52  ;;  %v1116_v29 = vrot.slane %v1109_v49, %v23357_v52  ;;  %v1133_v17 = vrot.slane %v1125_v34, %v23357_v52  ;;  %v1140_v62 = vrot.slane %v1126_v5, %v23357_v52 }
 0x185   : > { %v1150_v41 = vrot.slane %v1142_v40, %v23357_v52  ;;  %v1157_v46 = vrot.slane %v1143_v14, %v23357_v52  ;;  %v1167_v54 = vrot.slane %v1159_v30, %v23357_v52  ;;  %v1174_v12 = vrot.slane %v1160_v2, %v23357_v52 }
 0x186   : > { %v1141_v61 = vcombine.low %v1133_v17, %v1140_v62  ;;  %v1176_v15 = vcombine.low %v21766_v24, %v21769_v47  ;;  %v1177_v1 = vcombine.low %v21772_v63, %v21775_v23  ;;  %v1193_v51 = vcombine.low %v21778_v36, %v21780_v26 }
 0x187   : > { %v1158_v45 = vcombine.low %v1150_v41, %v1157_v46  ;;  %v1175_v3 = vcombine.low %v1167_v54, %v1174_v12  ;;  %v1194_v37 = vcombine.low %v21782_v57, %v21784_v59  ;;  %v1210_v53 = vcombine.low %v21786_v32, %v976_v7 }
 0x188   : > { %v1184_v6 = vrot.slane %v1176_v15, %v23357_v52  ;;  %v1191_v39 = vrot.slane %v1177_v1, %v23357_v52  ;;  %v1201_v48 = vrot.slane %v1193_v51, %v23357_v52  ;;  %v1224_v22 = vrot.slane %v977_v60, %v23357_v52 }
 0x189   : > { %v1208_v50 = vrot.slane %v1194_v37, %v23357_v52  ;;  %v1217_v24 = vrot.slane %v1210_v53, %v23357_v52  ;;  %v1230_v47 = vrot.slane %v1141_v61, 7  ;;  %v1241_v63 = vrot.slane %v1158_v45, 7 }
 0x18a   : > { %v1108_v23 = vcombine.low %v1100_v0, %v1107_v10  ;;  %v1124_v36 = vcombine.low %v1116_v29, %v1123_v38  ;;  %v1192_v26 = vcombine.low %v1184_v6, %v1191_v39  ;;  %v1248_v57 = vrot.slane %v1175_v3, 7 }
 0x18b   : > { %v1209_v59 = vcombine.low %v1201_v48, %v1208_v50  ;;  %v1225_v32 = vcombine.low %v1217_v24, %v1224_v22  ;;  %v1232_v43 = vsel %vm1231_vm1, %v1230_v47, %v1040_v58  ;;  %v1242_v35 = vsel %vm1231_vm1, %v1241_v63, %v1057_v31 }
 0x18c   : > { %v1234_v42 = vsel %vm1233_vm2, %v1230_v47, %v1232_v43  ;;  %v1243_v11 = vsel %vm1233_vm2, %v1241_v63, %v1242_v35  ;;  %v1249_v19 = vsel %vm1231_vm1, %v1248_v57, %v1074_v20  ;;  %v1255_v25 = vrot.slane %v1192_v26, 7 }
 0x18d   : > { %v1236_v52 = vsel %vm1235_vm3, %v1230_v47, %v1234_v42  ;;  %v1244_v9 = vsel %vm1235_vm3, %v1241_v63, %v1243_v11  ;;  %v1250_v27 = vsel %vm1233_vm2, %v1248_v57, %v1249_v19  ;;  %v1262_v28 = vrot.slane %v1209_v59, 7 }
 0x18e   : > { %v1238_v56 = vsel %vm1237_vm4, %v1230_v47, %v1236_v52  ;;  %v1245_v55 = vsel %vm1237_vm4, %v1241_v63, %v1244_v9  ;;  %v1251_v21 = vsel %vm1235_vm3, %v1248_v57, %v1250_v27  ;;  %v1256_v16 = vsel %vm1231_vm1, %v1255_v25, %v1091_v33 }
 0x18f   : > { %v1252_v4 = vsel %vm1237_vm4, %v1248_v57, %v1251_v21  ;;  %v1257_v8 = vsel %vm1233_vm2, %v1255_v25, %v1256_v16  ;;  %v1263_v44 = vsel %vm1231_vm1, %v1262_v28, %v1108_v23  ;;  %v1269_v13 = vrot.slane %v1225_v32, 7  ;;  %1280 = vst [vmem:[#allocation2] sm:$0xff] %v1238_v56  ;;  %1281 = vst [vmem:[#allocation2 + $0x8] sm:$0xff] %v1245_v55 }
 0x190   : > { %v1258_v7 = vsel %vm1235_vm3, %v1255_v25, %v1257_v8  ;;  %v1264_v60 = vsel %vm1233_vm2, %v1262_v28, %v1263_v44  ;;  %1282 = vst [vmem:[#allocation2 + $0x10] sm:$0xff] %v1252_v4 }
 0x191   : > { %v1259_v18 = vsel %vm1237_vm4, %v1255_v25, %v1258_v7  ;;  %v1265_v49 = vsel %vm1235_vm3, %v1262_v28, %v1264_v60  ;;  %v1270_v58 = vsel %vm1231_vm1, %v1269_v13, %v1124_v36 }
 0x192   : > { %v1266_v31 = vsel %vm1237_vm4, %v1262_v28, %v1265_v49  ;;  %v1271_v20 = vsel %vm1233_vm2, %v1269_v13, %v1270_v58  ;;  %1283 = vst [vmem:[#allocation2 + $0x18] sm:$0xff] %v1259_v18 }
 0x193   : > { %v1272_v33 = vsel %vm1235_vm3, %v1269_v13, %v1271_v20  ;;  %1284 = vst [vmem:[#allocation2 + $0x20] sm:$0xff] %v1266_v31 }
 0x194   : > { %v1273_v0 = vsel %vm1237_vm4, %v1269_v13, %v1272_v33 }
 0x195   : > { %1290 = vst.msk [vmem:[#allocation2 + $0x28] sm:$0x3f] %vm1289_vm9, %v1273_v0 }
 0x196 PF: > { %v1294_v38 = vld [vmem:[%s21272_s25 + $0x8] sm:$0xff]  ;;  %v1296_v34 = vld [vmem:[%s21272_s25 + $0x18] sm:$0xff]  ;;  %v1293_v5 = vld [vmem:[%s21272_s25] sm:$0xff]  ;;  %v7789_v63 = vlaneseq  ;;  %v20913_v59 = vmov 1983009808   ;;  %vm7908_vm10 = vcmask 523264  }
 0x197   : > { %v16318_v40 = vunpack.c.l.s8.bf16 %v1294_v38  ;;  %v16322_v14 = vunpack.c.h.s8.bf16 %v1294_v38  ;;  %v17038_v30 = vunpack.c.l.s8.bf16 %v1296_v34  ;;  %v17042_v2 = vunpack.c.h.s8.bf16 %v1296_v34  ;;  %v1295_v10 = vld [vmem:[%s21272_s25 + $0x10] sm:$0xff]  ;;  %v1302_v62 = vld [vmem:[%s21272_s25 + $0x48] sm:$0xff]  ;;  %v1304_v41 = vld [vmem:[%s21272_s25 + $0x58] sm:$0xff] }
 0x198   : > { %v16320_v29 = vunpack.c.l.s8.bf16 %v1293_v5  ;;  %v17040_v17 = vunpack.c.l.s8.bf16 %v1295_v10  ;;  %v16324_v46 = vunpack.c.h.s8.bf16 %v1293_v5  ;;  %v17044_v54 = vunpack.c.h.s8.bf16 %v1295_v10  ;;  %v1301_v15 = vld [vmem:[%s21272_s25 + $0x40] sm:$0xff]  ;;  %v1303_v1 = vld [vmem:[%s21272_s25 + $0x50] sm:$0xff]  ;;  %v1310_v53 = vld [vmem:[%s21272_s25 + $0x88] sm:$0xff] }
 0x199   : > { %16319 = vmatprep.subr.bf16.mxu0 %v16318_v40  ;;  %17039 = vmatprep.subr.bf16.mxu1 %v17038_v30  ;;  %v16326_v12 = vunpack.c.l.s8.bf16 %v1302_v62  ;;  %v17046_v61 = vunpack.c.l.s8.bf16 %v1304_v41  ;;  %v16328_v51 = vunpack.c.l.s8.bf16 %v1301_v15  ;;  %v17048_v45 = vunpack.c.l.s8.bf16 %v1303_v1  ;;  %v1312_v6 = vld [vmem:[%s21272_s25 + $0x98] sm:$0xff]  ;;  %v1309_v24 = vld [vmem:[%s21272_s25 + $0x80] sm:$0xff]  ;;  %v1311_v47 = vld [vmem:[%s21272_s25 + $0x90] sm:$0xff] }
 0x19a   : > { %16321 = vmatpush1.bf16.msra.mxu0 %v16320_v29  ;;  %17041 = vmatpush1.bf16.msra.mxu1 %v17040_v17  ;;  %v16330_v3 = vunpack.c.h.s8.bf16 %v1302_v62  ;;  %v17050_v37 = vunpack.c.h.s8.bf16 %v1304_v41  ;;  %v16332_v39 = vunpack.c.h.s8.bf16 %v1301_v15  ;;  %v17052_v48 = vunpack.c.h.s8.bf16 %v1303_v1  ;;  %v1318_v35 = vld [vmem:[%s21272_s25 + $0xc8] sm:$0xff]  ;;  %v1320_v42 = vld [vmem:[%s21272_s25 + $0xd8] sm:$0xff]  ;;  %v1317_v28 = vld [vmem:[%s21272_s25 + $0xc0] sm:$0xff] }
 0x19b   : > { %16323 = vmatprep.subr.bf16.mxu0 %v16322_v14  ;;  %17043 = vmatprep.subr.bf16.mxu1 %v17042_v2  ;;  %v16334_v22 = vunpack.c.l.s8.bf16 %v1310_v53  ;;  %v17054_v50 = vunpack.c.l.s8.bf16 %v1312_v6  ;;  %v16336_v23 = vunpack.c.l.s8.bf16 %v1309_v24  ;;  %v17056_v36 = vunpack.c.l.s8.bf16 %v1311_v47  ;;  %v21894_v52 = vld [vmem:[#allocation2] sm:$0xff]  ;;  %v1319_v56 = vld [vmem:[%s21272_s25 + $0xd0] sm:$0xff]  ;;  %v1328_v60 = vld [vmem:[%s21272_s25 + $0x118] sm:$0xff] }
 0x19c   : > { %v16338_v26 = vunpack.c.h.s8.bf16 %v1310_v53  ;;  %v17058_v57 = vunpack.c.h.s8.bf16 %v1312_v6  ;;  %v7787_v32 = vunpack.c.l.s4 %v20913_v59  ;;  %v21890_v43 = vshrl.u32 %v7789_v63, 7  ;;  %v1326_v7 = vld [vmem:[%s21272_s25 + $0x108] sm:$0xff]  ;;  %v1325_v20 = vld [vmem:[%s21272_s25 + $0x100] sm:$0xff]  ;;  %v1327_v33 = vld [vmem:[%s21272_s25 + $0x110] sm:$0xff] }
 0x19d   : > { %v16340_v19 = vunpack.c.h.s8.bf16 %v1309_v24  ;;  %v17060_v25 = vunpack.c.h.s8.bf16 %v1311_v47  ;;  %v16342_v9 = vunpack.c.l.s8.bf16 %v1318_v35  ;;  %v17062_v27 = vunpack.c.l.s8.bf16 %v1320_v42  ;;  %v1334_v40 = vld [vmem:[%s21272_s25 + $0x148] sm:$0xff]  ;;  %v1336_v14 = vld [vmem:[%s21272_s25 + $0x158] sm:$0xff]  ;;  %v1333_v17 = vld [vmem:[%s21272_s25 + $0x140] sm:$0xff] }
 0x19e   : > { %16325 = vmatpush1.bf16.msra.mxu0 %v16324_v46  ;;  %17045 = vmatpush1.bf16.msra.mxu1 %v17044_v54  ;;  %v7788_v11 = vunpack.c.0.s8 %v7787_v32  ;;  %v16344_v16 = vunpack.c.l.s8.bf16 %v1317_v28  ;;  %v17064_v4 = vunpack.c.l.s8.bf16 %v1319_v56  ;;  %v16346_v8 = vunpack.c.h.s8.bf16 %v1318_v35  ;;  %v1335_v62 = vld [vmem:[%s21272_s25 + $0x150] sm:$0xff]  ;;  %v1344_v15 = vld [vmem:[%s21272_s25 + $0x198] sm:$0xff] }
 0x19f   : > { %16327 = vmatprep.subr.bf16.mxu0 %v16326_v12  ;;  %17047 = vmatprep.subr.bf16.mxu1 %v17046_v61  ;;  %v17066_v44 = vunpack.c.h.s8.bf16 %v1320_v42  ;;  %v16348_v18 = vunpack.c.h.s8.bf16 %v1317_v28  ;;  %v17068_v49 = vunpack.c.h.s8.bf16 %v1319_v56  ;;  %v16350_v58 = vunpack.c.l.s8.bf16 %v1326_v7  ;;  %v1342_v61 = vld [vmem:[%s21272_s25 + $0x188] sm:$0xff]  ;;  %v1343_v53 = vld [vmem:[%s21272_s25 + $0x190] sm:$0xff]  ;;  %v1352_v24 = vld [vmem:[%s21272_s25 + $0x1d8] sm:$0xff] }
 0x1a0   : > { %v21899_v55 = vsub.s32 %v7788_v11, %v21890_v43  ;;  %v17070_v31 = vunpack.c.l.s8.bf16 %v1328_v60  ;;  %v16352_v0 = vunpack.c.l.s8.bf16 %v1325_v20  ;;  %v17072_v38 = vunpack.c.l.s8.bf16 %v1327_v33  ;;  %v1358_v11 = vld [vmem:[%s21272_s25 + $0x208] sm:$0xff] }
 0x1a1   : > { %v16354_v34 = vunpack.c.h.s8.bf16 %v1326_v7  ;;  %v17074_v5 = vunpack.c.h.s8.bf16 %v1328_v60  ;;  %v16356_v30 = vunpack.c.h.s8.bf16 %v1325_v20  ;;  %v17076_v2 = vunpack.c.h.s8.bf16 %v1327_v33 }
 0x1a2   : > { %16329 = vmatpush1.bf16.msra.mxu0 %v16328_v51  ;;  %17049 = vmatpush1.bf16.msra.mxu1 %v17048_v45  ;;  %v21903_v21 = vrot.slane %v21894_v52, %v21899_v55  ;;  %v16358_v10 = vunpack.c.l.s8.bf16 %v1334_v40  ;;  %v17078_v29 = vunpack.c.l.s8.bf16 %v1336_v14  ;;  %v16360_v41 = vunpack.c.l.s8.bf16 %v1333_v17 }
 0x1a3   : > { %16331 = vmatprep.subr.bf16.mxu0 %v16330_v3  ;;  %17051 = vmatprep.subr.bf16.mxu1 %v17050_v37  ;;  %v17080_v46 = vunpack.c.l.s8.bf16 %v1335_v62  ;;  %v16362_v54 = vunpack.c.h.s8.bf16 %v1334_v40  ;;  %v17082_v12 = vunpack.c.h.s8.bf16 %v1336_v14  ;;  %v16364_v1 = vunpack.c.h.s8.bf16 %v1333_v17  ;;  %v1341_v37 = vld [vmem:[%s21272_s25 + $0x180] sm:$0xff] }
 0x1a4   : > { %v21907_v13 = vcombine.high %v21903_v21, %v21903_v21  ;;  %v17084_v51 = vunpack.c.h.s8.bf16 %v1335_v62  ;;  %v16366_v45 = vunpack.c.l.s8.bf16 %v1342_v61  ;;  %v17086_v3 = vunpack.c.l.s8.bf16 %v1344_v15 }
 0x1a5   : > { %v16368_v6 = vunpack.c.l.s8.bf16 %v1341_v37  ;;  %v16372_v47 = vunpack.c.h.s8.bf16 %v1341_v37  ;;  %v17092_v63 = vunpack.c.h.s8.bf16 %v1343_v53  ;;  %v17098_v42 = vunpack.c.h.s8.bf16 %v1352_v24 }
 0x1a6   : > { %16333 = vmatpush1.bf16.msra.mxu0 %v16332_v39  ;;  %17053 = vmatpush1.bf16.msra.mxu1 %v17052_v48  ;;  %v17088_v39 = vunpack.c.l.s8.bf16 %v1343_v53  ;;  %v16370_v48 = vunpack.c.h.s8.bf16 %v1342_v61  ;;  %v16382_v28 = vunpack.c.l.s8.bf16 %v1358_v11 }
 0x1a7   : > { %16335 = vmatprep.subr.bf16.mxu0 %v16334_v22  ;;  %17055 = vmatprep.subr.bf16.mxu1 %v17054_v50  ;;  %v17090_v22 = vunpack.c.h.s8.bf16 %v1344_v15  ;;  %v1350_v50 = vld [vmem:[%s21272_s25 + $0x1c8] sm:$0xff] }
 0x1a8   : > { %7975 = vmatprep.mubr.f32.mxu0 %v21907_v13  ;;  %8827 = vmatprep.mubr.f32.mxu1 %v21907_v13  ;;  %v16378_v35 = vunpack.c.h.s8.bf16 %v1350_v50 }
 0x1aa   : > { %16337 = vmatpush1.bf16.msra.mxu0 %v16336_v23  ;;  %17057 = vmatpush1.bf16.msra.mxu1 %v17056_v36  ;;  %v16374_v23 = vunpack.c.l.s8.bf16 %v1350_v50  ;;  %v17094_v36 = vunpack.c.l.s8.bf16 %v1352_v24 }
 0x1ab   : > { %16339 = vmatprep.subr.bf16.mxu0 %v16338_v26  ;;  %17059 = vmatprep.subr.bf16.mxu1 %v17058_v57  ;;  %v1349_v26 = vld [vmem:[%s21272_s25 + $0x1c0] sm:$0xff]  ;;  %v1351_v57 = vld [vmem:[%s21272_s25 + $0x1d0] sm:$0xff] }
 0x1ac   : > { %v16376_v59 = vunpack.c.l.s8.bf16 %v1349_v26  ;;  %v17096_v32 = vunpack.c.l.s8.bf16 %v1351_v57 }
 0x1ae   : > { %16341 = vmatpush1.bf16.msra.mxu0 %v16340_v19  ;;  %17061 = vmatpush1.bf16.msra.mxu1 %v17060_v25  ;;  %v1360_v19 = vld [vmem:[%s21272_s25 + $0x218] sm:$0xff]  ;;  %v7785_v25 = vcombine.high %v21894_v52, %v21894_v52  ;;  %v16386_v52 = vunpack.c.h.s8.bf16 %v1358_v11 }
 0x1af   : > { %16343 = vmatprep.subr.bf16.mxu0 %v16342_v9  ;;  %17063 = vmatprep.subr.bf16.mxu1 %v17062_v27  ;;  %v16380_v9 = vunpack.c.h.s8.bf16 %v1349_v26  ;;  %v17100_v27 = vunpack.c.h.s8.bf16 %v1351_v57  ;;  %v17102_v56 = vunpack.c.l.s8.bf16 %v1360_v19  ;;  %v17106_v60 = vunpack.c.h.s8.bf16 %v1360_v19 }
 0x1b2   : > { %16345 = vmatpush1.bf16.msra.mxu0 %v16344_v16  ;;  %17065 = vmatpush1.bf16.msra.mxu1 %v17064_v4  ;;  %v1357_v16 = vld [vmem:[%s21272_s25 + $0x200] sm:$0xff]  ;;  %v1359_v4 = vld [vmem:[%s21272_s25 + $0x210] sm:$0xff] }
 0x1b3   : > { %16347 = vmatprep.subr.bf16.mxu0 %v16346_v8  ;;  %17067 = vmatprep.subr.bf16.mxu1 %v17066_v44  ;;  %v21934_v8 = vrot.slane %v7785_v25, %v21899_v55  ;;  %v16384_v44 = vunpack.c.l.s8.bf16 %v1357_v16  ;;  %v17104_v7 = vunpack.c.l.s8.bf16 %v1359_v4  ;;  %v17108_v20 = vunpack.c.h.s8.bf16 %v1359_v4 }
 0x1b6   : > { %16349 = vmatpush1.bf16.msra.mxu0 %v16348_v18  ;;  %17069 = vmatpush1.bf16.msra.mxu1 %v17068_v49  ;;  %v1366_v18 = vld [vmem:[%s21272_s25 + $0x248] sm:$0xff]  ;;  %v1368_v49 = vld [vmem:[%s21272_s25 + $0x258] sm:$0xff] }
 0x1b7   : > { %16351 = vmatprep.subr.bf16.mxu0 %v16350_v58  ;;  %17071 = vmatprep.subr.bf16.mxu1 %v17070_v31  ;;  %v21940_v58 = vcombine.high %v21934_v8, %v21934_v8  ;;  %v16388_v31 = vunpack.c.h.s8.bf16 %v1357_v16  ;;  %v16390_v33 = vunpack.c.l.s8.bf16 %v1366_v18  ;;  %v16394_v14 = vunpack.c.h.s8.bf16 %v1366_v18 }
 0x1ba   : > { %16353 = vmatpush1.bf16.msra.mxu0 %v16352_v0  ;;  %17073 = vmatpush1.bf16.msra.mxu1 %v17072_v38  ;;  %v17110_v0 = vunpack.c.l.s8.bf16 %v1368_v49  ;;  %v1365_v38 = vld [vmem:[%s21272_s25 + $0x240] sm:$0xff] }
 0x1bb   : > { %16355 = vmatprep.subr.bf16.mxu0 %v16354_v34  ;;  %17075 = vmatprep.subr.bf16.mxu1 %v17074_v5  ;;  %v1367_v34 = vld [vmem:[%s21272_s25 + $0x250] sm:$0xff]  ;;  %v16392_v5 = vunpack.c.l.s8.bf16 %v1365_v38 }
 0x1bc   : > { %v17112_v40 = vunpack.c.l.s8.bf16 %v1367_v34  ;;  %v17116_v17 = vunpack.c.h.s8.bf16 %v1367_v34 }
 0x1be   : > { %16357 = vmatpush1.bf16.msra.mxu0 %v16356_v30  ;;  %17077 = vmatpush1.bf16.msra.mxu1 %v17076_v2  ;;  %v17114_v30 = vunpack.c.h.s8.bf16 %v1368_v49  ;;  %v1374_v2 = vld [vmem:[%s21272_s25 + $0x288] sm:$0xff] }
 0x1bf   : > { %16359 = vmatprep.subr.bf16.mxu0 %v16358_v10  ;;  %17079 = vmatprep.subr.bf16.mxu1 %v17078_v29  ;;  %v1376_v10 = vld [vmem:[%s21272_s25 + $0x298] sm:$0xff]  ;;  %v16396_v29 = vunpack.c.h.s8.bf16 %v1365_v38  ;;  %v16398_v62 = vunpack.c.l.s8.bf16 %v1374_v2  ;;  %v16402_v15 = vunpack.c.h.s8.bf16 %v1374_v2 }
 0x1c2   : > { %16361 = vmatpush1.bf16.msra.mxu0 %v16360_v41  ;;  %17081 = vmatpush1.bf16.msra.mxu1 %v17080_v46  ;;  %v17118_v41 = vunpack.c.l.s8.bf16 %v1376_v10  ;;  %v1373_v46 = vld [vmem:[%s21272_s25 + $0x280] sm:$0xff] }
 0x1c3   : > { %16363 = vmatprep.subr.bf16.mxu0 %v16362_v54  ;;  %17083 = vmatprep.subr.bf16.mxu1 %v17082_v12  ;;  %v1375_v54 = vld [vmem:[%s21272_s25 + $0x290] sm:$0xff]  ;;  %v16400_v12 = vunpack.c.l.s8.bf16 %v1373_v46 }
 0x1c4   : > { %v17120_v61 = vunpack.c.l.s8.bf16 %v1375_v54  ;;  %v17124_v37 = vunpack.c.h.s8.bf16 %v1375_v54 }
 0x1c6   : > { %16365 = vmatpush1.bf16.msra.mxu0 %v16364_v1  ;;  %17085 = vmatpush1.bf16.msra.mxu1 %v17084_v51  ;;  %v17122_v1 = vunpack.c.h.s8.bf16 %v1376_v10  ;;  %v1382_v51 = vld [vmem:[%s21272_s25 + $0x2c8] sm:$0xff] }
 0x1c7   : > { %16367 = vmatprep.subr.bf16.mxu0 %v16366_v45  ;;  %17087 = vmatprep.subr.bf16.mxu1 %v17086_v3  ;;  %v1384_v45 = vld [vmem:[%s21272_s25 + $0x2d8] sm:$0xff]  ;;  %v16404_v3 = vunpack.c.h.s8.bf16 %v1373_v46  ;;  %v16406_v53 = vunpack.c.l.s8.bf16 %v1382_v51  ;;  %v16410_v24 = vunpack.c.h.s8.bf16 %v1382_v51 }
 0x1ca   : > { %16369 = vmatpush1.bf16.msra.mxu0 %v16368_v6  ;;  %17089 = vmatpush1.bf16.msra.mxu1 %v17088_v39  ;;  %v17126_v6 = vunpack.c.l.s8.bf16 %v1384_v45  ;;  %v1381_v39 = vld [vmem:[%s21272_s25 + $0x2c0] sm:$0xff] }
 0x1cb   : > { %16371 = vmatprep.subr.bf16.mxu0 %v16370_v48  ;;  %17091 = vmatprep.subr.bf16.mxu1 %v17090_v22  ;;  %v1383_v48 = vld [vmem:[%s21272_s25 + $0x2d0] sm:$0xff]  ;;  %v16408_v22 = vunpack.c.l.s8.bf16 %v1381_v39 }
 0x1cc   : > { %v17128_v50 = vunpack.c.l.s8.bf16 %v1383_v48  ;;  %v17132_v26 = vunpack.c.h.s8.bf16 %v1383_v48 }
 0x1ce   : > { %16373 = vmatpush1.bf16.msra.mxu0 %v16372_v47  ;;  %17093 = vmatpush1.bf16.msra.mxu1 %v17092_v63  ;;  %v17130_v47 = vunpack.c.h.s8.bf16 %v1384_v45  ;;  %v1390_v63 = vld [vmem:[%s21272_s25 + $0x308] sm:$0xff] }
 0x1cf   : > { %16375 = vmatprep.subr.bf16.mxu0 %v16374_v23  ;;  %17095 = vmatprep.subr.bf16.mxu1 %v17094_v36  ;;  %v1392_v23 = vld [vmem:[%s21272_s25 + $0x318] sm:$0xff]  ;;  %v16412_v36 = vunpack.c.h.s8.bf16 %v1381_v39  ;;  %v16414_v57 = vunpack.c.l.s8.bf16 %v1390_v63  ;;  %v16418_v19 = vunpack.c.h.s8.bf16 %v1390_v63 }
 0x1d0   : > { %v17138_v25 = vunpack.c.h.s8.bf16 %v1392_v23 }
 0x1d2   : > { %16377 = vmatpush1.bf16.msra.mxu0 %v16376_v59  ;;  %17097 = vmatpush1.bf16.msra.mxu1 %v17096_v32  ;;  %v17134_v59 = vunpack.c.l.s8.bf16 %v1392_v23  ;;  %v1389_v32 = vld [vmem:[%s21272_s25 + $0x300] sm:$0xff] }
 0x1d3   : > { %16379 = vmatprep.subr.bf16.mxu0 %v16378_v35  ;;  %17099 = vmatprep.subr.bf16.mxu1 %v17098_v42  ;;  %v1391_v35 = vld [vmem:[%s21272_s25 + $0x310] sm:$0xff]  ;;  %v16416_v42 = vunpack.c.l.s8.bf16 %v1389_v32 }
 0x1d4   : > { %v17136_v11 = vunpack.c.l.s8.bf16 %v1391_v35 }
 0x1d6   : > { %16381 = vmatpush1.bf16.msra.mxu0 %v16380_v9  ;;  %17101 = vmatpush1.bf16.msra.mxu1 %v17100_v27  ;;  %v1398_v9 = vld [vmem:[%s21272_s25 + $0x348] sm:$0xff]  ;;  %v1400_v27 = vld [vmem:[%s21272_s25 + $0x358] sm:$0xff] }
 0x1d7   : > { %16383 = vmatprep.subr.bf16.mxu0 %v16382_v28  ;;  %17103 = vmatprep.subr.bf16.mxu1 %v17102_v56  ;;  %v16420_v28 = vunpack.c.h.s8.bf16 %v1389_v32  ;;  %v17140_v56 = vunpack.c.h.s8.bf16 %v1391_v35  ;;  %v16422_v16 = vunpack.c.l.s8.bf16 %v1398_v9  ;;  %v17142_v4 = vunpack.c.l.s8.bf16 %v1400_v27 }
 0x1d8   : > { %v16426_v18 = vunpack.c.h.s8.bf16 %v1398_v9  ;;  %v17146_v49 = vunpack.c.h.s8.bf16 %v1400_v27  ;;  %v1431_v9 = vld [vmem:[%s21272_s25 + $0x450] sm:$0xff] }
 0x1d9   : > { %7976 = vmatmul.mubr.f32.vlgmr.msra.gmra.mrb[0].mxu0 %v21903_v21  ;;  %8828 = vmatmul.mubr.f32.vlgmr.msra.gmra.mrb[0].mxu1 %v21903_v21 }
 0x1da   : > { %16385 = vmatpush1.bf16.msra.mxu0 %v16384_v44  ;;  %17105 = vmatpush1.bf16.msra.mxu1 %v17104_v7  ;;  %v1397_v44 = vld [vmem:[%s21272_s25 + $0x340] sm:$0xff]  ;;  %v1399_v7 = vld [vmem:[%s21272_s25 + $0x350] sm:$0xff] }
 0x1db   : > { %16387 = vmatprep.subr.bf16.mxu0 %v16386_v52  ;;  %17107 = vmatprep.subr.bf16.mxu1 %v17106_v60  ;;  %v16424_v52 = vunpack.c.l.s8.bf16 %v1397_v44  ;;  %v17144_v60 = vunpack.c.l.s8.bf16 %v1399_v7 }
 0x1dc   : > { %8046 = vmatprep.mubr.f32.mxu0 %v21940_v58  ;;  %8898 = vmatprep.mubr.f32.mxu1 %v21940_v58 }
 0x1de   : > { %16389 = vmatpush1.bf16.msra.mxu0 %v16388_v31  ;;  %17109 = vmatpush1.bf16.msra.mxu1 %v17108_v20  ;;  %v1406_v31 = vld [vmem:[%s21272_s25 + $0x388] sm:$0xff]  ;;  %v1408_v20 = vld [vmem:[%s21272_s25 + $0x398] sm:$0xff] }
 0x1df   : > { %16391 = vmatprep.subr.bf16.mxu0 %v16390_v33  ;;  %17111 = vmatprep.subr.bf16.mxu1 %v17110_v0  ;;  %v16428_v33 = vunpack.c.h.s8.bf16 %v1397_v44  ;;  %v17148_v0 = vunpack.c.h.s8.bf16 %v1399_v7  ;;  %v16430_v38 = vunpack.c.l.s8.bf16 %v1406_v31  ;;  %v17150_v34 = vunpack.c.l.s8.bf16 %v1408_v20  ;;  %v1440_v44 = vld [vmem:[%s21272_s25 + $0x498] sm:$0xff] }
 0x1e0   : > { %v16434_v2 = vunpack.c.h.s8.bf16 %v1406_v31  ;;  %v17154_v10 = vunpack.c.h.s8.bf16 %v1408_v20  ;;  %v1439_v31 = vld [vmem:[%s21272_s25 + $0x490] sm:$0xff] }
 0x1e2   : > { %16393 = vmatpush1.bf16.msra.mxu0 %v16392_v5  ;;  %17113 = vmatpush1.bf16.msra.mxu1 %v17112_v40  ;;  %v1405_v5 = vld [vmem:[%s21272_s25 + $0x380] sm:$0xff]  ;;  %v1407_v40 = vld [vmem:[%s21272_s25 + $0x390] sm:$0xff] }
 0x1e3   : > { %16395 = vmatprep.subr.bf16.mxu0 %v16394_v14  ;;  %17115 = vmatprep.subr.bf16.mxu1 %v17114_v30  ;;  %v16432_v14 = vunpack.c.l.s8.bf16 %v1405_v5  ;;  %v17152_v30 = vunpack.c.l.s8.bf16 %v1407_v40 }
 0x1e6   : > { %16397 = vmatpush1.bf16.msra.mxu0 %v16396_v29  ;;  %17117 = vmatpush1.bf16.msra.mxu1 %v17116_v17  ;;  %v1414_v29 = vld [vmem:[%s21272_s25 + $0x3c8] sm:$0xff]  ;;  %v1416_v17 = vld [vmem:[%s21272_s25 + $0x3d8] sm:$0xff] }
 0x1e7   : > { %16399 = vmatprep.subr.bf16.mxu0 %v16398_v62  ;;  %17119 = vmatprep.subr.bf16.mxu1 %v17118_v41  ;;  %v16436_v62 = vunpack.c.h.s8.bf16 %v1405_v5  ;;  %v17156_v41 = vunpack.c.h.s8.bf16 %v1407_v40  ;;  %v16438_v46 = vunpack.c.l.s8.bf16 %v1414_v29  ;;  %v17158_v54 = vunpack.c.l.s8.bf16 %v1416_v17  ;;  %v1448_v5 = vld [vmem:[%s21272_s25 + $0x4d8] sm:$0xff] }
 0x1e8   : > { %v16442_v51 = vunpack.c.h.s8.bf16 %v1414_v29  ;;  %v17162_v45 = vunpack.c.h.s8.bf16 %v1416_v17  ;;  %v1447_v29 = vld [vmem:[%s21272_s25 + $0x4d0] sm:$0xff] }
 0x1ea   : > { %16401 = vmatpush1.bf16.msra.mxu0 %v16400_v12  ;;  %17121 = vmatpush1.bf16.msra.mxu1 %v17120_v61  ;;  %v1413_v12 = vld [vmem:[%s21272_s25 + $0x3c0] sm:$0xff]  ;;  %v1415_v61 = vld [vmem:[%s21272_s25 + $0x3d0] sm:$0xff] }
 0x1eb   : > { %16403 = vmatprep.subr.bf16.mxu0 %v16402_v15  ;;  %17123 = vmatprep.subr.bf16.mxu1 %v17122_v1  ;;  %v16440_v15 = vunpack.c.l.s8.bf16 %v1413_v12  ;;  %v17160_v1 = vunpack.c.l.s8.bf16 %v1415_v61  ;;  %v17164_v39 = vunpack.c.h.s8.bf16 %v1415_v61 }
 0x1ee   : > { %16405 = vmatpush1.bf16.msra.mxu0 %v16404_v3  ;;  %17125 = vmatpush1.bf16.msra.mxu1 %v17124_v37  ;;  %v1422_v3 = vld [vmem:[%s21272_s25 + $0x408] sm:$0xff]  ;;  %v1424_v37 = vld [vmem:[%s21272_s25 + $0x418] sm:$0xff] }
 0x1ef   : > { %16407 = vmatprep.subr.bf16.mxu0 %v16406_v53  ;;  %17127 = vmatprep.subr.bf16.mxu1 %v17126_v6  ;;  %v21974_v53 = vld [vmem:[#allocation2 + $0x8] sm:$0xff]  ;;  %v16444_v6 = vunpack.c.h.s8.bf16 %v1413_v12  ;;  %v16446_v48 = vunpack.c.l.s8.bf16 %v1422_v3  ;;  %v1456_v12 = vld [vmem:[%s21272_s25 + $0x518] sm:$0xff] }
 0x1f2   : > { %16409 = vmatpush1.bf16.msra.mxu0 %v16408_v22  ;;  %17129 = vmatpush1.bf16.msra.mxu1 %v17128_v50  ;;  %v17166_v22 = vunpack.c.l.s8.bf16 %v1424_v37  ;;  %v1421_v50 = vld [vmem:[%s21272_s25 + $0x400] sm:$0xff] }
 0x1f3   : > { %16411 = vmatprep.subr.bf16.mxu0 %v16410_v24  ;;  %17131 = vmatprep.subr.bf16.mxu1 %v17130_v47  ;;  %v1423_v24 = vld [vmem:[%s21272_s25 + $0x410] sm:$0xff]  ;;  %v21980_v47 = vrot.slane %v21974_v53, %v21899_v55  ;;  %v16448_v63 = vunpack.c.l.s8.bf16 %v1421_v50  ;;  %v16452_v35 = vunpack.c.h.s8.bf16 %v1421_v50  ;;  %v1464_v50 = vld [vmem:[%s21272_s25 + $0x558] sm:$0xff] }
 0x1f4   : > { %v17168_v23 = vunpack.c.l.s8.bf16 %v1423_v24 }
 0x1f5   : > { %v21986_v32 = vcombine.high %v21980_v47, %v21980_v47 }
 0x1f6   : > { %16413 = vmatpush1.bf16.msra.mxu0 %v16412_v36  ;;  %17133 = vmatpush1.bf16.msra.mxu1 %v17132_v26  ;;  %v16450_v36 = vunpack.c.h.s8.bf16 %v1422_v3  ;;  %v17170_v26 = vunpack.c.h.s8.bf16 %v1424_v37  ;;  %v1455_v3 = vld [vmem:[%s21272_s25 + $0x510] sm:$0xff] }
 0x1f7   : > { %16415 = vmatprep.subr.bf16.mxu0 %v16414_v57  ;;  %17135 = vmatprep.subr.bf16.mxu1 %v17134_v59  ;;  %v1430_v57 = vld [vmem:[%s21272_s25 + $0x448] sm:$0xff]  ;;  %v1432_v59 = vld [vmem:[%s21272_s25 + $0x458] sm:$0xff] }
 0x1fa   : > { %16417 = vmatpush1.bf16.msra.mxu0 %v16416_v42  ;;  %17137 = vmatpush1.bf16.msra.mxu1 %v17136_v11  ;;  %v17172_v42 = vunpack.c.h.s8.bf16 %v1423_v24  ;;  %v16454_v11 = vunpack.c.l.s8.bf16 %v1430_v57 }
 0x1fb   : > { %16419 = vmatprep.subr.bf16.mxu0 %v16418_v19  ;;  %17139 = vmatprep.subr.bf16.mxu1 %v17138_v25  ;;  %v17174_v19 = vunpack.c.l.s8.bf16 %v1432_v59  ;;  %v1429_v25 = vld [vmem:[%s21272_s25 + $0x440] sm:$0xff] }
 0x1fc   : > { %v16456_v27 = vunpack.c.l.s8.bf16 %v1429_v25  ;;  %v16460_v7 = vunpack.c.h.s8.bf16 %v1429_v25  ;;  %v1472_v25 = vld [vmem:[%s21272_s25 + $0x598] sm:$0xff] }
 0x1fe   : > { %16421 = vmatpush1.bf16.msra.mxu0 %v16420_v28  ;;  %17141 = vmatpush1.bf16.msra.mxu1 %v17140_v56  ;;  %v17176_v28 = vunpack.c.l.s8.bf16 %v1431_v9  ;;  %v16458_v56 = vunpack.c.h.s8.bf16 %v1430_v57  ;;  %v1463_v57 = vld [vmem:[%s21272_s25 + $0x550] sm:$0xff] }
 0x1ff   : > { %16423 = vmatprep.subr.bf16.mxu0 %v16422_v16  ;;  %17143 = vmatprep.subr.bf16.mxu1 %v17142_v4  ;;  %v17178_v16 = vunpack.c.h.s8.bf16 %v1432_v59  ;;  %v1438_v4 = vld [vmem:[%s21272_s25 + $0x488] sm:$0xff] }
 0x202   : > { %16425 = vmatpush1.bf16.msra.mxu0 %v16424_v52  ;;  %17145 = vmatpush1.bf16.msra.mxu1 %v17144_v60  ;;  %v17180_v52 = vunpack.c.h.s8.bf16 %v1431_v9  ;;  %v16462_v60 = vunpack.c.l.s8.bf16 %v1438_v4 }
 0x203   : > { %16427 = vmatprep.subr.bf16.mxu0 %v16426_v18  ;;  %17147 = vmatprep.subr.bf16.mxu1 %v17146_v49  ;;  %v17182_v18 = vunpack.c.l.s8.bf16 %v1440_v44  ;;  %v1437_v49 = vld [vmem:[%s21272_s25 + $0x480] sm:$0xff] }
 0x204   : > { %v16464_v20 = vunpack.c.l.s8.bf16 %v1437_v49  ;;  %v16468_v40 = vunpack.c.h.s8.bf16 %v1437_v49  ;;  %v1480_v49 = vld [vmem:[%s21272_s25 + $0x5d8] sm:$0xff] }
 0x206   : > { %16429 = vmatpush1.bf16.msra.mxu0 %v16428_v33  ;;  %17149 = vmatpush1.bf16.msra.mxu1 %v17148_v0  ;;  %v17184_v33 = vunpack.c.l.s8.bf16 %v1439_v31  ;;  %v16466_v0 = vunpack.c.h.s8.bf16 %v1438_v4  ;;  %v1471_v4 = vld [vmem:[%s21272_s25 + $0x590] sm:$0xff] }
 0x207   : > { %16431 = vmatprep.subr.bf16.mxu0 %v16430_v38  ;;  %17151 = vmatprep.subr.bf16.mxu1 %v17150_v34  ;;  %v17186_v38 = vunpack.c.h.s8.bf16 %v1440_v44  ;;  %v1446_v34 = vld [vmem:[%s21272_s25 + $0x4c8] sm:$0xff] }
 0x20a   : > { %16433 = vmatpush1.bf16.msra.mxu0 %v16432_v14  ;;  %17153 = vmatpush1.bf16.msra.mxu1 %v17152_v30  ;;  %v17188_v14 = vunpack.c.h.s8.bf16 %v1439_v31  ;;  %v16470_v30 = vunpack.c.l.s8.bf16 %v1446_v34 }
 0x20b   : > { %16435 = vmatprep.subr.bf16.mxu0 %v16434_v2  ;;  %17155 = vmatprep.subr.bf16.mxu1 %v17154_v10  ;;  %v17190_v2 = vunpack.c.l.s8.bf16 %v1448_v5  ;;  %v1445_v10 = vld [vmem:[%s21272_s25 + $0x4c0] sm:$0xff] }
 0x20c   : > { %v16472_v17 = vunpack.c.l.s8.bf16 %v1445_v10  ;;  %v16476_v61 = vunpack.c.h.s8.bf16 %v1445_v10  ;;  %v1488_v10 = vld [vmem:[%s21272_s25 + $0x618] sm:$0xff] }
 0x20e   : > { %16437 = vmatpush1.bf16.msra.mxu0 %v16436_v62  ;;  %17157 = vmatpush1.bf16.msra.mxu1 %v17156_v41  ;;  %v17192_v62 = vunpack.c.l.s8.bf16 %v1447_v29  ;;  %v16474_v41 = vunpack.c.h.s8.bf16 %v1446_v34  ;;  %v1479_v34 = vld [vmem:[%s21272_s25 + $0x5d0] sm:$0xff] }
 0x20f   : > { %16439 = vmatprep.subr.bf16.mxu0 %v16438_v46  ;;  %17159 = vmatprep.subr.bf16.mxu1 %v17158_v54  ;;  %v17194_v46 = vunpack.c.h.s8.bf16 %v1448_v5  ;;  %v1454_v54 = vld [vmem:[%s21272_s25 + $0x508] sm:$0xff] }
 0x212   : > { %16441 = vmatpush1.bf16.msra.mxu0 %v16440_v15  ;;  %17161 = vmatpush1.bf16.msra.mxu1 %v17160_v1  ;;  %v17196_v15 = vunpack.c.h.s8.bf16 %v1447_v29  ;;  %v16478_v1 = vunpack.c.l.s8.bf16 %v1454_v54  ;;  %v7802_v29 = vcombine.high %v21974_v53, %v21974_v53 }
 0x213   : > { %16443 = vmatprep.subr.bf16.mxu0 %v16442_v51  ;;  %17163 = vmatprep.subr.bf16.mxu1 %v17162_v45  ;;  %v17198_v51 = vunpack.c.l.s8.bf16 %v1456_v12  ;;  %v1453_v45 = vld [vmem:[%s21272_s25 + $0x500] sm:$0xff] }
 0x214   : > { %v16480_v37 = vunpack.c.l.s8.bf16 %v1453_v45  ;;  %v16484_v24 = vunpack.c.h.s8.bf16 %v1453_v45  ;;  %v1494_v45 = vld [vmem:[%s21272_s25 + $0x648] sm:$0xff] }
 0x216   : > { %16445 = vmatpush1.bf16.msra.mxu0 %v16444_v6  ;;  %17165 = vmatpush1.bf16.msra.mxu1 %v17164_v39  ;;  %v17200_v6 = vunpack.c.l.s8.bf16 %v1455_v3  ;;  %v16482_v39 = vunpack.c.h.s8.bf16 %v1454_v54  ;;  %v1485_v54 = vld [vmem:[%s21272_s25 + $0x600] sm:$0xff] }
 0x217   : > { %16447 = vmatprep.subr.bf16.mxu0 %v16446_v48  ;;  %17167 = vmatprep.subr.bf16.mxu1 %v17166_v22  ;;  %v17202_v48 = vunpack.c.h.s8.bf16 %v1456_v12  ;;  %v1462_v22 = vld [vmem:[%s21272_s25 + $0x548] sm:$0xff]  ;;  %v1487_v12 = vld [vmem:[%s21272_s25 + $0x610] sm:$0xff] }
 0x219   : > { %8047 = vmatmul.mubr.f32.vlgmr.msra.gmra.mrb[0].mxu0 %v21934_v8  ;;  %8899 = vmatmul.mubr.f32.vlgmr.msra.gmra.mrb[0].mxu1 %v21934_v8 }
 0x21a   : > { %16449 = vmatpush1.bf16.msra.mxu0 %v16448_v63  ;;  %17169 = vmatpush1.bf16.msra.mxu1 %v17168_v23  ;;  %v17204_v63 = vunpack.c.h.s8.bf16 %v1455_v3  ;;  %v16486_v23 = vunpack.c.l.s8.bf16 %v1462_v22  ;;  %v1496_v3 = vld [vmem:[%s21272_s25 + $0x658] sm:$0xff] }
 0x21b   : > { %16451 = vmatprep.subr.bf16.mxu0 %v16450_v36  ;;  %17171 = vmatprep.subr.bf16.mxu1 %v17170_v26  ;;  %v17206_v36 = vunpack.c.l.s8.bf16 %v1464_v50  ;;  %v1461_v26 = vld [vmem:[%s21272_s25 + $0x540] sm:$0xff] }
 0x21c   : > { %8117 = vmatprep.mubr.f32.mxu0 %v21986_v32  ;;  %8969 = vmatprep.mubr.f32.mxu1 %v21986_v32  ;;  %v16488_v59 = vunpack.c.l.s8.bf16 %v1461_v26  ;;  %v16492_v9 = vunpack.c.h.s8.bf16 %v1461_v26  ;;  %v17242_v26 = vunpack.c.h.s8.bf16 %v1496_v3 }
 0x21e   : > { %16453 = vmatpush1.bf16.msra.mxu0 %v16452_v35  ;;  %17173 = vmatpush1.bf16.msra.mxu1 %v17172_v42  ;;  %v17208_v35 = vunpack.c.l.s8.bf16 %v1463_v57  ;;  %v16490_v42 = vunpack.c.h.s8.bf16 %v1462_v22  ;;  %v17238_v22 = vunpack.c.l.s8.bf16 %v1496_v3  ;;  %v1527_v3 = vld [vmem:[%s21272_s25 + $0x750] sm:$0xff] }
 0x21f   : > { %16455 = vmatprep.subr.bf16.mxu0 %v16454_v11  ;;  %17175 = vmatprep.subr.bf16.mxu1 %v17174_v19  ;;  %v17210_v11 = vunpack.c.h.s8.bf16 %v1464_v50  ;;  %v1470_v19 = vld [vmem:[%s21272_s25 + $0x588] sm:$0xff]  ;;  %v1493_v50 = vld [vmem:[%s21272_s25 + $0x640] sm:$0xff] }
 0x222   : > { %16457 = vmatpush1.bf16.msra.mxu0 %v16456_v27  ;;  %17177 = vmatpush1.bf16.msra.mxu1 %v17176_v28  ;;  %v17212_v27 = vunpack.c.h.s8.bf16 %v1463_v57  ;;  %v16494_v28 = vunpack.c.l.s8.bf16 %v1470_v19  ;;  %v1502_v57 = vld [vmem:[%s21272_s25 + $0x688] sm:$0xff] }
 0x223   : > { %16459 = vmatprep.subr.bf16.mxu0 %v16458_v56  ;;  %17179 = vmatprep.subr.bf16.mxu1 %v17178_v16  ;;  %v17214_v56 = vunpack.c.l.s8.bf16 %v1472_v25  ;;  %v1469_v16 = vld [vmem:[%s21272_s25 + $0x580] sm:$0xff] }
 0x224   : > { %v16496_v44 = vunpack.c.l.s8.bf16 %v1469_v16  ;;  %v16500_v31 = vunpack.c.h.s8.bf16 %v1469_v16 }
 0x226   : > { %16461 = vmatpush1.bf16.msra.mxu0 %v16460_v7  ;;  %17181 = vmatpush1.bf16.msra.mxu1 %v17180_v52  ;;  %v17216_v7 = vunpack.c.l.s8.bf16 %v1471_v4  ;;  %v16498_v52 = vunpack.c.h.s8.bf16 %v1470_v19 }
 0x227   : > { %16463 = vmatprep.subr.bf16.mxu0 %v16462_v60  ;;  %17183 = vmatprep.subr.bf16.mxu1 %v17182_v18  ;;  %v17218_v60 = vunpack.c.h.s8.bf16 %v1472_v25  ;;  %v1478_v18 = vld [vmem:[%s21272_s25 + $0x5c8] sm:$0xff]  ;;  %v1501_v25 = vld [vmem:[%s21272_s25 + $0x680] sm:$0xff] }
 0x22a   : > { %16465 = vmatpush1.bf16.msra.mxu0 %v16464_v20  ;;  %17185 = vmatpush1.bf16.msra.mxu1 %v17184_v33  ;;  %v17220_v20 = vunpack.c.h.s8.bf16 %v1471_v4  ;;  %v16502_v33 = vunpack.c.l.s8.bf16 %v1478_v18  ;;  %v1510_v4 = vld [vmem:[%s21272_s25 + $0x6c8] sm:$0xff] }
 0x22b   : > { %16467 = vmatprep.subr.bf16.mxu0 %v16466_v0  ;;  %17187 = vmatprep.subr.bf16.mxu1 %v17186_v38  ;;  %v17222_v0 = vunpack.c.l.s8.bf16 %v1480_v49  ;;  %v1477_v38 = vld [vmem:[%s21272_s25 + $0x5c0] sm:$0xff] }
 0x22c   : > { %v16504_v5 = vunpack.c.l.s8.bf16 %v1477_v38 }
 0x22e   : > { %16469 = vmatpush1.bf16.msra.mxu0 %v16468_v40  ;;  %17189 = vmatpush1.bf16.msra.mxu1 %v17188_v14  ;;  %v17224_v40 = vunpack.c.l.s8.bf16 %v1479_v34  ;;  %v16506_v14 = vunpack.c.h.s8.bf16 %v1478_v18 }
 0x22f   : > { %16471 = vmatprep.subr.bf16.mxu0 %v16470_v30  ;;  %17191 = vmatprep.subr.bf16.mxu1 %v17190_v2  ;;  %v17226_v30 = vunpack.c.h.s8.bf16 %v1480_v49  ;;  %v1486_v2 = vld [vmem:[%s21272_s25 + $0x608] sm:$0xff]  ;;  %v1509_v49 = vld [vmem:[%s21272_s25 + $0x6c0] sm:$0xff] }
 0x230   : > { %v16514_v53 = vunpack.c.h.s8.bf16 %v1486_v2 }
 0x232   : > { %16473 = vmatpush1.bf16.msra.mxu0 %v16472_v17  ;;  %17193 = vmatpush1.bf16.msra.mxu1 %v17192_v62  ;;  %v16508_v17 = vunpack.c.h.s8.bf16 %v1477_v38  ;;  %v17228_v62 = vunpack.c.h.s8.bf16 %v1479_v34  ;;  %v1518_v34 = vld [vmem:[%s21272_s25 + $0x708] sm:$0xff] }
 0x233   : > { %16475 = vmatprep.subr.bf16.mxu0 %v16474_v41  ;;  %17195 = vmatprep.subr.bf16.mxu1 %v17194_v46  ;;  %v16510_v41 = vunpack.c.l.s8.bf16 %v1486_v2  ;;  %v17230_v46 = vunpack.c.l.s8.bf16 %v1488_v10 }
 0x236   : > { %16477 = vmatpush1.bf16.msra.mxu0 %v16476_v61  ;;  %17197 = vmatpush1.bf16.msra.mxu1 %v17196_v15  ;;  %v22025_v61 = vrot.slane %v7802_v29, %v21899_v55  ;;  %v16512_v15 = vunpack.c.l.s8.bf16 %v1485_v54  ;;  %v1519_v29 = vld [vmem:[%s21272_s25 + $0x710] sm:$0xff] }
 0x237   : > { %16479 = vmatprep.subr.bf16.mxu0 %v16478_v1  ;;  %17199 = vmatprep.subr.bf16.mxu1 %v17198_v51  ;;  %v17232_v1 = vunpack.c.l.s8.bf16 %v1487_v12  ;;  %v17234_v51 = vunpack.c.h.s8.bf16 %v1488_v10  ;;  %v1517_v10 = vld [vmem:[%s21272_s25 + $0x700] sm:$0xff] }
 0x23a   : > { %16481 = vmatpush1.bf16.msra.mxu0 %v16480_v37  ;;  %17201 = vmatpush1.bf16.msra.mxu1 %v17200_v6  ;;  %v22031_v37 = vcombine.high %v22025_v61, %v22025_v61  ;;  %v16516_v6 = vunpack.c.h.s8.bf16 %v1485_v54  ;;  %v1526_v54 = vld [vmem:[%s21272_s25 + $0x748] sm:$0xff] }
 0x23b   : > { %16483 = vmatprep.subr.bf16.mxu0 %v16482_v39  ;;  %17203 = vmatprep.subr.bf16.mxu1 %v17202_v48  ;;  %v17236_v39 = vunpack.c.h.s8.bf16 %v1487_v12  ;;  %v16518_v48 = vunpack.c.l.s8.bf16 %v1494_v45  ;;  %v1528_v12 = vld [vmem:[%s21272_s25 + $0x758] sm:$0xff] }
 0x23e   : > { %16485 = vmatpush1.bf16.msra.mxu0 %v16484_v24  ;;  %17205 = vmatpush1.bf16.msra.mxu1 %v17204_v63  ;;  %v1495_v24 = vld [vmem:[%s21272_s25 + $0x650] sm:$0xff]  ;;  %v16520_v63 = vunpack.c.l.s8.bf16 %v1493_v50 }
 0x23f   : > { %16487 = vmatprep.subr.bf16.mxu0 %v16486_v23  ;;  %17207 = vmatprep.subr.bf16.mxu1 %v17206_v36  ;;  %v17240_v23 = vunpack.c.l.s8.bf16 %v1495_v24  ;;  %v16522_v36 = vunpack.c.h.s8.bf16 %v1494_v45  ;;  %v1525_v45 = vld [vmem:[%s21272_s25 + $0x740] sm:$0xff] }
 0x242   : > { %16489 = vmatpush1.bf16.msra.mxu0 %v16488_v59  ;;  %17209 = vmatpush1.bf16.msra.mxu1 %v17208_v35  ;;  %v1504_v59 = vld [vmem:[%s21272_s25 + $0x698] sm:$0xff]  ;;  %v16524_v35 = vunpack.c.h.s8.bf16 %v1493_v50  ;;  %v1534_v50 = vld [vmem:[%s21272_s25 + $0x788] sm:$0xff] }
 0x243   : > { %16491 = vmatprep.subr.bf16.mxu0 %v16490_v42  ;;  %17211 = vmatprep.subr.bf16.mxu1 %v17210_v11  ;;  %v17244_v42 = vunpack.c.h.s8.bf16 %v1495_v24  ;;  %v16526_v11 = vunpack.c.l.s8.bf16 %v1502_v57  ;;  %v17246_v19 = vunpack.c.l.s8.bf16 %v1504_v59  ;;  %v17250_v16 = vunpack.c.h.s8.bf16 %v1504_v59  ;;  %v1536_v24 = vld [vmem:[%s21272_s25 + $0x798] sm:$0xff]  ;;  %v1535_v59 = vld [vmem:[%s21272_s25 + $0x790] sm:$0xff] }
 0x246   : > { %16493 = vmatpush1.bf16.msra.mxu0 %v16492_v9  ;;  %17213 = vmatpush1.bf16.msra.mxu1 %v17212_v27  ;;  %v1503_v9 = vld [vmem:[%s21272_s25 + $0x690] sm:$0xff]  ;;  %v16528_v27 = vunpack.c.l.s8.bf16 %v1501_v25 }
 0x247   : > { %16495 = vmatprep.subr.bf16.mxu0 %v16494_v28  ;;  %17215 = vmatprep.subr.bf16.mxu1 %v17214_v56  ;;  %v17248_v28 = vunpack.c.l.s8.bf16 %v1503_v9  ;;  %v16530_v56 = vunpack.c.h.s8.bf16 %v1502_v57  ;;  %v1533_v57 = vld [vmem:[%s21272_s25 + $0x780] sm:$0xff] }
 0x24a   : > { %16497 = vmatpush1.bf16.msra.mxu0 %v16496_v44  ;;  %17217 = vmatpush1.bf16.msra.mxu1 %v17216_v7  ;;  %v1512_v44 = vld [vmem:[%s21272_s25 + $0x6d8] sm:$0xff]  ;;  %v16532_v7 = vunpack.c.h.s8.bf16 %v1501_v25  ;;  %v1542_v25 = vld [vmem:[%s21272_s25 + $0x7c8] sm:$0xff] }
 0x24b   : > { %16499 = vmatprep.subr.bf16.mxu0 %v16498_v52  ;;  %17219 = vmatprep.subr.bf16.mxu1 %v17218_v60  ;;  %v17252_v52 = vunpack.c.h.s8.bf16 %v1503_v9  ;;  %v16534_v60 = vunpack.c.l.s8.bf16 %v1510_v4  ;;  %v17254_v18 = vunpack.c.l.s8.bf16 %v1512_v44  ;;  %v17258_v38 = vunpack.c.h.s8.bf16 %v1512_v44  ;;  %v1544_v9 = vld [vmem:[%s21272_s25 + $0x7d8] sm:$0xff]  ;;  %v1543_v44 = vld [vmem:[%s21272_s25 + $0x7d0] sm:$0xff] }
 0x24e   : > { %16501 = vmatpush1.bf16.msra.mxu0 %v16500_v31  ;;  %17221 = vmatpush1.bf16.msra.mxu1 %v17220_v20  ;;  %v1511_v31 = vld [vmem:[%s21272_s25 + $0x6d0] sm:$0xff]  ;;  %v16536_v20 = vunpack.c.l.s8.bf16 %v1509_v49 }
 0x24f   : > { %16503 = vmatprep.subr.bf16.mxu0 %v16502_v33  ;;  %17223 = vmatprep.subr.bf16.mxu1 %v17222_v0  ;;  %v17256_v33 = vunpack.c.l.s8.bf16 %v1511_v31  ;;  %v16538_v0 = vunpack.c.h.s8.bf16 %v1510_v4  ;;  %v1541_v4 = vld [vmem:[%s21272_s25 + $0x7c0] sm:$0xff] }
 0x252   : > { %16505 = vmatpush1.bf16.msra.mxu0 %v16504_v5  ;;  %17225 = vmatpush1.bf16.msra.mxu1 %v17224_v40  ;;  %v1520_v5 = vld [vmem:[%s21272_s25 + $0x718] sm:$0xff]  ;;  %v16540_v40 = vunpack.c.h.s8.bf16 %v1509_v49  ;;  %v1550_v49 = vld [vmem:[%s21272_s25 + $0x808] sm:$0xff] }
 0x253   : > { %16507 = vmatprep.subr.bf16.mxu0 %v16506_v14  ;;  %17227 = vmatprep.subr.bf16.mxu1 %v17226_v30  ;;  %v17260_v14 = vunpack.c.h.s8.bf16 %v1511_v31  ;;  %v16542_v30 = vunpack.c.l.s8.bf16 %v1518_v34  ;;  %v17262_v2 = vunpack.c.l.s8.bf16 %v1520_v5  ;;  %v1552_v31 = vld [vmem:[%s21272_s25 + $0x818] sm:$0xff] }
 0x256   : > { %16509 = vmatpush1.bf16.msra.mxu0 %v16508_v17  ;;  %17229 = vmatpush1.bf16.msra.mxu1 %v17228_v62  ;;  %v16544_v17 = vunpack.c.l.s8.bf16 %v1517_v10  ;;  %v17264_v62 = vunpack.c.l.s8.bf16 %v1519_v29 }
 0x257   : > { %16511 = vmatprep.subr.bf16.mxu0 %v16510_v41  ;;  %17231 = vmatprep.subr.bf16.mxu1 %v17230_v46  ;;  %v16546_v41 = vunpack.c.h.s8.bf16 %v1518_v34  ;;  %v17266_v46 = vunpack.c.h.s8.bf16 %v1520_v5  ;;  %v17294_v34 = vunpack.c.l.s8.bf16 %v1552_v31  ;;  %v1549_v5 = vld [vmem:[%s21272_s25 + $0x800] sm:$0xff] }
 0x259   : > { %8118 = vmatmul.mubr.f32.vlgmr.msra.gmra.mrb[0].mxu0 %v21980_v47  ;;  %8970 = vmatmul.mubr.f32.vlgmr.msra.gmra.mrb[0].mxu1 %v21980_v47 }
 0x25a   : > { %16513 = vmatpush1.bf16.msra.mxu0 %v16512_v15  ;;  %17233 = vmatpush1.bf16.msra.mxu1 %v17232_v1  ;;  %v16548_v15 = vunpack.c.h.s8.bf16 %v1517_v10  ;;  %v17268_v1 = vunpack.c.h.s8.bf16 %v1519_v29  ;;  %v16578_v10 = vunpack.c.h.s8.bf16 %v1550_v49  ;;  %v17298_v29 = vunpack.c.h.s8.bf16 %v1552_v31 }
 0x25b   : > { %16515 = vmatprep.subr.bf16.mxu0 %v16514_v53  ;;  %17235 = vmatprep.subr.bf16.mxu1 %v17234_v51  ;;  %v16550_v53 = vunpack.c.l.s8.bf16 %v1526_v54  ;;  %v17270_v51 = vunpack.c.l.s8.bf16 %v1528_v12 }
 0x25c   : > { %8188 = vmatprep.mubr.f32.mxu0 %v22031_v37  ;;  %9040 = vmatprep.mubr.f32.mxu1 %v22031_v37 }
 0x25e   : > { %16517 = vmatpush1.bf16.msra.mxu0 %v16516_v6  ;;  %17237 = vmatpush1.bf16.msra.mxu1 %v17236_v39  ;;  %v16552_v6 = vunpack.c.l.s8.bf16 %v1525_v45  ;;  %v17272_v39 = vunpack.c.l.s8.bf16 %v1527_v3 }
 0x25f   : > { %16519 = vmatprep.subr.bf16.mxu0 %v16518_v48  ;;  %17239 = vmatprep.subr.bf16.mxu1 %v17238_v22  ;;  %v16554_v48 = vunpack.c.h.s8.bf16 %v1526_v54  ;;  %v17274_v22 = vunpack.c.h.s8.bf16 %v1528_v12 }
 0x262   : > { %16521 = vmatpush1.bf16.msra.mxu0 %v16520_v63  ;;  %17241 = vmatpush1.bf16.msra.mxu1 %v17240_v23  ;;  %v16556_v63 = vunpack.c.h.s8.bf16 %v1525_v45  ;;  %v17276_v23 = vunpack.c.h.s8.bf16 %v1527_v3 }
 0x263   : > { %16523 = vmatprep.subr.bf16.mxu0 %v16522_v36  ;;  %17243 = vmatprep.subr.bf16.mxu1 %v17242_v26  ;;  %v16558_v36 = vunpack.c.l.s8.bf16 %v1534_v50  ;;  %v17278_v26 = vunpack.c.l.s8.bf16 %v1536_v24 }
 0x266   : > { %16525 = vmatpush1.bf16.msra.mxu0 %v16524_v35  ;;  %17245 = vmatpush1.bf16.msra.mxu1 %v17244_v42  ;;  %v16560_v35 = vunpack.c.l.s8.bf16 %v1533_v57  ;;  %v17280_v42 = vunpack.c.l.s8.bf16 %v1535_v59 }
 0x267   : > { %16527 = vmatprep.subr.bf16.mxu0 %v16526_v11  ;;  %17247 = vmatprep.subr.bf16.mxu1 %v17246_v19  ;;  %v16562_v11 = vunpack.c.h.s8.bf16 %v1534_v50  ;;  %v17282_v19 = vunpack.c.h.s8.bf16 %v1536_v24 }
 0x26a   : > { %16529 = vmatpush1.bf16.msra.mxu0 %v16528_v27  ;;  %17249 = vmatpush1.bf16.msra.mxu1 %v17248_v28  ;;  %v16564_v27 = vunpack.c.h.s8.bf16 %v1533_v57  ;;  %v17284_v28 = vunpack.c.h.s8.bf16 %v1535_v59 }
 0x26b   : > { %16531 = vmatprep.subr.bf16.mxu0 %v16530_v56  ;;  %17251 = vmatprep.subr.bf16.mxu1 %v17250_v16  ;;  %v16566_v56 = vunpack.c.l.s8.bf16 %v1542_v25  ;;  %v17286_v16 = vunpack.c.l.s8.bf16 %v1544_v9 }
 0x26e   : > { %16533 = vmatpush1.bf16.msra.mxu0 %v16532_v7  ;;  %17253 = vmatpush1.bf16.msra.mxu1 %v17252_v52  ;;  %v16568_v7 = vunpack.c.l.s8.bf16 %v1541_v4  ;;  %v17288_v52 = vunpack.c.l.s8.bf16 %v1543_v44 }
 0x26f   : > { %16535 = vmatprep.subr.bf16.mxu0 %v16534_v60  ;;  %17255 = vmatprep.subr.bf16.mxu1 %v17254_v18  ;;  %v16570_v60 = vunpack.c.h.s8.bf16 %v1542_v25  ;;  %v17290_v18 = vunpack.c.h.s8.bf16 %v1544_v9 }
 0x272   : > { %16537 = vmatpush1.bf16.msra.mxu0 %v16536_v20  ;;  %17257 = vmatpush1.bf16.msra.mxu1 %v17256_v33  ;;  %v22065_v20 = vld [vmem:[#allocation2 + $0x10] sm:$0xff]  ;;  %v16572_v33 = vunpack.c.h.s8.bf16 %v1541_v4 }
 0x273   : > { %16539 = vmatprep.subr.bf16.mxu0 %v16538_v0  ;;  %17259 = vmatprep.subr.bf16.mxu1 %v17258_v38  ;;  %v17292_v0 = vunpack.c.h.s8.bf16 %v1543_v44  ;;  %v16574_v38 = vunpack.c.l.s8.bf16 %v1550_v49 }
 0x276   : > { %16541 = vmatpush1.bf16.msra.mxu0 %v16540_v40  ;;  %17261 = vmatpush1.bf16.msra.mxu1 %v17260_v14  ;;  %v1551_v40 = vld [vmem:[%s21272_s25 + $0x810] sm:$0xff]  ;;  %v22071_v14 = vrot.slane %v22065_v20, %v21899_v55 }
 0x277   : > { %16543 = vmatprep.subr.bf16.mxu0 %v16542_v30  ;;  %17263 = vmatprep.subr.bf16.mxu1 %v17262_v2  ;;  %v16576_v30 = vunpack.c.l.s8.bf16 %v1549_v5  ;;  %v17296_v2 = vunpack.c.l.s8.bf16 %v1551_v40  ;;  %v17300_v54 = vunpack.c.h.s8.bf16 %v1551_v40 }
 0x27a   : > { %16545 = vmatpush1.bf16.msra.mxu0 %v16544_v17  ;;  %17265 = vmatpush1.bf16.msra.mxu1 %v17264_v62  ;;  %v1558_v17 = vld [vmem:[%s21272_s25 + $0x848] sm:$0xff]  ;;  %v1560_v62 = vld [vmem:[%s21272_s25 + $0x858] sm:$0xff] }
 0x27b   : > { %16547 = vmatprep.subr.bf16.mxu0 %v16546_v41  ;;  %17267 = vmatprep.subr.bf16.mxu1 %v17266_v46  ;;  %v22077_v41 = vcombine.high %v22071_v14, %v22071_v14  ;;  %v16580_v46 = vunpack.c.h.s8.bf16 %v1549_v5  ;;  %v16582_v12 = vunpack.c.l.s8.bf16 %v1558_v17  ;;  %v16586_v3 = vunpack.c.h.s8.bf16 %v1558_v17 }
 0x27e   : > { %16549 = vmatpush1.bf16.msra.mxu0 %v16548_v15  ;;  %17269 = vmatpush1.bf16.msra.mxu1 %v17268_v1  ;;  %v17302_v15 = vunpack.c.l.s8.bf16 %v1560_v62  ;;  %v1557_v1 = vld [vmem:[%s21272_s25 + $0x840] sm:$0xff] }
 0x27f   : > { %16551 = vmatprep.subr.bf16.mxu0 %v16550_v53  ;;  %17271 = vmatprep.subr.bf16.mxu1 %v17270_v51  ;;  %v1559_v53 = vld [vmem:[%s21272_s25 + $0x850] sm:$0xff]  ;;  %v16584_v51 = vunpack.c.l.s8.bf16 %v1557_v1 }
 0x280   : > { %v17304_v45 = vunpack.c.l.s8.bf16 %v1559_v53  ;;  %v17308_v50 = vunpack.c.h.s8.bf16 %v1559_v53 }
 0x282   : > { %16553 = vmatpush1.bf16.msra.mxu0 %v16552_v6  ;;  %17273 = vmatpush1.bf16.msra.mxu1 %v17272_v39  ;;  %v17306_v6 = vunpack.c.h.s8.bf16 %v1560_v62  ;;  %v1566_v39 = vld [vmem:[%s21272_s25 + $0x888] sm:$0xff] }
 0x283   : > { %16555 = vmatprep.subr.bf16.mxu0 %v16554_v48  ;;  %17275 = vmatprep.subr.bf16.mxu1 %v17274_v22  ;;  %v1568_v48 = vld [vmem:[%s21272_s25 + $0x898] sm:$0xff]  ;;  %v16588_v22 = vunpack.c.h.s8.bf16 %v1557_v1  ;;  %v16590_v24 = vunpack.c.l.s8.bf16 %v1566_v39  ;;  %v16594_v59 = vunpack.c.h.s8.bf16 %v1566_v39 }
 0x286   : > { %16557 = vmatpush1.bf16.msra.mxu0 %v16556_v63  ;;  %17277 = vmatpush1.bf16.msra.mxu1 %v17276_v23  ;;  %v17310_v63 = vunpack.c.l.s8.bf16 %v1568_v48  ;;  %v1565_v23 = vld [vmem:[%s21272_s25 + $0x880] sm:$0xff] }
 0x287   : > { %16559 = vmatprep.subr.bf16.mxu0 %v16558_v36  ;;  %17279 = vmatprep.subr.bf16.mxu1 %v17278_v26  ;;  %v1567_v36 = vld [vmem:[%s21272_s25 + $0x890] sm:$0xff]  ;;  %v16592_v26 = vunpack.c.l.s8.bf16 %v1565_v23 }
 0x288   : > { %v17312_v57 = vunpack.c.l.s8.bf16 %v1567_v36  ;;  %v17316_v25 = vunpack.c.h.s8.bf16 %v1567_v36 }
 0x28a   : > { %16561 = vmatpush1.bf16.msra.mxu0 %v16560_v35  ;;  %17281 = vmatpush1.bf16.msra.mxu1 %v17280_v42  ;;  %v17314_v35 = vunpack.c.h.s8.bf16 %v1568_v48  ;;  %v1574_v42 = vld [vmem:[%s21272_s25 + $0x8c8] sm:$0xff] }
 0x28b   : > { %16563 = vmatprep.subr.bf16.mxu0 %v16562_v11  ;;  %17283 = vmatprep.subr.bf16.mxu1 %v17282_v19  ;;  %v1576_v11 = vld [vmem:[%s21272_s25 + $0x8d8] sm:$0xff]  ;;  %v16596_v19 = vunpack.c.h.s8.bf16 %v1565_v23  ;;  %v16598_v9 = vunpack.c.l.s8.bf16 %v1574_v42  ;;  %v16602_v44 = vunpack.c.h.s8.bf16 %v1574_v42 }
 0x28e   : > { %16565 = vmatpush1.bf16.msra.mxu0 %v16564_v27  ;;  %17285 = vmatpush1.bf16.msra.mxu1 %v17284_v28  ;;  %v17318_v27 = vunpack.c.l.s8.bf16 %v1576_v11  ;;  %v1573_v28 = vld [vmem:[%s21272_s25 + $0x8c0] sm:$0xff] }
 0x28f   : > { %16567 = vmatprep.subr.bf16.mxu0 %v16566_v56  ;;  %17287 = vmatprep.subr.bf16.mxu1 %v17286_v16  ;;  %v1575_v56 = vld [vmem:[%s21272_s25 + $0x8d0] sm:$0xff]  ;;  %v16600_v16 = vunpack.c.l.s8.bf16 %v1573_v28 }
 0x290   : > { %v17320_v4 = vunpack.c.l.s8.bf16 %v1575_v56  ;;  %v17324_v49 = vunpack.c.h.s8.bf16 %v1575_v56 }
 0x292   : > { %16569 = vmatpush1.bf16.msra.mxu0 %v16568_v7  ;;  %17289 = vmatpush1.bf16.msra.mxu1 %v17288_v52  ;;  %v17322_v7 = vunpack.c.h.s8.bf16 %v1576_v11  ;;  %v1582_v52 = vld [vmem:[%s21272_s25 + $0x908] sm:$0xff] }
 0x293   : > { %16571 = vmatprep.subr.bf16.mxu0 %v16570_v60  ;;  %17291 = vmatprep.subr.bf16.mxu1 %v17290_v18  ;;  %v1584_v60 = vld [vmem:[%s21272_s25 + $0x918] sm:$0xff]  ;;  %v16604_v18 = vunpack.c.h.s8.bf16 %v1573_v28  ;;  %v16606_v31 = vunpack.c.l.s8.bf16 %v1582_v52  ;;  %v16610_v40 = vunpack.c.h.s8.bf16 %v1582_v52 }
 0x296   : > { %16573 = vmatpush1.bf16.msra.mxu0 %v16572_v33  ;;  %17293 = vmatpush1.bf16.msra.mxu1 %v17292_v0  ;;  %v17326_v33 = vunpack.c.l.s8.bf16 %v1584_v60  ;;  %v1581_v0 = vld [vmem:[%s21272_s25 + $0x900] sm:$0xff] }
 0x297   : > { %16575 = vmatprep.subr.bf16.mxu0 %v16574_v38  ;;  %17295 = vmatprep.subr.bf16.mxu1 %v17294_v34  ;;  %v1583_v38 = vld [vmem:[%s21272_s25 + $0x910] sm:$0xff]  ;;  %v16608_v34 = vunpack.c.l.s8.bf16 %v1581_v0 }
 0x298   : > { %v17328_v5 = vunpack.c.l.s8.bf16 %v1583_v38  ;;  %v17332_v17 = vunpack.c.h.s8.bf16 %v1583_v38 }
 0x299   : > { %8189 = vmatmul.mubr.f32.vlgmr.msra.gmra.mrb[0].mxu0 %v22025_v61  ;;  %9041 = vmatmul.mubr.f32.vlgmr.msra.gmra.mrb[0].mxu1 %v22025_v61 }
 0x29a   : > { %16577 = vmatpush1.bf16.msra.mxu0 %v16576_v30  ;;  %17297 = vmatpush1.bf16.msra.mxu1 %v17296_v2  ;;  %v17330_v30 = vunpack.c.h.s8.bf16 %v1584_v60  ;;  %v1590_v2 = vld [vmem:[%s21272_s25 + $0x948] sm:$0xff] }
 0x29b   : > { %16579 = vmatprep.subr.bf16.mxu0 %v16578_v10  ;;  %17299 = vmatprep.subr.bf16.mxu1 %v17298_v29  ;;  %v1592_v10 = vld [vmem:[%s21272_s25 + $0x958] sm:$0xff]  ;;  %v16612_v29 = vunpack.c.h.s8.bf16 %v1581_v0  ;;  %v16614_v62 = vunpack.c.l.s8.bf16 %v1590_v2  ;;  %v16618_v53 = vunpack.c.h.s8.bf16 %v1590_v2 }
 0x29c   : > { %8259 = vmatprep.mubr.f32.mxu0 %v22077_v41  ;;  %9111 = vmatprep.mubr.f32.mxu1 %v22077_v41 }
 0x29e   : > { %16581 = vmatpush1.bf16.msra.mxu0 %v16580_v46  ;;  %17301 = vmatpush1.bf16.msra.mxu1 %v17300_v54  ;;  %v17334_v46 = vunpack.c.l.s8.bf16 %v1592_v10  ;;  %v1589_v54 = vld [vmem:[%s21272_s25 + $0x940] sm:$0xff] }
 0x29f   : > { %16583 = vmatprep.subr.bf16.mxu0 %v16582_v12  ;;  %17303 = vmatprep.subr.bf16.mxu1 %v17302_v15  ;;  %v1591_v12 = vld [vmem:[%s21272_s25 + $0x950] sm:$0xff]  ;;  %v16616_v15 = vunpack.c.l.s8.bf16 %v1589_v54 }
 0x2a0   : > { %v17336_v1 = vunpack.c.l.s8.bf16 %v1591_v12  ;;  %v17340_v39 = vunpack.c.h.s8.bf16 %v1591_v12 }
 0x2a2   : > { %16585 = vmatpush1.bf16.msra.mxu0 %v16584_v51  ;;  %17305 = vmatpush1.bf16.msra.mxu1 %v17304_v45  ;;  %v17338_v51 = vunpack.c.h.s8.bf16 %v1592_v10  ;;  %v1598_v45 = vld [vmem:[%s21272_s25 + $0x988] sm:$0xff] }
 0x2a3   : > { %16587 = vmatprep.subr.bf16.mxu0 %v16586_v3  ;;  %17307 = vmatprep.subr.bf16.mxu1 %v17306_v6  ;;  %v1600_v3 = vld [vmem:[%s21272_s25 + $0x998] sm:$0xff]  ;;  %v16620_v6 = vunpack.c.h.s8.bf16 %v1589_v54  ;;  %v16622_v48 = vunpack.c.l.s8.bf16 %v1598_v45  ;;  %v16626_v36 = vunpack.c.h.s8.bf16 %v1598_v45  ;;  %v1623_v54 = vld [vmem:[%s21272_s25 + $0xa50] sm:$0xff] }
 0x2a4   : > { %v1632_v45 = vld [vmem:[%s21272_s25 + $0xa98] sm:$0xff] }
 0x2a6   : > { %16589 = vmatpush1.bf16.msra.mxu0 %v16588_v22  ;;  %17309 = vmatpush1.bf16.msra.mxu1 %v17308_v50  ;;  %v17342_v22 = vunpack.c.l.s8.bf16 %v1600_v3  ;;  %v1597_v50 = vld [vmem:[%s21272_s25 + $0x980] sm:$0xff] }
 0x2a7   : > { %16591 = vmatprep.subr.bf16.mxu0 %v16590_v24  ;;  %17311 = vmatprep.subr.bf16.mxu1 %v17310_v63  ;;  %v1599_v24 = vld [vmem:[%s21272_s25 + $0x990] sm:$0xff]  ;;  %v16624_v63 = vunpack.c.l.s8.bf16 %v1597_v50 }
 0x2a8   : > { %v17344_v23 = vunpack.c.l.s8.bf16 %v1599_v24  ;;  %v17348_v42 = vunpack.c.h.s8.bf16 %v1599_v24 }
 0x2aa   : > { %16593 = vmatpush1.bf16.msra.mxu0 %v16592_v26  ;;  %17313 = vmatpush1.bf16.msra.mxu1 %v17312_v57  ;;  %v17346_v26 = vunpack.c.h.s8.bf16 %v1600_v3  ;;  %v1606_v57 = vld [vmem:[%s21272_s25 + $0x9c8] sm:$0xff] }
 0x2ab   : > { %16595 = vmatprep.subr.bf16.mxu0 %v16594_v59  ;;  %17315 = vmatprep.subr.bf16.mxu1 %v17314_v35  ;;  %v1608_v59 = vld [vmem:[%s21272_s25 + $0x9d8] sm:$0xff]  ;;  %v16628_v35 = vunpack.c.h.s8.bf16 %v1597_v50  ;;  %v16630_v11 = vunpack.c.l.s8.bf16 %v1606_v57  ;;  %v16634_v56 = vunpack.c.h.s8.bf16 %v1606_v57  ;;  %v1631_v50 = vld [vmem:[%s21272_s25 + $0xa90] sm:$0xff] }
 0x2ac   : > { %v1640_v57 = vld [vmem:[%s21272_s25 + $0xad8] sm:$0xff] }
 0x2ae   : > { %16597 = vmatpush1.bf16.msra.mxu0 %v16596_v19  ;;  %17317 = vmatpush1.bf16.msra.mxu1 %v17316_v25  ;;  %v17350_v19 = vunpack.c.l.s8.bf16 %v1608_v59  ;;  %v1605_v25 = vld [vmem:[%s21272_s25 + $0x9c0] sm:$0xff] }
 0x2af   : > { %16599 = vmatprep.subr.bf16.mxu0 %v16598_v9  ;;  %17319 = vmatprep.subr.bf16.mxu1 %v17318_v27  ;;  %v1607_v9 = vld [vmem:[%s21272_s25 + $0x9d0] sm:$0xff]  ;;  %v16632_v27 = vunpack.c.l.s8.bf16 %v1605_v25  ;;  %v16636_v52 = vunpack.c.h.s8.bf16 %v1605_v25 }
 0x2b0   : > { %v17352_v28 = vunpack.c.l.s8.bf16 %v1607_v9  ;;  %v17356_v60 = vunpack.c.h.s8.bf16 %v1607_v9  ;;  %v1639_v25 = vld [vmem:[%s21272_s25 + $0xad0] sm:$0xff] }
 0x2b2   : > { %16601 = vmatpush1.bf16.msra.mxu0 %v16600_v16  ;;  %17321 = vmatpush1.bf16.msra.mxu1 %v17320_v4  ;;  %v17354_v16 = vunpack.c.h.s8.bf16 %v1608_v59  ;;  %v1614_v4 = vld [vmem:[%s21272_s25 + $0xa08] sm:$0xff] }
 0x2b3   : > { %16603 = vmatprep.subr.bf16.mxu0 %v16602_v44  ;;  %17323 = vmatprep.subr.bf16.mxu1 %v17322_v7  ;;  %v1616_v44 = vld [vmem:[%s21272_s25 + $0xa18] sm:$0xff]  ;;  %v7819_v7 = vcombine.high %v22065_v20, %v22065_v20  ;;  %v16642_v20 = vunpack.c.h.s8.bf16 %v1614_v4 }
 0x2b5   : > { %v22116_v0 = vrot.slane %v7819_v7, %v21899_v55  ;;  %v17388_v7 = vunpack.c.h.s8.bf16 %v1639_v25 }
 0x2b6   : > { %16605 = vmatpush1.bf16.msra.mxu0 %v16604_v18  ;;  %17325 = vmatpush1.bf16.msra.mxu1 %v17324_v49  ;;  %v16638_v18 = vunpack.c.l.s8.bf16 %v1614_v4  ;;  %v17358_v49 = vunpack.c.l.s8.bf16 %v1616_v44  ;;  %v1648_v4 = vld [vmem:[%s21272_s25 + $0xb18] sm:$0xff] }
 0x2b7   : > { %16607 = vmatprep.subr.bf16.mxu0 %v16606_v31  ;;  %17327 = vmatprep.subr.bf16.mxu1 %v17326_v33  ;;  %v1613_v31 = vld [vmem:[%s21272_s25 + $0xa00] sm:$0xff]  ;;  %v1615_v33 = vld [vmem:[%s21272_s25 + $0xa10] sm:$0xff]  ;;  %v22122_v2 = vcombine.high %v22116_v0, %v22116_v0 }
 0x2b8   : > { %v16640_v38 = vunpack.c.l.s8.bf16 %v1613_v31  ;;  %v16644_v10 = vunpack.c.h.s8.bf16 %v1613_v31 }
 0x2ba   : > { %16609 = vmatpush1.bf16.msra.mxu0 %v16608_v34  ;;  %17329 = vmatpush1.bf16.msra.mxu1 %v17328_v5  ;;  %v17360_v34 = vunpack.c.l.s8.bf16 %v1615_v33  ;;  %v17362_v5 = vunpack.c.h.s8.bf16 %v1616_v44 }
 0x2bb   : > { %16611 = vmatprep.subr.bf16.mxu0 %v16610_v40  ;;  %17331 = vmatprep.subr.bf16.mxu1 %v17330_v30  ;;  %v1622_v40 = vld [vmem:[%s21272_s25 + $0xa48] sm:$0xff]  ;;  %v1624_v30 = vld [vmem:[%s21272_s25 + $0xa58] sm:$0xff] }
 0x2be   : > { %16613 = vmatpush1.bf16.msra.mxu0 %v16612_v29  ;;  %17333 = vmatpush1.bf16.msra.mxu1 %v17332_v17  ;;  %v17364_v29 = vunpack.c.h.s8.bf16 %v1615_v33  ;;  %v16646_v17 = vunpack.c.l.s8.bf16 %v1622_v40 }
 0x2bf   : > { %16615 = vmatprep.subr.bf16.mxu0 %v16614_v62  ;;  %17335 = vmatprep.subr.bf16.mxu1 %v17334_v46  ;;  %v17366_v62 = vunpack.c.l.s8.bf16 %v1624_v30  ;;  %v1621_v46 = vld [vmem:[%s21272_s25 + $0xa40] sm:$0xff] }
 0x2c0   : > { %v16648_v12 = vunpack.c.l.s8.bf16 %v1621_v46  ;;  %v16652_v3 = vunpack.c.h.s8.bf16 %v1621_v46 }
 0x2c2   : > { %16617 = vmatpush1.bf16.msra.mxu0 %v16616_v15  ;;  %17337 = vmatpush1.bf16.msra.mxu1 %v17336_v1  ;;  %v17368_v15 = vunpack.c.l.s8.bf16 %v1623_v54  ;;  %v16650_v1 = vunpack.c.h.s8.bf16 %v1622_v40 }
 0x2c3   : > { %16619 = vmatprep.subr.bf16.mxu0 %v16618_v53  ;;  %17339 = vmatprep.subr.bf16.mxu1 %v17338_v51  ;;  %v17370_v53 = vunpack.c.h.s8.bf16 %v1624_v30  ;;  %v1630_v51 = vld [vmem:[%s21272_s25 + $0xa88] sm:$0xff] }
 0x2c6   : > { %16621 = vmatpush1.bf16.msra.mxu0 %v16620_v6  ;;  %17341 = vmatpush1.bf16.msra.mxu1 %v17340_v39  ;;  %v17372_v6 = vunpack.c.h.s8.bf16 %v1623_v54  ;;  %v16654_v39 = vunpack.c.l.s8.bf16 %v1630_v51 }
 0x2c7   : > { %16623 = vmatprep.subr.bf16.mxu0 %v16622_v48  ;;  %17343 = vmatprep.subr.bf16.mxu1 %v17342_v22  ;;  %v17374_v48 = vunpack.c.l.s8.bf16 %v1632_v45  ;;  %v1629_v22 = vld [vmem:[%s21272_s25 + $0xa80] sm:$0xff] }
 0x2c8   : > { %v16656_v24 = vunpack.c.l.s8.bf16 %v1629_v22  ;;  %v16660_v59 = vunpack.c.h.s8.bf16 %v1629_v22 }
 0x2ca   : > { %16625 = vmatpush1.bf16.msra.mxu0 %v16624_v63  ;;  %17345 = vmatpush1.bf16.msra.mxu1 %v17344_v23  ;;  %v17376_v63 = vunpack.c.l.s8.bf16 %v1631_v50  ;;  %v16658_v23 = vunpack.c.h.s8.bf16 %v1630_v51 }
 0x2cb   : > { %16627 = vmatprep.subr.bf16.mxu0 %v16626_v36  ;;  %17347 = vmatprep.subr.bf16.mxu1 %v17346_v26  ;;  %v17378_v36 = vunpack.c.h.s8.bf16 %v1632_v45  ;;  %v1638_v26 = vld [vmem:[%s21272_s25 + $0xac8] sm:$0xff] }
 0x2ce   : > { %16629 = vmatpush1.bf16.msra.mxu0 %v16628_v35  ;;  %17349 = vmatpush1.bf16.msra.mxu1 %v17348_v42  ;;  %v17380_v35 = vunpack.c.h.s8.bf16 %v1631_v50  ;;  %v16662_v42 = vunpack.c.l.s8.bf16 %v1638_v26 }
 0x2cf   : > { %16631 = vmatprep.subr.bf16.mxu0 %v16630_v11  ;;  %17351 = vmatprep.subr.bf16.mxu1 %v17350_v19  ;;  %v17382_v11 = vunpack.c.l.s8.bf16 %v1640_v57  ;;  %v1637_v19 = vld [vmem:[%s21272_s25 + $0xac0] sm:$0xff] }
 0x2d0   : > { %v16664_v9 = vunpack.c.l.s8.bf16 %v1637_v19  ;;  %v16668_v44 = vunpack.c.h.s8.bf16 %v1637_v19 }
 0x2d2   : > { %16633 = vmatpush1.bf16.msra.mxu0 %v16632_v27  ;;  %17353 = vmatpush1.bf16.msra.mxu1 %v17352_v28  ;;  %v17384_v27 = vunpack.c.l.s8.bf16 %v1639_v25  ;;  %v16666_v28 = vunpack.c.h.s8.bf16 %v1638_v26 }
 0x2d3   : > { %16635 = vmatprep.subr.bf16.mxu0 %v16634_v56  ;;  %17355 = vmatprep.subr.bf16.mxu1 %v17354_v16  ;;  %v17386_v56 = vunpack.c.h.s8.bf16 %v1640_v57  ;;  %v1646_v16 = vld [vmem:[%s21272_s25 + $0xb08] sm:$0xff] }
 0x2d6   : > { %16637 = vmatpush1.bf16.msra.mxu0 %v16636_v52  ;;  %17357 = vmatpush1.bf16.msra.mxu1 %v17356_v60  ;;  %v16670_v52 = vunpack.c.l.s8.bf16 %v1646_v16  ;;  %v17390_v60 = vunpack.c.l.s8.bf16 %v1648_v4 }
 0x2d7   : > { %16639 = vmatprep.subr.bf16.mxu0 %v16638_v18  ;;  %17359 = vmatprep.subr.bf16.mxu1 %v17358_v49  ;;  %v1645_v18 = vld [vmem:[%s21272_s25 + $0xb00] sm:$0xff]  ;;  %v1647_v49 = vld [vmem:[%s21272_s25 + $0xb10] sm:$0xff] }
 0x2d8   : > { %v16672_v31 = vunpack.c.l.s8.bf16 %v1645_v18  ;;  %v17392_v33 = vunpack.c.l.s8.bf16 %v1647_v49  ;;  %v16676_v40 = vunpack.c.h.s8.bf16 %v1645_v18  ;;  %v17396_v30 = vunpack.c.h.s8.bf16 %v1647_v49  ;;  %v1679_v18 = vld [vmem:[%s21272_s25 + $0xc10] sm:$0xff] }
 0x2d9   : > { %8260 = vmatmul.mubr.f32.vlgmr.msra.gmra.mrb[0].mxu0 %v22071_v14  ;;  %9112 = vmatmul.mubr.f32.vlgmr.msra.gmra.mrb[0].mxu1 %v22071_v14 }
 0x2da   : > { %16641 = vmatpush1.bf16.msra.mxu0 %v16640_v38  ;;  %17361 = vmatpush1.bf16.msra.mxu1 %v17360_v34  ;;  %v16674_v38 = vunpack.c.h.s8.bf16 %v1646_v16  ;;  %v17394_v34 = vunpack.c.h.s8.bf16 %v1648_v4  ;;  %v22156_v16 = vld [vmem:[#allocation2 + $0x18] sm:$0xff] }
 0x2db   : > { %16643 = vmatprep.subr.bf16.mxu0 %v16642_v20  ;;  %17363 = vmatprep.subr.bf16.mxu1 %v17362_v5  ;;  %v1654_v20 = vld [vmem:[%s21272_s25 + $0xb48] sm:$0xff]  ;;  %v1656_v5 = vld [vmem:[%s21272_s25 + $0xb58] sm:$0xff]  ;;  %v22162_v49 = vrot.slane %v22156_v16, %v21899_v55 }
 0x2dc   : > { %8330 = vmatprep.mubr.f32.mxu0 %v22122_v2  ;;  %9182 = vmatprep.mubr.f32.mxu1 %v22122_v2 }
 0x2de   : > { %16645 = vmatpush1.bf16.msra.mxu0 %v16644_v10  ;;  %17365 = vmatpush1.bf16.msra.mxu1 %v17364_v29  ;;  %v16678_v10 = vunpack.c.l.s8.bf16 %v1654_v20  ;;  %v17398_v29 = vunpack.c.l.s8.bf16 %v1656_v5 }
 0x2df   : > { %16647 = vmatprep.subr.bf16.mxu0 %v16646_v17  ;;  %17367 = vmatprep.subr.bf16.mxu1 %v17366_v62  ;;  %v1653_v17 = vld [vmem:[%s21272_s25 + $0xb40] sm:$0xff]  ;;  %v1655_v62 = vld [vmem:[%s21272_s25 + $0xb50] sm:$0xff] }
 0x2e0   : > { %v16680_v46 = vunpack.c.l.s8.bf16 %v1653_v17  ;;  %v17400_v54 = vunpack.c.l.s8.bf16 %v1655_v62  ;;  %v16684_v51 = vunpack.c.h.s8.bf16 %v1653_v17  ;;  %v17404_v45 = vunpack.c.h.s8.bf16 %v1655_v62  ;;  %v1685_v62 = vld [vmem:[%s21272_s25 + $0xc40] sm:$0xff] }
 0x2e2   : > { %16649 = vmatpush1.bf16.msra.mxu0 %v16648_v12  ;;  %17369 = vmatpush1.bf16.msra.mxu1 %v17368_v15  ;;  %v16682_v12 = vunpack.c.h.s8.bf16 %v1654_v20  ;;  %v17402_v15 = vunpack.c.h.s8.bf16 %v1656_v5  ;;  %v1686_v20 = vld [vmem:[%s21272_s25 + $0xc48] sm:$0xff]  ;;  %v1688_v5 = vld [vmem:[%s21272_s25 + $0xc58] sm:$0xff] }
 0x2e3   : > { %16651 = vmatprep.subr.bf16.mxu0 %v16650_v1  ;;  %17371 = vmatprep.subr.bf16.mxu1 %v17370_v53  ;;  %v1662_v1 = vld [vmem:[%s21272_s25 + $0xb88] sm:$0xff]  ;;  %v1664_v53 = vld [vmem:[%s21272_s25 + $0xb98] sm:$0xff]  ;;  %v17430_v17 = vunpack.c.l.s8.bf16 %v1688_v5 }
 0x2e6   : > { %16653 = vmatpush1.bf16.msra.mxu0 %v16652_v3  ;;  %17373 = vmatpush1.bf16.msra.mxu1 %v17372_v6  ;;  %v16686_v3 = vunpack.c.l.s8.bf16 %v1662_v1  ;;  %v17406_v6 = vunpack.c.l.s8.bf16 %v1664_v53 }
 0x2e7   : > { %16655 = vmatprep.subr.bf16.mxu0 %v16654_v39  ;;  %17375 = vmatprep.subr.bf16.mxu1 %v17374_v48  ;;  %v1661_v39 = vld [vmem:[%s21272_s25 + $0xb80] sm:$0xff]  ;;  %v1663_v48 = vld [vmem:[%s21272_s25 + $0xb90] sm:$0xff] }
 0x2e8   : > { %v16688_v22 = vunpack.c.l.s8.bf16 %v1661_v39  ;;  %v17408_v50 = vunpack.c.l.s8.bf16 %v1663_v48  ;;  %v16692_v26 = vunpack.c.h.s8.bf16 %v1661_v39  ;;  %v17412_v57 = vunpack.c.h.s8.bf16 %v1663_v48  ;;  %v1693_v48 = vld [vmem:[%s21272_s25 + $0xc80] sm:$0xff] }
 0x2ea   : > { %16657 = vmatpush1.bf16.msra.mxu0 %v16656_v24  ;;  %17377 = vmatpush1.bf16.msra.mxu1 %v17376_v63  ;;  %v16690_v24 = vunpack.c.h.s8.bf16 %v1662_v1  ;;  %v17410_v63 = vunpack.c.h.s8.bf16 %v1664_v53  ;;  %v17434_v1 = vunpack.c.h.s8.bf16 %v1688_v5  ;;  %v1694_v53 = vld [vmem:[%s21272_s25 + $0xc88] sm:$0xff] }
 0x2eb   : > { %16659 = vmatprep.subr.bf16.mxu0 %v16658_v23  ;;  %17379 = vmatprep.subr.bf16.mxu1 %v17378_v36  ;;  %v1670_v23 = vld [vmem:[%s21272_s25 + $0xbc8] sm:$0xff]  ;;  %v1672_v36 = vld [vmem:[%s21272_s25 + $0xbd8] sm:$0xff] }
 0x2ec   : > { %v1718_v5 = vld [vmem:[%s21272_s25 + $0xd48] sm:$0xff] }
 0x2ee   : > { %16661 = vmatpush1.bf16.msra.mxu0 %v16660_v59  ;;  %17381 = vmatpush1.bf16.msra.mxu1 %v17380_v35  ;;  %v16694_v59 = vunpack.c.l.s8.bf16 %v1670_v23  ;;  %v17414_v35 = vunpack.c.l.s8.bf16 %v1672_v36 }
 0x2ef   : > { %16663 = vmatprep.subr.bf16.mxu0 %v16662_v42  ;;  %17383 = vmatprep.subr.bf16.mxu1 %v17382_v11  ;;  %v1669_v42 = vld [vmem:[%s21272_s25 + $0xbc0] sm:$0xff]  ;;  %v1671_v11 = vld [vmem:[%s21272_s25 + $0xbd0] sm:$0xff] }
 0x2f0   : > { %v16696_v19 = vunpack.c.l.s8.bf16 %v1669_v42  ;;  %v17416_v25 = vunpack.c.l.s8.bf16 %v1671_v11  ;;  %v16700_v4 = vunpack.c.h.s8.bf16 %v1669_v42 }
 0x2f2   : > { %16665 = vmatpush1.bf16.msra.mxu0 %v16664_v9  ;;  %17385 = vmatpush1.bf16.msra.mxu1 %v17384_v27  ;;  %v16698_v9 = vunpack.c.h.s8.bf16 %v1670_v23  ;;  %v17418_v27 = vunpack.c.h.s8.bf16 %v1672_v36  ;;  %v1702_v36 = vld [vmem:[%s21272_s25 + $0xcc8] sm:$0xff] }
 0x2f3   : > { %16667 = vmatprep.subr.bf16.mxu0 %v16666_v28  ;;  %17387 = vmatprep.subr.bf16.mxu1 %v17386_v56  ;;  %v1678_v28 = vld [vmem:[%s21272_s25 + $0xc08] sm:$0xff]  ;;  %v1680_v56 = vld [vmem:[%s21272_s25 + $0xc18] sm:$0xff] }
 0x2f6   : > { %16669 = vmatpush1.bf16.msra.mxu0 %v16668_v44  ;;  %17389 = vmatpush1.bf16.msra.mxu1 %v17388_v7  ;;  %v17420_v44 = vunpack.c.h.s8.bf16 %v1671_v11  ;;  %v16702_v7 = vunpack.c.l.s8.bf16 %v1678_v28  ;;  %v1701_v11 = vld [vmem:[%s21272_s25 + $0xcc0] sm:$0xff] }
 0x2f7   : > { %16671 = vmatprep.subr.bf16.mxu0 %v16670_v52  ;;  %17391 = vmatprep.subr.bf16.mxu1 %v17390_v60  ;;  %v17422_v52 = vunpack.c.l.s8.bf16 %v1680_v56  ;;  %v1677_v60 = vld [vmem:[%s21272_s25 + $0xc00] sm:$0xff] }
 0x2fa   : > { %16673 = vmatpush1.bf16.msra.mxu0 %v16672_v31  ;;  %17393 = vmatpush1.bf16.msra.mxu1 %v17392_v33  ;;  %v16704_v31 = vunpack.c.l.s8.bf16 %v1677_v60  ;;  %v17424_v33 = vunpack.c.l.s8.bf16 %v1679_v18 }
 0x2fb   : > { %16675 = vmatprep.subr.bf16.mxu0 %v16674_v38  ;;  %17395 = vmatprep.subr.bf16.mxu1 %v17394_v34  ;;  %v16706_v38 = vunpack.c.h.s8.bf16 %v1678_v28  ;;  %v17426_v34 = vunpack.c.h.s8.bf16 %v1680_v56  ;;  %v1710_v56 = vld [vmem:[%s21272_s25 + $0xd08] sm:$0xff] }
 0x2fe   : > { %16677 = vmatpush1.bf16.msra.mxu0 %v16676_v40  ;;  %17397 = vmatpush1.bf16.msra.mxu1 %v17396_v30  ;;  %v22168_v40 = vcombine.high %v22162_v49, %v22162_v49  ;;  %v16708_v30 = vunpack.c.h.s8.bf16 %v1677_v60 }
 0x2ff   : > { %16679 = vmatprep.subr.bf16.mxu0 %v16678_v10  ;;  %17399 = vmatprep.subr.bf16.mxu1 %v17398_v29  ;;  %v17428_v10 = vunpack.c.h.s8.bf16 %v1679_v18  ;;  %v16710_v29 = vunpack.c.l.s8.bf16 %v1686_v20  ;;  %v1709_v18 = vld [vmem:[%s21272_s25 + $0xd00] sm:$0xff] }
 0x302   : > { %16681 = vmatpush1.bf16.msra.mxu0 %v16680_v46  ;;  %17401 = vmatpush1.bf16.msra.mxu1 %v17400_v54  ;;  %v1687_v46 = vld [vmem:[%s21272_s25 + $0xc50] sm:$0xff]  ;;  %v16712_v54 = vunpack.c.l.s8.bf16 %v1685_v62 }
 0x303   : > { %16683 = vmatprep.subr.bf16.mxu0 %v16682_v12  ;;  %17403 = vmatprep.subr.bf16.mxu1 %v17402_v15  ;;  %v17432_v12 = vunpack.c.l.s8.bf16 %v1687_v46  ;;  %v16714_v15 = vunpack.c.h.s8.bf16 %v1686_v20 }
 0x306   : > { %16685 = vmatpush1.bf16.msra.mxu0 %v16684_v51  ;;  %17405 = vmatpush1.bf16.msra.mxu1 %v17404_v45  ;;  %v1696_v51 = vld [vmem:[%s21272_s25 + $0xc98] sm:$0xff]  ;;  %v16716_v45 = vunpack.c.h.s8.bf16 %v1685_v62 }
 0x307   : > { %16687 = vmatprep.subr.bf16.mxu0 %v16686_v3  ;;  %17407 = vmatprep.subr.bf16.mxu1 %v17406_v6  ;;  %v17436_v3 = vunpack.c.h.s8.bf16 %v1687_v46  ;;  %v16718_v6 = vunpack.c.l.s8.bf16 %v1694_v53  ;;  %v17438_v39 = vunpack.c.l.s8.bf16 %v1696_v51  ;;  %v17442_v23 = vunpack.c.h.s8.bf16 %v1696_v51  ;;  %v1717_v46 = vld [vmem:[%s21272_s25 + $0xd40] sm:$0xff]  ;;  %v1726_v51 = vld [vmem:[%s21272_s25 + $0xd88] sm:$0xff] }
 0x30a   : > { %16689 = vmatpush1.bf16.msra.mxu0 %v16688_v22  ;;  %17409 = vmatpush1.bf16.msra.mxu1 %v17408_v50  ;;  %v1695_v22 = vld [vmem:[%s21272_s25 + $0xc90] sm:$0xff]  ;;  %v16720_v50 = vunpack.c.l.s8.bf16 %v1693_v48 }
 0x30b   : > { %16691 = vmatprep.subr.bf16.mxu0 %v16690_v24  ;;  %17411 = vmatprep.subr.bf16.mxu1 %v17410_v63  ;;  %v17440_v24 = vunpack.c.l.s8.bf16 %v1695_v22  ;;  %v16722_v63 = vunpack.c.h.s8.bf16 %v1694_v53 }
 0x30e   : > { %16693 = vmatpush1.bf16.msra.mxu0 %v16692_v26  ;;  %17413 = vmatpush1.bf16.msra.mxu1 %v17412_v57  ;;  %v1704_v26 = vld [vmem:[%s21272_s25 + $0xcd8] sm:$0xff]  ;;  %v16724_v57 = vunpack.c.h.s8.bf16 %v1693_v48 }
 0x30f   : > { %16695 = vmatprep.subr.bf16.mxu0 %v16694_v59  ;;  %17415 = vmatprep.subr.bf16.mxu1 %v17414_v35  ;;  %v17444_v59 = vunpack.c.h.s8.bf16 %v1695_v22  ;;  %v16726_v35 = vunpack.c.l.s8.bf16 %v1702_v36  ;;  %v17446_v42 = vunpack.c.l.s8.bf16 %v1704_v26  ;;  %v17450_v28 = vunpack.c.h.s8.bf16 %v1704_v26  ;;  %v1725_v22 = vld [vmem:[%s21272_s25 + $0xd80] sm:$0xff]  ;;  %v1734_v26 = vld [vmem:[%s21272_s25 + $0xdc8] sm:$0xff] }
 0x312   : > { %16697 = vmatpush1.bf16.msra.mxu0 %v16696_v19  ;;  %17417 = vmatpush1.bf16.msra.mxu1 %v17416_v25  ;;  %v1703_v19 = vld [vmem:[%s21272_s25 + $0xcd0] sm:$0xff]  ;;  %v16728_v25 = vunpack.c.l.s8.bf16 %v1701_v11 }
 0x313   : > { %16699 = vmatprep.subr.bf16.mxu0 %v16698_v9  ;;  %17419 = vmatprep.subr.bf16.mxu1 %v17418_v27  ;;  %v17448_v9 = vunpack.c.l.s8.bf16 %v1703_v19  ;;  %v16730_v27 = vunpack.c.h.s8.bf16 %v1702_v36 }
 0x316   : > { %16701 = vmatpush1.bf16.msra.mxu0 %v16700_v4  ;;  %17421 = vmatpush1.bf16.msra.mxu1 %v17420_v44  ;;  %v1712_v4 = vld [vmem:[%s21272_s25 + $0xd18] sm:$0xff]  ;;  %v16732_v44 = vunpack.c.h.s8.bf16 %v1701_v11 }
 0x317   : > { %16703 = vmatprep.subr.bf16.mxu0 %v16702_v7  ;;  %17423 = vmatprep.subr.bf16.mxu1 %v17422_v52  ;;  %v17452_v7 = vunpack.c.h.s8.bf16 %v1703_v19  ;;  %v16734_v52 = vunpack.c.l.s8.bf16 %v1710_v56  ;;  %v17454_v60 = vunpack.c.l.s8.bf16 %v1712_v4  ;;  %v17458_v20 = vunpack.c.h.s8.bf16 %v1712_v4  ;;  %v1733_v19 = vld [vmem:[%s21272_s25 + $0xdc0] sm:$0xff]  ;;  %v1742_v4 = vld [vmem:[%s21272_s25 + $0xe08] sm:$0xff] }
 0x319   : > { %8331 = vmatmul.mubr.f32.vlgmr.msra.gmra.mrb[0].mxu0 %v22116_v0  ;;  %9183 = vmatmul.mubr.f32.vlgmr.msra.gmra.mrb[0].mxu1 %v22116_v0 }
 0x31a   : > { %16705 = vmatpush1.bf16.msra.mxu0 %v16704_v31  ;;  %17425 = vmatpush1.bf16.msra.mxu1 %v17424_v33  ;;  %v1711_v31 = vld [vmem:[%s21272_s25 + $0xd10] sm:$0xff]  ;;  %v16736_v33 = vunpack.c.l.s8.bf16 %v1709_v18 }
 0x31b   : > { %16707 = vmatprep.subr.bf16.mxu0 %v16706_v38  ;;  %17427 = vmatprep.subr.bf16.mxu1 %v17426_v34  ;;  %v17456_v38 = vunpack.c.l.s8.bf16 %v1711_v31  ;;  %v16738_v34 = vunpack.c.h.s8.bf16 %v1710_v56 }
 0x31c   : > { %8401 = vmatprep.mubr.f32.mxu0 %v22168_v40  ;;  %9253 = vmatprep.mubr.f32.mxu1 %v22168_v40 }
 0x31e   : > { %16709 = vmatpush1.bf16.msra.mxu0 %v16708_v30  ;;  %17429 = vmatpush1.bf16.msra.mxu1 %v17428_v10  ;;  %v1720_v30 = vld [vmem:[%s21272_s25 + $0xd58] sm:$0xff]  ;;  %v16740_v10 = vunpack.c.h.s8.bf16 %v1709_v18  ;;  %v16766_v18 = vunpack.c.l.s8.bf16 %v1742_v4 }
 0x31f   : > { %16711 = vmatprep.subr.bf16.mxu0 %v16710_v29  ;;  %17431 = vmatprep.subr.bf16.mxu1 %v17430_v17  ;;  %v17460_v29 = vunpack.c.h.s8.bf16 %v1711_v31  ;;  %v16742_v17 = vunpack.c.l.s8.bf16 %v1718_v5  ;;  %v17462_v62 = vunpack.c.l.s8.bf16 %v1720_v30  ;;  %v17466_v53 = vunpack.c.h.s8.bf16 %v1720_v30 }
 0x322   : > { %16713 = vmatpush1.bf16.msra.mxu0 %v16712_v54  ;;  %17433 = vmatpush1.bf16.msra.mxu1 %v17432_v12  ;;  %v1719_v54 = vld [vmem:[%s21272_s25 + $0xd50] sm:$0xff]  ;;  %v16744_v12 = vunpack.c.l.s8.bf16 %v1717_v46 }
 0x323   : > { %16715 = vmatprep.subr.bf16.mxu0 %v16714_v15  ;;  %17435 = vmatprep.subr.bf16.mxu1 %v17434_v1  ;;  %v17464_v15 = vunpack.c.l.s8.bf16 %v1719_v54  ;;  %v16746_v1 = vunpack.c.h.s8.bf16 %v1718_v5 }
 0x326   : > { %16717 = vmatpush1.bf16.msra.mxu0 %v16716_v45  ;;  %17437 = vmatpush1.bf16.msra.mxu1 %v17436_v3  ;;  %v1728_v45 = vld [vmem:[%s21272_s25 + $0xd98] sm:$0xff]  ;;  %v16748_v3 = vunpack.c.h.s8.bf16 %v1717_v46 }
 0x327   : > { %16719 = vmatprep.subr.bf16.mxu0 %v16718_v6  ;;  %17439 = vmatprep.subr.bf16.mxu1 %v17438_v39  ;;  %v17468_v6 = vunpack.c.h.s8.bf16 %v1719_v54  ;;  %v16750_v39 = vunpack.c.l.s8.bf16 %v1726_v51  ;;  %v17470_v48 = vunpack.c.l.s8.bf16 %v1728_v45  ;;  %v17474_v36 = vunpack.c.h.s8.bf16 %v1728_v45 }
 0x32a   : > { %16721 = vmatpush1.bf16.msra.mxu0 %v16720_v50  ;;  %17441 = vmatpush1.bf16.msra.mxu1 %v17440_v24  ;;  %v1727_v50 = vld [vmem:[%s21272_s25 + $0xd90] sm:$0xff]  ;;  %v16752_v24 = vunpack.c.l.s8.bf16 %v1725_v22 }
 0x32b   : > { %16723 = vmatprep.subr.bf16.mxu0 %v16722_v63  ;;  %17443 = vmatprep.subr.bf16.mxu1 %v17442_v23  ;;  %v17472_v63 = vunpack.c.l.s8.bf16 %v1727_v50  ;;  %v16754_v23 = vunpack.c.h.s8.bf16 %v1726_v51 }
 0x32e   : > { %16725 = vmatpush1.bf16.msra.mxu0 %v16724_v57  ;;  %17445 = vmatpush1.bf16.msra.mxu1 %v17444_v59  ;;  %v1736_v57 = vld [vmem:[%s21272_s25 + $0xdd8] sm:$0xff]  ;;  %v16756_v59 = vunpack.c.h.s8.bf16 %v1725_v22 }
 0x32f   : > { %16727 = vmatprep.subr.bf16.mxu0 %v16726_v35  ;;  %17447 = vmatprep.subr.bf16.mxu1 %v17446_v42  ;;  %v17476_v35 = vunpack.c.h.s8.bf16 %v1727_v50  ;;  %v16758_v42 = vunpack.c.l.s8.bf16 %v1734_v26  ;;  %v17478_v11 = vunpack.c.l.s8.bf16 %v1736_v57  ;;  %v17482_v56 = vunpack.c.h.s8.bf16 %v1736_v57 }
 0x332   : > { %16729 = vmatpush1.bf16.msra.mxu0 %v16728_v25  ;;  %17449 = vmatpush1.bf16.msra.mxu1 %v17448_v9  ;;  %v1735_v25 = vld [vmem:[%s21272_s25 + $0xdd0] sm:$0xff]  ;;  %v16760_v9 = vunpack.c.l.s8.bf16 %v1733_v19 }
 0x333   : > { %16731 = vmatprep.subr.bf16.mxu0 %v16730_v27  ;;  %17451 = vmatprep.subr.bf16.mxu1 %v17450_v28  ;;  %v17480_v27 = vunpack.c.l.s8.bf16 %v1735_v25  ;;  %v16762_v28 = vunpack.c.h.s8.bf16 %v1734_v26 }
 0x336   : > { %16733 = vmatpush1.bf16.msra.mxu0 %v16732_v44  ;;  %17453 = vmatpush1.bf16.msra.mxu1 %v17452_v7  ;;  %v1744_v44 = vld [vmem:[%s21272_s25 + $0xe18] sm:$0xff]  ;;  %v7836_v7 = vcombine.high %v22156_v16, %v22156_v16  ;;  %v16770_v16 = vunpack.c.h.s8.bf16 %v1742_v4 }
 0x337   : > { %16735 = vmatprep.subr.bf16.mxu0 %v16734_v52  ;;  %17455 = vmatprep.subr.bf16.mxu1 %v17454_v60  ;;  %v16764_v52 = vunpack.c.h.s8.bf16 %v1733_v19  ;;  %v17484_v60 = vunpack.c.h.s8.bf16 %v1735_v25  ;;  %v17486_v31 = vunpack.c.l.s8.bf16 %v1744_v44  ;;  %v17490_v30 = vunpack.c.h.s8.bf16 %v1744_v44 }
 0x33a   : > { %16737 = vmatpush1.bf16.msra.mxu0 %v16736_v33  ;;  %17457 = vmatpush1.bf16.msra.mxu1 %v17456_v38  ;;  %v1741_v33 = vld [vmem:[%s21272_s25 + $0xe00] sm:$0xff]  ;;  %v1743_v38 = vld [vmem:[%s21272_s25 + $0xe10] sm:$0xff] }
 0x33b   : > { %16739 = vmatprep.subr.bf16.mxu0 %v16738_v34  ;;  %17459 = vmatprep.subr.bf16.mxu1 %v17458_v20  ;;  %v22207_v34 = vrot.slane %v7836_v7, %v21899_v55  ;;  %v16768_v20 = vunpack.c.l.s8.bf16 %v1741_v33  ;;  %v17488_v5 = vunpack.c.l.s8.bf16 %v1743_v38  ;;  %v17492_v46 = vunpack.c.h.s8.bf16 %v1743_v38 }
 0x33e   : > { %16741 = vmatpush1.bf16.msra.mxu0 %v16740_v10  ;;  %17461 = vmatpush1.bf16.msra.mxu1 %v17460_v29  ;;  %v1750_v10 = vld [vmem:[%s21272_s25 + $0xe48] sm:$0xff]  ;;  %v1752_v29 = vld [vmem:[%s21272_s25 + $0xe58] sm:$0xff] }
 0x33f   : > { %16743 = vmatprep.subr.bf16.mxu0 %v16742_v17  ;;  %17463 = vmatprep.subr.bf16.mxu1 %v17462_v62  ;;  %v22213_v17 = vcombine.high %v22207_v34, %v22207_v34  ;;  %v16772_v62 = vunpack.c.h.s8.bf16 %v1741_v33  ;;  %v16774_v54 = vunpack.c.l.s8.bf16 %v1750_v10  ;;  %v16778_v45 = vunpack.c.h.s8.bf16 %v1750_v10 }
 0x342   : > { %16745 = vmatpush1.bf16.msra.mxu0 %v16744_v12  ;;  %17465 = vmatpush1.bf16.msra.mxu1 %v17464_v15  ;;  %v17494_v12 = vunpack.c.l.s8.bf16 %v1752_v29  ;;  %v1749_v15 = vld [vmem:[%s21272_s25 + $0xe40] sm:$0xff] }
 0x343   : > { %16747 = vmatprep.subr.bf16.mxu0 %v16746_v1  ;;  %17467 = vmatprep.subr.bf16.mxu1 %v17466_v53  ;;  %v1751_v1 = vld [vmem:[%s21272_s25 + $0xe50] sm:$0xff]  ;;  %v16776_v53 = vunpack.c.l.s8.bf16 %v1749_v15 }
 0x344   : > { %v17496_v51 = vunpack.c.l.s8.bf16 %v1751_v1  ;;  %v17500_v22 = vunpack.c.h.s8.bf16 %v1751_v1 }
 0x346   : > { %16749 = vmatpush1.bf16.msra.mxu0 %v16748_v3  ;;  %17469 = vmatpush1.bf16.msra.mxu1 %v17468_v6  ;;  %v17498_v3 = vunpack.c.h.s8.bf16 %v1752_v29  ;;  %v1758_v6 = vld [vmem:[%s21272_s25 + $0xe88] sm:$0xff] }
 0x347   : > { %16751 = vmatprep.subr.bf16.mxu0 %v16750_v39  ;;  %17471 = vmatprep.subr.bf16.mxu1 %v17470_v48  ;;  %v1760_v39 = vld [vmem:[%s21272_s25 + $0xe98] sm:$0xff]  ;;  %v16780_v48 = vunpack.c.h.s8.bf16 %v1749_v15  ;;  %v16782_v50 = vunpack.c.l.s8.bf16 %v1758_v6  ;;  %v16786_v57 = vunpack.c.h.s8.bf16 %v1758_v6 }
 0x34a   : > { %16753 = vmatpush1.bf16.msra.mxu0 %v16752_v24  ;;  %17473 = vmatpush1.bf16.msra.mxu1 %v17472_v63  ;;  %v17502_v24 = vunpack.c.l.s8.bf16 %v1760_v39  ;;  %v1757_v63 = vld [vmem:[%s21272_s25 + $0xe80] sm:$0xff] }
 0x34b   : > { %16755 = vmatprep.subr.bf16.mxu0 %v16754_v23  ;;  %17475 = vmatprep.subr.bf16.mxu1 %v17474_v36  ;;  %v1759_v23 = vld [vmem:[%s21272_s25 + $0xe90] sm:$0xff]  ;;  %v16784_v36 = vunpack.c.l.s8.bf16 %v1757_v63 }
 0x34c   : > { %v17504_v26 = vunpack.c.l.s8.bf16 %v1759_v23  ;;  %v17508_v19 = vunpack.c.h.s8.bf16 %v1759_v23 }
 0x34e   : > { %16757 = vmatpush1.bf16.msra.mxu0 %v16756_v59  ;;  %17477 = vmatpush1.bf16.msra.mxu1 %v17476_v35  ;;  %v17506_v59 = vunpack.c.h.s8.bf16 %v1760_v39  ;;  %v1766_v35 = vld [vmem:[%s21272_s25 + $0xec8] sm:$0xff] }
 0x34f   : > { %16759 = vmatprep.subr.bf16.mxu0 %v16758_v42  ;;  %17479 = vmatprep.subr.bf16.mxu1 %v17478_v11  ;;  %v1768_v42 = vld [vmem:[%s21272_s25 + $0xed8] sm:$0xff]  ;;  %v16788_v11 = vunpack.c.h.s8.bf16 %v1757_v63  ;;  %v16790_v25 = vunpack.c.l.s8.bf16 %v1766_v35  ;;  %v16794_v44 = vunpack.c.h.s8.bf16 %v1766_v35 }
 0x350   : > { %v17514_v7 = vunpack.c.h.s8.bf16 %v1768_v42 }
 0x352   : > { %16761 = vmatpush1.bf16.msra.mxu0 %v16760_v9  ;;  %17481 = vmatpush1.bf16.msra.mxu1 %v17480_v27  ;;  %v17510_v9 = vunpack.c.l.s8.bf16 %v1768_v42  ;;  %v1765_v27 = vld [vmem:[%s21272_s25 + $0xec0] sm:$0xff] }
 0x353   : > { %16763 = vmatprep.subr.bf16.mxu0 %v16762_v28  ;;  %17483 = vmatprep.subr.bf16.mxu1 %v17482_v56  ;;  %v1767_v28 = vld [vmem:[%s21272_s25 + $0xed0] sm:$0xff]  ;;  %v16792_v56 = vunpack.c.l.s8.bf16 %v1765_v27 }
 0x354   : > { %v17512_v4 = vunpack.c.l.s8.bf16 %v1767_v28 }
 0x356   : > { %16765 = vmatpush1.bf16.msra.mxu0 %v16764_v52  ;;  %17485 = vmatpush1.bf16.msra.mxu1 %v17484_v60  ;;  %v1774_v52 = vld [vmem:[%s21272_s25 + $0xf08] sm:$0xff]  ;;  %v1776_v60 = vld [vmem:[%s21272_s25 + $0xf18] sm:$0xff] }
 0x357   : > { %16767 = vmatprep.subr.bf16.mxu0 %v16766_v18  ;;  %17487 = vmatprep.subr.bf16.mxu1 %v17486_v31  ;;  %v16796_v18 = vunpack.c.h.s8.bf16 %v1765_v27  ;;  %v17516_v31 = vunpack.c.h.s8.bf16 %v1767_v28  ;;  %v16798_v33 = vunpack.c.l.s8.bf16 %v1774_v52  ;;  %v17518_v38 = vunpack.c.l.s8.bf16 %v1776_v60 }
 0x358   : > { %v16802_v10 = vunpack.c.h.s8.bf16 %v1774_v52  ;;  %v17522_v29 = vunpack.c.h.s8.bf16 %v1776_v60 }
 0x359   : > { %8402 = vmatmul.mubr.f32.vlgmr.msra.gmra.mrb[0].mxu0 %v22162_v49  ;;  %9254 = vmatmul.mubr.f32.vlgmr.msra.gmra.mrb[0].mxu1 %v22162_v49 }
 0x35a   : > { %16769 = vmatpush1.bf16.msra.mxu0 %v16768_v20  ;;  %17489 = vmatpush1.bf16.msra.mxu1 %v17488_v5  ;;  %v1773_v20 = vld [vmem:[%s21272_s25 + $0xf00] sm:$0xff]  ;;  %v1775_v5 = vld [vmem:[%s21272_s25 + $0xf10] sm:$0xff] }
 0x35b   : > { %16771 = vmatprep.subr.bf16.mxu0 %v16770_v16  ;;  %17491 = vmatprep.subr.bf16.mxu1 %v17490_v30  ;;  %v16800_v16 = vunpack.c.l.s8.bf16 %v1773_v20  ;;  %v17520_v30 = vunpack.c.l.s8.bf16 %v1775_v5 }
 0x35c   : > { %8472 = vmatprep.mubr.f32.mxu0 %v22213_v17  ;;  %9324 = vmatprep.mubr.f32.mxu1 %v22213_v17 }
 0x35e   : > { %16773 = vmatpush1.bf16.msra.mxu0 %v16772_v62  ;;  %17493 = vmatpush1.bf16.msra.mxu1 %v17492_v46  ;;  %v1782_v62 = vld [vmem:[%s21272_s25 + $0xf48] sm:$0xff]  ;;  %v1784_v46 = vld [vmem:[%s21272_s25 + $0xf58] sm:$0xff] }
 0x35f   : > { %16775 = vmatprep.subr.bf16.mxu0 %v16774_v54  ;;  %17495 = vmatprep.subr.bf16.mxu1 %v17494_v12  ;;  %v16804_v54 = vunpack.c.h.s8.bf16 %v1773_v20  ;;  %v17524_v12 = vunpack.c.h.s8.bf16 %v1775_v5  ;;  %v16806_v15 = vunpack.c.l.s8.bf16 %v1782_v62  ;;  %v17526_v1 = vunpack.c.l.s8.bf16 %v1784_v46 }
 0x360   : > { %v16810_v6 = vunpack.c.h.s8.bf16 %v1782_v62  ;;  %v17530_v39 = vunpack.c.h.s8.bf16 %v1784_v46 }
 0x362   : > { %16777 = vmatpush1.bf16.msra.mxu0 %v16776_v53  ;;  %17497 = vmatpush1.bf16.msra.mxu1 %v17496_v51  ;;  %v1781_v53 = vld [vmem:[%s21272_s25 + $0xf40] sm:$0xff]  ;;  %v1783_v51 = vld [vmem:[%s21272_s25 + $0xf50] sm:$0xff] }
 0x363   : > { %16779 = vmatprep.subr.bf16.mxu0 %v16778_v45  ;;  %17499 = vmatprep.subr.bf16.mxu1 %v17498_v3  ;;  %v16808_v45 = vunpack.c.l.s8.bf16 %v1781_v53  ;;  %v17528_v3 = vunpack.c.l.s8.bf16 %v1783_v51 }
 0x366   : > { %16781 = vmatpush1.bf16.msra.mxu0 %v16780_v48  ;;  %17501 = vmatpush1.bf16.msra.mxu1 %v17500_v22  ;;  %v1790_v48 = vld [vmem:[%s21272_s25 + $0xf88] sm:$0xff]  ;;  %v1792_v22 = vld [vmem:[%s21272_s25 + $0xf98] sm:$0xff] }
 0x367   : > { %16783 = vmatprep.subr.bf16.mxu0 %v16782_v50  ;;  %17503 = vmatprep.subr.bf16.mxu1 %v17502_v24  ;;  %v16812_v50 = vunpack.c.h.s8.bf16 %v1781_v53  ;;  %v17532_v24 = vunpack.c.h.s8.bf16 %v1783_v51  ;;  %v16814_v63 = vunpack.c.l.s8.bf16 %v1790_v48  ;;  %v17534_v23 = vunpack.c.l.s8.bf16 %v1792_v22 }
 0x368   : > { %v16818_v35 = vunpack.c.h.s8.bf16 %v1790_v48  ;;  %v17538_v42 = vunpack.c.h.s8.bf16 %v1792_v22  ;;  %v1815_v48 = vld [vmem:[%s21272_s25 + $0x1050] sm:$0xff] }
 0x36a   : > { %16785 = vmatpush1.bf16.msra.mxu0 %v16784_v36  ;;  %17505 = vmatpush1.bf16.msra.mxu1 %v17504_v26  ;;  %v1789_v36 = vld [vmem:[%s21272_s25 + $0xf80] sm:$0xff]  ;;  %v1791_v26 = vld [vmem:[%s21272_s25 + $0xf90] sm:$0xff] }
 0x36b   : > { %16787 = vmatprep.subr.bf16.mxu0 %v16786_v57  ;;  %17507 = vmatprep.subr.bf16.mxu1 %v17506_v59  ;;  %v16816_v57 = vunpack.c.l.s8.bf16 %v1789_v36  ;;  %v17536_v59 = vunpack.c.l.s8.bf16 %v1791_v26 }
 0x36e   : > { %16789 = vmatpush1.bf16.msra.mxu0 %v16788_v11  ;;  %17509 = vmatpush1.bf16.msra.mxu1 %v17508_v19  ;;  %v1798_v11 = vld [vmem:[%s21272_s25 + $0xfc8] sm:$0xff]  ;;  %v1800_v19 = vld [vmem:[%s21272_s25 + $0xfd8] sm:$0xff] }
 0x36f   : > { %16791 = vmatprep.subr.bf16.mxu0 %v16790_v25  ;;  %17511 = vmatprep.subr.bf16.mxu1 %v17510_v9  ;;  %v16820_v25 = vunpack.c.h.s8.bf16 %v1789_v36  ;;  %v17540_v9 = vunpack.c.h.s8.bf16 %v1791_v26  ;;  %v16822_v27 = vunpack.c.l.s8.bf16 %v1798_v11  ;;  %v17542_v28 = vunpack.c.l.s8.bf16 %v1800_v19  ;;  %v1824_v36 = vld [vmem:[%s21272_s25 + $0x1098] sm:$0xff] }
 0x370   : > { %v16826_v52 = vunpack.c.h.s8.bf16 %v1798_v11  ;;  %v17546_v60 = vunpack.c.h.s8.bf16 %v1800_v19  ;;  %v1823_v11 = vld [vmem:[%s21272_s25 + $0x1090] sm:$0xff] }
 0x372   : > { %16793 = vmatpush1.bf16.msra.mxu0 %v16792_v56  ;;  %17513 = vmatpush1.bf16.msra.mxu1 %v17512_v4  ;;  %v1797_v56 = vld [vmem:[%s21272_s25 + $0xfc0] sm:$0xff]  ;;  %v1799_v4 = vld [vmem:[%s21272_s25 + $0xfd0] sm:$0xff] }
 0x373   : > { %16795 = vmatprep.subr.bf16.mxu0 %v16794_v44  ;;  %17515 = vmatprep.subr.bf16.mxu1 %v17514_v7  ;;  %v16824_v44 = vunpack.c.l.s8.bf16 %v1797_v56  ;;  %v17544_v7 = vunpack.c.l.s8.bf16 %v1799_v4  ;;  %v17548_v20 = vunpack.c.h.s8.bf16 %v1799_v4 }
 0x376   : > { %16797 = vmatpush1.bf16.msra.mxu0 %v16796_v18  ;;  %17517 = vmatpush1.bf16.msra.mxu1 %v17516_v31  ;;  %v1806_v18 = vld [vmem:[%s21272_s25 + $0x1008] sm:$0xff]  ;;  %v1808_v31 = vld [vmem:[%s21272_s25 + $0x1018] sm:$0xff] }
 0x377   : > { %16799 = vmatprep.subr.bf16.mxu0 %v16798_v33  ;;  %17519 = vmatprep.subr.bf16.mxu1 %v17518_v38  ;;  %v22247_v33 = vld [vmem:[#allocation2 + $0x20] sm:$0xff]  ;;  %v16828_v38 = vunpack.c.h.s8.bf16 %v1797_v56  ;;  %v16830_v5 = vunpack.c.l.s8.bf16 %v1806_v18  ;;  %v1832_v56 = vld [vmem:[%s21272_s25 + $0x10d8] sm:$0xff] }
 0x37a   : > { %16801 = vmatpush1.bf16.msra.mxu0 %v16800_v16  ;;  %17521 = vmatpush1.bf16.msra.mxu1 %v17520_v30  ;;  %v17550_v16 = vunpack.c.l.s8.bf16 %v1808_v31  ;;  %v1805_v30 = vld [vmem:[%s21272_s25 + $0x1000] sm:$0xff] }
 0x37b   : > { %16803 = vmatprep.subr.bf16.mxu0 %v16802_v10  ;;  %17523 = vmatprep.subr.bf16.mxu1 %v17522_v29  ;;  %v1807_v10 = vld [vmem:[%s21272_s25 + $0x1010] sm:$0xff]  ;;  %v22253_v29 = vrot.slane %v22247_v33, %v21899_v55  ;;  %v16832_v62 = vunpack.c.l.s8.bf16 %v1805_v30  ;;  %v16836_v51 = vunpack.c.h.s8.bf16 %v1805_v30  ;;  %v1840_v30 = vld [vmem:[%s21272_s25 + $0x1118] sm:$0xff] }
 0x37c   : > { %v17552_v46 = vunpack.c.l.s8.bf16 %v1807_v10 }
 0x37d   : > { %v22259_v53 = vcombine.high %v22253_v29, %v22253_v29 }
 0x37e   : > { %16805 = vmatpush1.bf16.msra.mxu0 %v16804_v54  ;;  %17525 = vmatpush1.bf16.msra.mxu1 %v17524_v12  ;;  %v16834_v54 = vunpack.c.h.s8.bf16 %v1806_v18  ;;  %v17554_v12 = vunpack.c.h.s8.bf16 %v1808_v31  ;;  %v1831_v18 = vld [vmem:[%s21272_s25 + $0x10d0] sm:$0xff] }
 0x37f   : > { %16807 = vmatprep.subr.bf16.mxu0 %v16806_v15  ;;  %17527 = vmatprep.subr.bf16.mxu1 %v17526_v1  ;;  %v1814_v15 = vld [vmem:[%s21272_s25 + $0x1048] sm:$0xff]  ;;  %v1816_v1 = vld [vmem:[%s21272_s25 + $0x1058] sm:$0xff] }
 0x382   : > { %16809 = vmatpush1.bf16.msra.mxu0 %v16808_v45  ;;  %17529 = vmatpush1.bf16.msra.mxu1 %v17528_v3  ;;  %v17556_v45 = vunpack.c.h.s8.bf16 %v1807_v10  ;;  %v16838_v3 = vunpack.c.l.s8.bf16 %v1814_v15 }
 0x383   : > { %16811 = vmatprep.subr.bf16.mxu0 %v16810_v6  ;;  %17531 = vmatprep.subr.bf16.mxu1 %v17530_v39  ;;  %v17558_v6 = vunpack.c.l.s8.bf16 %v1816_v1  ;;  %v1813_v39 = vld [vmem:[%s21272_s25 + $0x1040] sm:$0xff] }
 0x384   : > { %v16840_v22 = vunpack.c.l.s8.bf16 %v1813_v39  ;;  %v16844_v26 = vunpack.c.h.s8.bf16 %v1813_v39  ;;  %v1848_v39 = vld [vmem:[%s21272_s25 + $0x1158] sm:$0xff] }
 0x386   : > { %16813 = vmatpush1.bf16.msra.mxu0 %v16812_v50  ;;  %17533 = vmatpush1.bf16.msra.mxu1 %v17532_v24  ;;  %v17560_v50 = vunpack.c.l.s8.bf16 %v1815_v48  ;;  %v16842_v24 = vunpack.c.h.s8.bf16 %v1814_v15  ;;  %v1839_v15 = vld [vmem:[%s21272_s25 + $0x1110] sm:$0xff] }
 0x387   : > { %16815 = vmatprep.subr.bf16.mxu0 %v16814_v63  ;;  %17535 = vmatprep.subr.bf16.mxu1 %v17534_v23  ;;  %v17562_v63 = vunpack.c.h.s8.bf16 %v1816_v1  ;;  %v1822_v23 = vld [vmem:[%s21272_s25 + $0x1088] sm:$0xff] }
 0x38a   : > { %16817 = vmatpush1.bf16.msra.mxu0 %v16816_v57  ;;  %17537 = vmatpush1.bf16.msra.mxu1 %v17536_v59  ;;  %v17564_v57 = vunpack.c.h.s8.bf16 %v1815_v48  ;;  %v16846_v59 = vunpack.c.l.s8.bf16 %v1822_v23 }
 0x38b   : > { %16819 = vmatprep.subr.bf16.mxu0 %v16818_v35  ;;  %17539 = vmatprep.subr.bf16.mxu1 %v17538_v42  ;;  %v17566_v35 = vunpack.c.l.s8.bf16 %v1824_v36  ;;  %v1821_v42 = vld [vmem:[%s21272_s25 + $0x1080] sm:$0xff] }
 0x38c   : > { %v16848_v19 = vunpack.c.l.s8.bf16 %v1821_v42  ;;  %v16852_v4 = vunpack.c.h.s8.bf16 %v1821_v42  ;;  %v1856_v42 = vld [vmem:[%s21272_s25 + $0x1198] sm:$0xff] }
 0x38e   : > { %16821 = vmatpush1.bf16.msra.mxu0 %v16820_v25  ;;  %17541 = vmatpush1.bf16.msra.mxu1 %v17540_v9  ;;  %v17568_v25 = vunpack.c.l.s8.bf16 %v1823_v11  ;;  %v16850_v9 = vunpack.c.h.s8.bf16 %v1822_v23  ;;  %v1847_v23 = vld [vmem:[%s21272_s25 + $0x1150] sm:$0xff] }
 0x38f   : > { %16823 = vmatprep.subr.bf16.mxu0 %v16822_v27  ;;  %17543 = vmatprep.subr.bf16.mxu1 %v17542_v28  ;;  %v17570_v27 = vunpack.c.h.s8.bf16 %v1824_v36  ;;  %v1830_v28 = vld [vmem:[%s21272_s25 + $0x10c8] sm:$0xff] }
 0x392   : > { %16825 = vmatpush1.bf16.msra.mxu0 %v16824_v44  ;;  %17545 = vmatpush1.bf16.msra.mxu1 %v17544_v7  ;;  %v17572_v44 = vunpack.c.h.s8.bf16 %v1823_v11  ;;  %v16854_v7 = vunpack.c.l.s8.bf16 %v1830_v28 }
 0x393   : > { %16827 = vmatprep.subr.bf16.mxu0 %v16826_v52  ;;  %17547 = vmatprep.subr.bf16.mxu1 %v17546_v60  ;;  %v17574_v52 = vunpack.c.l.s8.bf16 %v1832_v56  ;;  %v1829_v60 = vld [vmem:[%s21272_s25 + $0x10c0] sm:$0xff] }
 0x394   : > { %v16856_v31 = vunpack.c.l.s8.bf16 %v1829_v60  ;;  %v16860_v10 = vunpack.c.h.s8.bf16 %v1829_v60  ;;  %v1864_v60 = vld [vmem:[%s21272_s25 + $0x11d8] sm:$0xff] }
 0x396   : > { %16829 = vmatpush1.bf16.msra.mxu0 %v16828_v38  ;;  %17549 = vmatpush1.bf16.msra.mxu1 %v17548_v20  ;;  %v17576_v38 = vunpack.c.l.s8.bf16 %v1831_v18  ;;  %v16858_v20 = vunpack.c.h.s8.bf16 %v1830_v28  ;;  %v1855_v28 = vld [vmem:[%s21272_s25 + $0x1190] sm:$0xff] }
 0x397   : > { %16831 = vmatprep.subr.bf16.mxu0 %v16830_v5  ;;  %17551 = vmatprep.subr.bf16.mxu1 %v17550_v16  ;;  %v17578_v5 = vunpack.c.h.s8.bf16 %v1832_v56  ;;  %v1838_v16 = vld [vmem:[%s21272_s25 + $0x1108] sm:$0xff] }
 0x399   : > { %8473 = vmatmul.mubr.f32.vlgmr.msra.gmra.mrb[0].mxu0 %v22207_v34  ;;  %9325 = vmatmul.mubr.f32.vlgmr.msra.gmra.mrb[0].mxu1 %v22207_v34 }
 0x39a   : > { %16833 = vmatpush1.bf16.msra.mxu0 %v16832_v62  ;;  %17553 = vmatpush1.bf16.msra.mxu1 %v17552_v46  ;;  %v17580_v62 = vunpack.c.h.s8.bf16 %v1831_v18  ;;  %v16862_v46 = vunpack.c.l.s8.bf16 %v1838_v16 }
 0x39b   : > { %16835 = vmatprep.subr.bf16.mxu0 %v16834_v54  ;;  %17555 = vmatprep.subr.bf16.mxu1 %v17554_v12  ;;  %v17582_v54 = vunpack.c.l.s8.bf16 %v1840_v30  ;;  %v1837_v12 = vld [vmem:[%s21272_s25 + $0x1100] sm:$0xff] }
 0x39c   : > { %8543 = vmatprep.mubr.f32.mxu0 %v22259_v53  ;;  %9395 = vmatprep.mubr.f32.mxu1 %v22259_v53  ;;  %v16864_v1 = vunpack.c.l.s8.bf16 %v1837_v12  ;;  %v16868_v48 = vunpack.c.h.s8.bf16 %v1837_v12  ;;  %v1872_v12 = vld [vmem:[%s21272_s25 + $0x1218] sm:$0xff] }
 0x39e   : > { %16837 = vmatpush1.bf16.msra.mxu0 %v16836_v51  ;;  %17557 = vmatpush1.bf16.msra.mxu1 %v17556_v45  ;;  %v17584_v51 = vunpack.c.l.s8.bf16 %v1839_v15  ;;  %v16866_v45 = vunpack.c.h.s8.bf16 %v1838_v16  ;;  %v1863_v16 = vld [vmem:[%s21272_s25 + $0x11d0] sm:$0xff] }
 0x39f   : > { %16839 = vmatprep.subr.bf16.mxu0 %v16838_v3  ;;  %17559 = vmatprep.subr.bf16.mxu1 %v17558_v6  ;;  %v17586_v3 = vunpack.c.h.s8.bf16 %v1840_v30  ;;  %v1846_v6 = vld [vmem:[%s21272_s25 + $0x1148] sm:$0xff] }
 0x3a2   : > { %16841 = vmatpush1.bf16.msra.mxu0 %v16840_v22  ;;  %17561 = vmatpush1.bf16.msra.mxu1 %v17560_v50  ;;  %v17588_v22 = vunpack.c.h.s8.bf16 %v1839_v15  ;;  %v16870_v50 = vunpack.c.l.s8.bf16 %v1846_v6  ;;  %v7853_v15 = vcombine.high %v22247_v33, %v22247_v33 }
 0x3a3   : > { %16843 = vmatprep.subr.bf16.mxu0 %v16842_v24  ;;  %17563 = vmatprep.subr.bf16.mxu1 %v17562_v63  ;;  %v17590_v24 = vunpack.c.l.s8.bf16 %v1848_v39  ;;  %v1845_v63 = vld [vmem:[%s21272_s25 + $0x1140] sm:$0xff] }
 0x3a4   : > { %v16872_v36 = vunpack.c.l.s8.bf16 %v1845_v63  ;;  %v16876_v11 = vunpack.c.h.s8.bf16 %v1845_v63  ;;  %v1878_v63 = vld [vmem:[%s21272_s25 + $0x1248] sm:$0xff] }
 0x3a6   : > { %16845 = vmatpush1.bf16.msra.mxu0 %v16844_v26  ;;  %17565 = vmatpush1.bf16.msra.mxu1 %v17564_v57  ;;  %v17592_v26 = vunpack.c.l.s8.bf16 %v1847_v23  ;;  %v16874_v57 = vunpack.c.h.s8.bf16 %v1846_v6  ;;  %v1869_v6 = vld [vmem:[%s21272_s25 + $0x1200] sm:$0xff] }
 0x3a7   : > { %16847 = vmatprep.subr.bf16.mxu0 %v16846_v59  ;;  %17567 = vmatprep.subr.bf16.mxu1 %v17566_v35  ;;  %v17594_v59 = vunpack.c.h.s8.bf16 %v1848_v39  ;;  %v1854_v35 = vld [vmem:[%s21272_s25 + $0x1188] sm:$0xff]  ;;  %v1871_v39 = vld [vmem:[%s21272_s25 + $0x1210] sm:$0xff] }
 0x3aa   : > { %16849 = vmatpush1.bf16.msra.mxu0 %v16848_v19  ;;  %17569 = vmatpush1.bf16.msra.mxu1 %v17568_v25  ;;  %v17596_v19 = vunpack.c.h.s8.bf16 %v1847_v23  ;;  %v16878_v25 = vunpack.c.l.s8.bf16 %v1854_v35  ;;  %v1880_v23 = vld [vmem:[%s21272_s25 + $0x1258] sm:$0xff] }
 0x3ab   : > { %16851 = vmatprep.subr.bf16.mxu0 %v16850_v9  ;;  %17571 = vmatprep.subr.bf16.mxu1 %v17570_v27  ;;  %v17598_v9 = vunpack.c.l.s8.bf16 %v1856_v42  ;;  %v1853_v27 = vld [vmem:[%s21272_s25 + $0x1180] sm:$0xff] }
 0x3ac   : > { %v16880_v56 = vunpack.c.l.s8.bf16 %v1853_v27  ;;  %v16884_v18 = vunpack.c.h.s8.bf16 %v1853_v27  ;;  %v17626_v27 = vunpack.c.h.s8.bf16 %v1880_v23 }
 0x3ae   : > { %16853 = vmatpush1.bf16.msra.mxu0 %v16852_v4  ;;  %17573 = vmatpush1.bf16.msra.mxu1 %v17572_v44  ;;  %v17600_v4 = vunpack.c.l.s8.bf16 %v1855_v28  ;;  %v16882_v44 = vunpack.c.h.s8.bf16 %v1854_v35  ;;  %v17622_v35 = vunpack.c.l.s8.bf16 %v1880_v23  ;;  %v1903_v23 = vld [vmem:[%s21272_s25 + $0x1310] sm:$0xff] }
 0x3af   : > { %16855 = vmatprep.subr.bf16.mxu0 %v16854_v7  ;;  %17575 = vmatprep.subr.bf16.mxu1 %v17574_v52  ;;  %v17602_v7 = vunpack.c.h.s8.bf16 %v1856_v42  ;;  %v1862_v52 = vld [vmem:[%s21272_s25 + $0x11c8] sm:$0xff]  ;;  %v1877_v42 = vld [vmem:[%s21272_s25 + $0x1240] sm:$0xff] }
 0x3b2   : > { %16857 = vmatpush1.bf16.msra.mxu0 %v16856_v31  ;;  %17577 = vmatpush1.bf16.msra.mxu1 %v17576_v38  ;;  %v17604_v31 = vunpack.c.h.s8.bf16 %v1855_v28  ;;  %v16886_v38 = vunpack.c.l.s8.bf16 %v1862_v52  ;;  %v1886_v28 = vld [vmem:[%s21272_s25 + $0x1288] sm:$0xff] }
 0x3b3   : > { %16859 = vmatprep.subr.bf16.mxu0 %v16858_v20  ;;  %17579 = vmatprep.subr.bf16.mxu1 %v17578_v5  ;;  %v17606_v20 = vunpack.c.l.s8.bf16 %v1864_v60  ;;  %v1861_v5 = vld [vmem:[%s21272_s25 + $0x11c0] sm:$0xff] }
 0x3b4   : > { %v16888_v30 = vunpack.c.l.s8.bf16 %v1861_v5 }
 0x3b6   : > { %16861 = vmatpush1.bf16.msra.mxu0 %v16860_v10  ;;  %17581 = vmatpush1.bf16.msra.mxu1 %v17580_v62  ;;  %v17608_v10 = vunpack.c.l.s8.bf16 %v1863_v16  ;;  %v16890_v62 = vunpack.c.h.s8.bf16 %v1862_v52 }
 0x3b7   : > { %16863 = vmatprep.subr.bf16.mxu0 %v16862_v46  ;;  %17583 = vmatprep.subr.bf16.mxu1 %v17582_v54  ;;  %v17610_v46 = vunpack.c.h.s8.bf16 %v1864_v60  ;;  %v1870_v54 = vld [vmem:[%s21272_s25 + $0x1208] sm:$0xff]  ;;  %v1885_v60 = vld [vmem:[%s21272_s25 + $0x1280] sm:$0xff] }
 0x3b8   : > { %v16898_v33 = vunpack.c.h.s8.bf16 %v1870_v54 }
 0x3ba   : > { %16865 = vmatpush1.bf16.msra.mxu0 %v16864_v1  ;;  %17585 = vmatpush1.bf16.msra.mxu1 %v17584_v51  ;;  %v16892_v1 = vunpack.c.h.s8.bf16 %v1861_v5  ;;  %v17612_v51 = vunpack.c.h.s8.bf16 %v1863_v16  ;;  %v1894_v16 = vld [vmem:[%s21272_s25 + $0x12c8] sm:$0xff] }
 0x3bb   : > { %16867 = vmatprep.subr.bf16.mxu0 %v16866_v45  ;;  %17587 = vmatprep.subr.bf16.mxu1 %v17586_v3  ;;  %v16894_v45 = vunpack.c.l.s8.bf16 %v1870_v54  ;;  %v17614_v3 = vunpack.c.l.s8.bf16 %v1872_v12 }
 0x3be   : > { %16869 = vmatpush1.bf16.msra.mxu0 %v16868_v48  ;;  %17589 = vmatpush1.bf16.msra.mxu1 %v17588_v22  ;;  %v22298_v48 = vrot.slane %v7853_v15, %v21899_v55  ;;  %v16896_v22 = vunpack.c.l.s8.bf16 %v1869_v6  ;;  %v1895_v15 = vld [vmem:[%s21272_s25 + $0x12d0] sm:$0xff] }
 0x3bf   : > { %16871 = vmatprep.subr.bf16.mxu0 %v16870_v50  ;;  %17591 = vmatprep.subr.bf16.mxu1 %v17590_v24  ;;  %v17616_v50 = vunpack.c.l.s8.bf16 %v1871_v39  ;;  %v17618_v24 = vunpack.c.h.s8.bf16 %v1872_v12  ;;  %v1893_v12 = vld [vmem:[%s21272_s25 + $0x12c0] sm:$0xff] }
 0x3c2   : > { %16873 = vmatpush1.bf16.msra.mxu0 %v16872_v36  ;;  %17593 = vmatpush1.bf16.msra.mxu1 %v17592_v26  ;;  %v22304_v36 = vcombine.high %v22298_v48, %v22298_v48  ;;  %v16900_v26 = vunpack.c.h.s8.bf16 %v1869_v6  ;;  %v1902_v6 = vld [vmem:[%s21272_s25 + $0x1308] sm:$0xff] }
 0x3c3   : > { %16875 = vmatprep.subr.bf16.mxu0 %v16874_v57  ;;  %17595 = vmatprep.subr.bf16.mxu1 %v17594_v59  ;;  %v17620_v57 = vunpack.c.h.s8.bf16 %v1871_v39  ;;  %v16902_v59 = vunpack.c.l.s8.bf16 %v1878_v63  ;;  %v1904_v39 = vld [vmem:[%s21272_s25 + $0x1318] sm:$0xff] }
 0x3c6   : > { %16877 = vmatpush1.bf16.msra.mxu0 %v16876_v11  ;;  %17597 = vmatpush1.bf16.msra.mxu1 %v17596_v19  ;;  %v1879_v11 = vld [vmem:[%s21272_s25 + $0x1250] sm:$0xff]  ;;  %v16904_v19 = vunpack.c.l.s8.bf16 %v1877_v42 }
 0x3c7   : > { %16879 = vmatprep.subr.bf16.mxu0 %v16878_v25  ;;  %17599 = vmatprep.subr.bf16.mxu1 %v17598_v9  ;;  %v17624_v25 = vunpack.c.l.s8.bf16 %v1879_v11  ;;  %v16906_v9 = vunpack.c.h.s8.bf16 %v1878_v63  ;;  %v1901_v63 = vld [vmem:[%s21272_s25 + $0x1300] sm:$0xff] }
 0x3ca   : > { %16881 = vmatpush1.bf16.msra.mxu0 %v16880_v56  ;;  %17601 = vmatpush1.bf16.msra.mxu1 %v17600_v4  ;;  %v1888_v56 = vld [vmem:[%s21272_s25 + $0x1298] sm:$0xff]  ;;  %v16908_v4 = vunpack.c.h.s8.bf16 %v1877_v42  ;;  %v1910_v42 = vld [vmem:[%s21272_s25 + $0x1348] sm:$0xff] }
 0x3cb   : > { %16883 = vmatprep.subr.bf16.mxu0 %v16882_v44  ;;  %17603 = vmatprep.subr.bf16.mxu1 %v17602_v7  ;;  %v17628_v44 = vunpack.c.h.s8.bf16 %v1879_v11  ;;  %v16910_v7 = vunpack.c.l.s8.bf16 %v1886_v28  ;;  %v17630_v52 = vunpack.c.l.s8.bf16 %v1888_v56  ;;  %v17634_v5 = vunpack.c.h.s8.bf16 %v1888_v56  ;;  %v1912_v11 = vld [vmem:[%s21272_s25 + $0x1358] sm:$0xff]  ;;  %v1911_v56 = vld [vmem:[%s21272_s25 + $0x1350] sm:$0xff] }
 0x3ce   : > { %16885 = vmatpush1.bf16.msra.mxu0 %v16884_v18  ;;  %17605 = vmatpush1.bf16.msra.mxu1 %v17604_v31  ;;  %v1887_v18 = vld [vmem:[%s21272_s25 + $0x1290] sm:$0xff]  ;;  %v16912_v31 = vunpack.c.l.s8.bf16 %v1885_v60 }
 0x3cf   : > { %16887 = vmatprep.subr.bf16.mxu0 %v16886_v38  ;;  %17607 = vmatprep.subr.bf16.mxu1 %v17606_v20  ;;  %v17632_v38 = vunpack.c.l.s8.bf16 %v1887_v18  ;;  %v16914_v20 = vunpack.c.h.s8.bf16 %v1886_v28  ;;  %v1909_v28 = vld [vmem:[%s21272_s25 + $0x1340] sm:$0xff] }
 0x3d2   : > { %16889 = vmatpush1.bf16.msra.mxu0 %v16888_v30  ;;  %17609 = vmatpush1.bf16.msra.mxu1 %v17608_v10  ;;  %v1896_v30 = vld [vmem:[%s21272_s25 + $0x12d8] sm:$0xff]  ;;  %v16916_v10 = vunpack.c.h.s8.bf16 %v1885_v60  ;;  %v1918_v60 = vld [vmem:[%s21272_s25 + $0x1388] sm:$0xff] }
 0x3d3   : > { %16891 = vmatprep.subr.bf16.mxu0 %v16890_v62  ;;  %17611 = vmatprep.subr.bf16.mxu1 %v17610_v46  ;;  %v17636_v62 = vunpack.c.h.s8.bf16 %v1887_v18  ;;  %v16918_v46 = vunpack.c.l.s8.bf16 %v1894_v16  ;;  %v17638_v54 = vunpack.c.l.s8.bf16 %v1896_v30  ;;  %v1920_v18 = vld [vmem:[%s21272_s25 + $0x1398] sm:$0xff] }
 0x3d6   : > { %16893 = vmatpush1.bf16.msra.mxu0 %v16892_v1  ;;  %17613 = vmatpush1.bf16.msra.mxu1 %v17612_v51  ;;  %v16920_v1 = vunpack.c.l.s8.bf16 %v1893_v12  ;;  %v17640_v51 = vunpack.c.l.s8.bf16 %v1895_v15 }
 0x3d7   : > { %16895 = vmatprep.subr.bf16.mxu0 %v16894_v45  ;;  %17615 = vmatprep.subr.bf16.mxu1 %v17614_v3  ;;  %v16922_v45 = vunpack.c.h.s8.bf16 %v1894_v16  ;;  %v17642_v3 = vunpack.c.h.s8.bf16 %v1896_v30  ;;  %v1917_v16 = vld [vmem:[%s21272_s25 + $0x1380] sm:$0xff]  ;;  %v1919_v30 = vld [vmem:[%s21272_s25 + $0x1390] sm:$0xff] }
 0x3d9   : > { %8544 = vmatmul.mubr.f32.vlgmr.msra.gmra.mrb[0].mxu0 %v22253_v29  ;;  %9396 = vmatmul.mubr.f32.vlgmr.msra.gmra.mrb[0].mxu1 %v22253_v29 }
 0x3da   : > { %16897 = vmatpush1.bf16.msra.mxu0 %v16896_v22  ;;  %17617 = vmatpush1.bf16.msra.mxu1 %v17616_v50  ;;  %v16924_v22 = vunpack.c.h.s8.bf16 %v1893_v12  ;;  %v17644_v50 = vunpack.c.h.s8.bf16 %v1895_v15  ;;  %v1926_v12 = vld [vmem:[%s21272_s25 + $0x13c8] sm:$0xff]  ;;  %v1928_v15 = vld [vmem:[%s21272_s25 + $0x13d8] sm:$0xff] }
 0x3db   : > { %16899 = vmatprep.subr.bf16.mxu0 %v16898_v33  ;;  %17619 = vmatprep.subr.bf16.mxu1 %v17618_v24  ;;  %v16926_v33 = vunpack.c.l.s8.bf16 %v1902_v6  ;;  %v17646_v24 = vunpack.c.l.s8.bf16 %v1904_v39 }
 0x3dc   : > { %8614 = vmatprep.mubr.f32.mxu0 %v22304_v36  ;;  %9466 = vmatprep.mubr.f32.mxu1 %v22304_v36 }
 0x3de   : > { %16901 = vmatpush1.bf16.msra.mxu0 %v16900_v26  ;;  %17621 = vmatpush1.bf16.msra.mxu1 %v17620_v57  ;;  %v16928_v26 = vunpack.c.l.s8.bf16 %v1901_v63  ;;  %v17648_v57 = vunpack.c.l.s8.bf16 %v1903_v23 }
 0x3df   : > { %16903 = vmatprep.subr.bf16.mxu0 %v16902_v59  ;;  %17623 = vmatprep.subr.bf16.mxu1 %v17622_v35  ;;  %v16930_v59 = vunpack.c.h.s8.bf16 %v1902_v6  ;;  %v17650_v35 = vunpack.c.h.s8.bf16 %v1904_v39  ;;  %v1925_v6 = vld [vmem:[%s21272_s25 + $0x13c0] sm:$0xff]  ;;  %v1927_v39 = vld [vmem:[%s21272_s25 + $0x13d0] sm:$0xff] }
 0x3e2   : > { %16905 = vmatpush1.bf16.msra.mxu0 %v16904_v19  ;;  %17625 = vmatpush1.bf16.msra.mxu1 %v17624_v25  ;;  %v16932_v19 = vunpack.c.h.s8.bf16 %v1901_v63  ;;  %v17652_v25 = vunpack.c.h.s8.bf16 %v1903_v23  ;;  %v1934_v63 = vld [vmem:[%s21272_s25 + $0x1408] sm:$0xff]  ;;  %v1936_v23 = vld [vmem:[%s21272_s25 + $0x1418] sm:$0xff] }
 0x3e3   : > { %16907 = vmatprep.subr.bf16.mxu0 %v16906_v9  ;;  %17627 = vmatprep.subr.bf16.mxu1 %v17626_v27  ;;  %v16934_v9 = vunpack.c.l.s8.bf16 %v1910_v42  ;;  %v17654_v27 = vunpack.c.l.s8.bf16 %v1912_v11 }
 0x3e6   : > { %16909 = vmatpush1.bf16.msra.mxu0 %v16908_v4  ;;  %17629 = vmatpush1.bf16.msra.mxu1 %v17628_v44  ;;  %v16936_v4 = vunpack.c.l.s8.bf16 %v1909_v28  ;;  %v17656_v44 = vunpack.c.l.s8.bf16 %v1911_v56 }
 0x3e7   : > { %16911 = vmatprep.subr.bf16.mxu0 %v16910_v7  ;;  %17631 = vmatprep.subr.bf16.mxu1 %v17630_v52  ;;  %v16938_v7 = vunpack.c.h.s8.bf16 %v1910_v42  ;;  %v17658_v52 = vunpack.c.h.s8.bf16 %v1912_v11  ;;  %v17678_v42 = vunpack.c.l.s8.bf16 %v1936_v23  ;;  %v1933_v11 = vld [vmem:[%s21272_s25 + $0x1400] sm:$0xff] }
 0x3ea   : > { %16913 = vmatpush1.bf16.msra.mxu0 %v16912_v31  ;;  %17633 = vmatpush1.bf16.msra.mxu1 %v17632_v38  ;;  %v16940_v31 = vunpack.c.h.s8.bf16 %v1909_v28  ;;  %v17660_v38 = vunpack.c.h.s8.bf16 %v1911_v56  ;;  %v16962_v28 = vunpack.c.h.s8.bf16 %v1934_v63  ;;  %v17682_v56 = vunpack.c.h.s8.bf16 %v1936_v23 }
 0x3eb   : > { %16915 = vmatprep.subr.bf16.mxu0 %v16914_v20  ;;  %17635 = vmatprep.subr.bf16.mxu1 %v17634_v5  ;;  %v16942_v20 = vunpack.c.l.s8.bf16 %v1918_v60  ;;  %v17662_v5 = vunpack.c.l.s8.bf16 %v1920_v18 }
 0x3ee   : > { %16917 = vmatpush1.bf16.msra.mxu0 %v16916_v10  ;;  %17637 = vmatpush1.bf16.msra.mxu1 %v17636_v62  ;;  %v16944_v10 = vunpack.c.l.s8.bf16 %v1917_v16  ;;  %v17664_v62 = vunpack.c.l.s8.bf16 %v1919_v30 }
 0x3ef   : > { %16919 = vmatprep.subr.bf16.mxu0 %v16918_v46  ;;  %17639 = vmatprep.subr.bf16.mxu1 %v17638_v54  ;;  %v16946_v46 = vunpack.c.h.s8.bf16 %v1918_v60  ;;  %v17666_v54 = vunpack.c.h.s8.bf16 %v1920_v18 }
 0x3f2   : > { %16921 = vmatpush1.bf16.msra.mxu0 %v16920_v1  ;;  %17641 = vmatpush1.bf16.msra.mxu1 %v17640_v51  ;;  %v16948_v1 = vunpack.c.h.s8.bf16 %v1917_v16  ;;  %v17668_v51 = vunpack.c.h.s8.bf16 %v1919_v30 }
 0x3f3   : > { %16923 = vmatprep.subr.bf16.mxu0 %v16922_v45  ;;  %17643 = vmatprep.subr.bf16.mxu1 %v17642_v3  ;;  %v16950_v45 = vunpack.c.l.s8.bf16 %v1926_v12  ;;  %v17670_v3 = vunpack.c.l.s8.bf16 %v1928_v15 }
 0x3f6   : > { %16925 = vmatpush1.bf16.msra.mxu0 %v16924_v22  ;;  %17645 = vmatpush1.bf16.msra.mxu1 %v17644_v50  ;;  %v16952_v22 = vunpack.c.l.s8.bf16 %v1925_v6  ;;  %v17672_v50 = vunpack.c.l.s8.bf16 %v1927_v39 }
 0x3f7   : > { %16927 = vmatprep.subr.bf16.mxu0 %v16926_v33  ;;  %17647 = vmatprep.subr.bf16.mxu1 %v17646_v24  ;;  %v16954_v33 = vunpack.c.h.s8.bf16 %v1926_v12  ;;  %v17674_v24 = vunpack.c.h.s8.bf16 %v1928_v15 }
 0x3fa   : > { %16929 = vmatpush1.bf16.msra.mxu0 %v16928_v26  ;;  %17649 = vmatpush1.bf16.msra.mxu1 %v17648_v57  ;;  %v22338_v26 = vld [vmem:[#allocation2 + $0x28] sm:$0x3f]  ;;  %v16956_v57 = vunpack.c.h.s8.bf16 %v1925_v6 }
 0x3fb   : > { %16931 = vmatprep.subr.bf16.mxu0 %v16930_v59  ;;  %17651 = vmatprep.subr.bf16.mxu1 %v17650_v35  ;;  %v17676_v59 = vunpack.c.h.s8.bf16 %v1927_v39  ;;  %v16958_v35 = vunpack.c.l.s8.bf16 %v1934_v63 }
 0x3fe   : > { %16933 = vmatpush1.bf16.msra.mxu0 %v16932_v19  ;;  %17653 = vmatpush1.bf16.msra.mxu1 %v17652_v25  ;;  %v1935_v19 = vld [vmem:[%s21272_s25 + $0x1410] sm:$0xff]  ;;  %v22344_v25 = vrot.slane %v22338_v26, %v21899_v55 }
 0x3ff   : > { %16935 = vmatprep.subr.bf16.mxu0 %v16934_v9  ;;  %17655 = vmatprep.subr.bf16.mxu1 %v17654_v27  ;;  %v16960_v9 = vunpack.c.l.s8.bf16 %v1933_v11  ;;  %v17680_v27 = vunpack.c.l.s8.bf16 %v1935_v19  ;;  %v17684_v60 = vunpack.c.h.s8.bf16 %v1935_v19 }
 0x402   : > { %16937 = vmatpush1.bf16.msra.mxu0 %v16936_v4  ;;  %17657 = vmatpush1.bf16.msra.mxu1 %v17656_v44  ;;  %v1942_v4 = vld [vmem:[%s21272_s25 + $0x1448] sm:$0xff]  ;;  %v1944_v44 = vld [vmem:[%s21272_s25 + $0x1458] sm:$0xff] }
 0x403   : > { %16939 = vmatprep.subr.bf16.mxu0 %v16938_v7  ;;  %17659 = vmatprep.subr.bf16.mxu1 %v17658_v52  ;;  %v22350_v7 = vcombine.high %v22344_v25, %v22344_v25  ;;  %v16964_v52 = vunpack.c.h.s8.bf16 %v1933_v11  ;;  %v16966_v18 = vunpack.c.l.s8.bf16 %v1942_v4  ;;  %v16970_v30 = vunpack.c.h.s8.bf16 %v1942_v4 }
 0x406   : > { %16941 = vmatpush1.bf16.msra.mxu0 %v16940_v31  ;;  %17661 = vmatpush1.bf16.msra.mxu1 %v17660_v38  ;;  %v17686_v31 = vunpack.c.l.s8.bf16 %v1944_v44  ;;  %v1941_v38 = vld [vmem:[%s21272_s25 + $0x1440] sm:$0xff] }
 0x407   : > { %16943 = vmatprep.subr.bf16.mxu0 %v16942_v20  ;;  %17663 = vmatprep.subr.bf16.mxu1 %v17662_v5  ;;  %v1943_v20 = vld [vmem:[%s21272_s25 + $0x1450] sm:$0xff]  ;;  %v16968_v5 = vunpack.c.l.s8.bf16 %v1941_v38 }
 0x408   : > { %v17688_v16 = vunpack.c.l.s8.bf16 %v1943_v20  ;;  %v17692_v12 = vunpack.c.h.s8.bf16 %v1943_v20 }
 0x40a   : > { %16945 = vmatpush1.bf16.msra.mxu0 %v16944_v10  ;;  %17665 = vmatpush1.bf16.msra.mxu1 %v17664_v62  ;;  %v17690_v10 = vunpack.c.h.s8.bf16 %v1944_v44  ;;  %v1950_v62 = vld [vmem:[%s21272_s25 + $0x1488] sm:$0xff] }
 0x40b   : > { %16947 = vmatprep.subr.bf16.mxu0 %v16946_v46  ;;  %17667 = vmatprep.subr.bf16.mxu1 %v17666_v54  ;;  %v1952_v46 = vld [vmem:[%s21272_s25 + $0x1498] sm:$0xff]  ;;  %v16972_v54 = vunpack.c.h.s8.bf16 %v1941_v38  ;;  %v16974_v15 = vunpack.c.l.s8.bf16 %v1950_v62  ;;  %v16978_v39 = vunpack.c.h.s8.bf16 %v1950_v62 }
 0x40e   : > { %16949 = vmatpush1.bf16.msra.mxu0 %v16948_v1  ;;  %17669 = vmatpush1.bf16.msra.mxu1 %v17668_v51  ;;  %v17694_v1 = vunpack.c.l.s8.bf16 %v1952_v46  ;;  %v1949_v51 = vld [vmem:[%s21272_s25 + $0x1480] sm:$0xff] }
 0x40f   : > { %16951 = vmatprep.subr.bf16.mxu0 %v16950_v45  ;;  %17671 = vmatprep.subr.bf16.mxu1 %v17670_v3  ;;  %v1951_v45 = vld [vmem:[%s21272_s25 + $0x1490] sm:$0xff]  ;;  %v16976_v3 = vunpack.c.l.s8.bf16 %v1949_v51 }
 0x410   : > { %v17696_v6 = vunpack.c.l.s8.bf16 %v1951_v45  ;;  %v17700_v63 = vunpack.c.h.s8.bf16 %v1951_v45 }
 0x412   : > { %16953 = vmatpush1.bf16.msra.mxu0 %v16952_v22  ;;  %17673 = vmatpush1.bf16.msra.mxu1 %v17672_v50  ;;  %v17698_v22 = vunpack.c.h.s8.bf16 %v1952_v46  ;;  %v1958_v50 = vld [vmem:[%s21272_s25 + $0x14c8] sm:$0xff] }
 0x413   : > { %16955 = vmatprep.subr.bf16.mxu0 %v16954_v33  ;;  %17675 = vmatprep.subr.bf16.mxu1 %v17674_v24  ;;  %v1960_v33 = vld [vmem:[%s21272_s25 + $0x14d8] sm:$0xff]  ;;  %v16980_v24 = vunpack.c.h.s8.bf16 %v1949_v51  ;;  %v16982_v23 = vunpack.c.l.s8.bf16 %v1958_v50  ;;  %v16986_v19 = vunpack.c.h.s8.bf16 %v1958_v50 }
 0x416   : > { %16957 = vmatpush1.bf16.msra.mxu0 %v16956_v57  ;;  %17677 = vmatpush1.bf16.msra.mxu1 %v17676_v59  ;;  %v17702_v57 = vunpack.c.l.s8.bf16 %v1960_v33  ;;  %v1957_v59 = vld [vmem:[%s21272_s25 + $0x14c0] sm:$0xff] }
 0x417   : > { %16959 = vmatprep.subr.bf16.mxu0 %v16958_v35  ;;  %17679 = vmatprep.subr.bf16.mxu1 %v17678_v42  ;;  %v1959_v35 = vld [vmem:[%s21272_s25 + $0x14d0] sm:$0xff]  ;;  %v16984_v42 = vunpack.c.l.s8.bf16 %v1957_v59 }
 0x418   : > { %v17704_v11 = vunpack.c.l.s8.bf16 %v1959_v35  ;;  %v17708_v4 = vunpack.c.h.s8.bf16 %v1959_v35 }
 0x419   : > { %8615 = vmatmul.mubr.f32.vlgmr.msra.gmra.mrb[0].mxu0 %v22298_v48  ;;  %9467 = vmatmul.mubr.f32.vlgmr.msra.gmra.mrb[0].mxu1 %v22298_v48 }
 0x41a   : > { %16961 = vmatpush1.bf16.msra.mxu0 %v16960_v9  ;;  %17681 = vmatpush1.bf16.msra.mxu1 %v17680_v27  ;;  %v17706_v9 = vunpack.c.h.s8.bf16 %v1960_v33  ;;  %v1966_v27 = vld [vmem:[%s21272_s25 + $0x1508] sm:$0xff] }
 0x41b   : > { %16963 = vmatprep.subr.bf16.mxu0 %v16962_v28  ;;  %17683 = vmatprep.subr.bf16.mxu1 %v17682_v56  ;;  %v1968_v28 = vld [vmem:[%s21272_s25 + $0x1518] sm:$0xff]  ;;  %v16988_v56 = vunpack.c.h.s8.bf16 %v1957_v59  ;;  %v16990_v44 = vunpack.c.l.s8.bf16 %v1966_v27  ;;  %v16994_v20 = vunpack.c.h.s8.bf16 %v1966_v27 }
 0x41c   : > { %8685 = vmatprep.mubr.f32.mxu0 %v22350_v7  ;;  %9537 = vmatprep.mubr.f32.mxu1 %v22350_v7 }
 0x41e   : > { %16965 = vmatpush1.bf16.msra.mxu0 %v16964_v52  ;;  %17685 = vmatpush1.bf16.msra.mxu1 %v17684_v60  ;;  %v17710_v52 = vunpack.c.l.s8.bf16 %v1968_v28  ;;  %v1965_v60 = vld [vmem:[%s21272_s25 + $0x1500] sm:$0xff] }
 0x41f   : > { %16967 = vmatprep.subr.bf16.mxu0 %v16966_v18  ;;  %17687 = vmatprep.subr.bf16.mxu1 %v17686_v31  ;;  %v1967_v18 = vld [vmem:[%s21272_s25 + $0x1510] sm:$0xff]  ;;  %v16992_v31 = vunpack.c.l.s8.bf16 %v1965_v60 }
 0x420   : > { %v17712_v38 = vunpack.c.l.s8.bf16 %v1967_v18  ;;  %v17716_v62 = vunpack.c.h.s8.bf16 %v1967_v18 }
 0x422   : > { %16969 = vmatpush1.bf16.msra.mxu0 %v16968_v5  ;;  %17689 = vmatpush1.bf16.msra.mxu1 %v17688_v16  ;;  %v17714_v5 = vunpack.c.h.s8.bf16 %v1968_v28  ;;  %v1974_v16 = vld [vmem:[%s21272_s25 + $0x1548] sm:$0xff] }
 0x423   : > { %16971 = vmatprep.subr.bf16.mxu0 %v16970_v30  ;;  %17691 = vmatprep.subr.bf16.mxu1 %v17690_v10  ;;  %v1976_v30 = vld [vmem:[%s21272_s25 + $0x1558] sm:$0xff]  ;;  %v16996_v10 = vunpack.c.h.s8.bf16 %v1965_v60  ;;  %v16998_v46 = vunpack.c.l.s8.bf16 %v1974_v16  ;;  %v17002_v45 = vunpack.c.h.s8.bf16 %v1974_v16 }
 0x426   : > { %16973 = vmatpush1.bf16.msra.mxu0 %v16972_v54  ;;  %17693 = vmatpush1.bf16.msra.mxu1 %v17692_v12  ;;  %v17718_v54 = vunpack.c.l.s8.bf16 %v1976_v30  ;;  %v1973_v12 = vld [vmem:[%s21272_s25 + $0x1540] sm:$0xff] }
 0x427   : > { %16975 = vmatprep.subr.bf16.mxu0 %v16974_v15  ;;  %17695 = vmatprep.subr.bf16.mxu1 %v17694_v1  ;;  %v1975_v15 = vld [vmem:[%s21272_s25 + $0x1550] sm:$0xff]  ;;  %v17000_v1 = vunpack.c.l.s8.bf16 %v1973_v12 }
 0x428   : > { %v17720_v51 = vunpack.c.l.s8.bf16 %v1975_v15  ;;  %v17724_v50 = vunpack.c.h.s8.bf16 %v1975_v15 }
 0x42a   : > { %16977 = vmatpush1.bf16.msra.mxu0 %v16976_v3  ;;  %17697 = vmatpush1.bf16.msra.mxu1 %v17696_v6  ;;  %v17722_v3 = vunpack.c.h.s8.bf16 %v1976_v30  ;;  %v1982_v6 = vld [vmem:[%s21272_s25 + $0x1588] sm:$0xff] }
 0x42b   : > { %16979 = vmatprep.subr.bf16.mxu0 %v16978_v39  ;;  %17699 = vmatprep.subr.bf16.mxu1 %v17698_v22  ;;  %v1984_v39 = vld [vmem:[%s21272_s25 + $0x1598] sm:$0xff]  ;;  %v17004_v22 = vunpack.c.h.s8.bf16 %v1973_v12  ;;  %v17006_v33 = vunpack.c.l.s8.bf16 %v1982_v6  ;;  %v17010_v35 = vunpack.c.h.s8.bf16 %v1982_v6 }
 0x42e   : > { %16981 = vmatpush1.bf16.msra.mxu0 %v16980_v24  ;;  %17701 = vmatpush1.bf16.msra.mxu1 %v17700_v63  ;;  %v17726_v24 = vunpack.c.l.s8.bf16 %v1984_v39  ;;  %v1981_v63 = vld [vmem:[%s21272_s25 + $0x1580] sm:$0xff] }
 0x42f   : > { %16983 = vmatprep.subr.bf16.mxu0 %v16982_v23  ;;  %17703 = vmatprep.subr.bf16.mxu1 %v17702_v57  ;;  %v1983_v23 = vld [vmem:[%s21272_s25 + $0x1590] sm:$0xff]  ;;  %v17008_v57 = vunpack.c.l.s8.bf16 %v1981_v63 }
 0x430   : > { %v17728_v59 = vunpack.c.l.s8.bf16 %v1983_v23  ;;  %v17732_v27 = vunpack.c.h.s8.bf16 %v1983_v23 }
 0x432   : > { %16985 = vmatpush1.bf16.msra.mxu0 %v16984_v42  ;;  %17705 = vmatpush1.bf16.msra.mxu1 %v17704_v11  ;;  %v17730_v42 = vunpack.c.h.s8.bf16 %v1984_v39  ;;  %v1990_v11 = vld [vmem:[%s21272_s25 + $0x15c8] sm:$0xff] }
 0x433   : > { %16987 = vmatprep.subr.bf16.mxu0 %v16986_v19  ;;  %17707 = vmatprep.subr.bf16.mxu1 %v17706_v9  ;;  %v1992_v19 = vld [vmem:[%s21272_s25 + $0x15d8] sm:$0xff]  ;;  %v17012_v9 = vunpack.c.h.s8.bf16 %v1981_v63  ;;  %v17014_v28 = vunpack.c.l.s8.bf16 %v1990_v11  ;;  %v17018_v18 = vunpack.c.h.s8.bf16 %v1990_v11  ;;  %v7870_v11 = vcombine.high %v22338_v26, %v22338_v26 }
 0x436   : > { %16989 = vmatpush1.bf16.msra.mxu0 %v16988_v56  ;;  %17709 = vmatpush1.bf16.msra.mxu1 %v17708_v4  ;;  %v17734_v56 = vunpack.c.l.s8.bf16 %v1992_v19  ;;  %v1989_v4 = vld [vmem:[%s21272_s25 + $0x15c0] sm:$0xff] }
 0x437   : > { %16991 = vmatprep.subr.bf16.mxu0 %v16990_v44  ;;  %17711 = vmatprep.subr.bf16.mxu1 %v17710_v52  ;;  %v1991_v44 = vld [vmem:[%s21272_s25 + $0x15d0] sm:$0xff]  ;;  %v17016_v52 = vunpack.c.l.s8.bf16 %v1989_v4 }
 0x438   : > { %v17736_v60 = vunpack.c.l.s8.bf16 %v1991_v44  ;;  %v17740_v16 = vunpack.c.h.s8.bf16 %v1991_v44  ;;  %v22401_v44 = vrot.slane %v7870_v11, %v21899_v55 }
 0x43a   : > { %16993 = vmatpush1.bf16.msra.mxu0 %v16992_v31  ;;  %17713 = vmatpush1.bf16.msra.mxu1 %v17712_v38  ;;  %v17738_v31 = vunpack.c.h.s8.bf16 %v1992_v19  ;;  %v1998_v38 = vld [vmem:[%s21272_s25 + $0x1608] sm:$0xff] }
 0x43b   : > { %16995 = vmatprep.subr.bf16.mxu0 %v16994_v20  ;;  %17715 = vmatprep.subr.bf16.mxu1 %v17714_v5  ;;  %v2000_v20 = vld [vmem:[%s21272_s25 + $0x1618] sm:$0xff]  ;;  %v17020_v5 = vunpack.c.h.s8.bf16 %v1989_v4  ;;  %v17022_v30 = vunpack.c.l.s8.bf16 %v1998_v38  ;;  %v17026_v15 = vunpack.c.h.s8.bf16 %v1998_v38  ;;  %v1299_v4 = vld [vmem:[%s21272_s25 + $0x30] sm:$0xff] }
 0x43c   : > { %v18480_v26 = vunpack.c.l.s8.bf16 %v1299_v4  ;;  %v1308_v38 = vld [vmem:[%s21272_s25 + $0x78] sm:$0xff] }
 0x43e   : > { %16997 = vmatpush1.bf16.msra.mxu0 %v16996_v10  ;;  %17717 = vmatpush1.bf16.msra.mxu1 %v17716_v62  ;;  %v17742_v10 = vunpack.c.l.s8.bf16 %v2000_v20  ;;  %v1997_v62 = vld [vmem:[%s21272_s25 + $0x1600] sm:$0xff] }
 0x43f   : > { %16999 = vmatprep.subr.bf16.mxu0 %v16998_v46  ;;  %17719 = vmatprep.subr.bf16.mxu1 %v17718_v54  ;;  %v1999_v46 = vld [vmem:[%s21272_s25 + $0x1610] sm:$0xff]  ;;  %v17024_v54 = vunpack.c.l.s8.bf16 %v1997_v62 }
 0x440   : > { %v17744_v12 = vunpack.c.l.s8.bf16 %v1999_v46  ;;  %v17748_v6 = vunpack.c.h.s8.bf16 %v1999_v46 }
 0x442   : > { %17001 = vmatpush1.bf16.msra.mxu0 %v17000_v1  ;;  %17721 = vmatpush1.bf16.msra.mxu1 %v17720_v51  ;;  %v17746_v1 = vunpack.c.h.s8.bf16 %v2000_v20  ;;  %v2006_v51 = vld [vmem:[%s21272_s25 + $0x1648] sm:$0xff] }
 0x443   : > { %17003 = vmatprep.subr.bf16.mxu0 %v17002_v45  ;;  %17723 = vmatprep.subr.bf16.mxu1 %v17722_v3  ;;  %v2008_v45 = vld [vmem:[%s21272_s25 + $0x1658] sm:$0xff]  ;;  %v17028_v3 = vunpack.c.h.s8.bf16 %v1997_v62  ;;  %v17030_v39 = vunpack.c.l.s8.bf16 %v2006_v51  ;;  %v1307_v62 = vld [vmem:[%s21272_s25 + $0x70] sm:$0xff] }
 0x446   : > { %17005 = vmatpush1.bf16.msra.mxu0 %v17004_v22  ;;  %17725 = vmatpush1.bf16.msra.mxu1 %v17724_v50  ;;  %v17750_v22 = vunpack.c.l.s8.bf16 %v2008_v45  ;;  %v2005_v50 = vld [vmem:[%s21272_s25 + $0x1640] sm:$0xff] }
 0x447   : > { %17007 = vmatprep.subr.bf16.mxu0 %v17006_v33  ;;  %17727 = vmatprep.subr.bf16.mxu1 %v17726_v24  ;;  %v2007_v33 = vld [vmem:[%s21272_s25 + $0x1650] sm:$0xff]  ;;  %v20914_v24 = vmov 0.0   ;;  %v17032_v63 = vunpack.c.l.s8.bf16 %v2005_v50  ;;  %v17036_v19 = vunpack.c.h.s8.bf16 %v2005_v50 }
 0x448   : > { %v17752_v23 = vunpack.c.l.s8.bf16 %v2007_v33 }
 0x44a   : > { %17009 = vmatpush1.bf16.msra.mxu0 %v17008_v57  ;;  %17729 = vmatpush1.bf16.msra.mxu1 %v17728_v59  ;;  %v17034_v57 = vunpack.c.h.s8.bf16 %v2006_v51  ;;  %v17754_v59 = vunpack.c.h.s8.bf16 %v2008_v45  ;;  %v1316_v51 = vld [vmem:[%s21272_s25 + $0xb8] sm:$0xff] }
 0x44b   : > { %17011 = vmatprep.subr.bf16.mxu0 %v17010_v35  ;;  %17731 = vmatprep.subr.bf16.mxu1 %v17730_v42  ;;  %v1298_v35 = vld [vmem:[%s21272_s25 + $0x28] sm:$0xff]  ;;  %v1300_v42 = vld [vmem:[%s21272_s25 + $0x38] sm:$0xff] }
 0x44e   : > { %17013 = vmatpush1.bf16.msra.mxu0 %v17012_v9  ;;  %17733 = vmatpush1.bf16.msra.mxu1 %v17732_v27  ;;  %v17756_v9 = vunpack.c.h.s8.bf16 %v2007_v33  ;;  %v17758_v27 = vunpack.c.l.s8.bf16 %v1298_v35 }
 0x44f   : > { %17015 = vmatprep.subr.bf16.mxu0 %v17014_v28  ;;  %17735 = vmatprep.subr.bf16.mxu1 %v17734_v56  ;;  %v18478_v28 = vunpack.c.l.s8.bf16 %v1300_v42  ;;  %v1297_v56 = vld [vmem:[%s21272_s25 + $0x20] sm:$0xff] }
 0x450   : > { %v17764_v20 = vunpack.c.h.s8.bf16 %v1297_v56 }
 0x452   : > { %17017 = vmatpush1.bf16.msra.mxu0 %v17016_v52  ;;  %17737 = vmatpush1.bf16.msra.mxu1 %v17736_v60  ;;  %v17760_v52 = vunpack.c.l.s8.bf16 %v1297_v56  ;;  %v17762_v60 = vunpack.c.h.s8.bf16 %v1298_v35 }
 0x453   : > { %17019 = vmatprep.subr.bf16.mxu0 %v17018_v18  ;;  %17739 = vmatprep.subr.bf16.mxu1 %v17738_v31  ;;  %v18482_v18 = vunpack.c.h.s8.bf16 %v1300_v42  ;;  %v1306_v31 = vld [vmem:[%s21272_s25 + $0x68] sm:$0xff] }
 0x456   : > { %17021 = vmatpush1.bf16.msra.mxu0 %v17020_v5  ;;  %17741 = vmatpush1.bf16.msra.mxu1 %v17740_v16  ;;  %v18484_v5 = vunpack.c.h.s8.bf16 %v1299_v4  ;;  %v17766_v16 = vunpack.c.l.s8.bf16 %v1306_v31 }
 0x457   : > { %17023 = vmatprep.subr.bf16.mxu0 %v17022_v30  ;;  %17743 = vmatprep.subr.bf16.mxu1 %v17742_v10  ;;  %v18486_v30 = vunpack.c.l.s8.bf16 %v1308_v38  ;;  %v1305_v10 = vld [vmem:[%s21272_s25 + $0x60] sm:$0xff] }
 0x458   : > { %v17768_v46 = vunpack.c.l.s8.bf16 %v1305_v10  ;;  %v17772_v45 = vunpack.c.h.s8.bf16 %v1305_v10 }
 0x459   : > { %8686 = vmatmul.mubr.f32.vlgmr.msra.gmra.mrb[0].mxu0 %v22344_v25  ;;  %9538 = vmatmul.mubr.f32.vlgmr.msra.gmra.mrb[0].mxu1 %v22344_v25 }
 0x45a   : > { %17025 = vmatpush1.bf16.msra.mxu0 %v17024_v54  ;;  %17745 = vmatpush1.bf16.msra.mxu1 %v17744_v12  ;;  %v18488_v54 = vunpack.c.l.s8.bf16 %v1307_v62  ;;  %v17770_v12 = vunpack.c.h.s8.bf16 %v1306_v31 }
 0x45b   : > { %17027 = vmatprep.subr.bf16.mxu0 %v17026_v15  ;;  %17747 = vmatprep.subr.bf16.mxu1 %v17746_v1  ;;  %v18490_v15 = vunpack.c.h.s8.bf16 %v1308_v38  ;;  %v1314_v1 = vld [vmem:[%s21272_s25 + $0xa8] sm:$0xff] }
 0x45c   : > { %8756 = vmatprep.mubr.f32.mxu0 %v20914_v24  ;;  %9608 = vmatprep.mubr.f32.mxu1 %v20914_v24 }
 0x45e   : > { %17029 = vmatpush1.bf16.msra.mxu0 %v17028_v3  ;;  %17749 = vmatpush1.bf16.msra.mxu1 %v17748_v6  ;;  %v18492_v3 = vunpack.c.h.s8.bf16 %v1307_v62  ;;  %v18494_v6 = vunpack.c.l.s8.bf16 %v1316_v51 }
 0x45f   : > { %17031 = vmatprep.subr.bf16.mxu0 %v17030_v39  ;;  %17751 = vmatprep.subr.bf16.mxu1 %v17750_v22  ;;  %v1313_v39 = vld [vmem:[%s21272_s25 + $0xa0] sm:$0xff]  ;;  %v1315_v22 = vld [vmem:[%s21272_s25 + $0xb0] sm:$0xff] }
 0x460   : > { %v17776_v50 = vunpack.c.l.s8.bf16 %v1313_v39  ;;  %v18496_v33 = vunpack.c.l.s8.bf16 %v1315_v22  ;;  %v17780_v35 = vunpack.c.h.s8.bf16 %v1313_v39  ;;  %v18500_v42 = vunpack.c.h.s8.bf16 %v1315_v22 }
 0x462   : > { %17033 = vmatpush1.bf16.msra.mxu0 %v17032_v63  ;;  %17753 = vmatpush1.bf16.msra.mxu1 %v17752_v23  ;;  %v17778_v63 = vunpack.c.h.s8.bf16 %v1314_v1  ;;  %v18498_v23 = vunpack.c.h.s8.bf16 %v1316_v51 }
 0x463   : > { %17035 = vmatprep.subr.bf16.mxu0 %v17034_v57  ;;  %17755 = vmatprep.subr.bf16.mxu1 %v17754_v59  ;;  %v1322_v57 = vld [vmem:[%s21272_s25 + $0xe8] sm:$0xff]  ;;  %v1324_v59 = vld [vmem:[%s21272_s25 + $0xf8] sm:$0xff] }
 0x464   : > { %v17782_v11 = vunpack.c.l.s8.bf16 %v1322_v57  ;;  %v17786_v4 = vunpack.c.h.s8.bf16 %v1322_v57 }
 0x466   : > { %17037 = vmatpush1.bf16.msra.mxu0 %v17036_v19  ;;  %17757 = vmatpush1.bf16.msra.mxu1 %v17756_v9  ;;  %v18502_v19 = vunpack.c.l.s8.bf16 %v1324_v59  ;;  %v1321_v9 = vld [vmem:[%s21272_s25 + $0xe0] sm:$0xff] }
 0x467   : > { %17759 = vmatprep.subr.bf16.mxu0 %v17758_v27  ;;  %18479 = vmatprep.subr.bf16.mxu1 %v18478_v28  ;;  %v1323_v27 = vld [vmem:[%s21272_s25 + $0xf0] sm:$0xff]  ;;  %v17784_v28 = vunpack.c.l.s8.bf16 %v1321_v9 }
 0x468   : > { %v18504_v56 = vunpack.c.l.s8.bf16 %v1323_v27  ;;  %v18508_v31 = vunpack.c.h.s8.bf16 %v1323_v27 }
 0x469   : > { %15845 = vmatmul.mubr.msk.f32.vlgmr.msra.gmra.mrb[0].mxu0 %vm7908_vm10, %v22401_v44  ;;  %15846 = vmatmul.mubr.msk.f32.vlgmr.msra.gmra.mrb[0].mxu1 %vm7908_vm10, %v22401_v44 }
 0x46a   : > { %17761 = vmatpush1.bf16.msra.mxu0 %v17760_v52  ;;  %18481 = vmatpush1.bf16.msra.mxu1 %v18480_v26  ;;  %v18506_v52 = vunpack.c.h.s8.bf16 %v1324_v59  ;;  %v1330_v26 = vld [vmem:[%s21272_s25 + $0x128] sm:$0xff] }
 0x46b   : > { %17763 = vmatprep.subr.bf16.mxu0 %v17762_v60  ;;  %18483 = vmatprep.subr.bf16.mxu1 %v18482_v18  ;;  %v1332_v60 = vld [vmem:[%s21272_s25 + $0x138] sm:$0xff]  ;;  %v17788_v18 = vunpack.c.h.s8.bf16 %v1321_v9  ;;  %v17790_v38 = vunpack.c.l.s8.bf16 %v1330_v26  ;;  %v17794_v62 = vunpack.c.h.s8.bf16 %v1330_v26 }
 0x46c   : > { %9679 = vmatprep.mubr.f32.mxu0 %v21907_v13  ;;  %10531 = vmatprep.mubr.f32.mxu1 %v21907_v13  ;;  %v17774_v13 = vunpack.c.l.s8.bf16 %v1314_v1 }
 0x46e   : > { %17765 = vmatpush1.bf16.msra.mxu0 %v17764_v20  ;;  %18485 = vmatpush1.bf16.msra.mxu1 %v18484_v5  ;;  %v18510_v20 = vunpack.c.l.s8.bf16 %v1332_v60  ;;  %v1329_v5 = vld [vmem:[%s21272_s25 + $0x120] sm:$0xff] }
 0x46f   : > { %17767 = vmatprep.subr.bf16.mxu0 %v17766_v16  ;;  %18487 = vmatprep.subr.bf16.mxu1 %v18486_v30  ;;  %v1331_v16 = vld [vmem:[%s21272_s25 + $0x130] sm:$0xff]  ;;  %v17792_v30 = vunpack.c.l.s8.bf16 %v1329_v5 }
 0x470   : > { %v18512_v10 = vunpack.c.l.s8.bf16 %v1331_v16  ;;  %v18516_v1 = vunpack.c.h.s8.bf16 %v1331_v16 }
 0x472   : > { %17769 = vmatpush1.bf16.msra.mxu0 %v17768_v46  ;;  %18489 = vmatpush1.bf16.msra.mxu1 %v18488_v54  ;;  %v18514_v46 = vunpack.c.h.s8.bf16 %v1332_v60  ;;  %v1338_v54 = vld [vmem:[%s21272_s25 + $0x168] sm:$0xff] }
 0x473   : > { %17771 = vmatprep.subr.bf16.mxu0 %v17770_v12  ;;  %18491 = vmatprep.subr.bf16.mxu1 %v18490_v15  ;;  %v1340_v12 = vld [vmem:[%s21272_s25 + $0x178] sm:$0xff]  ;;  %v17796_v15 = vunpack.c.h.s8.bf16 %v1329_v5  ;;  %v17798_v51 = vunpack.c.l.s8.bf16 %v1338_v54  ;;  %v17802_v22 = vunpack.c.h.s8.bf16 %v1338_v54 }
 0x476   : > { %17773 = vmatpush1.bf16.msra.mxu0 %v17772_v45  ;;  %18493 = vmatpush1.bf16.msra.mxu1 %v18492_v3  ;;  %v18518_v45 = vunpack.c.l.s8.bf16 %v1340_v12  ;;  %v1337_v3 = vld [vmem:[%s21272_s25 + $0x160] sm:$0xff] }
 0x477   : > { %17775 = vmatprep.subr.bf16.mxu0 %v17774_v13  ;;  %18495 = vmatprep.subr.bf16.mxu1 %v18494_v6  ;;  %v1339_v13 = vld [vmem:[%s21272_s25 + $0x170] sm:$0xff]  ;;  %v17800_v6 = vunpack.c.l.s8.bf16 %v1337_v3 }
 0x478   : > { %v18520_v39 = vunpack.c.l.s8.bf16 %v1339_v13  ;;  %v18524_v57 = vunpack.c.h.s8.bf16 %v1339_v13 }
 0x47a   : > { %17777 = vmatpush1.bf16.msra.mxu0 %v17776_v50  ;;  %18497 = vmatpush1.bf16.msra.mxu1 %v18496_v33  ;;  %v18522_v50 = vunpack.c.h.s8.bf16 %v1340_v12  ;;  %v1346_v33 = vld [vmem:[%s21272_s25 + $0x1a8] sm:$0xff] }
 0x47b   : > { %17779 = vmatprep.subr.bf16.mxu0 %v17778_v63  ;;  %18499 = vmatprep.subr.bf16.mxu1 %v18498_v23  ;;  %v1348_v63 = vld [vmem:[%s21272_s25 + $0x1b8] sm:$0xff]  ;;  %v17804_v23 = vunpack.c.h.s8.bf16 %v1337_v3  ;;  %v17806_v59 = vunpack.c.l.s8.bf16 %v1346_v33  ;;  %v17810_v27 = vunpack.c.h.s8.bf16 %v1346_v33 }
 0x47e   : > { %17781 = vmatpush1.bf16.msra.mxu0 %v17780_v35  ;;  %18501 = vmatpush1.bf16.msra.mxu1 %v18500_v42  ;;  %v18526_v35 = vunpack.c.l.s8.bf16 %v1348_v63  ;;  %v1345_v42 = vld [vmem:[%s21272_s25 + $0x1a0] sm:$0xff] }
 0x47f   : > { %17783 = vmatprep.subr.bf16.mxu0 %v17782_v11  ;;  %18503 = vmatprep.subr.bf16.mxu1 %v18502_v19  ;;  %v1347_v11 = vld [vmem:[%s21272_s25 + $0x1b0] sm:$0xff]  ;;  %v17808_v19 = vunpack.c.l.s8.bf16 %v1345_v42 }
 0x480   : > { %v18528_v9 = vunpack.c.l.s8.bf16 %v1347_v11  ;;  %v18532_v26 = vunpack.c.h.s8.bf16 %v1347_v11 }
 0x482   : > { %17785 = vmatpush1.bf16.msra.mxu0 %v17784_v28  ;;  %18505 = vmatpush1.bf16.msra.mxu1 %v18504_v56  ;;  %v18530_v28 = vunpack.c.h.s8.bf16 %v1348_v63  ;;  %v1354_v56 = vld [vmem:[%s21272_s25 + $0x1e8] sm:$0xff] }
 0x483   : > { %17787 = vmatprep.subr.bf16.mxu0 %v17786_v4  ;;  %18507 = vmatprep.subr.bf16.mxu1 %v18506_v52  ;;  %v1356_v4 = vld [vmem:[%s21272_s25 + $0x1f8] sm:$0xff]  ;;  %v17812_v52 = vunpack.c.h.s8.bf16 %v1345_v42  ;;  %v17814_v60 = vunpack.c.l.s8.bf16 %v1354_v56  ;;  %v17818_v16 = vunpack.c.h.s8.bf16 %v1354_v56 }
 0x486   : > { %17789 = vmatpush1.bf16.msra.mxu0 %v17788_v18  ;;  %18509 = vmatpush1.bf16.msra.mxu1 %v18508_v31  ;;  %v18534_v18 = vunpack.c.l.s8.bf16 %v1356_v4  ;;  %v1353_v31 = vld [vmem:[%s21272_s25 + $0x1e0] sm:$0xff] }
 0x487   : > { %17791 = vmatprep.subr.bf16.mxu0 %v17790_v38  ;;  %18511 = vmatprep.subr.bf16.mxu1 %v18510_v20  ;;  %v1355_v38 = vld [vmem:[%s21272_s25 + $0x1f0] sm:$0xff]  ;;  %v17816_v20 = vunpack.c.l.s8.bf16 %v1353_v31 }
 0x488   : > { %v18536_v5 = vunpack.c.l.s8.bf16 %v1355_v38  ;;  %v18540_v54 = vunpack.c.h.s8.bf16 %v1355_v38  ;;  %v1386_v38 = vld [vmem:[%s21272_s25 + $0x2e8] sm:$0xff] }
 0x48a   : > { %17793 = vmatpush1.bf16.msra.mxu0 %v17792_v30  ;;  %18513 = vmatpush1.bf16.msra.mxu1 %v18512_v10  ;;  %v18538_v30 = vunpack.c.h.s8.bf16 %v1356_v4  ;;  %v1362_v10 = vld [vmem:[%s21272_s25 + $0x228] sm:$0xff]  ;;  %v1377_v4 = vld [vmem:[%s21272_s25 + $0x2a0] sm:$0xff] }
 0x48b   : > { %17795 = vmatprep.subr.bf16.mxu0 %v17794_v62  ;;  %18515 = vmatprep.subr.bf16.mxu1 %v18514_v46  ;;  %v1364_v62 = vld [vmem:[%s21272_s25 + $0x238] sm:$0xff]  ;;  %v17820_v46 = vunpack.c.h.s8.bf16 %v1353_v31  ;;  %v17822_v12 = vunpack.c.l.s8.bf16 %v1362_v10  ;;  %v17826_v13 = vunpack.c.h.s8.bf16 %v1362_v10 }
 0x48e   : > { %17797 = vmatpush1.bf16.msra.mxu0 %v17796_v15  ;;  %18517 = vmatpush1.bf16.msra.mxu1 %v18516_v1  ;;  %v18542_v15 = vunpack.c.l.s8.bf16 %v1364_v62  ;;  %v1361_v1 = vld [vmem:[%s21272_s25 + $0x220] sm:$0xff] }
 0x48f   : > { %17799 = vmatprep.subr.bf16.mxu0 %v17798_v51  ;;  %18519 = vmatprep.subr.bf16.mxu1 %v18518_v45  ;;  %v1363_v51 = vld [vmem:[%s21272_s25 + $0x230] sm:$0xff]  ;;  %v17824_v45 = vunpack.c.l.s8.bf16 %v1361_v1 }
 0x490   : > { %v18544_v3 = vunpack.c.l.s8.bf16 %v1363_v51  ;;  %v18548_v33 = vunpack.c.h.s8.bf16 %v1363_v51  ;;  %v1394_v51 = vld [vmem:[%s21272_s25 + $0x328] sm:$0xff] }
 0x492   : > { %17801 = vmatpush1.bf16.msra.mxu0 %v17800_v6  ;;  %18521 = vmatpush1.bf16.msra.mxu1 %v18520_v39  ;;  %v18546_v6 = vunpack.c.h.s8.bf16 %v1364_v62  ;;  %v1370_v39 = vld [vmem:[%s21272_s25 + $0x268] sm:$0xff]  ;;  %v1385_v62 = vld [vmem:[%s21272_s25 + $0x2e0] sm:$0xff] }
 0x493   : > { %17803 = vmatprep.subr.bf16.mxu0 %v17802_v22  ;;  %18523 = vmatprep.subr.bf16.mxu1 %v18522_v50  ;;  %v1372_v22 = vld [vmem:[%s21272_s25 + $0x278] sm:$0xff]  ;;  %v17828_v50 = vunpack.c.h.s8.bf16 %v1361_v1  ;;  %v17830_v63 = vunpack.c.l.s8.bf16 %v1370_v39  ;;  %v17834_v42 = vunpack.c.h.s8.bf16 %v1370_v39 }
 0x494   : > { %v18554_v11 = vunpack.c.h.s8.bf16 %v1372_v22 }
 0x496   : > { %17805 = vmatpush1.bf16.msra.mxu0 %v17804_v23  ;;  %18525 = vmatpush1.bf16.msra.mxu1 %v18524_v57  ;;  %v18550_v23 = vunpack.c.l.s8.bf16 %v1372_v22  ;;  %v1369_v57 = vld [vmem:[%s21272_s25 + $0x260] sm:$0xff] }
 0x497   : > { %17807 = vmatprep.subr.bf16.mxu0 %v17806_v59  ;;  %18527 = vmatprep.subr.bf16.mxu1 %v18526_v35  ;;  %v1371_v59 = vld [vmem:[%s21272_s25 + $0x270] sm:$0xff]  ;;  %v17832_v35 = vunpack.c.l.s8.bf16 %v1369_v57  ;;  %v1393_v22 = vld [vmem:[%s21272_s25 + $0x320] sm:$0xff] }
 0x49a   : > { %17809 = vmatpush1.bf16.msra.mxu0 %v17808_v19  ;;  %18529 = vmatpush1.bf16.msra.mxu1 %v18528_v9  ;;  %v1378_v19 = vld [vmem:[%s21272_s25 + $0x2a8] sm:$0xff]  ;;  %v1380_v9 = vld [vmem:[%s21272_s25 + $0x2b8] sm:$0xff] }
 0x49b   : > { %17811 = vmatprep.subr.bf16.mxu0 %v17810_v27  ;;  %18531 = vmatprep.subr.bf16.mxu1 %v18530_v28  ;;  %v17836_v27 = vunpack.c.h.s8.bf16 %v1369_v57  ;;  %v18556_v28 = vunpack.c.h.s8.bf16 %v1371_v59  ;;  %v18558_v56 = vunpack.c.l.s8.bf16 %v1380_v9  ;;  %v18562_v31 = vunpack.c.h.s8.bf16 %v1380_v9  ;;  %v1401_v9 = vld [vmem:[%s21272_s25 + $0x360] sm:$0xff] }
 0x49e   : > { %17813 = vmatpush1.bf16.msra.mxu0 %v17812_v52  ;;  %18533 = vmatpush1.bf16.msra.mxu1 %v18532_v26  ;;  %v1379_v52 = vld [vmem:[%s21272_s25 + $0x2b0] sm:$0xff]  ;;  %v17840_v26 = vunpack.c.l.s8.bf16 %v1377_v4 }
 0x49f   : > { %17815 = vmatprep.subr.bf16.mxu0 %v17814_v60  ;;  %18535 = vmatprep.subr.bf16.mxu1 %v18534_v18  ;;  %v18560_v60 = vunpack.c.l.s8.bf16 %v1379_v52  ;;  %v17842_v18 = vunpack.c.h.s8.bf16 %v1378_v19 }
 0x4a2   : > { %17817 = vmatpush1.bf16.msra.mxu0 %v17816_v20  ;;  %18537 = vmatpush1.bf16.msra.mxu1 %v18536_v5  ;;  %v1388_v20 = vld [vmem:[%s21272_s25 + $0x2f8] sm:$0xff]  ;;  %v17844_v5 = vunpack.c.h.s8.bf16 %v1377_v4 }
 0x4a3   : > { %17819 = vmatprep.subr.bf16.mxu0 %v17818_v16  ;;  %18539 = vmatprep.subr.bf16.mxu1 %v18538_v30  ;;  %v18564_v16 = vunpack.c.h.s8.bf16 %v1379_v52  ;;  %v17846_v30 = vunpack.c.l.s8.bf16 %v1386_v38  ;;  %v18566_v10 = vunpack.c.l.s8.bf16 %v1388_v20  ;;  %v18570_v1 = vunpack.c.h.s8.bf16 %v1388_v20  ;;  %v1410_v52 = vld [vmem:[%s21272_s25 + $0x3a8] sm:$0xff]  ;;  %v1409_v20 = vld [vmem:[%s21272_s25 + $0x3a0] sm:$0xff] }
 0x4a6   : > { %17821 = vmatpush1.bf16.msra.mxu0 %v17820_v46  ;;  %18541 = vmatpush1.bf16.msra.mxu1 %v18540_v54  ;;  %v1387_v46 = vld [vmem:[%s21272_s25 + $0x2f0] sm:$0xff]  ;;  %v17848_v54 = vunpack.c.l.s8.bf16 %v1385_v62 }
 0x4a7   : > { %17823 = vmatprep.subr.bf16.mxu0 %v17822_v12  ;;  %18543 = vmatprep.subr.bf16.mxu1 %v18542_v15  ;;  %v18568_v12 = vunpack.c.l.s8.bf16 %v1387_v46  ;;  %v17850_v15 = vunpack.c.h.s8.bf16 %v1386_v38 }
 0x4a9   : > { %9680 = vmatmul.mubr.f32.vlgmr.msra.gmra.mrb[2].mxu0 %v21903_v21  ;;  %10532 = vmatmul.mubr.f32.vlgmr.msra.gmra.mrb[2].mxu1 %v21903_v21  ;;  %v18552_v21 = vunpack.c.l.s8.bf16 %v1371_v59  ;;  %v1402_v59 = vld [vmem:[%s21272_s25 + $0x368] sm:$0xff] }
 0x4aa   : > { %17825 = vmatpush1.bf16.msra.mxu0 %v17824_v45  ;;  %18545 = vmatpush1.bf16.msra.mxu1 %v18544_v3  ;;  %v1396_v45 = vld [vmem:[%s21272_s25 + $0x338] sm:$0xff]  ;;  %v17852_v3 = vunpack.c.h.s8.bf16 %v1385_v62 }
 0x4ab   : > { %17827 = vmatprep.subr.bf16.mxu0 %v17826_v13  ;;  %18547 = vmatprep.subr.bf16.mxu1 %v18546_v6  ;;  %v18572_v13 = vunpack.c.h.s8.bf16 %v1387_v46  ;;  %v17854_v6 = vunpack.c.l.s8.bf16 %v1394_v51  ;;  %v18574_v39 = vunpack.c.l.s8.bf16 %v1396_v45  ;;  %v18578_v57 = vunpack.c.h.s8.bf16 %v1396_v45  ;;  %v1418_v46 = vld [vmem:[%s21272_s25 + $0x3e8] sm:$0xff]  ;;  %v1417_v45 = vld [vmem:[%s21272_s25 + $0x3e0] sm:$0xff] }
 0x4ac   : > { %9750 = vmatprep.mubr.f32.mxu0 %v21940_v58  ;;  %10602 = vmatprep.mubr.f32.mxu1 %v21940_v58  ;;  %v17838_v58 = vunpack.c.l.s8.bf16 %v1378_v19 }
 0x4ae   : > { %17829 = vmatpush1.bf16.msra.mxu0 %v17828_v50  ;;  %18549 = vmatpush1.bf16.msra.mxu1 %v18548_v33  ;;  %v1395_v50 = vld [vmem:[%s21272_s25 + $0x330] sm:$0xff]  ;;  %v17856_v33 = vunpack.c.l.s8.bf16 %v1393_v22 }
 0x4af   : > { %17831 = vmatprep.subr.bf16.mxu0 %v17830_v63  ;;  %18551 = vmatprep.subr.bf16.mxu1 %v18550_v23  ;;  %v18576_v63 = vunpack.c.l.s8.bf16 %v1395_v50  ;;  %v17858_v23 = vunpack.c.h.s8.bf16 %v1394_v51 }
 0x4b2   : > { %17833 = vmatpush1.bf16.msra.mxu0 %v17832_v35  ;;  %18553 = vmatpush1.bf16.msra.mxu1 %v18552_v21  ;;  %v1404_v35 = vld [vmem:[%s21272_s25 + $0x378] sm:$0xff]  ;;  %v17860_v21 = vunpack.c.h.s8.bf16 %v1393_v22 }
 0x4b3   : > { %17835 = vmatprep.subr.bf16.mxu0 %v17834_v42  ;;  %18555 = vmatprep.subr.bf16.mxu1 %v18554_v11  ;;  %v18580_v42 = vunpack.c.h.s8.bf16 %v1395_v50  ;;  %v17862_v11 = vunpack.c.l.s8.bf16 %v1402_v59  ;;  %v18582_v19 = vunpack.c.l.s8.bf16 %v1404_v35  ;;  %v18586_v4 = vunpack.c.h.s8.bf16 %v1404_v35  ;;  %v1426_v50 = vld [vmem:[%s21272_s25 + $0x428] sm:$0xff]  ;;  %v1425_v35 = vld [vmem:[%s21272_s25 + $0x420] sm:$0xff] }
 0x4b6   : > { %17837 = vmatpush1.bf16.msra.mxu0 %v17836_v27  ;;  %18557 = vmatpush1.bf16.msra.mxu1 %v18556_v28  ;;  %v1403_v27 = vld [vmem:[%s21272_s25 + $0x370] sm:$0xff]  ;;  %v17864_v28 = vunpack.c.l.s8.bf16 %v1401_v9 }
 0x4b7   : > { %17839 = vmatprep.subr.bf16.mxu0 %v17838_v58  ;;  %18559 = vmatprep.subr.bf16.mxu1 %v18558_v56  ;;  %v18584_v58 = vunpack.c.l.s8.bf16 %v1403_v27  ;;  %v17866_v56 = vunpack.c.h.s8.bf16 %v1402_v59 }
 0x4ba   : > { %17841 = vmatpush1.bf16.msra.mxu0 %v17840_v26  ;;  %18561 = vmatpush1.bf16.msra.mxu1 %v18560_v60  ;;  %v1412_v26 = vld [vmem:[%s21272_s25 + $0x3b8] sm:$0xff]  ;;  %v17868_v60 = vunpack.c.h.s8.bf16 %v1401_v9 }
 0x4bb   : > { %17843 = vmatprep.subr.bf16.mxu0 %v17842_v18  ;;  %18563 = vmatprep.subr.bf16.mxu1 %v18562_v31  ;;  %v18588_v18 = vunpack.c.h.s8.bf16 %v1403_v27  ;;  %v17870_v31 = vunpack.c.l.s8.bf16 %v1410_v52  ;;  %v18590_v38 = vunpack.c.l.s8.bf16 %v1412_v26  ;;  %v18594_v62 = vunpack.c.h.s8.bf16 %v1412_v26  ;;  %v1434_v27 = vld [vmem:[%s21272_s25 + $0x468] sm:$0xff]  ;;  %v1433_v26 = vld [vmem:[%s21272_s25 + $0x460] sm:$0xff] }
 0x4be   : > { %17845 = vmatpush1.bf16.msra.mxu0 %v17844_v5  ;;  %18565 = vmatpush1.bf16.msra.mxu1 %v18564_v16  ;;  %v1411_v5 = vld [vmem:[%s21272_s25 + $0x3b0] sm:$0xff]  ;;  %v17872_v16 = vunpack.c.l.s8.bf16 %v1409_v20 }
 0x4bf   : > { %17847 = vmatprep.subr.bf16.mxu0 %v17846_v30  ;;  %18567 = vmatprep.subr.bf16.mxu1 %v18566_v10  ;;  %v18592_v30 = vunpack.c.l.s8.bf16 %v1411_v5  ;;  %v17874_v10 = vunpack.c.h.s8.bf16 %v1410_v52 }
 0x4c2   : > { %17849 = vmatpush1.bf16.msra.mxu0 %v17848_v54  ;;  %18569 = vmatpush1.bf16.msra.mxu1 %v18568_v12  ;;  %v1420_v54 = vld [vmem:[%s21272_s25 + $0x3f8] sm:$0xff]  ;;  %v17876_v12 = vunpack.c.h.s8.bf16 %v1409_v20  ;;  %v1442_v20 = vld [vmem:[%s21272_s25 + $0x4a8] sm:$0xff] }
 0x4c3   : > { %17851 = vmatprep.subr.bf16.mxu0 %v17850_v15  ;;  %18571 = vmatprep.subr.bf16.mxu1 %v18570_v1  ;;  %v18596_v15 = vunpack.c.h.s8.bf16 %v1411_v5  ;;  %v17878_v1 = vunpack.c.l.s8.bf16 %v1418_v46  ;;  %v18598_v51 = vunpack.c.l.s8.bf16 %v1420_v54  ;;  %v18602_v22 = vunpack.c.h.s8.bf16 %v1420_v54  ;;  %v1444_v5 = vld [vmem:[%s21272_s25 + $0x4b8] sm:$0xff] }
 0x4c6   : > { %17853 = vmatpush1.bf16.msra.mxu0 %v17852_v3  ;;  %18573 = vmatpush1.bf16.msra.mxu1 %v18572_v13  ;;  %v1419_v3 = vld [vmem:[%s21272_s25 + $0x3f0] sm:$0xff]  ;;  %v17880_v13 = vunpack.c.l.s8.bf16 %v1417_v45 }
 0x4c7   : > { %17855 = vmatprep.subr.bf16.mxu0 %v17854_v6  ;;  %18575 = vmatprep.subr.bf16.mxu1 %v18574_v39  ;;  %v18600_v6 = vunpack.c.l.s8.bf16 %v1419_v3  ;;  %v17882_v39 = vunpack.c.h.s8.bf16 %v1418_v46  ;;  %v1443_v46 = vld [vmem:[%s21272_s25 + $0x4b0] sm:$0xff] }
 0x4ca   : > { %17857 = vmatpush1.bf16.msra.mxu0 %v17856_v33  ;;  %18577 = vmatpush1.bf16.msra.mxu1 %v18576_v63  ;;  %v1428_v33 = vld [vmem:[%s21272_s25 + $0x438] sm:$0xff]  ;;  %v17884_v63 = vunpack.c.h.s8.bf16 %v1417_v45 }
 0x4cb   : > { %17859 = vmatprep.subr.bf16.mxu0 %v17858_v23  ;;  %18579 = vmatprep.subr.bf16.mxu1 %v18578_v57  ;;  %v18604_v23 = vunpack.c.h.s8.bf16 %v1419_v3  ;;  %v17886_v57 = vunpack.c.l.s8.bf16 %v1426_v50  ;;  %v18606_v59 = vunpack.c.l.s8.bf16 %v1428_v33  ;;  %v18610_v9 = vunpack.c.h.s8.bf16 %v1428_v33  ;;  %v1452_v45 = vld [vmem:[%s21272_s25 + $0x4f8] sm:$0xff] }
 0x4ce   : > { %17861 = vmatpush1.bf16.msra.mxu0 %v17860_v21  ;;  %18581 = vmatpush1.bf16.msra.mxu1 %v18580_v42  ;;  %v1427_v21 = vld [vmem:[%s21272_s25 + $0x430] sm:$0xff]  ;;  %v17888_v42 = vunpack.c.l.s8.bf16 %v1425_v35 }
 0x4cf   : > { %17863 = vmatprep.subr.bf16.mxu0 %v17862_v11  ;;  %18583 = vmatprep.subr.bf16.mxu1 %v18582_v19  ;;  %v18608_v11 = vunpack.c.l.s8.bf16 %v1427_v21  ;;  %v17890_v19 = vunpack.c.h.s8.bf16 %v1426_v50  ;;  %v1451_v50 = vld [vmem:[%s21272_s25 + $0x4f0] sm:$0xff] }
 0x4d2   : > { %17865 = vmatpush1.bf16.msra.mxu0 %v17864_v28  ;;  %18585 = vmatpush1.bf16.msra.mxu1 %v18584_v58  ;;  %v1436_v28 = vld [vmem:[%s21272_s25 + $0x478] sm:$0xff]  ;;  %v17892_v58 = vunpack.c.h.s8.bf16 %v1425_v35 }
 0x4d3   : > { %17867 = vmatprep.subr.bf16.mxu0 %v17866_v56  ;;  %18587 = vmatprep.subr.bf16.mxu1 %v18586_v4  ;;  %v18612_v56 = vunpack.c.h.s8.bf16 %v1427_v21  ;;  %v17894_v4 = vunpack.c.l.s8.bf16 %v1434_v27  ;;  %v18614_v52 = vunpack.c.l.s8.bf16 %v1436_v28  ;;  %v1460_v35 = vld [vmem:[%s21272_s25 + $0x538] sm:$0xff] }
 0x4d6   : > { %17869 = vmatpush1.bf16.msra.mxu0 %v17868_v60  ;;  %18589 = vmatpush1.bf16.msra.mxu1 %v18588_v18  ;;  %v1435_v60 = vld [vmem:[%s21272_s25 + $0x470] sm:$0xff]  ;;  %v17896_v18 = vunpack.c.l.s8.bf16 %v1433_v26 }
 0x4d7   : > { %17871 = vmatprep.subr.bf16.mxu0 %v17870_v31  ;;  %18591 = vmatprep.subr.bf16.mxu1 %v18590_v38  ;;  %v17898_v31 = vunpack.c.h.s8.bf16 %v1434_v27  ;;  %v18618_v38 = vunpack.c.h.s8.bf16 %v1436_v28  ;;  %v1459_v27 = vld [vmem:[%s21272_s25 + $0x530] sm:$0xff] }
 0x4da   : > { %17873 = vmatpush1.bf16.msra.mxu0 %v17872_v16  ;;  %18593 = vmatpush1.bf16.msra.mxu1 %v18592_v30  ;;  %v17900_v16 = vunpack.c.h.s8.bf16 %v1433_v26  ;;  %v18620_v30 = vunpack.c.h.s8.bf16 %v1435_v60  ;;  %v1468_v26 = vld [vmem:[%s21272_s25 + $0x578] sm:$0xff] }
 0x4db   : > { %17875 = vmatprep.subr.bf16.mxu0 %v17874_v10  ;;  %18595 = vmatprep.subr.bf16.mxu1 %v18594_v62  ;;  %v18622_v10 = vunpack.c.l.s8.bf16 %v1444_v5  ;;  %v1441_v62 = vld [vmem:[%s21272_s25 + $0x4a0] sm:$0xff] }
 0x4dc   : > { %v17904_v54 = vunpack.c.l.s8.bf16 %v1441_v62  ;;  %v17908_v3 = vunpack.c.h.s8.bf16 %v1441_v62  ;;  %v1476_v62 = vld [vmem:[%s21272_s25 + $0x5b8] sm:$0xff] }
 0x4de   : > { %17877 = vmatpush1.bf16.msra.mxu0 %v17876_v12  ;;  %18597 = vmatpush1.bf16.msra.mxu1 %v18596_v15  ;;  %v18624_v12 = vunpack.c.l.s8.bf16 %v1443_v46  ;;  %v17906_v15 = vunpack.c.h.s8.bf16 %v1442_v20 }
 0x4df   : > { %17879 = vmatprep.subr.bf16.mxu0 %v17878_v1  ;;  %18599 = vmatprep.subr.bf16.mxu1 %v18598_v51  ;;  %v18626_v1 = vunpack.c.h.s8.bf16 %v1444_v5  ;;  %v1450_v51 = vld [vmem:[%s21272_s25 + $0x4e8] sm:$0xff] }
 0x4e2   : > { %17881 = vmatpush1.bf16.msra.mxu0 %v17880_v13  ;;  %18601 = vmatpush1.bf16.msra.mxu1 %v18600_v6  ;;  %v18628_v13 = vunpack.c.h.s8.bf16 %v1443_v46  ;;  %v17910_v6 = vunpack.c.l.s8.bf16 %v1450_v51 }
 0x4e3   : > { %17883 = vmatprep.subr.bf16.mxu0 %v17882_v39  ;;  %18603 = vmatprep.subr.bf16.mxu1 %v18602_v22  ;;  %v18630_v39 = vunpack.c.l.s8.bf16 %v1452_v45  ;;  %v1449_v22 = vld [vmem:[%s21272_s25 + $0x4e0] sm:$0xff] }
 0x4e4   : > { %v17912_v33 = vunpack.c.l.s8.bf16 %v1449_v22  ;;  %v17916_v21 = vunpack.c.h.s8.bf16 %v1449_v22  ;;  %v1484_v22 = vld [vmem:[%s21272_s25 + $0x5f8] sm:$0xff] }
 0x4e6   : > { %17885 = vmatpush1.bf16.msra.mxu0 %v17884_v63  ;;  %18605 = vmatpush1.bf16.msra.mxu1 %v18604_v23  ;;  %v18632_v63 = vunpack.c.l.s8.bf16 %v1451_v50  ;;  %v17914_v23 = vunpack.c.h.s8.bf16 %v1450_v51  ;;  %v1475_v51 = vld [vmem:[%s21272_s25 + $0x5b0] sm:$0xff] }
 0x4e7   : > { %17887 = vmatprep.subr.bf16.mxu0 %v17886_v57  ;;  %18607 = vmatprep.subr.bf16.mxu1 %v18606_v59  ;;  %v18634_v57 = vunpack.c.h.s8.bf16 %v1452_v45  ;;  %v1458_v59 = vld [vmem:[%s21272_s25 + $0x528] sm:$0xff] }
 0x4e9   : > { %9751 = vmatmul.mubr.f32.vlgmr.msra.gmra.mrb[2].mxu0 %v21934_v8  ;;  %10603 = vmatmul.mubr.f32.vlgmr.msra.gmra.mrb[2].mxu1 %v21934_v8  ;;  %v18616_v8 = vunpack.c.l.s8.bf16 %v1435_v60 }
 0x4ea   : > { %17889 = vmatpush1.bf16.msra.mxu0 %v17888_v42  ;;  %18609 = vmatpush1.bf16.msra.mxu1 %v18608_v11  ;;  %v18636_v42 = vunpack.c.h.s8.bf16 %v1451_v50  ;;  %v17918_v11 = vunpack.c.l.s8.bf16 %v1458_v59 }
 0x4eb   : > { %17891 = vmatprep.subr.bf16.mxu0 %v17890_v19  ;;  %18611 = vmatprep.subr.bf16.mxu1 %v18610_v9  ;;  %v18638_v19 = vunpack.c.l.s8.bf16 %v1460_v35  ;;  %v1457_v9 = vld [vmem:[%s21272_s25 + $0x520] sm:$0xff] }
 0x4ec   : > { %9821 = vmatprep.mubr.f32.mxu0 %v21986_v32  ;;  %10673 = vmatprep.mubr.f32.mxu1 %v21986_v32  ;;  %v17902_v32 = vunpack.c.l.s8.bf16 %v1442_v20  ;;  %v17920_v28 = vunpack.c.l.s8.bf16 %v1457_v9  ;;  %v17924_v60 = vunpack.c.h.s8.bf16 %v1457_v9  ;;  %v1467_v20 = vld [vmem:[%s21272_s25 + $0x570] sm:$0xff]  ;;  %v1492_v9 = vld [vmem:[%s21272_s25 + $0x638] sm:$0xff] }
 0x4ee   : > { %17893 = vmatpush1.bf16.msra.mxu0 %v17892_v58  ;;  %18613 = vmatpush1.bf16.msra.mxu1 %v18612_v56  ;;  %v18640_v58 = vunpack.c.l.s8.bf16 %v1459_v27  ;;  %v17922_v56 = vunpack.c.h.s8.bf16 %v1458_v59  ;;  %v1483_v59 = vld [vmem:[%s21272_s25 + $0x5f0] sm:$0xff] }
 0x4ef   : > { %17895 = vmatprep.subr.bf16.mxu0 %v17894_v4  ;;  %18615 = vmatprep.subr.bf16.mxu1 %v18614_v52  ;;  %v18642_v4 = vunpack.c.h.s8.bf16 %v1460_v35  ;;  %v1466_v52 = vld [vmem:[%s21272_s25 + $0x568] sm:$0xff] }
 0x4f2   : > { %17897 = vmatpush1.bf16.msra.mxu0 %v17896_v18  ;;  %18617 = vmatpush1.bf16.msra.mxu1 %v18616_v8  ;;  %v18644_v18 = vunpack.c.h.s8.bf16 %v1459_v27  ;;  %v17926_v8 = vunpack.c.l.s8.bf16 %v1466_v52 }
 0x4f3   : > { %17899 = vmatprep.subr.bf16.mxu0 %v17898_v31  ;;  %18619 = vmatprep.subr.bf16.mxu1 %v18618_v38  ;;  %v18646_v31 = vunpack.c.l.s8.bf16 %v1468_v26  ;;  %v1465_v38 = vld [vmem:[%s21272_s25 + $0x560] sm:$0xff] }
 0x4f4   : > { %v17928_v5 = vunpack.c.l.s8.bf16 %v1465_v38  ;;  %v17932_v46 = vunpack.c.h.s8.bf16 %v1465_v38  ;;  %v1500_v38 = vld [vmem:[%s21272_s25 + $0x678] sm:$0xff] }
 0x4f6   : > { %17901 = vmatpush1.bf16.msra.mxu0 %v17900_v16  ;;  %18621 = vmatpush1.bf16.msra.mxu1 %v18620_v30  ;;  %v18648_v16 = vunpack.c.l.s8.bf16 %v1467_v20  ;;  %v17930_v30 = vunpack.c.h.s8.bf16 %v1466_v52  ;;  %v1491_v52 = vld [vmem:[%s21272_s25 + $0x630] sm:$0xff] }
 0x4f7   : > { %17903 = vmatprep.subr.bf16.mxu0 %v17902_v32  ;;  %18623 = vmatprep.subr.bf16.mxu1 %v18622_v10  ;;  %v18650_v32 = vunpack.c.h.s8.bf16 %v1468_v26  ;;  %v1474_v10 = vld [vmem:[%s21272_s25 + $0x5a8] sm:$0xff] }
 0x4fa   : > { %17905 = vmatpush1.bf16.msra.mxu0 %v17904_v54  ;;  %18625 = vmatpush1.bf16.msra.mxu1 %v18624_v12  ;;  %v18652_v54 = vunpack.c.h.s8.bf16 %v1467_v20  ;;  %v17934_v12 = vunpack.c.l.s8.bf16 %v1474_v10 }
 0x4fb   : > { %17907 = vmatprep.subr.bf16.mxu0 %v17906_v15  ;;  %18627 = vmatprep.subr.bf16.mxu1 %v18626_v1  ;;  %v18654_v15 = vunpack.c.l.s8.bf16 %v1476_v62  ;;  %v1473_v1 = vld [vmem:[%s21272_s25 + $0x5a0] sm:$0xff] }
 0x4fc   : > { %v17936_v45 = vunpack.c.l.s8.bf16 %v1473_v1  ;;  %v17940_v50 = vunpack.c.h.s8.bf16 %v1473_v1 }
 0x4fe   : > { %17909 = vmatpush1.bf16.msra.mxu0 %v17908_v3  ;;  %18629 = vmatpush1.bf16.msra.mxu1 %v18628_v13  ;;  %v18656_v3 = vunpack.c.l.s8.bf16 %v1475_v51  ;;  %v17938_v13 = vunpack.c.h.s8.bf16 %v1474_v10  ;;  %v1499_v10 = vld [vmem:[%s21272_s25 + $0x670] sm:$0xff] }
 0x4ff   : > { %17911 = vmatprep.subr.bf16.mxu0 %v17910_v6  ;;  %18631 = vmatprep.subr.bf16.mxu1 %v18630_v39  ;;  %v18658_v6 = vunpack.c.h.s8.bf16 %v1476_v62  ;;  %v1482_v39 = vld [vmem:[%s21272_s25 + $0x5e8] sm:$0xff] }
 0x502   : > { %17913 = vmatpush1.bf16.msra.mxu0 %v17912_v33  ;;  %18633 = vmatpush1.bf16.msra.mxu1 %v18632_v63  ;;  %v18660_v33 = vunpack.c.h.s8.bf16 %v1475_v51  ;;  %v17942_v63 = vunpack.c.l.s8.bf16 %v1482_v39  ;;  %v18684_v51 = vunpack.c.h.s8.bf16 %v1499_v10 }
 0x503   : > { %17915 = vmatprep.subr.bf16.mxu0 %v17914_v23  ;;  %18635 = vmatprep.subr.bf16.mxu1 %v18634_v57  ;;  %v18662_v23 = vunpack.c.l.s8.bf16 %v1484_v22  ;;  %v1481_v57 = vld [vmem:[%s21272_s25 + $0x5e0] sm:$0xff] }
 0x504   : > { %v17944_v35 = vunpack.c.l.s8.bf16 %v1481_v57  ;;  %v17948_v27 = vunpack.c.h.s8.bf16 %v1481_v57 }
 0x506   : > { %17917 = vmatpush1.bf16.msra.mxu0 %v17916_v21  ;;  %18637 = vmatpush1.bf16.msra.mxu1 %v18636_v42  ;;  %v18664_v21 = vunpack.c.l.s8.bf16 %v1483_v59  ;;  %v17946_v42 = vunpack.c.h.s8.bf16 %v1482_v39 }
 0x507   : > { %17919 = vmatprep.subr.bf16.mxu0 %v17918_v11  ;;  %18639 = vmatprep.subr.bf16.mxu1 %v18638_v19  ;;  %v18666_v11 = vunpack.c.h.s8.bf16 %v1484_v22  ;;  %v1490_v19 = vld [vmem:[%s21272_s25 + $0x628] sm:$0xff] }
 0x50a   : > { %17921 = vmatpush1.bf16.msra.mxu0 %v17920_v28  ;;  %18641 = vmatpush1.bf16.msra.mxu1 %v18640_v58  ;;  %v18668_v28 = vunpack.c.h.s8.bf16 %v1483_v59  ;;  %v17950_v58 = vunpack.c.l.s8.bf16 %v1490_v19 }
 0x50b   : > { %17923 = vmatprep.subr.bf16.mxu0 %v17922_v56  ;;  %18643 = vmatprep.subr.bf16.mxu1 %v18642_v4  ;;  %v18670_v56 = vunpack.c.l.s8.bf16 %v1492_v9  ;;  %v1489_v4 = vld [vmem:[%s21272_s25 + $0x620] sm:$0xff] }
 0x50c   : > { %v17952_v26 = vunpack.c.l.s8.bf16 %v1489_v4  ;;  %v17956_v20 = vunpack.c.h.s8.bf16 %v1489_v4 }
 0x50e   : > { %17925 = vmatpush1.bf16.msra.mxu0 %v17924_v60  ;;  %18645 = vmatpush1.bf16.msra.mxu1 %v18644_v18  ;;  %v18672_v60 = vunpack.c.l.s8.bf16 %v1491_v52  ;;  %v17954_v18 = vunpack.c.h.s8.bf16 %v1490_v19 }
 0x50f   : > { %17927 = vmatprep.subr.bf16.mxu0 %v17926_v8  ;;  %18647 = vmatprep.subr.bf16.mxu1 %v18646_v31  ;;  %v18674_v8 = vunpack.c.h.s8.bf16 %v1492_v9  ;;  %v1498_v31 = vld [vmem:[%s21272_s25 + $0x668] sm:$0xff] }
 0x512   : > { %17929 = vmatpush1.bf16.msra.mxu0 %v17928_v5  ;;  %18649 = vmatpush1.bf16.msra.mxu1 %v18648_v16  ;;  %v18676_v5 = vunpack.c.h.s8.bf16 %v1491_v52  ;;  %v17958_v16 = vunpack.c.l.s8.bf16 %v1498_v31  ;;  %v1522_v52 = vld [vmem:[%s21272_s25 + $0x728] sm:$0xff] }
 0x513   : > { %17931 = vmatprep.subr.bf16.mxu0 %v17930_v30  ;;  %18651 = vmatprep.subr.bf16.mxu1 %v18650_v32  ;;  %v18678_v30 = vunpack.c.l.s8.bf16 %v1500_v38  ;;  %v1497_v32 = vld [vmem:[%s21272_s25 + $0x660] sm:$0xff] }
 0x514   : > { %v17960_v62 = vunpack.c.l.s8.bf16 %v1497_v32  ;;  %v17964_v1 = vunpack.c.h.s8.bf16 %v1497_v32 }
 0x516   : > { %17933 = vmatpush1.bf16.msra.mxu0 %v17932_v46  ;;  %18653 = vmatpush1.bf16.msra.mxu1 %v18652_v54  ;;  %v17962_v46 = vunpack.c.h.s8.bf16 %v1498_v31  ;;  %v18682_v54 = vunpack.c.h.s8.bf16 %v1500_v38  ;;  %v1521_v38 = vld [vmem:[%s21272_s25 + $0x720] sm:$0xff] }
 0x517   : > { %17935 = vmatprep.subr.bf16.mxu0 %v17934_v12  ;;  %18655 = vmatprep.subr.bf16.mxu1 %v18654_v15  ;;  %v1506_v12 = vld [vmem:[%s21272_s25 + $0x6a8] sm:$0xff]  ;;  %v1508_v15 = vld [vmem:[%s21272_s25 + $0x6b8] sm:$0xff] }
 0x518   : > { %v17970_v22 = vunpack.c.h.s8.bf16 %v1506_v12 }
 0x51a   : > { %17937 = vmatpush1.bf16.msra.mxu0 %v17936_v45  ;;  %18657 = vmatpush1.bf16.msra.mxu1 %v18656_v3  ;;  %v18686_v45 = vunpack.c.l.s8.bf16 %v1508_v15  ;;  %v1505_v3 = vld [vmem:[%s21272_s25 + $0x6a0] sm:$0xff] }
 0x51b   : > { %17939 = vmatprep.subr.bf16.mxu0 %v17938_v13  ;;  %18659 = vmatprep.subr.bf16.mxu1 %v18658_v6  ;;  %v1507_v13 = vld [vmem:[%s21272_s25 + $0x6b0] sm:$0xff]  ;;  %v17968_v6 = vunpack.c.l.s8.bf16 %v1505_v3 }
 0x51c   : > { %v18688_v39 = vunpack.c.l.s8.bf16 %v1507_v13  ;;  %v18692_v57 = vunpack.c.h.s8.bf16 %v1507_v13  ;;  %v1538_v13 = vld [vmem:[%s21272_s25 + $0x7a8] sm:$0xff] }
 0x51e   : > { %17941 = vmatpush1.bf16.msra.mxu0 %v17940_v50  ;;  %18661 = vmatpush1.bf16.msra.mxu1 %v18660_v33  ;;  %v18690_v50 = vunpack.c.h.s8.bf16 %v1508_v15  ;;  %v1514_v33 = vld [vmem:[%s21272_s25 + $0x6e8] sm:$0xff]  ;;  %v1529_v15 = vld [vmem:[%s21272_s25 + $0x760] sm:$0xff] }
 0x51f   : > { %17943 = vmatprep.subr.bf16.mxu0 %v17942_v63  ;;  %18663 = vmatprep.subr.bf16.mxu1 %v18662_v23  ;;  %v1516_v63 = vld [vmem:[%s21272_s25 + $0x6f8] sm:$0xff]  ;;  %v17972_v23 = vunpack.c.h.s8.bf16 %v1505_v3  ;;  %v17974_v59 = vunpack.c.l.s8.bf16 %v1514_v33 }
 0x520   : > { %v18698_v4 = vunpack.c.h.s8.bf16 %v1516_v63 }
 0x522   : > { %17945 = vmatpush1.bf16.msra.mxu0 %v17944_v35  ;;  %18665 = vmatpush1.bf16.msra.mxu1 %v18664_v21  ;;  %v18694_v35 = vunpack.c.l.s8.bf16 %v1516_v63  ;;  %v1513_v21 = vld [vmem:[%s21272_s25 + $0x6e0] sm:$0xff] }
 0x523   : > { %17947 = vmatprep.subr.bf16.mxu0 %v17946_v42  ;;  %18667 = vmatprep.subr.bf16.mxu1 %v18666_v11  ;;  %v1515_v42 = vld [vmem:[%s21272_s25 + $0x6f0] sm:$0xff]  ;;  %v1537_v63 = vld [vmem:[%s21272_s25 + $0x7a0] sm:$0xff] }
 0x526   : > { %17949 = vmatpush1.bf16.msra.mxu0 %v17948_v27  ;;  %18669 = vmatpush1.bf16.msra.mxu1 %v18668_v28  ;;  %v17976_v28 = vunpack.c.l.s8.bf16 %v1513_v21 }
 0x527   : > { %17951 = vmatprep.subr.bf16.mxu0 %v17950_v58  ;;  %18671 = vmatprep.subr.bf16.mxu1 %v18670_v56  ;;  %v18696_v58 = vunpack.c.l.s8.bf16 %v1515_v42  ;;  %v17978_v56 = vunpack.c.h.s8.bf16 %v1514_v33 }
 0x529   : > { %9822 = vmatmul.mubr.f32.vlgmr.msra.gmra.mrb[2].mxu0 %v21980_v47  ;;  %10674 = vmatmul.mubr.f32.vlgmr.msra.gmra.mrb[2].mxu1 %v21980_v47  ;;  %v18680_v47 = vunpack.c.l.s8.bf16 %v1499_v10  ;;  %v1530_v10 = vld [vmem:[%s21272_s25 + $0x768] sm:$0xff] }
 0x52a   : > { %17953 = vmatpush1.bf16.msra.mxu0 %v17952_v26  ;;  %18673 = vmatpush1.bf16.msra.mxu1 %v18672_v60  ;;  %v1524_v26 = vld [vmem:[%s21272_s25 + $0x738] sm:$0xff]  ;;  %v17980_v60 = vunpack.c.h.s8.bf16 %v1513_v21 }
 0x52b   : > { %17955 = vmatprep.subr.bf16.mxu0 %v17954_v18  ;;  %18675 = vmatprep.subr.bf16.mxu1 %v18674_v8  ;;  %v18700_v18 = vunpack.c.h.s8.bf16 %v1515_v42  ;;  %v17982_v8 = vunpack.c.l.s8.bf16 %v1522_v52  ;;  %v18702_v31 = vunpack.c.l.s8.bf16 %v1524_v26  ;;  %v18706_v32 = vunpack.c.h.s8.bf16 %v1524_v26  ;;  %v1546_v42 = vld [vmem:[%s21272_s25 + $0x7e8] sm:$0xff]  ;;  %v1545_v26 = vld [vmem:[%s21272_s25 + $0x7e0] sm:$0xff] }
 0x52c   : > { %9892 = vmatprep.mubr.f32.mxu0 %v22031_v37  ;;  %10744 = vmatprep.mubr.f32.mxu1 %v22031_v37  ;;  %v17966_v37 = vunpack.c.l.s8.bf16 %v1506_v12 }
 0x52e   : > { %17957 = vmatpush1.bf16.msra.mxu0 %v17956_v20  ;;  %18677 = vmatpush1.bf16.msra.mxu1 %v18676_v5  ;;  %v1523_v20 = vld [vmem:[%s21272_s25 + $0x730] sm:$0xff]  ;;  %v17984_v5 = vunpack.c.l.s8.bf16 %v1521_v38 }
 0x52f   : > { %17959 = vmatprep.subr.bf16.mxu0 %v17958_v16  ;;  %18679 = vmatprep.subr.bf16.mxu1 %v18678_v30  ;;  %v18704_v16 = vunpack.c.l.s8.bf16 %v1523_v20  ;;  %v17986_v30 = vunpack.c.h.s8.bf16 %v1522_v52 }
 0x532   : > { %17961 = vmatpush1.bf16.msra.mxu0 %v17960_v62  ;;  %18681 = vmatpush1.bf16.msra.mxu1 %v18680_v47  ;;  %v1532_v62 = vld [vmem:[%s21272_s25 + $0x778] sm:$0xff]  ;;  %v17988_v47 = vunpack.c.h.s8.bf16 %v1521_v38 }
 0x533   : > { %17963 = vmatprep.subr.bf16.mxu0 %v17962_v46  ;;  %18683 = vmatprep.subr.bf16.mxu1 %v18682_v54  ;;  %v18708_v46 = vunpack.c.h.s8.bf16 %v1523_v20  ;;  %v17990_v54 = vunpack.c.l.s8.bf16 %v1530_v10  ;;  %v18710_v12 = vunpack.c.l.s8.bf16 %v1532_v62  ;;  %v18714_v3 = vunpack.c.h.s8.bf16 %v1532_v62  ;;  %v1554_v20 = vld [vmem:[%s21272_s25 + $0x828] sm:$0xff]  ;;  %v1553_v62 = vld [vmem:[%s21272_s25 + $0x820] sm:$0xff] }
 0x536   : > { %17965 = vmatpush1.bf16.msra.mxu0 %v17964_v1  ;;  %18685 = vmatpush1.bf16.msra.mxu1 %v18684_v51  ;;  %v1531_v1 = vld [vmem:[%s21272_s25 + $0x770] sm:$0xff]  ;;  %v17992_v51 = vunpack.c.l.s8.bf16 %v1529_v15 }
 0x537   : > { %17967 = vmatprep.subr.bf16.mxu0 %v17966_v37  ;;  %18687 = vmatprep.subr.bf16.mxu1 %v18686_v45  ;;  %v18712_v37 = vunpack.c.l.s8.bf16 %v1531_v1  ;;  %v17994_v45 = vunpack.c.h.s8.bf16 %v1530_v10 }
 0x53a   : > { %17969 = vmatpush1.bf16.msra.mxu0 %v17968_v6  ;;  %18689 = vmatpush1.bf16.msra.mxu1 %v18688_v39  ;;  %v1540_v6 = vld [vmem:[%s21272_s25 + $0x7b8] sm:$0xff]  ;;  %v17996_v39 = vunpack.c.h.s8.bf16 %v1529_v15 }
 0x53b   : > { %17971 = vmatprep.subr.bf16.mxu0 %v17970_v22  ;;  %18691 = vmatprep.subr.bf16.mxu1 %v18690_v50  ;;  %v18716_v22 = vunpack.c.h.s8.bf16 %v1531_v1  ;;  %v17998_v50 = vunpack.c.l.s8.bf16 %v1538_v13  ;;  %v18718_v33 = vunpack.c.l.s8.bf16 %v1540_v6  ;;  %v18722_v21 = vunpack.c.h.s8.bf16 %v1540_v6  ;;  %v1562_v1 = vld [vmem:[%s21272_s25 + $0x868] sm:$0xff]  ;;  %v1561_v6 = vld [vmem:[%s21272_s25 + $0x860] sm:$0xff] }
 0x53c   : > { %v22529_v11 = vpop.f32.mrb[0].mxu0  ;;  %v22531_v19 = vpop.f32.mrb[0].mxu1 }
 0x53d   : > { %v22533_v9 = vpop.f32.mrb[1].mxu0  ;;  %v22535_v27 = vpop.f32.mrb[1].mxu1 }
 0x53e   : > { %17973 = vmatpush1.bf16.msra.mxu0 %v17972_v23  ;;  %18693 = vmatpush1.bf16.msra.mxu1 %v18692_v57  ;;  %v1539_v23 = vld [vmem:[%s21272_s25 + $0x7b0] sm:$0xff]  ;;  %v18000_v57 = vunpack.c.l.s8.bf16 %v1537_v63 }
 0x53f   : > { %17975 = vmatprep.subr.bf16.mxu0 %v17974_v59  ;;  %18695 = vmatprep.subr.bf16.mxu1 %v18694_v35  ;;  %v18720_v59 = vunpack.c.l.s8.bf16 %v1539_v23  ;;  %v18002_v35 = vunpack.c.h.s8.bf16 %v1538_v13 }
 0x542   : > { %17977 = vmatpush1.bf16.msra.mxu0 %v17976_v28  ;;  %18697 = vmatpush1.bf16.msra.mxu1 %v18696_v58  ;;  %v1548_v28 = vld [vmem:[%s21272_s25 + $0x7f8] sm:$0xff]  ;;  %v18004_v58 = vunpack.c.h.s8.bf16 %v1537_v63  ;;  %v1570_v63 = vld [vmem:[%s21272_s25 + $0x8a8] sm:$0xff] }
 0x543   : > { %17979 = vmatprep.subr.bf16.mxu0 %v17978_v56  ;;  %18699 = vmatprep.subr.bf16.mxu1 %v18698_v4  ;;  %v18724_v56 = vunpack.c.h.s8.bf16 %v1539_v23  ;;  %v18006_v4 = vunpack.c.l.s8.bf16 %v1546_v42  ;;  %v18726_v52 = vunpack.c.l.s8.bf16 %v1548_v28  ;;  %v18730_v38 = vunpack.c.h.s8.bf16 %v1548_v28  ;;  %v1572_v23 = vld [vmem:[%s21272_s25 + $0x8b8] sm:$0xff] }
 0x546   : > { %17981 = vmatpush1.bf16.msra.mxu0 %v17980_v60  ;;  %18701 = vmatpush1.bf16.msra.mxu1 %v18700_v18  ;;  %v1547_v60 = vld [vmem:[%s21272_s25 + $0x7f0] sm:$0xff]  ;;  %v18008_v18 = vunpack.c.l.s8.bf16 %v1545_v26 }
 0x547   : > { %17983 = vmatprep.subr.bf16.mxu0 %v17982_v8  ;;  %18703 = vmatprep.subr.bf16.mxu1 %v18702_v31  ;;  %v18728_v8 = vunpack.c.l.s8.bf16 %v1547_v60  ;;  %v18010_v31 = vunpack.c.h.s8.bf16 %v1546_v42  ;;  %v1571_v42 = vld [vmem:[%s21272_s25 + $0x8b0] sm:$0xff] }
 0x54a   : > { %17985 = vmatpush1.bf16.msra.mxu0 %v17984_v5  ;;  %18705 = vmatpush1.bf16.msra.mxu1 %v18704_v16  ;;  %v1556_v5 = vld [vmem:[%s21272_s25 + $0x838] sm:$0xff]  ;;  %v18012_v16 = vunpack.c.h.s8.bf16 %v1545_v26 }
 0x54b   : > { %17987 = vmatprep.subr.bf16.mxu0 %v17986_v30  ;;  %18707 = vmatprep.subr.bf16.mxu1 %v18706_v32  ;;  %v18732_v30 = vunpack.c.h.s8.bf16 %v1547_v60  ;;  %v18014_v32 = vunpack.c.l.s8.bf16 %v1554_v20  ;;  %v18734_v10 = vunpack.c.l.s8.bf16 %v1556_v5  ;;  %v18738_v15 = vunpack.c.h.s8.bf16 %v1556_v5  ;;  %v1580_v26 = vld [vmem:[%s21272_s25 + $0x8f8] sm:$0xff] }
 0x54e   : > { %17989 = vmatpush1.bf16.msra.mxu0 %v17988_v47  ;;  %18709 = vmatpush1.bf16.msra.mxu1 %v18708_v46  ;;  %v1555_v47 = vld [vmem:[%s21272_s25 + $0x830] sm:$0xff]  ;;  %v18016_v46 = vunpack.c.l.s8.bf16 %v1553_v62 }
 0x54f   : > { %17991 = vmatprep.subr.bf16.mxu0 %v17990_v54  ;;  %18711 = vmatprep.subr.bf16.mxu1 %v18710_v12  ;;  %v18736_v54 = vunpack.c.l.s8.bf16 %v1555_v47  ;;  %v18018_v12 = vunpack.c.h.s8.bf16 %v1554_v20  ;;  %v1579_v20 = vld [vmem:[%s21272_s25 + $0x8f0] sm:$0xff] }
 0x552   : > { %17993 = vmatpush1.bf16.msra.mxu0 %v17992_v51  ;;  %18713 = vmatpush1.bf16.msra.mxu1 %v18712_v37  ;;  %v1564_v51 = vld [vmem:[%s21272_s25 + $0x878] sm:$0xff]  ;;  %v18020_v37 = vunpack.c.h.s8.bf16 %v1553_v62 }
 0x553   : > { %17995 = vmatprep.subr.bf16.mxu0 %v17994_v45  ;;  %18715 = vmatprep.subr.bf16.mxu1 %v18714_v3  ;;  %v18740_v45 = vunpack.c.h.s8.bf16 %v1555_v47  ;;  %v18022_v3 = vunpack.c.l.s8.bf16 %v1562_v1  ;;  %v18742_v13 = vunpack.c.l.s8.bf16 %v1564_v51  ;;  %v1588_v62 = vld [vmem:[%s21272_s25 + $0x938] sm:$0xff] }
 0x556   : > { %17997 = vmatpush1.bf16.msra.mxu0 %v17996_v39  ;;  %18717 = vmatpush1.bf16.msra.mxu1 %v18716_v22  ;;  %v1563_v39 = vld [vmem:[%s21272_s25 + $0x870] sm:$0xff]  ;;  %v18024_v22 = vunpack.c.l.s8.bf16 %v1561_v6 }
 0x557   : > { %17999 = vmatprep.subr.bf16.mxu0 %v17998_v50  ;;  %18719 = vmatprep.subr.bf16.mxu1 %v18718_v33  ;;  %v18026_v50 = vunpack.c.h.s8.bf16 %v1562_v1  ;;  %v18746_v33 = vunpack.c.h.s8.bf16 %v1564_v51  ;;  %v1587_v1 = vld [vmem:[%s21272_s25 + $0x930] sm:$0xff] }
 0x55a   : > { %18001 = vmatpush1.bf16.msra.mxu0 %v18000_v57  ;;  %18721 = vmatpush1.bf16.msra.mxu1 %v18720_v59  ;;  %v18028_v57 = vunpack.c.h.s8.bf16 %v1561_v6  ;;  %v18748_v59 = vunpack.c.h.s8.bf16 %v1563_v39  ;;  %v1596_v6 = vld [vmem:[%s21272_s25 + $0x978] sm:$0xff] }
 0x55b   : > { %18003 = vmatprep.subr.bf16.mxu0 %v18002_v35  ;;  %18723 = vmatprep.subr.bf16.mxu1 %v18722_v21  ;;  %v18750_v35 = vunpack.c.l.s8.bf16 %v1572_v23  ;;  %v1569_v21 = vld [vmem:[%s21272_s25 + $0x8a0] sm:$0xff] }
 0x55c   : > { %v18032_v28 = vunpack.c.l.s8.bf16 %v1569_v21  ;;  %v18036_v60 = vunpack.c.h.s8.bf16 %v1569_v21  ;;  %v1604_v21 = vld [vmem:[%s21272_s25 + $0x9b8] sm:$0xff] }
 0x55e   : > { %18005 = vmatpush1.bf16.msra.mxu0 %v18004_v58  ;;  %18725 = vmatpush1.bf16.msra.mxu1 %v18724_v56  ;;  %v18752_v58 = vunpack.c.l.s8.bf16 %v1571_v42  ;;  %v18034_v56 = vunpack.c.h.s8.bf16 %v1570_v63 }
 0x55f   : > { %18007 = vmatprep.subr.bf16.mxu0 %v18006_v4  ;;  %18727 = vmatprep.subr.bf16.mxu1 %v18726_v52  ;;  %v18754_v4 = vunpack.c.h.s8.bf16 %v1572_v23  ;;  %v1578_v52 = vld [vmem:[%s21272_s25 + $0x8e8] sm:$0xff] }
 0x562   : > { %18009 = vmatpush1.bf16.msra.mxu0 %v18008_v18  ;;  %18729 = vmatpush1.bf16.msra.mxu1 %v18728_v8  ;;  %v18756_v18 = vunpack.c.h.s8.bf16 %v1571_v42  ;;  %v18038_v8 = vunpack.c.l.s8.bf16 %v1578_v52 }
 0x563   : > { %18011 = vmatprep.subr.bf16.mxu0 %v18010_v31  ;;  %18731 = vmatprep.subr.bf16.mxu1 %v18730_v38  ;;  %v18758_v31 = vunpack.c.l.s8.bf16 %v1580_v26  ;;  %v1577_v38 = vld [vmem:[%s21272_s25 + $0x8e0] sm:$0xff] }
 0x564   : > { %v18040_v5 = vunpack.c.l.s8.bf16 %v1577_v38  ;;  %v18044_v47 = vunpack.c.h.s8.bf16 %v1577_v38  ;;  %v1612_v38 = vld [vmem:[%s21272_s25 + $0x9f8] sm:$0xff] }
 0x566   : > { %18013 = vmatpush1.bf16.msra.mxu0 %v18012_v16  ;;  %18733 = vmatpush1.bf16.msra.mxu1 %v18732_v30  ;;  %v18760_v16 = vunpack.c.l.s8.bf16 %v1579_v20  ;;  %v18042_v30 = vunpack.c.h.s8.bf16 %v1578_v52  ;;  %v1603_v52 = vld [vmem:[%s21272_s25 + $0x9b0] sm:$0xff] }
 0x567   : > { %18015 = vmatprep.subr.bf16.mxu0 %v18014_v32  ;;  %18735 = vmatprep.subr.bf16.mxu1 %v18734_v10  ;;  %v18762_v32 = vunpack.c.h.s8.bf16 %v1580_v26  ;;  %v1586_v10 = vld [vmem:[%s21272_s25 + $0x928] sm:$0xff] }
 0x569   : > { %9893 = vmatmul.mubr.f32.vlgmr.msra.gmra.mrb[2].mxu0 %v22025_v61  ;;  %10745 = vmatmul.mubr.f32.vlgmr.msra.gmra.mrb[2].mxu1 %v22025_v61  ;;  %v18744_v61 = vunpack.c.l.s8.bf16 %v1563_v39 }
 0x56a   : > { %18017 = vmatpush1.bf16.msra.mxu0 %v18016_v46  ;;  %18737 = vmatpush1.bf16.msra.mxu1 %v18736_v54  ;;  %v18764_v46 = vunpack.c.h.s8.bf16 %v1579_v20  ;;  %v18046_v54 = vunpack.c.l.s8.bf16 %v1586_v10 }
 0x56b   : > { %18019 = vmatprep.subr.bf16.mxu0 %v18018_v12  ;;  %18739 = vmatprep.subr.bf16.mxu1 %v18738_v15  ;;  %v18766_v12 = vunpack.c.l.s8.bf16 %v1588_v62  ;;  %v1585_v15 = vld [vmem:[%s21272_s25 + $0x920] sm:$0xff] }
 0x56c   : > { %9963 = vmatprep.mubr.f32.mxu0 %v22077_v41  ;;  %10815 = vmatprep.mubr.f32.mxu1 %v22077_v41  ;;  %v18030_v41 = vunpack.c.l.s8.bf16 %v1570_v63  ;;  %v18048_v51 = vunpack.c.l.s8.bf16 %v1585_v15  ;;  %v18052_v39 = vunpack.c.h.s8.bf16 %v1585_v15  ;;  %v1595_v63 = vld [vmem:[%s21272_s25 + $0x970] sm:$0xff]  ;;  %v1620_v15 = vld [vmem:[%s21272_s25 + $0xa38] sm:$0xff] }
 0x56e   : > { %18021 = vmatpush1.bf16.msra.mxu0 %v18020_v37  ;;  %18741 = vmatpush1.bf16.msra.mxu1 %v18740_v45  ;;  %v18768_v37 = vunpack.c.l.s8.bf16 %v1587_v1  ;;  %v18050_v45 = vunpack.c.h.s8.bf16 %v1586_v10  ;;  %v1611_v10 = vld [vmem:[%s21272_s25 + $0x9f0] sm:$0xff] }
 0x56f   : > { %18023 = vmatprep.subr.bf16.mxu0 %v18022_v3  ;;  %18743 = vmatprep.subr.bf16.mxu1 %v18742_v13  ;;  %v18770_v3 = vunpack.c.h.s8.bf16 %v1588_v62  ;;  %v1594_v13 = vld [vmem:[%s21272_s25 + $0x968] sm:$0xff] }
 0x572   : > { %18025 = vmatpush1.bf16.msra.mxu0 %v18024_v22  ;;  %18745 = vmatpush1.bf16.msra.mxu1 %v18744_v61  ;;  %v18772_v22 = vunpack.c.h.s8.bf16 %v1587_v1  ;;  %v18054_v61 = vunpack.c.l.s8.bf16 %v1594_v13 }
 0x573   : > { %18027 = vmatprep.subr.bf16.mxu0 %v18026_v50  ;;  %18747 = vmatprep.subr.bf16.mxu1 %v18746_v33  ;;  %v18774_v50 = vunpack.c.l.s8.bf16 %v1596_v6  ;;  %v1593_v33 = vld [vmem:[%s21272_s25 + $0x960] sm:$0xff] }
 0x574   : > { %v18056_v23 = vunpack.c.l.s8.bf16 %v1593_v33  ;;  %v18060_v42 = vunpack.c.h.s8.bf16 %v1593_v33  ;;  %v1628_v33 = vld [vmem:[%s21272_s25 + $0xa78] sm:$0xff] }
 0x576   : > { %18029 = vmatpush1.bf16.msra.mxu0 %v18028_v57  ;;  %18749 = vmatpush1.bf16.msra.mxu1 %v18748_v59  ;;  %v18776_v57 = vunpack.c.l.s8.bf16 %v1595_v63  ;;  %v18058_v59 = vunpack.c.h.s8.bf16 %v1594_v13  ;;  %v1619_v13 = vld [vmem:[%s21272_s25 + $0xa30] sm:$0xff] }
 0x577   : > { %18031 = vmatprep.subr.bf16.mxu0 %v18030_v41  ;;  %18751 = vmatprep.subr.bf16.mxu1 %v18750_v35  ;;  %v18778_v41 = vunpack.c.h.s8.bf16 %v1596_v6  ;;  %v1602_v35 = vld [vmem:[%s21272_s25 + $0x9a8] sm:$0xff] }
 0x57a   : > { %18033 = vmatpush1.bf16.msra.mxu0 %v18032_v28  ;;  %18753 = vmatpush1.bf16.msra.mxu1 %v18752_v58  ;;  %v18780_v28 = vunpack.c.h.s8.bf16 %v1595_v63  ;;  %v18062_v58 = vunpack.c.l.s8.bf16 %v1602_v35 }
 0x57b   : > { %18035 = vmatprep.subr.bf16.mxu0 %v18034_v56  ;;  %18755 = vmatprep.subr.bf16.mxu1 %v18754_v4  ;;  %v18782_v56 = vunpack.c.l.s8.bf16 %v1604_v21  ;;  %v1601_v4 = vld [vmem:[%s21272_s25 + $0x9a0] sm:$0xff] }
 0x57c   : > { %v18064_v26 = vunpack.c.l.s8.bf16 %v1601_v4  ;;  %v18068_v20 = vunpack.c.h.s8.bf16 %v1601_v4 }
 0x57e   : > { %18037 = vmatpush1.bf16.msra.mxu0 %v18036_v60  ;;  %18757 = vmatpush1.bf16.msra.mxu1 %v18756_v18  ;;  %v18784_v60 = vunpack.c.l.s8.bf16 %v1603_v52  ;;  %v18066_v18 = vunpack.c.h.s8.bf16 %v1602_v35  ;;  %v1627_v35 = vld [vmem:[%s21272_s25 + $0xa70] sm:$0xff] }
 0x57f   : > { %18039 = vmatprep.subr.bf16.mxu0 %v18038_v8  ;;  %18759 = vmatprep.subr.bf16.mxu1 %v18758_v31  ;;  %v18786_v8 = vunpack.c.h.s8.bf16 %v1604_v21  ;;  %v1610_v31 = vld [vmem:[%s21272_s25 + $0x9e8] sm:$0xff] }
 0x582   : > { %18041 = vmatpush1.bf16.msra.mxu0 %v18040_v5  ;;  %18761 = vmatpush1.bf16.msra.mxu1 %v18760_v16  ;;  %v18788_v5 = vunpack.c.h.s8.bf16 %v1603_v52  ;;  %v18070_v16 = vunpack.c.l.s8.bf16 %v1610_v31  ;;  %v18812_v52 = vunpack.c.h.s8.bf16 %v1627_v35 }
 0x583   : > { %18043 = vmatprep.subr.bf16.mxu0 %v18042_v30  ;;  %18763 = vmatprep.subr.bf16.mxu1 %v18762_v32  ;;  %v18790_v30 = vunpack.c.l.s8.bf16 %v1612_v38  ;;  %v1609_v32 = vld [vmem:[%s21272_s25 + $0x9e0] sm:$0xff] }
 0x584   : > { %v18072_v62 = vunpack.c.l.s8.bf16 %v1609_v32  ;;  %v18076_v1 = vunpack.c.h.s8.bf16 %v1609_v32 }
 0x586   : > { %18045 = vmatpush1.bf16.msra.mxu0 %v18044_v47  ;;  %18765 = vmatpush1.bf16.msra.mxu1 %v18764_v46  ;;  %v18792_v47 = vunpack.c.l.s8.bf16 %v1611_v10  ;;  %v18074_v46 = vunpack.c.h.s8.bf16 %v1610_v31 }
 0x587   : > { %18047 = vmatprep.subr.bf16.mxu0 %v18046_v54  ;;  %18767 = vmatprep.subr.bf16.mxu1 %v18766_v12  ;;  %v18794_v54 = vunpack.c.h.s8.bf16 %v1612_v38  ;;  %v1618_v12 = vld [vmem:[%s21272_s25 + $0xa28] sm:$0xff] }
 0x58a   : > { %18049 = vmatpush1.bf16.msra.mxu0 %v18048_v51  ;;  %18769 = vmatpush1.bf16.msra.mxu1 %v18768_v37  ;;  %v18796_v51 = vunpack.c.h.s8.bf16 %v1611_v10  ;;  %v18078_v37 = vunpack.c.l.s8.bf16 %v1618_v12 }
 0x58b   : > { %18051 = vmatprep.subr.bf16.mxu0 %v18050_v45  ;;  %18771 = vmatprep.subr.bf16.mxu1 %v18770_v3  ;;  %v18798_v45 = vunpack.c.l.s8.bf16 %v1620_v15  ;;  %v1617_v3 = vld [vmem:[%s21272_s25 + $0xa20] sm:$0xff] }
 0x58c   : > { %v18080_v6 = vunpack.c.l.s8.bf16 %v1617_v3  ;;  %v18084_v63 = vunpack.c.h.s8.bf16 %v1617_v3 }
 0x58e   : > { %18053 = vmatpush1.bf16.msra.mxu0 %v18052_v39  ;;  %18773 = vmatpush1.bf16.msra.mxu1 %v18772_v22  ;;  %v18800_v39 = vunpack.c.l.s8.bf16 %v1619_v13  ;;  %v18082_v22 = vunpack.c.h.s8.bf16 %v1618_v12 }
 0x58f   : > { %18055 = vmatprep.subr.bf16.mxu0 %v18054_v61  ;;  %18775 = vmatprep.subr.bf16.mxu1 %v18774_v50  ;;  %v18802_v61 = vunpack.c.h.s8.bf16 %v1620_v15  ;;  %v1626_v50 = vld [vmem:[%s21272_s25 + $0xa68] sm:$0xff] }
 0x592   : > { %18057 = vmatpush1.bf16.msra.mxu0 %v18056_v23  ;;  %18777 = vmatpush1.bf16.msra.mxu1 %v18776_v57  ;;  %v18804_v23 = vunpack.c.h.s8.bf16 %v1619_v13  ;;  %v18086_v57 = vunpack.c.l.s8.bf16 %v1626_v50 }
 0x593   : > { %18059 = vmatprep.subr.bf16.mxu0 %v18058_v59  ;;  %18779 = vmatprep.subr.bf16.mxu1 %v18778_v41  ;;  %v18806_v59 = vunpack.c.l.s8.bf16 %v1628_v33  ;;  %v1625_v41 = vld [vmem:[%s21272_s25 + $0xa60] sm:$0xff] }
 0x594   : > { %v18088_v21 = vunpack.c.l.s8.bf16 %v1625_v41  ;;  %v18092_v4 = vunpack.c.h.s8.bf16 %v1625_v41 }
 0x596   : > { %18061 = vmatpush1.bf16.msra.mxu0 %v18060_v42  ;;  %18781 = vmatpush1.bf16.msra.mxu1 %v18780_v28  ;;  %v18090_v42 = vunpack.c.h.s8.bf16 %v1626_v50  ;;  %v18810_v28 = vunpack.c.h.s8.bf16 %v1628_v33 }
 0x597   : > { %18063 = vmatprep.subr.bf16.mxu0 %v18062_v58  ;;  %18783 = vmatprep.subr.bf16.mxu1 %v18782_v56  ;;  %v1634_v58 = vld [vmem:[%s21272_s25 + $0xaa8] sm:$0xff]  ;;  %v1636_v56 = vld [vmem:[%s21272_s25 + $0xab8] sm:$0xff] }
 0x598   : > { %v18098_v38 = vunpack.c.h.s8.bf16 %v1634_v58 }
 0x59a   : > { %18065 = vmatpush1.bf16.msra.mxu0 %v18064_v26  ;;  %18785 = vmatpush1.bf16.msra.mxu1 %v18784_v60  ;;  %v18814_v26 = vunpack.c.l.s8.bf16 %v1636_v56  ;;  %v1633_v60 = vld [vmem:[%s21272_s25 + $0xaa0] sm:$0xff] }
 0x59b   : > { %18067 = vmatprep.subr.bf16.mxu0 %v18066_v18  ;;  %18787 = vmatprep.subr.bf16.mxu1 %v18786_v8  ;;  %v1635_v18 = vld [vmem:[%s21272_s25 + $0xab0] sm:$0xff]  ;;  %v18096_v8 = vunpack.c.l.s8.bf16 %v1633_v60 }
 0x59c   : > { %v18816_v31 = vunpack.c.l.s8.bf16 %v1635_v18  ;;  %v18820_v32 = vunpack.c.h.s8.bf16 %v1635_v18 }
 0x59e   : > { %18069 = vmatpush1.bf16.msra.mxu0 %v18068_v20  ;;  %18789 = vmatpush1.bf16.msra.mxu1 %v18788_v5  ;;  %v18818_v20 = vunpack.c.h.s8.bf16 %v1636_v56  ;;  %v1642_v5 = vld [vmem:[%s21272_s25 + $0xae8] sm:$0xff] }
 0x59f   : > { %18071 = vmatprep.subr.bf16.mxu0 %v18070_v16  ;;  %18791 = vmatprep.subr.bf16.mxu1 %v18790_v30  ;;  %v1644_v16 = vld [vmem:[%s21272_s25 + $0xaf8] sm:$0xff]  ;;  %v18100_v30 = vunpack.c.h.s8.bf16 %v1633_v60  ;;  %v18102_v10 = vunpack.c.l.s8.bf16 %v1642_v5  ;;  %v18106_v15 = vunpack.c.h.s8.bf16 %v1642_v5 }
 0x5a2   : > { %18073 = vmatpush1.bf16.msra.mxu0 %v18072_v62  ;;  %18793 = vmatpush1.bf16.msra.mxu1 %v18792_v47  ;;  %v18822_v62 = vunpack.c.l.s8.bf16 %v1644_v16  ;;  %v1641_v47 = vld [vmem:[%s21272_s25 + $0xae0] sm:$0xff] }
 0x5a3   : > { %18075 = vmatprep.subr.bf16.mxu0 %v18074_v46  ;;  %18795 = vmatprep.subr.bf16.mxu1 %v18794_v54  ;;  %v1643_v46 = vld [vmem:[%s21272_s25 + $0xaf0] sm:$0xff]  ;;  %v18104_v54 = vunpack.c.l.s8.bf16 %v1641_v47 }
 0x5a4   : > { %v18824_v12 = vunpack.c.l.s8.bf16 %v1643_v46  ;;  %v18828_v3 = vunpack.c.h.s8.bf16 %v1643_v46 }
 0x5a6   : > { %18077 = vmatpush1.bf16.msra.mxu0 %v18076_v1  ;;  %18797 = vmatpush1.bf16.msra.mxu1 %v18796_v51  ;;  %v18826_v1 = vunpack.c.h.s8.bf16 %v1644_v16  ;;  %v1650_v51 = vld [vmem:[%s21272_s25 + $0xb28] sm:$0xff] }
 0x5a7   : > { %18079 = vmatprep.subr.bf16.mxu0 %v18078_v37  ;;  %18799 = vmatprep.subr.bf16.mxu1 %v18798_v45  ;;  %v1652_v37 = vld [vmem:[%s21272_s25 + $0xb38] sm:$0xff]  ;;  %v18108_v45 = vunpack.c.h.s8.bf16 %v1641_v47  ;;  %v18110_v13 = vunpack.c.l.s8.bf16 %v1650_v51  ;;  %v18114_v33 = vunpack.c.h.s8.bf16 %v1650_v51 }
 0x5a9   : > { %9964 = vmatmul.mubr.f32.vlgmr.msra.gmra.mrb[2].mxu0 %v22071_v14  ;;  %10816 = vmatmul.mubr.f32.vlgmr.msra.gmra.mrb[2].mxu1 %v22071_v14  ;;  %v18808_v14 = vunpack.c.l.s8.bf16 %v1627_v35 }
 0x5aa   : > { %18081 = vmatpush1.bf16.msra.mxu0 %v18080_v6  ;;  %18801 = vmatpush1.bf16.msra.mxu1 %v18800_v39  ;;  %v18830_v6 = vunpack.c.l.s8.bf16 %v1652_v37  ;;  %v1649_v39 = vld [vmem:[%s21272_s25 + $0xb20] sm:$0xff] }
 0x5ab   : > { %18083 = vmatprep.subr.bf16.mxu0 %v18082_v22  ;;  %18803 = vmatprep.subr.bf16.mxu1 %v18802_v61  ;;  %v1651_v22 = vld [vmem:[%s21272_s25 + $0xb30] sm:$0xff]  ;;  %v18112_v61 = vunpack.c.l.s8.bf16 %v1649_v39 }
 0x5ac   : > { %10034 = vmatprep.mubr.f32.mxu0 %v22122_v2  ;;  %10886 = vmatprep.mubr.f32.mxu1 %v22122_v2  ;;  %v18094_v2 = vunpack.c.l.s8.bf16 %v1634_v58  ;;  %v18832_v50 = vunpack.c.l.s8.bf16 %v1651_v22  ;;  %v18836_v41 = vunpack.c.h.s8.bf16 %v1651_v22 }
 0x5ae   : > { %18085 = vmatpush1.bf16.msra.mxu0 %v18084_v63  ;;  %18805 = vmatpush1.bf16.msra.mxu1 %v18804_v23  ;;  %v18834_v63 = vunpack.c.h.s8.bf16 %v1652_v37  ;;  %v1658_v23 = vld [vmem:[%s21272_s25 + $0xb68] sm:$0xff] }
 0x5af   : > { %18087 = vmatprep.subr.bf16.mxu0 %v18086_v57  ;;  %18807 = vmatprep.subr.bf16.mxu1 %v18806_v59  ;;  %v1660_v57 = vld [vmem:[%s21272_s25 + $0xb78] sm:$0xff]  ;;  %v18116_v59 = vunpack.c.h.s8.bf16 %v1649_v39  ;;  %v18118_v35 = vunpack.c.l.s8.bf16 %v1658_v23  ;;  %v18122_v56 = vunpack.c.h.s8.bf16 %v1658_v23 }
 0x5b2   : > { %18089 = vmatpush1.bf16.msra.mxu0 %v18088_v21  ;;  %18809 = vmatpush1.bf16.msra.mxu1 %v18808_v14  ;;  %v18838_v21 = vunpack.c.l.s8.bf16 %v1660_v57  ;;  %v1657_v14 = vld [vmem:[%s21272_s25 + $0xb60] sm:$0xff] }
 0x5b3   : > { %18091 = vmatprep.subr.bf16.mxu0 %v18090_v42  ;;  %18811 = vmatprep.subr.bf16.mxu1 %v18810_v28  ;;  %v1659_v42 = vld [vmem:[%s21272_s25 + $0xb70] sm:$0xff]  ;;  %v18120_v28 = vunpack.c.l.s8.bf16 %v1657_v14 }
 0x5b4   : > { %v18840_v58 = vunpack.c.l.s8.bf16 %v1659_v42  ;;  %v18844_v60 = vunpack.c.h.s8.bf16 %v1659_v42 }
 0x5b6   : > { %18093 = vmatpush1.bf16.msra.mxu0 %v18092_v4  ;;  %18813 = vmatpush1.bf16.msra.mxu1 %v18812_v52  ;;  %v18842_v4 = vunpack.c.h.s8.bf16 %v1660_v57  ;;  %v1666_v52 = vld [vmem:[%s21272_s25 + $0xba8] sm:$0xff] }
 0x5b7   : > { %18095 = vmatprep.subr.bf16.mxu0 %v18094_v2  ;;  %18815 = vmatprep.subr.bf16.mxu1 %v18814_v26  ;;  %v1668_v2 = vld [vmem:[%s21272_s25 + $0xbb8] sm:$0xff]  ;;  %v18124_v26 = vunpack.c.h.s8.bf16 %v1657_v14  ;;  %v18126_v18 = vunpack.c.l.s8.bf16 %v1666_v52  ;;  %v18130_v16 = vunpack.c.h.s8.bf16 %v1666_v52 }
 0x5ba   : > { %18097 = vmatpush1.bf16.msra.mxu0 %v18096_v8  ;;  %18817 = vmatpush1.bf16.msra.mxu1 %v18816_v31  ;;  %v18846_v8 = vunpack.c.l.s8.bf16 %v1668_v2  ;;  %v1665_v31 = vld [vmem:[%s21272_s25 + $0xba0] sm:$0xff] }
 0x5bb   : > { %18099 = vmatprep.subr.bf16.mxu0 %v18098_v38  ;;  %18819 = vmatprep.subr.bf16.mxu1 %v18818_v20  ;;  %v1667_v38 = vld [vmem:[%s21272_s25 + $0xbb0] sm:$0xff]  ;;  %v18128_v20 = vunpack.c.l.s8.bf16 %v1665_v31 }
 0x5bc   : > { %v18848_v5 = vunpack.c.l.s8.bf16 %v1667_v38  ;;  %v18852_v47 = vunpack.c.h.s8.bf16 %v1667_v38  ;;  %v1697_v38 = vld [vmem:[%s21272_s25 + $0xca0] sm:$0xff] }
 0x5be   : > { %18101 = vmatpush1.bf16.msra.mxu0 %v18100_v30  ;;  %18821 = vmatpush1.bf16.msra.mxu1 %v18820_v32  ;;  %v18850_v30 = vunpack.c.h.s8.bf16 %v1668_v2  ;;  %v1674_v32 = vld [vmem:[%s21272_s25 + $0xbe8] sm:$0xff] }
 0x5bf   : > { %18103 = vmatprep.subr.bf16.mxu0 %v18102_v10  ;;  %18823 = vmatprep.subr.bf16.mxu1 %v18822_v62  ;;  %v1676_v10 = vld [vmem:[%s21272_s25 + $0xbf8] sm:$0xff]  ;;  %v18132_v62 = vunpack.c.h.s8.bf16 %v1665_v31  ;;  %v18134_v46 = vunpack.c.l.s8.bf16 %v1674_v32  ;;  %v18138_v37 = vunpack.c.h.s8.bf16 %v1674_v32 }
 0x5c2   : > { %18105 = vmatpush1.bf16.msra.mxu0 %v18104_v54  ;;  %18825 = vmatpush1.bf16.msra.mxu1 %v18824_v12  ;;  %v18854_v54 = vunpack.c.l.s8.bf16 %v1676_v10  ;;  %v1673_v12 = vld [vmem:[%s21272_s25 + $0xbe0] sm:$0xff] }
 0x5c3   : > { %18107 = vmatprep.subr.bf16.mxu0 %v18106_v15  ;;  %18827 = vmatprep.subr.bf16.mxu1 %v18826_v1  ;;  %v1675_v15 = vld [vmem:[%s21272_s25 + $0xbf0] sm:$0xff]  ;;  %v18136_v1 = vunpack.c.l.s8.bf16 %v1673_v12 }
 0x5c4   : > { %v18856_v51 = vunpack.c.l.s8.bf16 %v1675_v15  ;;  %v18860_v39 = vunpack.c.h.s8.bf16 %v1675_v15  ;;  %v1705_v15 = vld [vmem:[%s21272_s25 + $0xce0] sm:$0xff] }
 0x5c6   : > { %18109 = vmatpush1.bf16.msra.mxu0 %v18108_v45  ;;  %18829 = vmatpush1.bf16.msra.mxu1 %v18828_v3  ;;  %v18858_v45 = vunpack.c.h.s8.bf16 %v1676_v10  ;;  %v1682_v3 = vld [vmem:[%s21272_s25 + $0xc28] sm:$0xff] }
 0x5c7   : > { %18111 = vmatprep.subr.bf16.mxu0 %v18110_v13  ;;  %18831 = vmatprep.subr.bf16.mxu1 %v18830_v6  ;;  %v1684_v13 = vld [vmem:[%s21272_s25 + $0xc38] sm:$0xff]  ;;  %v18140_v6 = vunpack.c.h.s8.bf16 %v1673_v12  ;;  %v18142_v22 = vunpack.c.l.s8.bf16 %v1682_v3  ;;  %v18146_v57 = vunpack.c.h.s8.bf16 %v1682_v3  ;;  %v1706_v10 = vld [vmem:[%s21272_s25 + $0xce8] sm:$0xff] }
 0x5ca   : > { %18113 = vmatpush1.bf16.msra.mxu0 %v18112_v61  ;;  %18833 = vmatpush1.bf16.msra.mxu1 %v18832_v50  ;;  %v18862_v61 = vunpack.c.l.s8.bf16 %v1684_v13  ;;  %v1681_v50 = vld [vmem:[%s21272_s25 + $0xc20] sm:$0xff] }
 0x5cb   : > { %18115 = vmatprep.subr.bf16.mxu0 %v18114_v33  ;;  %18835 = vmatprep.subr.bf16.mxu1 %v18834_v63  ;;  %v1683_v33 = vld [vmem:[%s21272_s25 + $0xc30] sm:$0xff]  ;;  %v18144_v63 = vunpack.c.l.s8.bf16 %v1681_v50 }
 0x5cc   : > { %v18864_v23 = vunpack.c.l.s8.bf16 %v1683_v33  ;;  %v18868_v14 = vunpack.c.h.s8.bf16 %v1683_v33  ;;  %v1713_v33 = vld [vmem:[%s21272_s25 + $0xd20] sm:$0xff] }
 0x5ce   : > { %18117 = vmatpush1.bf16.msra.mxu0 %v18116_v59  ;;  %18837 = vmatpush1.bf16.msra.mxu1 %v18836_v41  ;;  %v18866_v59 = vunpack.c.h.s8.bf16 %v1684_v13  ;;  %v1690_v41 = vld [vmem:[%s21272_s25 + $0xc68] sm:$0xff] }
 0x5cf   : > { %18119 = vmatprep.subr.bf16.mxu0 %v18118_v35  ;;  %18839 = vmatprep.subr.bf16.mxu1 %v18838_v21  ;;  %v1692_v35 = vld [vmem:[%s21272_s25 + $0xc78] sm:$0xff]  ;;  %v18148_v21 = vunpack.c.h.s8.bf16 %v1681_v50  ;;  %v18150_v42 = vunpack.c.l.s8.bf16 %v1690_v41  ;;  %v18154_v52 = vunpack.c.h.s8.bf16 %v1690_v41  ;;  %v1714_v13 = vld [vmem:[%s21272_s25 + $0xd28] sm:$0xff] }
 0x5d0   : > { %v18874_v2 = vunpack.c.h.s8.bf16 %v1692_v35 }
 0x5d2   : > { %18121 = vmatpush1.bf16.msra.mxu0 %v18120_v28  ;;  %18841 = vmatpush1.bf16.msra.mxu1 %v18840_v58  ;;  %v18870_v28 = vunpack.c.l.s8.bf16 %v1692_v35  ;;  %v1689_v58 = vld [vmem:[%s21272_s25 + $0xc60] sm:$0xff]  ;;  %v1722_v35 = vld [vmem:[%s21272_s25 + $0xd68] sm:$0xff] }
 0x5d3   : > { %18123 = vmatprep.subr.bf16.mxu0 %v18122_v56  ;;  %18843 = vmatprep.subr.bf16.mxu1 %v18842_v4  ;;  %v1691_v56 = vld [vmem:[%s21272_s25 + $0xc70] sm:$0xff]  ;;  %v18152_v4 = vunpack.c.l.s8.bf16 %v1689_v58 }
 0x5d6   : > { %18125 = vmatpush1.bf16.msra.mxu0 %v18124_v26  ;;  %18845 = vmatpush1.bf16.msra.mxu1 %v18844_v60  ;;  %v1698_v26 = vld [vmem:[%s21272_s25 + $0xca8] sm:$0xff]  ;;  %v1700_v60 = vld [vmem:[%s21272_s25 + $0xcb8] sm:$0xff] }
 0x5d7   : > { %18127 = vmatprep.subr.bf16.mxu0 %v18126_v18  ;;  %18847 = vmatprep.subr.bf16.mxu1 %v18846_v8  ;;  %v18156_v18 = vunpack.c.h.s8.bf16 %v1689_v58  ;;  %v18876_v8 = vunpack.c.h.s8.bf16 %v1691_v56  ;;  %v18878_v31 = vunpack.c.l.s8.bf16 %v1700_v60  ;;  %v18882_v32 = vunpack.c.h.s8.bf16 %v1700_v60  ;;  %v1730_v60 = vld [vmem:[%s21272_s25 + $0xda8] sm:$0xff] }
 0x5da   : > { %18129 = vmatpush1.bf16.msra.mxu0 %v18128_v20  ;;  %18849 = vmatpush1.bf16.msra.mxu1 %v18848_v5  ;;  %v1699_v20 = vld [vmem:[%s21272_s25 + $0xcb0] sm:$0xff]  ;;  %v18160_v5 = vunpack.c.l.s8.bf16 %v1697_v38 }
 0x5db   : > { %18131 = vmatprep.subr.bf16.mxu0 %v18130_v16  ;;  %18851 = vmatprep.subr.bf16.mxu1 %v18850_v30  ;;  %v18880_v16 = vunpack.c.l.s8.bf16 %v1699_v20  ;;  %v18162_v30 = vunpack.c.h.s8.bf16 %v1698_v26 }
 0x5de   : > { %18133 = vmatpush1.bf16.msra.mxu0 %v18132_v62  ;;  %18853 = vmatpush1.bf16.msra.mxu1 %v18852_v47  ;;  %v1708_v62 = vld [vmem:[%s21272_s25 + $0xcf8] sm:$0xff]  ;;  %v18164_v47 = vunpack.c.h.s8.bf16 %v1697_v38 }
 0x5df   : > { %18135 = vmatprep.subr.bf16.mxu0 %v18134_v46  ;;  %18855 = vmatprep.subr.bf16.mxu1 %v18854_v54  ;;  %v18884_v46 = vunpack.c.h.s8.bf16 %v1699_v20  ;;  %v18166_v54 = vunpack.c.l.s8.bf16 %v1706_v10  ;;  %v18886_v12 = vunpack.c.l.s8.bf16 %v1708_v62  ;;  %v18890_v3 = vunpack.c.h.s8.bf16 %v1708_v62  ;;  %v1729_v20 = vld [vmem:[%s21272_s25 + $0xda0] sm:$0xff]  ;;  %v1738_v62 = vld [vmem:[%s21272_s25 + $0xde8] sm:$0xff] }
 0x5e2   : > { %18137 = vmatpush1.bf16.msra.mxu0 %v18136_v1  ;;  %18857 = vmatpush1.bf16.msra.mxu1 %v18856_v51  ;;  %v1707_v1 = vld [vmem:[%s21272_s25 + $0xcf0] sm:$0xff]  ;;  %v18168_v51 = vunpack.c.l.s8.bf16 %v1705_v15 }
 0x5e3   : > { %18139 = vmatprep.subr.bf16.mxu0 %v18138_v37  ;;  %18859 = vmatprep.subr.bf16.mxu1 %v18858_v45  ;;  %v18888_v37 = vunpack.c.l.s8.bf16 %v1707_v1  ;;  %v18170_v45 = vunpack.c.h.s8.bf16 %v1706_v10 }
 0x5e6   : > { %18141 = vmatpush1.bf16.msra.mxu0 %v18140_v6  ;;  %18861 = vmatpush1.bf16.msra.mxu1 %v18860_v39  ;;  %v1716_v6 = vld [vmem:[%s21272_s25 + $0xd38] sm:$0xff]  ;;  %v18172_v39 = vunpack.c.h.s8.bf16 %v1705_v15 }
 0x5e7   : > { %18143 = vmatprep.subr.bf16.mxu0 %v18142_v22  ;;  %18863 = vmatprep.subr.bf16.mxu1 %v18862_v61  ;;  %v18892_v22 = vunpack.c.h.s8.bf16 %v1707_v1  ;;  %v18174_v61 = vunpack.c.l.s8.bf16 %v1714_v13  ;;  %v18894_v50 = vunpack.c.l.s8.bf16 %v1716_v6  ;;  %v18898_v41 = vunpack.c.h.s8.bf16 %v1716_v6  ;;  %v1737_v1 = vld [vmem:[%s21272_s25 + $0xde0] sm:$0xff]  ;;  %v1746_v6 = vld [vmem:[%s21272_s25 + $0xe28] sm:$0xff] }
 0x5e9   : > { %10035 = vmatmul.mubr.f32.vlgmr.msra.gmra.mrb[2].mxu0 %v22116_v0  ;;  %10887 = vmatmul.mubr.f32.vlgmr.msra.gmra.mrb[2].mxu1 %v22116_v0  ;;  %v18872_v0 = vunpack.c.l.s8.bf16 %v1691_v56  ;;  %v1721_v56 = vld [vmem:[%s21272_s25 + $0xd60] sm:$0xff] }
 0x5ea   : > { %18145 = vmatpush1.bf16.msra.mxu0 %v18144_v63  ;;  %18865 = vmatpush1.bf16.msra.mxu1 %v18864_v23  ;;  %v1715_v63 = vld [vmem:[%s21272_s25 + $0xd30] sm:$0xff]  ;;  %v18176_v23 = vunpack.c.l.s8.bf16 %v1713_v33 }
 0x5eb   : > { %18147 = vmatprep.subr.bf16.mxu0 %v18146_v57  ;;  %18867 = vmatprep.subr.bf16.mxu1 %v18866_v59  ;;  %v18896_v57 = vunpack.c.l.s8.bf16 %v1715_v63  ;;  %v18178_v59 = vunpack.c.h.s8.bf16 %v1714_v13 }
 0x5ec   : > { %10105 = vmatprep.mubr.f32.mxu0 %v22168_v40  ;;  %10957 = vmatprep.mubr.f32.mxu1 %v22168_v40  ;;  %v18158_v40 = vunpack.c.l.s8.bf16 %v1698_v26 }
 0x5ee   : > { %18149 = vmatpush1.bf16.msra.mxu0 %v18148_v21  ;;  %18869 = vmatpush1.bf16.msra.mxu1 %v18868_v14  ;;  %v1724_v21 = vld [vmem:[%s21272_s25 + $0xd78] sm:$0xff]  ;;  %v18180_v14 = vunpack.c.h.s8.bf16 %v1713_v33 }
 0x5ef   : > { %18151 = vmatprep.subr.bf16.mxu0 %v18150_v42  ;;  %18871 = vmatprep.subr.bf16.mxu1 %v18870_v28  ;;  %v18900_v42 = vunpack.c.h.s8.bf16 %v1715_v63  ;;  %v18182_v28 = vunpack.c.l.s8.bf16 %v1722_v35  ;;  %v18902_v58 = vunpack.c.l.s8.bf16 %v1724_v21  ;;  %v18906_v26 = vunpack.c.h.s8.bf16 %v1724_v21  ;;  %v1745_v63 = vld [vmem:[%s21272_s25 + $0xe20] sm:$0xff]  ;;  %v1754_v21 = vld [vmem:[%s21272_s25 + $0xe68] sm:$0xff] }
 0x5f2   : > { %18153 = vmatpush1.bf16.msra.mxu0 %v18152_v4  ;;  %18873 = vmatpush1.bf16.msra.mxu1 %v18872_v0  ;;  %v1723_v4 = vld [vmem:[%s21272_s25 + $0xd70] sm:$0xff]  ;;  %v18184_v0 = vunpack.c.l.s8.bf16 %v1721_v56 }
 0x5f3   : > { %18155 = vmatprep.subr.bf16.mxu0 %v18154_v52  ;;  %18875 = vmatprep.subr.bf16.mxu1 %v18874_v2  ;;  %v18904_v52 = vunpack.c.l.s8.bf16 %v1723_v4  ;;  %v18186_v2 = vunpack.c.h.s8.bf16 %v1722_v35 }
 0x5f6   : > { %18157 = vmatpush1.bf16.msra.mxu0 %v18156_v18  ;;  %18877 = vmatpush1.bf16.msra.mxu1 %v18876_v8  ;;  %v1732_v18 = vld [vmem:[%s21272_s25 + $0xdb8] sm:$0xff]  ;;  %v18188_v8 = vunpack.c.h.s8.bf16 %v1721_v56 }
 0x5f7   : > { %18159 = vmatprep.subr.bf16.mxu0 %v18158_v40  ;;  %18879 = vmatprep.subr.bf16.mxu1 %v18878_v31  ;;  %v18908_v40 = vunpack.c.h.s8.bf16 %v1723_v4  ;;  %v18190_v31 = vunpack.c.l.s8.bf16 %v1730_v60  ;;  %v18910_v38 = vunpack.c.l.s8.bf16 %v1732_v18  ;;  %v18914_v10 = vunpack.c.h.s8.bf16 %v1732_v18  ;;  %v1753_v4 = vld [vmem:[%s21272_s25 + $0xe60] sm:$0xff]  ;;  %v1764_v18 = vld [vmem:[%s21272_s25 + $0xeb8] sm:$0xff] }
 0x5fa   : > { %18161 = vmatpush1.bf16.msra.mxu0 %v18160_v5  ;;  %18881 = vmatpush1.bf16.msra.mxu1 %v18880_v16  ;;  %v1731_v5 = vld [vmem:[%s21272_s25 + $0xdb0] sm:$0xff]  ;;  %v18192_v16 = vunpack.c.l.s8.bf16 %v1729_v20 }
 0x5fb   : > { %18163 = vmatprep.subr.bf16.mxu0 %v18162_v30  ;;  %18883 = vmatprep.subr.bf16.mxu1 %v18882_v32  ;;  %v18912_v30 = vunpack.c.l.s8.bf16 %v1731_v5  ;;  %v18194_v32 = vunpack.c.h.s8.bf16 %v1730_v60  ;;  %v1762_v60 = vld [vmem:[%s21272_s25 + $0xea8] sm:$0xff] }
 0x5fe   : > { %18165 = vmatpush1.bf16.msra.mxu0 %v18164_v47  ;;  %18885 = vmatpush1.bf16.msra.mxu1 %v18884_v46  ;;  %v1740_v47 = vld [vmem:[%s21272_s25 + $0xdf8] sm:$0xff]  ;;  %v18196_v46 = vunpack.c.h.s8.bf16 %v1729_v20  ;;  %v1763_v20 = vld [vmem:[%s21272_s25 + $0xeb0] sm:$0xff] }
 0x5ff   : > { %18167 = vmatprep.subr.bf16.mxu0 %v18166_v54  ;;  %18887 = vmatprep.subr.bf16.mxu1 %v18886_v12  ;;  %v18916_v54 = vunpack.c.h.s8.bf16 %v1731_v5  ;;  %v18198_v12 = vunpack.c.l.s8.bf16 %v1738_v62  ;;  %v18918_v15 = vunpack.c.l.s8.bf16 %v1740_v47  ;;  %v18922_v13 = vunpack.c.h.s8.bf16 %v1740_v47 }
 0x602   : > { %18169 = vmatpush1.bf16.msra.mxu0 %v18168_v51  ;;  %18889 = vmatpush1.bf16.msra.mxu1 %v18888_v37  ;;  %v1739_v51 = vld [vmem:[%s21272_s25 + $0xdf0] sm:$0xff]  ;;  %v18200_v37 = vunpack.c.l.s8.bf16 %v1737_v1 }
 0x603   : > { %18171 = vmatprep.subr.bf16.mxu0 %v18170_v45  ;;  %18891 = vmatprep.subr.bf16.mxu1 %v18890_v3  ;;  %v18920_v45 = vunpack.c.l.s8.bf16 %v1739_v51  ;;  %v18202_v3 = vunpack.c.h.s8.bf16 %v1738_v62  ;;  %v1772_v62 = vld [vmem:[%s21272_s25 + $0xef8] sm:$0xff] }
 0x606   : > { %18173 = vmatpush1.bf16.msra.mxu0 %v18172_v39  ;;  %18893 = vmatpush1.bf16.msra.mxu1 %v18892_v22  ;;  %v1748_v39 = vld [vmem:[%s21272_s25 + $0xe38] sm:$0xff]  ;;  %v18204_v22 = vunpack.c.h.s8.bf16 %v1737_v1  ;;  %v1771_v1 = vld [vmem:[%s21272_s25 + $0xef0] sm:$0xff] }
 0x607   : > { %18175 = vmatprep.subr.bf16.mxu0 %v18174_v61  ;;  %18895 = vmatprep.subr.bf16.mxu1 %v18894_v50  ;;  %v18924_v61 = vunpack.c.h.s8.bf16 %v1739_v51  ;;  %v18206_v50 = vunpack.c.l.s8.bf16 %v1746_v6  ;;  %v18926_v33 = vunpack.c.l.s8.bf16 %v1748_v39  ;;  %v18930_v35 = vunpack.c.h.s8.bf16 %v1748_v39 }
 0x60a   : > { %18177 = vmatpush1.bf16.msra.mxu0 %v18176_v23  ;;  %18897 = vmatpush1.bf16.msra.mxu1 %v18896_v57  ;;  %v1747_v23 = vld [vmem:[%s21272_s25 + $0xe30] sm:$0xff]  ;;  %v18208_v57 = vunpack.c.l.s8.bf16 %v1745_v63 }
 0x60b   : > { %18179 = vmatprep.subr.bf16.mxu0 %v18178_v59  ;;  %18899 = vmatprep.subr.bf16.mxu1 %v18898_v41  ;;  %v18928_v59 = vunpack.c.l.s8.bf16 %v1747_v23  ;;  %v18210_v41 = vunpack.c.h.s8.bf16 %v1746_v6  ;;  %v1780_v6 = vld [vmem:[%s21272_s25 + $0xf38] sm:$0xff] }
 0x60e   : > { %18181 = vmatpush1.bf16.msra.mxu0 %v18180_v14  ;;  %18901 = vmatpush1.bf16.msra.mxu1 %v18900_v42  ;;  %v1756_v14 = vld [vmem:[%s21272_s25 + $0xe78] sm:$0xff]  ;;  %v18212_v42 = vunpack.c.h.s8.bf16 %v1745_v63  ;;  %v1779_v63 = vld [vmem:[%s21272_s25 + $0xf30] sm:$0xff] }
 0x60f   : > { %18183 = vmatprep.subr.bf16.mxu0 %v18182_v28  ;;  %18903 = vmatprep.subr.bf16.mxu1 %v18902_v58  ;;  %v18932_v28 = vunpack.c.h.s8.bf16 %v1747_v23  ;;  %v18214_v58 = vunpack.c.l.s8.bf16 %v1754_v21  ;;  %v18934_v56 = vunpack.c.l.s8.bf16 %v1756_v14 }
 0x612   : > { %18185 = vmatpush1.bf16.msra.mxu0 %v18184_v0  ;;  %18905 = vmatpush1.bf16.msra.mxu1 %v18904_v52  ;;  %v1755_v0 = vld [vmem:[%s21272_s25 + $0xe70] sm:$0xff]  ;;  %v18216_v52 = vunpack.c.l.s8.bf16 %v1753_v4 }
 0x613   : > { %18187 = vmatprep.subr.bf16.mxu0 %v18186_v2  ;;  %18907 = vmatprep.subr.bf16.mxu1 %v18906_v26  ;;  %v18218_v2 = vunpack.c.h.s8.bf16 %v1754_v21  ;;  %v18938_v26 = vunpack.c.h.s8.bf16 %v1756_v14  ;;  %v1788_v21 = vld [vmem:[%s21272_s25 + $0xf78] sm:$0xff] }
 0x616   : > { %18189 = vmatpush1.bf16.msra.mxu0 %v18188_v8  ;;  %18909 = vmatpush1.bf16.msra.mxu1 %v18908_v40  ;;  %v18220_v8 = vunpack.c.h.s8.bf16 %v1753_v4  ;;  %v18940_v40 = vunpack.c.h.s8.bf16 %v1755_v0  ;;  %v1787_v4 = vld [vmem:[%s21272_s25 + $0xf70] sm:$0xff] }
 0x617   : > { %18191 = vmatprep.subr.bf16.mxu0 %v18190_v31  ;;  %18911 = vmatprep.subr.bf16.mxu1 %v18910_v38  ;;  %v18942_v31 = vunpack.c.l.s8.bf16 %v1764_v18  ;;  %v1761_v38 = vld [vmem:[%s21272_s25 + $0xea0] sm:$0xff] }
 0x618   : > { %v18224_v5 = vunpack.c.l.s8.bf16 %v1761_v38  ;;  %v18228_v47 = vunpack.c.h.s8.bf16 %v1761_v38  ;;  %v1795_v38 = vld [vmem:[%s21272_s25 + $0xfb0] sm:$0xff] }
 0x61a   : > { %18193 = vmatpush1.bf16.msra.mxu0 %v18192_v16  ;;  %18913 = vmatpush1.bf16.msra.mxu1 %v18912_v30  ;;  %v18944_v16 = vunpack.c.l.s8.bf16 %v1763_v20  ;;  %v18226_v30 = vunpack.c.h.s8.bf16 %v1762_v60 }
 0x61b   : > { %18195 = vmatprep.subr.bf16.mxu0 %v18194_v32  ;;  %18915 = vmatprep.subr.bf16.mxu1 %v18914_v10  ;;  %v18946_v32 = vunpack.c.h.s8.bf16 %v1764_v18  ;;  %v1770_v10 = vld [vmem:[%s21272_s25 + $0xee8] sm:$0xff] }
 0x61e   : > { %18197 = vmatpush1.bf16.msra.mxu0 %v18196_v46  ;;  %18917 = vmatpush1.bf16.msra.mxu1 %v18916_v54  ;;  %v18948_v46 = vunpack.c.h.s8.bf16 %v1763_v20  ;;  %v18230_v54 = vunpack.c.l.s8.bf16 %v1770_v10 }
 0x61f   : > { %18199 = vmatprep.subr.bf16.mxu0 %v18198_v12  ;;  %18919 = vmatprep.subr.bf16.mxu1 %v18918_v15  ;;  %v18950_v12 = vunpack.c.l.s8.bf16 %v1772_v62  ;;  %v1769_v15 = vld [vmem:[%s21272_s25 + $0xee0] sm:$0xff] }
 0x620   : > { %v18232_v51 = vunpack.c.l.s8.bf16 %v1769_v15  ;;  %v18236_v39 = vunpack.c.h.s8.bf16 %v1769_v15  ;;  %v1803_v15 = vld [vmem:[%s21272_s25 + $0xff0] sm:$0xff] }
 0x622   : > { %18201 = vmatpush1.bf16.msra.mxu0 %v18200_v37  ;;  %18921 = vmatpush1.bf16.msra.mxu1 %v18920_v45  ;;  %v18952_v37 = vunpack.c.l.s8.bf16 %v1771_v1  ;;  %v18234_v45 = vunpack.c.h.s8.bf16 %v1770_v10  ;;  %v1804_v10 = vld [vmem:[%s21272_s25 + $0xff8] sm:$0xff] }
 0x623   : > { %18203 = vmatprep.subr.bf16.mxu0 %v18202_v3  ;;  %18923 = vmatprep.subr.bf16.mxu1 %v18922_v13  ;;  %v18954_v3 = vunpack.c.h.s8.bf16 %v1772_v62  ;;  %v1778_v13 = vld [vmem:[%s21272_s25 + $0xf28] sm:$0xff] }
 0x626   : > { %18205 = vmatpush1.bf16.msra.mxu0 %v18204_v22  ;;  %18925 = vmatpush1.bf16.msra.mxu1 %v18924_v61  ;;  %v18956_v22 = vunpack.c.h.s8.bf16 %v1771_v1  ;;  %v18238_v61 = vunpack.c.l.s8.bf16 %v1778_v13 }
 0x627   : > { %18207 = vmatprep.subr.bf16.mxu0 %v18206_v50  ;;  %18927 = vmatprep.subr.bf16.mxu1 %v18926_v33  ;;  %v18958_v50 = vunpack.c.l.s8.bf16 %v1780_v6  ;;  %v1777_v33 = vld [vmem:[%s21272_s25 + $0xf20] sm:$0xff] }
 0x628   : > { %v18240_v23 = vunpack.c.l.s8.bf16 %v1777_v33  ;;  %v18244_v14 = vunpack.c.h.s8.bf16 %v1777_v33  ;;  %v1811_v33 = vld [vmem:[%s21272_s25 + $0x1030] sm:$0xff] }
 0x629   : > { %10106 = vmatmul.mubr.f32.vlgmr.msra.gmra.mrb[2].mxu0 %v22162_v49  ;;  %10958 = vmatmul.mubr.f32.vlgmr.msra.gmra.mrb[2].mxu1 %v22162_v49  ;;  %v18936_v49 = vunpack.c.l.s8.bf16 %v1755_v0 }
 0x62a   : > { %18209 = vmatpush1.bf16.msra.mxu0 %v18208_v57  ;;  %18929 = vmatpush1.bf16.msra.mxu1 %v18928_v59  ;;  %v18960_v57 = vunpack.c.l.s8.bf16 %v1779_v63  ;;  %v18242_v59 = vunpack.c.h.s8.bf16 %v1778_v13  ;;  %v1812_v13 = vld [vmem:[%s21272_s25 + $0x1038] sm:$0xff] }
 0x62b   : > { %18211 = vmatprep.subr.bf16.mxu0 %v18210_v41  ;;  %18931 = vmatprep.subr.bf16.mxu1 %v18930_v35  ;;  %v18962_v41 = vunpack.c.h.s8.bf16 %v1780_v6  ;;  %v1786_v35 = vld [vmem:[%s21272_s25 + $0xf68] sm:$0xff] }
 0x62c   : > { %10176 = vmatprep.mubr.f32.mxu0 %v22213_v17  ;;  %11028 = vmatprep.mubr.f32.mxu1 %v22213_v17  ;;  %v18222_v17 = vunpack.c.l.s8.bf16 %v1762_v60  ;;  %v1796_v60 = vld [vmem:[%s21272_s25 + $0xfb8] sm:$0xff] }
 0x62e   : > { %18213 = vmatpush1.bf16.msra.mxu0 %v18212_v42  ;;  %18933 = vmatpush1.bf16.msra.mxu1 %v18932_v28  ;;  %v18964_v42 = vunpack.c.h.s8.bf16 %v1779_v63  ;;  %v18246_v28 = vunpack.c.l.s8.bf16 %v1786_v35 }
 0x62f   : > { %18215 = vmatprep.subr.bf16.mxu0 %v18214_v58  ;;  %18935 = vmatprep.subr.bf16.mxu1 %v18934_v56  ;;  %v18966_v58 = vunpack.c.l.s8.bf16 %v1788_v21  ;;  %v1785_v56 = vld [vmem:[%s21272_s25 + $0xf60] sm:$0xff] }
 0x630   : > { %v18248_v0 = vunpack.c.l.s8.bf16 %v1785_v56  ;;  %v18252_v18 = vunpack.c.h.s8.bf16 %v1785_v56  ;;  %v1819_v56 = vld [vmem:[%s21272_s25 + $0x1070] sm:$0xff] }
 0x632   : > { %18217 = vmatpush1.bf16.msra.mxu0 %v18216_v52  ;;  %18937 = vmatpush1.bf16.msra.mxu1 %v18936_v49  ;;  %v18968_v52 = vunpack.c.l.s8.bf16 %v1787_v4  ;;  %v18250_v49 = vunpack.c.h.s8.bf16 %v1786_v35  ;;  %v1820_v35 = vld [vmem:[%s21272_s25 + $0x1078] sm:$0xff] }
 0x633   : > { %18219 = vmatprep.subr.bf16.mxu0 %v18218_v2  ;;  %18939 = vmatprep.subr.bf16.mxu1 %v18938_v26  ;;  %v18970_v2 = vunpack.c.h.s8.bf16 %v1788_v21  ;;  %v1794_v26 = vld [vmem:[%s21272_s25 + $0xfa8] sm:$0xff] }
 0x636   : > { %18221 = vmatpush1.bf16.msra.mxu0 %v18220_v8  ;;  %18941 = vmatpush1.bf16.msra.mxu1 %v18940_v40  ;;  %v18972_v8 = vunpack.c.h.s8.bf16 %v1787_v4  ;;  %v18254_v40 = vunpack.c.l.s8.bf16 %v1794_v26 }
 0x637   : > { %18223 = vmatprep.subr.bf16.mxu0 %v18222_v17  ;;  %18943 = vmatprep.subr.bf16.mxu1 %v18942_v31  ;;  %v18974_v17 = vunpack.c.l.s8.bf16 %v1796_v60  ;;  %v1793_v31 = vld [vmem:[%s21272_s25 + $0xfa0] sm:$0xff] }
 0x638   : > { %v18256_v20 = vunpack.c.l.s8.bf16 %v1793_v31  ;;  %v18260_v62 = vunpack.c.h.s8.bf16 %v1793_v31 }
 0x63a   : > { %18225 = vmatpush1.bf16.msra.mxu0 %v18224_v5  ;;  %18945 = vmatpush1.bf16.msra.mxu1 %v18944_v16  ;;  %v18976_v5 = vunpack.c.l.s8.bf16 %v1795_v38  ;;  %v18258_v16 = vunpack.c.h.s8.bf16 %v1794_v26 }
 0x63b   : > { %18227 = vmatprep.subr.bf16.mxu0 %v18226_v30  ;;  %18947 = vmatprep.subr.bf16.mxu1 %v18946_v32  ;;  %v18978_v30 = vunpack.c.h.s8.bf16 %v1796_v60  ;;  %v1802_v32 = vld [vmem:[%s21272_s25 + $0xfe8] sm:$0xff]  ;;  %v19004_v60 = vunpack.c.h.s8.bf16 %v1819_v56 }
 0x63e   : > { %18229 = vmatpush1.bf16.msra.mxu0 %v18228_v47  ;;  %18949 = vmatpush1.bf16.msra.mxu1 %v18948_v46  ;;  %v18980_v47 = vunpack.c.h.s8.bf16 %v1795_v38  ;;  %v18262_v46 = vunpack.c.l.s8.bf16 %v1802_v32 }
 0x63f   : > { %18231 = vmatprep.subr.bf16.mxu0 %v18230_v54  ;;  %18951 = vmatprep.subr.bf16.mxu1 %v18950_v12  ;;  %v18982_v54 = vunpack.c.l.s8.bf16 %v1804_v10  ;;  %v1801_v12 = vld [vmem:[%s21272_s25 + $0xfe0] sm:$0xff] }
 0x640   : > { %v18264_v1 = vunpack.c.l.s8.bf16 %v1801_v12  ;;  %v18268_v6 = vunpack.c.h.s8.bf16 %v1801_v12 }
 0x642   : > { %18233 = vmatpush1.bf16.msra.mxu0 %v18232_v51  ;;  %18953 = vmatpush1.bf16.msra.mxu1 %v18952_v37  ;;  %v18984_v51 = vunpack.c.l.s8.bf16 %v1803_v15  ;;  %v18266_v37 = vunpack.c.h.s8.bf16 %v1802_v32 }
 0x643   : > { %18235 = vmatprep.subr.bf16.mxu0 %v18234_v45  ;;  %18955 = vmatprep.subr.bf16.mxu1 %v18954_v3  ;;  %v18986_v45 = vunpack.c.h.s8.bf16 %v1804_v10  ;;  %v1810_v3 = vld [vmem:[%s21272_s25 + $0x1028] sm:$0xff] }
 0x646   : > { %18237 = vmatpush1.bf16.msra.mxu0 %v18236_v39  ;;  %18957 = vmatpush1.bf16.msra.mxu1 %v18956_v22  ;;  %v18988_v39 = vunpack.c.h.s8.bf16 %v1803_v15  ;;  %v18270_v22 = vunpack.c.l.s8.bf16 %v1810_v3 }
 0x647   : > { %18239 = vmatprep.subr.bf16.mxu0 %v18238_v61  ;;  %18959 = vmatprep.subr.bf16.mxu1 %v18958_v50  ;;  %v18990_v61 = vunpack.c.l.s8.bf16 %v1812_v13  ;;  %v1809_v50 = vld [vmem:[%s21272_s25 + $0x1020] sm:$0xff] }
 0x648   : > { %v18272_v63 = vunpack.c.l.s8.bf16 %v1809_v50  ;;  %v18276_v21 = vunpack.c.h.s8.bf16 %v1809_v50 }
 0x64a   : > { %18241 = vmatpush1.bf16.msra.mxu0 %v18240_v23  ;;  %18961 = vmatpush1.bf16.msra.mxu1 %v18960_v57  ;;  %v18992_v23 = vunpack.c.l.s8.bf16 %v1811_v33  ;;  %v18274_v57 = vunpack.c.h.s8.bf16 %v1810_v3 }
 0x64b   : > { %18243 = vmatprep.subr.bf16.mxu0 %v18242_v59  ;;  %18963 = vmatprep.subr.bf16.mxu1 %v18962_v41  ;;  %v18994_v59 = vunpack.c.h.s8.bf16 %v1812_v13  ;;  %v1818_v41 = vld [vmem:[%s21272_s25 + $0x1068] sm:$0xff] }
 0x64e   : > { %18245 = vmatpush1.bf16.msra.mxu0 %v18244_v14  ;;  %18965 = vmatpush1.bf16.msra.mxu1 %v18964_v42  ;;  %v18996_v14 = vunpack.c.h.s8.bf16 %v1811_v33  ;;  %v18278_v42 = vunpack.c.l.s8.bf16 %v1818_v41 }
 0x64f   : > { %18247 = vmatprep.subr.bf16.mxu0 %v18246_v28  ;;  %18967 = vmatprep.subr.bf16.mxu1 %v18966_v58  ;;  %v18998_v28 = vunpack.c.l.s8.bf16 %v1820_v35  ;;  %v1817_v58 = vld [vmem:[%s21272_s25 + $0x1060] sm:$0xff] }
 0x650   : > { %v18280_v4 = vunpack.c.l.s8.bf16 %v1817_v58  ;;  %v18284_v26 = vunpack.c.h.s8.bf16 %v1817_v58 }
 0x652   : > { %18249 = vmatpush1.bf16.msra.mxu0 %v18248_v0  ;;  %18969 = vmatpush1.bf16.msra.mxu1 %v18968_v52  ;;  %v18282_v0 = vunpack.c.h.s8.bf16 %v1818_v41  ;;  %v19002_v52 = vunpack.c.h.s8.bf16 %v1820_v35 }
 0x653   : > { %18251 = vmatprep.subr.bf16.mxu0 %v18250_v49  ;;  %18971 = vmatprep.subr.bf16.mxu1 %v18970_v2  ;;  %v1826_v49 = vld [vmem:[%s21272_s25 + $0x10a8] sm:$0xff]  ;;  %v1828_v2 = vld [vmem:[%s21272_s25 + $0x10b8] sm:$0xff] }
 0x654   : > { %v18290_v38 = vunpack.c.h.s8.bf16 %v1826_v49 }
 0x656   : > { %18253 = vmatpush1.bf16.msra.mxu0 %v18252_v18  ;;  %18973 = vmatpush1.bf16.msra.mxu1 %v18972_v8  ;;  %v19006_v18 = vunpack.c.l.s8.bf16 %v1828_v2  ;;  %v1825_v8 = vld [vmem:[%s21272_s25 + $0x10a0] sm:$0xff] }
 0x657   : > { %18255 = vmatprep.subr.bf16.mxu0 %v18254_v40  ;;  %18975 = vmatprep.subr.bf16.mxu1 %v18974_v17  ;;  %v1827_v40 = vld [vmem:[%s21272_s25 + $0x10b0] sm:$0xff]  ;;  %v18288_v17 = vunpack.c.l.s8.bf16 %v1825_v8 }
 0x658   : > { %v19008_v31 = vunpack.c.l.s8.bf16 %v1827_v40  ;;  %v19012_v32 = vunpack.c.h.s8.bf16 %v1827_v40 }
 0x65a   : > { %18257 = vmatpush1.bf16.msra.mxu0 %v18256_v20  ;;  %18977 = vmatpush1.bf16.msra.mxu1 %v18976_v5  ;;  %v19010_v20 = vunpack.c.h.s8.bf16 %v1828_v2  ;;  %v1834_v5 = vld [vmem:[%s21272_s25 + $0x10e8] sm:$0xff] }
 0x65b   : > { %18259 = vmatprep.subr.bf16.mxu0 %v18258_v16  ;;  %18979 = vmatprep.subr.bf16.mxu1 %v18978_v30  ;;  %v1836_v16 = vld [vmem:[%s21272_s25 + $0x10f8] sm:$0xff]  ;;  %v18292_v30 = vunpack.c.h.s8.bf16 %v1825_v8  ;;  %v18294_v10 = vunpack.c.l.s8.bf16 %v1834_v5  ;;  %v18298_v15 = vunpack.c.h.s8.bf16 %v1834_v5 }
 0x65e   : > { %18261 = vmatpush1.bf16.msra.mxu0 %v18260_v62  ;;  %18981 = vmatpush1.bf16.msra.mxu1 %v18980_v47  ;;  %v19014_v62 = vunpack.c.l.s8.bf16 %v1836_v16  ;;  %v1833_v47 = vld [vmem:[%s21272_s25 + $0x10e0] sm:$0xff] }
 0x65f   : > { %18263 = vmatprep.subr.bf16.mxu0 %v18262_v46  ;;  %18983 = vmatprep.subr.bf16.mxu1 %v18982_v54  ;;  %v1835_v46 = vld [vmem:[%s21272_s25 + $0x10f0] sm:$0xff]  ;;  %v18296_v54 = vunpack.c.l.s8.bf16 %v1833_v47 }
 0x660   : > { %v19016_v12 = vunpack.c.l.s8.bf16 %v1835_v46  ;;  %v19020_v3 = vunpack.c.h.s8.bf16 %v1835_v46 }
 0x662   : > { %18265 = vmatpush1.bf16.msra.mxu0 %v18264_v1  ;;  %18985 = vmatpush1.bf16.msra.mxu1 %v18984_v51  ;;  %v19018_v1 = vunpack.c.h.s8.bf16 %v1836_v16  ;;  %v1842_v51 = vld [vmem:[%s21272_s25 + $0x1128] sm:$0xff] }
 0x663   : > { %18267 = vmatprep.subr.bf16.mxu0 %v18266_v37  ;;  %18987 = vmatprep.subr.bf16.mxu1 %v18986_v45  ;;  %v1844_v37 = vld [vmem:[%s21272_s25 + $0x1138] sm:$0xff]  ;;  %v18300_v45 = vunpack.c.h.s8.bf16 %v1833_v47  ;;  %v18302_v13 = vunpack.c.l.s8.bf16 %v1842_v51  ;;  %v18306_v33 = vunpack.c.h.s8.bf16 %v1842_v51 }
 0x666   : > { %18269 = vmatpush1.bf16.msra.mxu0 %v18268_v6  ;;  %18989 = vmatpush1.bf16.msra.mxu1 %v18988_v39  ;;  %v19022_v6 = vunpack.c.l.s8.bf16 %v1844_v37  ;;  %v1841_v39 = vld [vmem:[%s21272_s25 + $0x1120] sm:$0xff] }
 0x667   : > { %18271 = vmatprep.subr.bf16.mxu0 %v18270_v22  ;;  %18991 = vmatprep.subr.bf16.mxu1 %v18990_v61  ;;  %v1843_v22 = vld [vmem:[%s21272_s25 + $0x1130] sm:$0xff]  ;;  %v18304_v61 = vunpack.c.l.s8.bf16 %v1841_v39 }
 0x668   : > { %v19024_v50 = vunpack.c.l.s8.bf16 %v1843_v22  ;;  %v19028_v41 = vunpack.c.h.s8.bf16 %v1843_v22 }
 0x669   : > { %10177 = vmatmul.mubr.f32.vlgmr.msra.gmra.mrb[2].mxu0 %v22207_v34  ;;  %11029 = vmatmul.mubr.f32.vlgmr.msra.gmra.mrb[2].mxu1 %v22207_v34  ;;  %v19000_v34 = vunpack.c.l.s8.bf16 %v1819_v56 }
 0x66a   : > { %18273 = vmatpush1.bf16.msra.mxu0 %v18272_v63  ;;  %18993 = vmatpush1.bf16.msra.mxu1 %v18992_v23  ;;  %v19026_v63 = vunpack.c.h.s8.bf16 %v1844_v37  ;;  %v1850_v23 = vld [vmem:[%s21272_s25 + $0x1168] sm:$0xff] }
 0x66b   : > { %18275 = vmatprep.subr.bf16.mxu0 %v18274_v57  ;;  %18995 = vmatprep.subr.bf16.mxu1 %v18994_v59  ;;  %v1852_v57 = vld [vmem:[%s21272_s25 + $0x1178] sm:$0xff]  ;;  %v18308_v59 = vunpack.c.h.s8.bf16 %v1841_v39  ;;  %v18310_v35 = vunpack.c.l.s8.bf16 %v1850_v23  ;;  %v18314_v56 = vunpack.c.h.s8.bf16 %v1850_v23 }
 0x66c   : > { %10247 = vmatprep.mubr.f32.mxu0 %v22259_v53  ;;  %11099 = vmatprep.mubr.f32.mxu1 %v22259_v53  ;;  %v18286_v53 = vunpack.c.l.s8.bf16 %v1826_v49 }
 0x66e   : > { %18277 = vmatpush1.bf16.msra.mxu0 %v18276_v21  ;;  %18997 = vmatpush1.bf16.msra.mxu1 %v18996_v14  ;;  %v19030_v21 = vunpack.c.l.s8.bf16 %v1852_v57  ;;  %v1849_v14 = vld [vmem:[%s21272_s25 + $0x1160] sm:$0xff] }
 0x66f   : > { %18279 = vmatprep.subr.bf16.mxu0 %v18278_v42  ;;  %18999 = vmatprep.subr.bf16.mxu1 %v18998_v28  ;;  %v1851_v42 = vld [vmem:[%s21272_s25 + $0x1170] sm:$0xff]  ;;  %v18312_v28 = vunpack.c.l.s8.bf16 %v1849_v14 }
 0x670   : > { %v19032_v58 = vunpack.c.l.s8.bf16 %v1851_v42  ;;  %v19036_v49 = vunpack.c.h.s8.bf16 %v1851_v42 }
 0x672   : > { %18281 = vmatpush1.bf16.msra.mxu0 %v18280_v4  ;;  %19001 = vmatpush1.bf16.msra.mxu1 %v19000_v34  ;;  %v19034_v4 = vunpack.c.h.s8.bf16 %v1852_v57  ;;  %v1858_v34 = vld [vmem:[%s21272_s25 + $0x11a8] sm:$0xff] }
 0x673   : > { %18283 = vmatprep.subr.bf16.mxu0 %v18282_v0  ;;  %19003 = vmatprep.subr.bf16.mxu1 %v19002_v52  ;;  %v1860_v0 = vld [vmem:[%s21272_s25 + $0x11b8] sm:$0xff]  ;;  %v18316_v52 = vunpack.c.h.s8.bf16 %v1849_v14  ;;  %v18318_v2 = vunpack.c.l.s8.bf16 %v1858_v34  ;;  %v18322_v40 = vunpack.c.h.s8.bf16 %v1858_v34 }
 0x676   : > { %18285 = vmatpush1.bf16.msra.mxu0 %v18284_v26  ;;  %19005 = vmatpush1.bf16.msra.mxu1 %v19004_v60  ;;  %v19038_v26 = vunpack.c.l.s8.bf16 %v1860_v0  ;;  %v1857_v60 = vld [vmem:[%s21272_s25 + $0x11a0] sm:$0xff] }
 0x677   : > { %18287 = vmatprep.subr.bf16.mxu0 %v18286_v53  ;;  %19007 = vmatprep.subr.bf16.mxu1 %v19006_v18  ;;  %v1859_v53 = vld [vmem:[%s21272_s25 + $0x11b0] sm:$0xff]  ;;  %v18320_v18 = vunpack.c.l.s8.bf16 %v1857_v60 }
 0x678   : > { %v19040_v8 = vunpack.c.l.s8.bf16 %v1859_v53  ;;  %v19044_v5 = vunpack.c.h.s8.bf16 %v1859_v53  ;;  %v1898_v53 = vld [vmem:[%s21272_s25 + $0x12e8] sm:$0xff] }
 0x67a   : > { %18289 = vmatpush1.bf16.msra.mxu0 %v18288_v17  ;;  %19009 = vmatpush1.bf16.msra.mxu1 %v19008_v31  ;;  %v19042_v17 = vunpack.c.h.s8.bf16 %v1860_v0  ;;  %v1866_v31 = vld [vmem:[%s21272_s25 + $0x11e8] sm:$0xff]  ;;  %v1889_v0 = vld [vmem:[%s21272_s25 + $0x12a0] sm:$0xff] }
 0x67b   : > { %18291 = vmatprep.subr.bf16.mxu0 %v18290_v38  ;;  %19011 = vmatprep.subr.bf16.mxu1 %v19010_v20  ;;  %v1868_v38 = vld [vmem:[%s21272_s25 + $0x11f8] sm:$0xff]  ;;  %v18324_v20 = vunpack.c.h.s8.bf16 %v1857_v60  ;;  %v18326_v16 = vunpack.c.l.s8.bf16 %v1866_v31  ;;  %v18330_v46 = vunpack.c.h.s8.bf16 %v1866_v31 }
 0x67e   : > { %18293 = vmatpush1.bf16.msra.mxu0 %v18292_v30  ;;  %19013 = vmatpush1.bf16.msra.mxu1 %v19012_v32  ;;  %v19046_v30 = vunpack.c.l.s8.bf16 %v1868_v38  ;;  %v1865_v32 = vld [vmem:[%s21272_s25 + $0x11e0] sm:$0xff] }
 0x67f   : > { %18295 = vmatprep.subr.bf16.mxu0 %v18294_v10  ;;  %19015 = vmatprep.subr.bf16.mxu1 %v19014_v62  ;;  %v1867_v10 = vld [vmem:[%s21272_s25 + $0x11f0] sm:$0xff]  ;;  %v18328_v62 = vunpack.c.l.s8.bf16 %v1865_v32 }
 0x680   : > { %v19048_v47 = vunpack.c.l.s8.bf16 %v1867_v10  ;;  %v19052_v51 = vunpack.c.h.s8.bf16 %v1867_v10  ;;  %v1906_v10 = vld [vmem:[%s21272_s25 + $0x1328] sm:$0xff] }
 0x682   : > { %18297 = vmatpush1.bf16.msra.mxu0 %v18296_v54  ;;  %19017 = vmatpush1.bf16.msra.mxu1 %v19016_v12  ;;  %v19050_v54 = vunpack.c.h.s8.bf16 %v1868_v38  ;;  %v1874_v12 = vld [vmem:[%s21272_s25 + $0x1228] sm:$0xff]  ;;  %v1897_v38 = vld [vmem:[%s21272_s25 + $0x12e0] sm:$0xff] }
 0x683   : > { %18299 = vmatprep.subr.bf16.mxu0 %v18298_v15  ;;  %19019 = vmatprep.subr.bf16.mxu1 %v19018_v1  ;;  %v1876_v15 = vld [vmem:[%s21272_s25 + $0x1238] sm:$0xff]  ;;  %v18332_v1 = vunpack.c.h.s8.bf16 %v1865_v32  ;;  %v18334_v37 = vunpack.c.l.s8.bf16 %v1874_v12  ;;  %v18338_v22 = vunpack.c.h.s8.bf16 %v1874_v12 }
 0x686   : > { %18301 = vmatpush1.bf16.msra.mxu0 %v18300_v45  ;;  %19021 = vmatpush1.bf16.msra.mxu1 %v19020_v3  ;;  %v19054_v45 = vunpack.c.l.s8.bf16 %v1876_v15  ;;  %v1873_v3 = vld [vmem:[%s21272_s25 + $0x1220] sm:$0xff] }
 0x687   : > { %18303 = vmatprep.subr.bf16.mxu0 %v18302_v13  ;;  %19023 = vmatprep.subr.bf16.mxu1 %v19022_v6  ;;  %v1875_v13 = vld [vmem:[%s21272_s25 + $0x1230] sm:$0xff]  ;;  %v18336_v6 = vunpack.c.l.s8.bf16 %v1873_v3 }
 0x688   : > { %v19056_v39 = vunpack.c.l.s8.bf16 %v1875_v13  ;;  %v19060_v23 = vunpack.c.h.s8.bf16 %v1875_v13  ;;  %v1914_v13 = vld [vmem:[%s21272_s25 + $0x1368] sm:$0xff] }
 0x68a   : > { %18305 = vmatpush1.bf16.msra.mxu0 %v18304_v61  ;;  %19025 = vmatpush1.bf16.msra.mxu1 %v19024_v50  ;;  %v19058_v61 = vunpack.c.h.s8.bf16 %v1876_v15  ;;  %v1882_v50 = vld [vmem:[%s21272_s25 + $0x1268] sm:$0xff]  ;;  %v1905_v15 = vld [vmem:[%s21272_s25 + $0x1320] sm:$0xff] }
 0x68b   : > { %18307 = vmatprep.subr.bf16.mxu0 %v18306_v33  ;;  %19027 = vmatprep.subr.bf16.mxu1 %v19026_v63  ;;  %v1884_v33 = vld [vmem:[%s21272_s25 + $0x1278] sm:$0xff]  ;;  %v18340_v63 = vunpack.c.h.s8.bf16 %v1873_v3  ;;  %v18342_v57 = vunpack.c.l.s8.bf16 %v1882_v50  ;;  %v18346_v14 = vunpack.c.h.s8.bf16 %v1882_v50 }
 0x68c   : > { %v19066_v42 = vunpack.c.h.s8.bf16 %v1884_v33 }
 0x68e   : > { %18309 = vmatpush1.bf16.msra.mxu0 %v18308_v59  ;;  %19029 = vmatpush1.bf16.msra.mxu1 %v19028_v41  ;;  %v19062_v59 = vunpack.c.l.s8.bf16 %v1884_v33  ;;  %v1881_v41 = vld [vmem:[%s21272_s25 + $0x1260] sm:$0xff] }
 0x68f   : > { %18311 = vmatprep.subr.bf16.mxu0 %v18310_v35  ;;  %19031 = vmatprep.subr.bf16.mxu1 %v19030_v21  ;;  %v1883_v35 = vld [vmem:[%s21272_s25 + $0x1270] sm:$0xff]  ;;  %v18344_v21 = vunpack.c.l.s8.bf16 %v1881_v41  ;;  %v1913_v33 = vld [vmem:[%s21272_s25 + $0x1360] sm:$0xff] }
 0x692   : > { %18313 = vmatpush1.bf16.msra.mxu0 %v18312_v28  ;;  %19033 = vmatpush1.bf16.msra.mxu1 %v19032_v58  ;;  %v1890_v28 = vld [vmem:[%s21272_s25 + $0x12a8] sm:$0xff]  ;;  %v1892_v58 = vld [vmem:[%s21272_s25 + $0x12b8] sm:$0xff] }
 0x693   : > { %18315 = vmatprep.subr.bf16.mxu0 %v18314_v56  ;;  %19035 = vmatprep.subr.bf16.mxu1 %v19034_v4  ;;  %v18348_v56 = vunpack.c.h.s8.bf16 %v1881_v41  ;;  %v19068_v4 = vunpack.c.h.s8.bf16 %v1883_v35  ;;  %v19070_v34 = vunpack.c.l.s8.bf16 %v1892_v58  ;;  %v19074_v60 = vunpack.c.h.s8.bf16 %v1892_v58  ;;  %v1921_v58 = vld [vmem:[%s21272_s25 + $0x13a0] sm:$0xff] }
 0x696   : > { %18317 = vmatpush1.bf16.msra.mxu0 %v18316_v52  ;;  %19037 = vmatpush1.bf16.msra.mxu1 %v19036_v49  ;;  %v1891_v52 = vld [vmem:[%s21272_s25 + $0x12b0] sm:$0xff]  ;;  %v18352_v49 = vunpack.c.l.s8.bf16 %v1889_v0 }
 0x697   : > { %18319 = vmatprep.subr.bf16.mxu0 %v18318_v2  ;;  %19039 = vmatprep.subr.bf16.mxu1 %v19038_v26  ;;  %v19072_v2 = vunpack.c.l.s8.bf16 %v1891_v52  ;;  %v18354_v26 = vunpack.c.h.s8.bf16 %v1890_v28 }
 0x69a   : > { %18321 = vmatpush1.bf16.msra.mxu0 %v18320_v18  ;;  %19041 = vmatpush1.bf16.msra.mxu1 %v19040_v8  ;;  %v1900_v18 = vld [vmem:[%s21272_s25 + $0x12f8] sm:$0xff]  ;;  %v18356_v8 = vunpack.c.h.s8.bf16 %v1889_v0 }
 0x69b   : > { %18323 = vmatprep.subr.bf16.mxu0 %v18322_v40  ;;  %19043 = vmatprep.subr.bf16.mxu1 %v19042_v17  ;;  %v19076_v40 = vunpack.c.h.s8.bf16 %v1891_v52  ;;  %v18358_v17 = vunpack.c.l.s8.bf16 %v1898_v53  ;;  %v19078_v31 = vunpack.c.l.s8.bf16 %v1900_v18  ;;  %v19082_v32 = vunpack.c.h.s8.bf16 %v1900_v18  ;;  %v1930_v52 = vld [vmem:[%s21272_s25 + $0x13e8] sm:$0xff]  ;;  %v1929_v18 = vld [vmem:[%s21272_s25 + $0x13e0] sm:$0xff] }
 0x69e   : > { %18325 = vmatpush1.bf16.msra.mxu0 %v18324_v20  ;;  %19045 = vmatpush1.bf16.msra.mxu1 %v19044_v5  ;;  %v1899_v20 = vld [vmem:[%s21272_s25 + $0x12f0] sm:$0xff]  ;;  %v18360_v5 = vunpack.c.l.s8.bf16 %v1897_v38 }
 0x69f   : > { %18327 = vmatprep.subr.bf16.mxu0 %v18326_v16  ;;  %19047 = vmatprep.subr.bf16.mxu1 %v19046_v30  ;;  %v19080_v16 = vunpack.c.l.s8.bf16 %v1899_v20  ;;  %v18362_v30 = vunpack.c.h.s8.bf16 %v1898_v53 }
 0x6a2   : > { %18329 = vmatpush1.bf16.msra.mxu0 %v18328_v62  ;;  %19049 = vmatpush1.bf16.msra.mxu1 %v19048_v47  ;;  %v1908_v62 = vld [vmem:[%s21272_s25 + $0x1338] sm:$0xff]  ;;  %v18364_v47 = vunpack.c.h.s8.bf16 %v1897_v38 }
 0x6a3   : > { %18331 = vmatprep.subr.bf16.mxu0 %v18330_v46  ;;  %19051 = vmatprep.subr.bf16.mxu1 %v19050_v54  ;;  %v19084_v46 = vunpack.c.h.s8.bf16 %v1899_v20  ;;  %v18366_v54 = vunpack.c.l.s8.bf16 %v1906_v10  ;;  %v19086_v12 = vunpack.c.l.s8.bf16 %v1908_v62  ;;  %v19090_v3 = vunpack.c.h.s8.bf16 %v1908_v62  ;;  %v1938_v20 = vld [vmem:[%s21272_s25 + $0x1428] sm:$0xff]  ;;  %v1937_v62 = vld [vmem:[%s21272_s25 + $0x1420] sm:$0xff] }
 0x6a6   : > { %18333 = vmatpush1.bf16.msra.mxu0 %v18332_v1  ;;  %19053 = vmatpush1.bf16.msra.mxu1 %v19052_v51  ;;  %v1907_v1 = vld [vmem:[%s21272_s25 + $0x1330] sm:$0xff]  ;;  %v18368_v51 = vunpack.c.l.s8.bf16 %v1905_v15 }
 0x6a7   : > { %18335 = vmatprep.subr.bf16.mxu0 %v18334_v37  ;;  %19055 = vmatprep.subr.bf16.mxu1 %v19054_v45  ;;  %v19088_v37 = vunpack.c.l.s8.bf16 %v1907_v1  ;;  %v18370_v45 = vunpack.c.h.s8.bf16 %v1906_v10 }
 0x6a9   : > { %10248 = vmatmul.mubr.f32.vlgmr.msra.gmra.mrb[2].mxu0 %v22253_v29  ;;  %11100 = vmatmul.mubr.f32.vlgmr.msra.gmra.mrb[2].mxu1 %v22253_v29  ;;  %v19064_v29 = vunpack.c.l.s8.bf16 %v1883_v35  ;;  %v1922_v35 = vld [vmem:[%s21272_s25 + $0x13a8] sm:$0xff] }
 0x6aa   : > { %18337 = vmatpush1.bf16.msra.mxu0 %v18336_v6  ;;  %19057 = vmatpush1.bf16.msra.mxu1 %v19056_v39  ;;  %v1916_v6 = vld [vmem:[%s21272_s25 + $0x1378] sm:$0xff]  ;;  %v18372_v39 = vunpack.c.h.s8.bf16 %v1905_v15 }
 0x6ab   : > { %18339 = vmatprep.subr.bf16.mxu0 %v18338_v22  ;;  %19059 = vmatprep.subr.bf16.mxu1 %v19058_v61  ;;  %v19092_v22 = vunpack.c.h.s8.bf16 %v1907_v1  ;;  %v18374_v61 = vunpack.c.l.s8.bf16 %v1914_v13  ;;  %v19094_v50 = vunpack.c.l.s8.bf16 %v1916_v6  ;;  %v19098_v41 = vunpack.c.h.s8.bf16 %v1916_v6  ;;  %v1946_v1 = vld [vmem:[%s21272_s25 + $0x1468] sm:$0xff]  ;;  %v1945_v6 = vld [vmem:[%s21272_s25 + $0x1460] sm:$0xff] }
 0x6ac   : > { %10318 = vmatprep.mubr.f32.mxu0 %v22304_v36  ;;  %11170 = vmatprep.mubr.f32.mxu1 %v22304_v36  ;;  %v18350_v36 = vunpack.c.l.s8.bf16 %v1890_v28 }
 0x6ae   : > { %18341 = vmatpush1.bf16.msra.mxu0 %v18340_v63  ;;  %19061 = vmatpush1.bf16.msra.mxu1 %v19060_v23  ;;  %v1915_v63 = vld [vmem:[%s21272_s25 + $0x1370] sm:$0xff]  ;;  %v18376_v23 = vunpack.c.l.s8.bf16 %v1913_v33 }
 0x6af   : > { %18343 = vmatprep.subr.bf16.mxu0 %v18342_v57  ;;  %19063 = vmatprep.subr.bf16.mxu1 %v19062_v59  ;;  %v19096_v57 = vunpack.c.l.s8.bf16 %v1915_v63  ;;  %v18378_v59 = vunpack.c.h.s8.bf16 %v1914_v13 }
 0x6b2   : > { %18345 = vmatpush1.bf16.msra.mxu0 %v18344_v21  ;;  %19065 = vmatpush1.bf16.msra.mxu1 %v19064_v29  ;;  %v1924_v21 = vld [vmem:[%s21272_s25 + $0x13b8] sm:$0xff]  ;;  %v18380_v29 = vunpack.c.h.s8.bf16 %v1913_v33  ;;  %v1954_v33 = vld [vmem:[%s21272_s25 + $0x14a8] sm:$0xff] }
 0x6b3   : > { %18347 = vmatprep.subr.bf16.mxu0 %v18346_v14  ;;  %19067 = vmatprep.subr.bf16.mxu1 %v19066_v42  ;;  %v19100_v14 = vunpack.c.h.s8.bf16 %v1915_v63  ;;  %v18382_v42 = vunpack.c.l.s8.bf16 %v1922_v35  ;;  %v19102_v28 = vunpack.c.l.s8.bf16 %v1924_v21  ;;  %v19106_v0 = vunpack.c.h.s8.bf16 %v1924_v21  ;;  %v1956_v63 = vld [vmem:[%s21272_s25 + $0x14b8] sm:$0xff] }
 0x6b6   : > { %18349 = vmatpush1.bf16.msra.mxu0 %v18348_v56  ;;  %19069 = vmatpush1.bf16.msra.mxu1 %v19068_v4  ;;  %v1923_v56 = vld [vmem:[%s21272_s25 + $0x13b0] sm:$0xff]  ;;  %v18384_v4 = vunpack.c.l.s8.bf16 %v1921_v58 }
 0x6b7   : > { %18351 = vmatprep.subr.bf16.mxu0 %v18350_v36  ;;  %19071 = vmatprep.subr.bf16.mxu1 %v19070_v34  ;;  %v19104_v36 = vunpack.c.l.s8.bf16 %v1923_v56  ;;  %v18386_v34 = vunpack.c.h.s8.bf16 %v1922_v35  ;;  %v1955_v35 = vld [vmem:[%s21272_s25 + $0x14b0] sm:$0xff] }
 0x6ba   : > { %18353 = vmatpush1.bf16.msra.mxu0 %v18352_v49  ;;  %19073 = vmatpush1.bf16.msra.mxu1 %v19072_v2  ;;  %v1932_v49 = vld [vmem:[%s21272_s25 + $0x13f8] sm:$0xff]  ;;  %v18388_v2 = vunpack.c.h.s8.bf16 %v1921_v58 }
 0x6bb   : > { %18355 = vmatprep.subr.bf16.mxu0 %v18354_v26  ;;  %19075 = vmatprep.subr.bf16.mxu1 %v19074_v60  ;;  %v19108_v26 = vunpack.c.h.s8.bf16 %v1923_v56  ;;  %v18390_v60 = vunpack.c.l.s8.bf16 %v1930_v52  ;;  %v19110_v53 = vunpack.c.l.s8.bf16 %v1932_v49  ;;  %v19114_v38 = vunpack.c.h.s8.bf16 %v1932_v49  ;;  %v1964_v58 = vld [vmem:[%s21272_s25 + $0x14f8] sm:$0xff] }
 0x6be   : > { %18357 = vmatpush1.bf16.msra.mxu0 %v18356_v8  ;;  %19077 = vmatpush1.bf16.msra.mxu1 %v19076_v40  ;;  %v1931_v8 = vld [vmem:[%s21272_s25 + $0x13f0] sm:$0xff]  ;;  %v18392_v40 = vunpack.c.l.s8.bf16 %v1929_v18 }
 0x6bf   : > { %18359 = vmatprep.subr.bf16.mxu0 %v18358_v17  ;;  %19079 = vmatprep.subr.bf16.mxu1 %v19078_v31  ;;  %v19112_v17 = vunpack.c.l.s8.bf16 %v1931_v8  ;;  %v18394_v31 = vunpack.c.h.s8.bf16 %v1930_v52  ;;  %v1963_v52 = vld [vmem:[%s21272_s25 + $0x14f0] sm:$0xff] }
 0x6c2   : > { %18361 = vmatpush1.bf16.msra.mxu0 %v18360_v5  ;;  %19081 = vmatpush1.bf16.msra.mxu1 %v19080_v16  ;;  %v1940_v5 = vld [vmem:[%s21272_s25 + $0x1438] sm:$0xff]  ;;  %v18396_v16 = vunpack.c.h.s8.bf16 %v1929_v18 }
 0x6c3   : > { %18363 = vmatprep.subr.bf16.mxu0 %v18362_v30  ;;  %19083 = vmatprep.subr.bf16.mxu1 %v19082_v32  ;;  %v19116_v30 = vunpack.c.h.s8.bf16 %v1931_v8  ;;  %v18398_v32 = vunpack.c.l.s8.bf16 %v1938_v20  ;;  %v19118_v10 = vunpack.c.l.s8.bf16 %v1940_v5  ;;  %v19122_v15 = vunpack.c.h.s8.bf16 %v1940_v5  ;;  %v1972_v18 = vld [vmem:[%s21272_s25 + $0x1538] sm:$0xff] }
 0x6c6   : > { %18365 = vmatpush1.bf16.msra.mxu0 %v18364_v47  ;;  %19085 = vmatpush1.bf16.msra.mxu1 %v19084_v46  ;;  %v1939_v47 = vld [vmem:[%s21272_s25 + $0x1430] sm:$0xff]  ;;  %v18400_v46 = vunpack.c.l.s8.bf16 %v1937_v62 }
 0x6c7   : > { %18367 = vmatprep.subr.bf16.mxu0 %v18366_v54  ;;  %19087 = vmatprep.subr.bf16.mxu1 %v19086_v12  ;;  %v19120_v54 = vunpack.c.l.s8.bf16 %v1939_v47  ;;  %v18402_v12 = vunpack.c.h.s8.bf16 %v1938_v20  ;;  %v1971_v20 = vld [vmem:[%s21272_s25 + $0x1530] sm:$0xff] }
 0x6ca   : > { %18369 = vmatpush1.bf16.msra.mxu0 %v18368_v51  ;;  %19089 = vmatpush1.bf16.msra.mxu1 %v19088_v37  ;;  %v1948_v51 = vld [vmem:[%s21272_s25 + $0x1478] sm:$0xff]  ;;  %v18404_v37 = vunpack.c.h.s8.bf16 %v1937_v62 }
 0x6cb   : > { %18371 = vmatprep.subr.bf16.mxu0 %v18370_v45  ;;  %19091 = vmatprep.subr.bf16.mxu1 %v19090_v3  ;;  %v19124_v45 = vunpack.c.h.s8.bf16 %v1939_v47  ;;  %v18406_v3 = vunpack.c.l.s8.bf16 %v1946_v1  ;;  %v19126_v13 = vunpack.c.l.s8.bf16 %v1948_v51  ;;  %v1980_v62 = vld [vmem:[%s21272_s25 + $0x1578] sm:$0xff] }
 0x6ce   : > { %18373 = vmatpush1.bf16.msra.mxu0 %v18372_v39  ;;  %19093 = vmatpush1.bf16.msra.mxu1 %v19092_v22  ;;  %v1947_v39 = vld [vmem:[%s21272_s25 + $0x1470] sm:$0xff]  ;;  %v18408_v22 = vunpack.c.l.s8.bf16 %v1945_v6 }
 0x6cf   : > { %18375 = vmatprep.subr.bf16.mxu0 %v18374_v61  ;;  %19095 = vmatprep.subr.bf16.mxu1 %v19094_v50  ;;  %v18410_v61 = vunpack.c.h.s8.bf16 %v1946_v1  ;;  %v19130_v50 = vunpack.c.h.s8.bf16 %v1948_v51  ;;  %v1979_v1 = vld [vmem:[%s21272_s25 + $0x1570] sm:$0xff] }
 0x6d2   : > { %18377 = vmatpush1.bf16.msra.mxu0 %v18376_v23  ;;  %19097 = vmatpush1.bf16.msra.mxu1 %v19096_v57  ;;  %v18412_v23 = vunpack.c.h.s8.bf16 %v1945_v6  ;;  %v19132_v57 = vunpack.c.h.s8.bf16 %v1947_v39  ;;  %v1988_v6 = vld [vmem:[%s21272_s25 + $0x15b8] sm:$0xff] }
 0x6d3   : > { %18379 = vmatprep.subr.bf16.mxu0 %v18378_v59  ;;  %19099 = vmatprep.subr.bf16.mxu1 %v19098_v41  ;;  %v19134_v59 = vunpack.c.l.s8.bf16 %v1956_v63  ;;  %v1953_v41 = vld [vmem:[%s21272_s25 + $0x14a0] sm:$0xff] }
 0x6d4   : > { %v18416_v21 = vunpack.c.l.s8.bf16 %v1953_v41  ;;  %v18420_v56 = vunpack.c.h.s8.bf16 %v1953_v41  ;;  %v1996_v41 = vld [vmem:[%s21272_s25 + $0x15f8] sm:$0xff] }
 0x6d6   : > { %18381 = vmatpush1.bf16.msra.mxu0 %v18380_v29  ;;  %19101 = vmatpush1.bf16.msra.mxu1 %v19100_v14  ;;  %v19136_v29 = vunpack.c.l.s8.bf16 %v1955_v35  ;;  %v18418_v14 = vunpack.c.h.s8.bf16 %v1954_v33 }
 0x6d7   : > { %18383 = vmatprep.subr.bf16.mxu0 %v18382_v42  ;;  %19103 = vmatprep.subr.bf16.mxu1 %v19102_v28  ;;  %v19138_v42 = vunpack.c.h.s8.bf16 %v1956_v63  ;;  %v1962_v28 = vld [vmem:[%s21272_s25 + $0x14e8] sm:$0xff] }
 0x6da   : > { %18385 = vmatpush1.bf16.msra.mxu0 %v18384_v4  ;;  %19105 = vmatpush1.bf16.msra.mxu1 %v19104_v36  ;;  %v19140_v4 = vunpack.c.h.s8.bf16 %v1955_v35  ;;  %v18422_v36 = vunpack.c.l.s8.bf16 %v1962_v28 }
 0x6db   : > { %18387 = vmatprep.subr.bf16.mxu0 %v18386_v34  ;;  %19107 = vmatprep.subr.bf16.mxu1 %v19106_v0  ;;  %v19142_v34 = vunpack.c.l.s8.bf16 %v1964_v58  ;;  %v1961_v0 = vld [vmem:[%s21272_s25 + $0x14e0] sm:$0xff] }
 0x6dc   : > { %v18424_v49 = vunpack.c.l.s8.bf16 %v1961_v0  ;;  %v18428_v8 = vunpack.c.h.s8.bf16 %v1961_v0  ;;  %v2004_v0 = vld [vmem:[%s21272_s25 + $0x1638] sm:$0xff] }
 0x6de   : > { %18389 = vmatpush1.bf16.msra.mxu0 %v18388_v2  ;;  %19109 = vmatpush1.bf16.msra.mxu1 %v19108_v26  ;;  %v19144_v2 = vunpack.c.l.s8.bf16 %v1963_v52  ;;  %v18426_v26 = vunpack.c.h.s8.bf16 %v1962_v28  ;;  %v1995_v28 = vld [vmem:[%s21272_s25 + $0x15f0] sm:$0xff] }
 0x6df   : > { %18391 = vmatprep.subr.bf16.mxu0 %v18390_v60  ;;  %19111 = vmatprep.subr.bf16.mxu1 %v19110_v53  ;;  %v19146_v60 = vunpack.c.h.s8.bf16 %v1964_v58  ;;  %v1970_v53 = vld [vmem:[%s21272_s25 + $0x1528] sm:$0xff] }
 0x6e2   : > { %18393 = vmatpush1.bf16.msra.mxu0 %v18392_v40  ;;  %19113 = vmatpush1.bf16.msra.mxu1 %v19112_v17  ;;  %v19148_v40 = vunpack.c.h.s8.bf16 %v1963_v52  ;;  %v18430_v17 = vunpack.c.l.s8.bf16 %v1970_v53 }
 0x6e3   : > { %18395 = vmatprep.subr.bf16.mxu0 %v18394_v31  ;;  %19115 = vmatprep.subr.bf16.mxu1 %v19114_v38  ;;  %v19150_v31 = vunpack.c.l.s8.bf16 %v1972_v18  ;;  %v1969_v38 = vld [vmem:[%s21272_s25 + $0x1520] sm:$0xff] }
 0x6e4   : > { %v18432_v5 = vunpack.c.l.s8.bf16 %v1969_v38  ;;  %v18436_v47 = vunpack.c.h.s8.bf16 %v1969_v38  ;;  %v2010_v38 = vld [vmem:[%s21272_s25 + $0x1668] sm:$0xff] }
 0x6e6   : > { %18397 = vmatpush1.bf16.msra.mxu0 %v18396_v16  ;;  %19117 = vmatpush1.bf16.msra.mxu1 %v19116_v30  ;;  %v19152_v16 = vunpack.c.l.s8.bf16 %v1971_v20  ;;  %v18434_v30 = vunpack.c.h.s8.bf16 %v1970_v53  ;;  %v2003_v53 = vld [vmem:[%s21272_s25 + $0x1630] sm:$0xff] }
 0x6e7   : > { %18399 = vmatprep.subr.bf16.mxu0 %v18398_v32  ;;  %19119 = vmatprep.subr.bf16.mxu1 %v19118_v10  ;;  %v19154_v32 = vunpack.c.h.s8.bf16 %v1972_v18  ;;  %v1978_v10 = vld [vmem:[%s21272_s25 + $0x1568] sm:$0xff] }
 0x6e9   : > { %10319 = vmatmul.mubr.f32.vlgmr.msra.gmra.mrb[2].mxu0 %v22298_v48  ;;  %11171 = vmatmul.mubr.f32.vlgmr.msra.gmra.mrb[2].mxu1 %v22298_v48  ;;  %v19128_v48 = vunpack.c.l.s8.bf16 %v1947_v39 }
 0x6ea   : > { %18401 = vmatpush1.bf16.msra.mxu0 %v18400_v46  ;;  %19121 = vmatpush1.bf16.msra.mxu1 %v19120_v54  ;;  %v19156_v46 = vunpack.c.h.s8.bf16 %v1971_v20  ;;  %v18438_v54 = vunpack.c.l.s8.bf16 %v1978_v10  ;;  %v2012_v20 = vld [vmem:[%s21272_s25 + $0x1678] sm:$0xff] }
 0x6eb   : > { %18403 = vmatprep.subr.bf16.mxu0 %v18402_v12  ;;  %19123 = vmatprep.subr.bf16.mxu1 %v19122_v15  ;;  %v19158_v12 = vunpack.c.l.s8.bf16 %v1980_v62  ;;  %v1977_v15 = vld [vmem:[%s21272_s25 + $0x1560] sm:$0xff] }
 0x6ec   : > { %10389 = vmatprep.mubr.f32.mxu0 %v22350_v7  ;;  %11241 = vmatprep.mubr.f32.mxu1 %v22350_v7  ;;  %v18414_v7 = vunpack.c.l.s8.bf16 %v1954_v33  ;;  %v18440_v51 = vunpack.c.l.s8.bf16 %v1977_v15  ;;  %v18444_v39 = vunpack.c.h.s8.bf16 %v1977_v15  ;;  %v1987_v33 = vld [vmem:[%s21272_s25 + $0x15b0] sm:$0xff]  ;;  %v18474_v15 = vunpack.c.h.s8.bf16 %v2010_v38 }
 0x6ee   : > { %18405 = vmatpush1.bf16.msra.mxu0 %v18404_v37  ;;  %19125 = vmatpush1.bf16.msra.mxu1 %v19124_v45  ;;  %v19160_v37 = vunpack.c.l.s8.bf16 %v1979_v1  ;;  %v18442_v45 = vunpack.c.h.s8.bf16 %v1978_v10  ;;  %v19190_v10 = vunpack.c.l.s8.bf16 %v2012_v20 }
 0x6ef   : > { %18407 = vmatprep.subr.bf16.mxu0 %v18406_v3  ;;  %19127 = vmatprep.subr.bf16.mxu1 %v19126_v13  ;;  %v19162_v3 = vunpack.c.h.s8.bf16 %v1980_v62  ;;  %v1986_v13 = vld [vmem:[%s21272_s25 + $0x15a8] sm:$0xff]  ;;  %v2009_v62 = vld [vmem:[%s21272_s25 + $0x1660] sm:$0xff] }
 0x6f2   : > { %18409 = vmatpush1.bf16.msra.mxu0 %v18408_v22  ;;  %19129 = vmatpush1.bf16.msra.mxu1 %v19128_v48  ;;  %v19164_v22 = vunpack.c.h.s8.bf16 %v1979_v1  ;;  %v18446_v48 = vunpack.c.l.s8.bf16 %v1986_v13  ;;  %v19194_v1 = vunpack.c.h.s8.bf16 %v2012_v20 }
 0x6f3   : > { %18411 = vmatprep.subr.bf16.mxu0 %v18410_v61  ;;  %19131 = vmatprep.subr.bf16.mxu1 %v19130_v50  ;;  %v19166_v61 = vunpack.c.l.s8.bf16 %v1988_v6  ;;  %v1985_v50 = vld [vmem:[%s21272_s25 + $0x15a0] sm:$0xff] }
 0x6f4   : > { %v18448_v63 = vunpack.c.l.s8.bf16 %v1985_v50  ;;  %v18452_v35 = vunpack.c.h.s8.bf16 %v1985_v50 }
 0x6f6   : > { %18413 = vmatpush1.bf16.msra.mxu0 %v18412_v23  ;;  %19133 = vmatpush1.bf16.msra.mxu1 %v19132_v57  ;;  %v19168_v23 = vunpack.c.l.s8.bf16 %v1987_v33  ;;  %v18450_v57 = vunpack.c.h.s8.bf16 %v1986_v13 }
 0x6f7   : > { %18415 = vmatprep.subr.bf16.mxu0 %v18414_v7  ;;  %19135 = vmatprep.subr.bf16.mxu1 %v19134_v59  ;;  %v19170_v7 = vunpack.c.h.s8.bf16 %v1988_v6  ;;  %v1994_v59 = vld [vmem:[%s21272_s25 + $0x15e8] sm:$0xff] }
 0x6fa   : > { %18417 = vmatpush1.bf16.msra.mxu0 %v18416_v21  ;;  %19137 = vmatpush1.bf16.msra.mxu1 %v19136_v29  ;;  %v19172_v21 = vunpack.c.h.s8.bf16 %v1987_v33  ;;  %v18454_v29 = vunpack.c.l.s8.bf16 %v1994_v59 }
 0x6fb   : > { %18419 = vmatprep.subr.bf16.mxu0 %v18418_v14  ;;  %19139 = vmatprep.subr.bf16.mxu1 %v19138_v42  ;;  %v19174_v14 = vunpack.c.l.s8.bf16 %v1996_v41  ;;  %v1993_v42 = vld [vmem:[%s21272_s25 + $0x15e0] sm:$0xff] }
 0x6fc   : > { %v18456_v58 = vunpack.c.l.s8.bf16 %v1993_v42  ;;  %v18460_v52 = vunpack.c.h.s8.bf16 %v1993_v42 }
 0x6fe   : > { %18421 = vmatpush1.bf16.msra.mxu0 %v18420_v56  ;;  %19141 = vmatpush1.bf16.msra.mxu1 %v19140_v4  ;;  %v19176_v56 = vunpack.c.l.s8.bf16 %v1995_v28  ;;  %v18458_v4 = vunpack.c.h.s8.bf16 %v1994_v59 }
 0x6ff   : > { %18423 = vmatprep.subr.bf16.mxu0 %v18422_v36  ;;  %19143 = vmatprep.subr.bf16.mxu1 %v19142_v34  ;;  %v19178_v36 = vunpack.c.h.s8.bf16 %v1996_v41  ;;  %v2002_v34 = vld [vmem:[%s21272_s25 + $0x1628] sm:$0xff] }
 0x702   : > { %18425 = vmatpush1.bf16.msra.mxu0 %v18424_v49  ;;  %19145 = vmatpush1.bf16.msra.mxu1 %v19144_v2  ;;  %v19180_v49 = vunpack.c.h.s8.bf16 %v1995_v28  ;;  %v18462_v2 = vunpack.c.l.s8.bf16 %v2002_v34 }
 0x703   : > { %18427 = vmatprep.subr.bf16.mxu0 %v18426_v26  ;;  %19147 = vmatprep.subr.bf16.mxu1 %v19146_v60  ;;  %v19182_v26 = vunpack.c.l.s8.bf16 %v2004_v0  ;;  %v2001_v60 = vld [vmem:[%s21272_s25 + $0x1620] sm:$0xff] }
 0x704   : > { %v18464_v18 = vunpack.c.l.s8.bf16 %v2001_v60 }
 0x706   : > { %18429 = vmatpush1.bf16.msra.mxu0 %v18428_v8  ;;  %19149 = vmatpush1.bf16.msra.mxu1 %v19148_v40  ;;  %v19184_v8 = vunpack.c.l.s8.bf16 %v2003_v53  ;;  %v18466_v40 = vunpack.c.h.s8.bf16 %v2002_v34 }
 0x707   : > { %18431 = vmatprep.subr.bf16.mxu0 %v18430_v17  ;;  %19151 = vmatprep.subr.bf16.mxu1 %v19150_v31  ;;  %v19186_v17 = vunpack.c.h.s8.bf16 %v2004_v0  ;;  %v22810_v31 = vsub.s32 1, %v21890_v43 }
 0x70a   : > { %18433 = vmatpush1.bf16.msra.mxu0 %v18432_v5  ;;  %19153 = vmatpush1.bf16.msra.mxu1 %v19152_v16  ;;  %v22815_v5 = vld [vmem:[%s21279_s13] sm:$0xff]  ;;  %v18468_v16 = vunpack.c.h.s8.bf16 %v2001_v60 }
 0x70b   : > { %18435 = vmatprep.subr.bf16.mxu0 %v18434_v30  ;;  %19155 = vmatprep.subr.bf16.mxu1 %v19154_v32  ;;  %v19188_v30 = vunpack.c.h.s8.bf16 %v2003_v53  ;;  %v18470_v32 = vunpack.c.l.s8.bf16 %v2010_v38 }
 0x70e   : > { %18437 = vmatpush1.bf16.msra.mxu0 %v18436_v47  ;;  %19157 = vmatpush1.bf16.msra.mxu1 %v19156_v46  ;;  %v2011_v47 = vld [vmem:[%s21272_s25 + $0x1670] sm:$0xff]  ;;  %v11328_v46 = vrot.slane %v22815_v5, %v22810_v31  ;;  %s23358_s25 = sld [smem:[#allocation27_spill]] }
 0x70f   : > { %18439 = vmatprep.subr.bf16.mxu0 %v18438_v54  ;;  %19159 = vmatprep.subr.bf16.mxu1 %v19158_v12  ;;  %v18472_v54 = vunpack.c.l.s8.bf16 %v2009_v62  ;;  %v19192_v12 = vunpack.c.l.s8.bf16 %v2011_v47  ;;  %v19196_v13 = vunpack.c.h.s8.bf16 %v2011_v47 }
 0x712   : > { %18441 = vmatpush1.bf16.msra.mxu0 %v18440_v51  ;;  %19161 = vmatpush1.bf16.msra.mxu1 %v19160_v37  ;;  %v11362_v51 = vmul.f32 %v11328_v46, %v22533_v9 }
 0x713   : > { %18443 = vmatprep.subr.bf16.mxu0 %v18442_v45  ;;  %19163 = vmatprep.subr.bf16.mxu1 %v19162_v3  ;;  %v11428_v45 = vld [vmem:[%s21287_s16 + $0x8] sm:$0xff]  ;;  %v11430_v3 = vld [vmem:[%s21287_s16 + $0x18] sm:$0xff] }
 0x714   : > { %v19198_v6 = vunpack.c.l.s8.bf16 %v11428_v45  ;;  %p15849_p4 = scmp.ne.s32.totalorder %s23358_s25, 1 }
 0x716   : > { %18445 = vmatpush1.bf16.msra.mxu0 %v18444_v39  ;;  %19165 = vmatpush1.bf16.msra.mxu1 %v19164_v22  ;;  %v19454_v39 = vunpack.c.l.s8.bf16 %v11430_v3  ;;  %v11427_v22 = vld [vmem:[%s21287_s16] sm:$0xff] }
 0x717   : > { %18447 = vmatprep.subr.bf16.mxu0 %v18446_v48  ;;  %19167 = vmatprep.subr.bf16.mxu1 %v19166_v61  ;;  %v11429_v61 = vld [vmem:[%s21287_s16 + $0x10] sm:$0xff]  ;;  %v19200_v9 = vunpack.c.l.s8.bf16 %v11427_v22  ;;  %v19204_v59 = vunpack.c.h.s8.bf16 %v11427_v22  ;;  %v11468_v22 = vld [vmem:[%s21287_s16 + $0x148] sm:$0xff] }
 0x718   : > { %v19456_v50 = vunpack.c.l.s8.bf16 %v11429_v61  ;;  %v19460_v41 = vunpack.c.h.s8.bf16 %v11429_v61 }
 0x71a   : > { %18449 = vmatpush1.bf16.msra.mxu0 %v18448_v63  ;;  %19169 = vmatpush1.bf16.msra.mxu1 %v19168_v23  ;;  %v19202_v63 = vunpack.c.h.s8.bf16 %v11428_v45  ;;  %v19458_v23 = vunpack.c.h.s8.bf16 %v11430_v3  ;;  %v11461_v3 = vld [vmem:[%s21287_s16 + $0x110] sm:$0xff] }
 0x71b   : > { %18451 = vmatprep.subr.bf16.mxu0 %v18450_v57  ;;  %19171 = vmatprep.subr.bf16.mxu1 %v19170_v7  ;;  %v11436_v57 = vld [vmem:[%s21287_s16 + $0x48] sm:$0xff]  ;;  %v11438_v7 = vld [vmem:[%s21287_s16 + $0x58] sm:$0xff] }
 0x71c   : > { %v19210_v28 = vunpack.c.h.s8.bf16 %v11436_v57 }
 0x71e   : > { %18453 = vmatpush1.bf16.msra.mxu0 %v18452_v35  ;;  %19173 = vmatpush1.bf16.msra.mxu1 %v19172_v21  ;;  %v19206_v35 = vunpack.c.l.s8.bf16 %v11436_v57  ;;  %v11435_v21 = vld [vmem:[%s21287_s16 + $0x40] sm:$0xff]  ;;  %v11469_v57 = vld [vmem:[%s21287_s16 + $0x150] sm:$0xff] }
 0x71f   : > { %18455 = vmatprep.subr.bf16.mxu0 %v18454_v29  ;;  %19175 = vmatprep.subr.bf16.mxu1 %v19174_v14  ;;  %v19462_v29 = vunpack.c.l.s8.bf16 %v11438_v7  ;;  %v11437_v14 = vld [vmem:[%s21287_s16 + $0x50] sm:$0xff] }
 0x720   : > { %v19464_v42 = vunpack.c.l.s8.bf16 %v11437_v14  ;;  %v19468_v34 = vunpack.c.h.s8.bf16 %v11437_v14 }
 0x722   : > { %18457 = vmatpush1.bf16.msra.mxu0 %v18456_v58  ;;  %19177 = vmatpush1.bf16.msra.mxu1 %v19176_v56  ;;  %v19466_v58 = vunpack.c.h.s8.bf16 %v11438_v7  ;;  %v11444_v56 = vld [vmem:[%s21287_s16 + $0x88] sm:$0xff] }
 0x723   : > { %18459 = vmatprep.subr.bf16.mxu0 %v18458_v4  ;;  %19179 = vmatprep.subr.bf16.mxu1 %v19178_v36  ;;  %v11446_v4 = vld [vmem:[%s21287_s16 + $0x98] sm:$0xff]  ;;  %v19212_v36 = vunpack.c.h.s8.bf16 %v11435_v21  ;;  %v19214_v0 = vunpack.c.l.s8.bf16 %v11444_v56  ;;  %v19218_v53 = vunpack.c.h.s8.bf16 %v11444_v56  ;;  %v11477_v56 = vld [vmem:[%s21287_s16 + $0x190] sm:$0xff] }
 0x726   : > { %18461 = vmatpush1.bf16.msra.mxu0 %v18460_v52  ;;  %19181 = vmatpush1.bf16.msra.mxu1 %v19180_v49  ;;  %v11443_v52 = vld [vmem:[%s21287_s16 + $0x80] sm:$0xff]  ;;  %v19470_v49 = vunpack.c.l.s8.bf16 %v11446_v4 }
 0x727   : > { %18463 = vmatprep.subr.bf16.mxu0 %v18462_v2  ;;  %19183 = vmatprep.subr.bf16.mxu1 %v19182_v26  ;;  %v11445_v2 = vld [vmem:[%s21287_s16 + $0x90] sm:$0xff]  ;;  %v19216_v26 = vunpack.c.l.s8.bf16 %v11443_v52 }
 0x728   : > { %v19472_v60 = vunpack.c.l.s8.bf16 %v11445_v2  ;;  %v19476_v38 = vunpack.c.h.s8.bf16 %v11445_v2  ;;  %v22872_v2 = vsub.s32 3, %v21890_v43 }
 0x729   : > { %10390 = vmatmul.mubr.f32.vlgmr.msra.gmra.mrb[2].mxu0 %v22344_v25  ;;  %11242 = vmatmul.mubr.f32.vlgmr.msra.gmra.mrb[2].mxu1 %v22344_v25  ;;  %v22826_v25 = vld [vmem:[%s21285_s22] sm:$0xff] }
 0x72a   : > { %18465 = vmatpush1.bf16.msra.mxu0 %v18464_v18  ;;  %19185 = vmatpush1.bf16.msra.mxu1 %v19184_v8  ;;  %v11378_v37 = vrot.slane %v22826_v25, %v22810_v31  ;;  %v19474_v18 = vunpack.c.h.s8.bf16 %v11446_v4  ;;  %v11452_v8 = vld [vmem:[%s21287_s16 + $0xc8] sm:$0xff] }
 0x72b   : > { %18467 = vmatprep.subr.bf16.mxu0 %v18466_v40  ;;  %19187 = vmatprep.subr.bf16.mxu1 %v19186_v17  ;;  %v11454_v40 = vld [vmem:[%s21287_s16 + $0xd8] sm:$0xff]  ;;  %v19220_v17 = vunpack.c.h.s8.bf16 %v11443_v52  ;;  %v19222_v20 = vunpack.c.l.s8.bf16 %v11452_v8  ;;  %v19226_v47 = vunpack.c.h.s8.bf16 %v11452_v8 }
 0x72c   : > { %10460 = vmatprep.mubr.f32.mxu0 %v20914_v24  ;;  %11312 = vmatprep.mubr.f32.mxu1 %v20914_v24  ;;  %v18476_v24 = vunpack.c.h.s8.bf16 %v2009_v62  ;;  %v11412_v48 = vadd.f32 %v11378_v37, %v11362_v51  ;;  %v19482_v46 = vunpack.c.h.s8.bf16 %v11454_v40  ;;  %v11459_v37 = vld [vmem:[%s21287_s16 + $0x100] sm:$0xff] }
 0x72d   : > { %v19236_v61 = vunpack.c.h.s8.bf16 %v11459_v37 }
 0x72e   : > { %18469 = vmatpush1.bf16.msra.mxu0 %v18468_v16  ;;  %19189 = vmatpush1.bf16.msra.mxu1 %v19188_v30  ;;  %v22835_v33 = vmax.f32 %v11412_v48, 0.0  ;;  %v11451_v16 = vld [vmem:[%s21287_s16 + $0xc0] sm:$0xff]  ;;  %v19478_v30 = vunpack.c.l.s8.bf16 %v11454_v40  ;;  %v11470_v48 = vld [vmem:[%s21287_s16 + $0x158] sm:$0xff] }
 0x72f   : > { %18471 = vmatprep.subr.bf16.mxu0 %v18470_v32  ;;  %19191 = vmatprep.subr.bf16.mxu1 %v19190_v10  ;;  %v11453_v32 = vld [vmem:[%s21287_s16 + $0xd0] sm:$0xff]  ;;  %v19224_v10 = vunpack.c.l.s8.bf16 %v11451_v16  ;;  %v11483_v40 = vld [vmem:[%s21287_s16 + $0x1c0] sm:$0xff] }
 0x730   : > { %v19480_v62 = vunpack.c.l.s8.bf16 %v11453_v32 }
 0x732   : > { %18473 = vmatpush1.bf16.msra.mxu0 %v18472_v54  ;;  %19193 = vmatpush1.bf16.msra.mxu1 %v19192_v12  ;;  %v11460_v54 = vld [vmem:[%s21287_s16 + $0x108] sm:$0xff]  ;;  %v11462_v12 = vld [vmem:[%s21287_s16 + $0x118] sm:$0xff] }
 0x733   : > { %18475 = vmatprep.subr.bf16.mxu0 %v18474_v15  ;;  %19195 = vmatprep.subr.bf16.mxu1 %v19194_v1  ;;  %v19228_v15 = vunpack.c.h.s8.bf16 %v11451_v16  ;;  %v19484_v1 = vunpack.c.h.s8.bf16 %v11453_v32  ;;  %v19230_v51 = vunpack.c.l.s8.bf16 %v11460_v54  ;;  %v19486_v45 = vunpack.c.l.s8.bf16 %v11462_v12 }
 0x734   : > { %v19256_v16 = vunpack.c.l.s8.bf16 %v11483_v40 }
 0x736   : > { %18477 = vmatpush1.bf16.msra.mxu0 %v18476_v24  ;;  %19197 = vmatpush1.bf16.msra.mxu1 %v19196_v13  ;;  %v19232_v24 = vunpack.c.l.s8.bf16 %v11459_v37  ;;  %v19488_v13 = vunpack.c.l.s8.bf16 %v11461_v3 }
 0x737   : > { %19199 = vmatprep.subr.bf16.mxu0 %v19198_v6  ;;  %19455 = vmatprep.subr.bf16.mxu1 %v19454_v39  ;;  %v19234_v6 = vunpack.c.h.s8.bf16 %v11460_v54  ;;  %v19490_v39 = vunpack.c.h.s8.bf16 %v11462_v12  ;;  %v11386_v12 = vrot.slane %v22826_v25, %v22872_v2 }
 0x739   : > { %15847 = vmatmul.mubr.msk.f32.vlgmr.msra.gmra.mrb[2].mxu0 %vm7908_vm10, %v22401_v44  ;;  %15848 = vmatmul.mubr.msk.f32.vlgmr.msra.gmra.mrb[2].mxu1 %vm7908_vm10, %v22401_v44  ;;  %v19208_v44 = vunpack.c.l.s8.bf16 %v11435_v21  ;;  %v11476_v21 = vld [vmem:[%s21287_s16 + $0x188] sm:$0xff] }
 0x73a   : > { %19201 = vmatpush1.bf16.msra.mxu0 %v19200_v9  ;;  %13797 = vmatprep.mubr.f32.mxu0 %v22835_v33  ;;  %v19492_v9 = vunpack.c.h.s8.bf16 %v11461_v3 }
 0x73b   : > { %19457 = vmatpush1.bf16.msra.mxu1 %v19456_v50  ;;  %14081 = vmatprep.mubr.f32.mxu1 %v22835_v33  ;;  %v19238_v50 = vunpack.c.l.s8.bf16 %v11468_v22 }
 0x73c   : > { %19203 = vmatprep.subr.bf16.mxu0 %v19202_v63  ;;  %19459 = vmatprep.subr.bf16.mxu1 %v19458_v23  ;;  %v11467_v63 = vld [vmem:[%s21287_s16 + $0x140] sm:$0xff]  ;;  %v19494_v23 = vunpack.c.l.s8.bf16 %v11470_v48 }
 0x73d   : > { %v19240_v7 = vunpack.c.l.s8.bf16 %v11467_v63  ;;  %v19244_v14 = vunpack.c.h.s8.bf16 %v11467_v63 }
 0x73e   : > { %19205 = vmatpush1.bf16.msra.mxu0 %v19204_v59  ;;  %v19496_v59 = vunpack.c.l.s8.bf16 %v11469_v57 }
 0x73f   : > { %19461 = vmatpush1.bf16.msra.mxu1 %v19460_v41  ;;  %19207 = vmatprep.subr.bf16.mxu0 %v19206_v35  ;;  %v19242_v41 = vunpack.c.h.s8.bf16 %v11468_v22  ;;  %v19498_v35 = vunpack.c.h.s8.bf16 %v11470_v48  ;;  %v11500_v48 = vld [vmem:[%s21287_s16 + $0x248] sm:$0xff] }
 0x740   : > { %19463 = vmatprep.subr.bf16.mxu1 %v19462_v29  ;;  %v11478_v29 = vld [vmem:[%s21287_s16 + $0x198] sm:$0xff] }
 0x741   : > { %v19506_v52 = vunpack.c.h.s8.bf16 %v11478_v29 }
 0x742   : > { %19209 = vmatpush1.bf16.msra.mxu0 %v19208_v44  ;;  %v19500_v44 = vunpack.c.h.s8.bf16 %v11469_v57  ;;  %v19270_v57 = vunpack.c.l.s8.bf16 %v11500_v48 }
 0x743   : > { %19465 = vmatpush1.bf16.msra.mxu1 %v19464_v42  ;;  %19211 = vmatprep.subr.bf16.mxu0 %v19210_v28  ;;  %v19246_v42 = vunpack.c.l.s8.bf16 %v11476_v21  ;;  %v11475_v28 = vld [vmem:[%s21287_s16 + $0x180] sm:$0xff] }
 0x744   : > { %19467 = vmatprep.subr.bf16.mxu1 %v19466_v58  ;;  %v19502_v58 = vunpack.c.l.s8.bf16 %v11478_v29  ;;  %v19248_v4 = vunpack.c.l.s8.bf16 %v11475_v28  ;;  %v19274_v29 = vunpack.c.h.s8.bf16 %v11500_v48 }
 0x746   : > { %19213 = vmatpush1.bf16.msra.mxu0 %v19212_v36  ;;  %v22868_v36 = vsub.s32 0, %v21890_v43 }
 0x747   : > { %19469 = vmatpush1.bf16.msra.mxu1 %v19468_v34  ;;  %19215 = vmatprep.subr.bf16.mxu0 %v19214_v0  ;;  %v19504_v34 = vunpack.c.l.s8.bf16 %v11477_v56  ;;  %v19250_v0 = vunpack.c.h.s8.bf16 %v11476_v21 }
 0x748   : > { %19471 = vmatprep.subr.bf16.mxu1 %v19470_v49  ;;  %v11484_v49 = vld [vmem:[%s21287_s16 + $0x1c8] sm:$0xff]  ;;  %v11374_v32 = vrot.slane %v22826_v25, %v22868_v36 }
 0x749   : > { %v19254_v8 = vunpack.c.l.s8.bf16 %v11484_v49 }
 0x74a   : > { %19217 = vmatpush1.bf16.msra.mxu0 %v19216_v26  ;;  %v11486_v26 = vld [vmem:[%s21287_s16 + $0x1d8] sm:$0xff] }
 0x74b   : > { %19473 = vmatpush1.bf16.msra.mxu1 %v19472_v60  ;;  %19219 = vmatprep.subr.bf16.mxu0 %v19218_v53  ;;  %v19252_v60 = vunpack.c.h.s8.bf16 %v11475_v28  ;;  %v11324_v53 = vrot.slane %v22815_v5, %v22868_v36 }
 0x74c   : > { %19475 = vmatprep.subr.bf16.mxu1 %v19474_v18  ;;  %v19508_v18 = vunpack.c.h.s8.bf16 %v11477_v56 }
 0x74e   : > { %19221 = vmatpush1.bf16.msra.mxu0 %v19220_v17  ;;  %v19510_v17 = vunpack.c.l.s8.bf16 %v11486_v26 }
 0x74f   : > { %19477 = vmatpush1.bf16.msra.mxu1 %v19476_v38  ;;  %19223 = vmatprep.subr.bf16.mxu0 %v19222_v20  ;;  %v11485_v38 = vld [vmem:[%s21287_s16 + $0x1d0] sm:$0xff]  ;;  %v11336_v20 = vrot.slane %v22815_v5, %v22872_v2 }
 0x750   : > { %19479 = vmatprep.subr.bf16.mxu1 %v19478_v30  ;;  %v11361_v30 = vmul.f32 %v11324_v53, %v22529_v11  ;;  %v19260_v11 = vunpack.c.h.s8.bf16 %v11483_v40  ;;  %v11516_v53 = vld [vmem:[%s21287_s16 + $0x2c8] sm:$0xff] }
 0x751   : > { %v11364_v54 = vmul.f32 %v11336_v20, %v22535_v27 }
 0x752   : > { %19225 = vmatpush1.bf16.msra.mxu0 %v19224_v10  ;;  %v19512_v10 = vunpack.c.l.s8.bf16 %v11485_v38 }
 0x753   : > { %19481 = vmatpush1.bf16.msra.mxu1 %v19480_v62  ;;  %19227 = vmatprep.subr.bf16.mxu0 %v19226_v47  ;;  %v19258_v62 = vunpack.c.h.s8.bf16 %v11484_v49  ;;  %v19514_v47 = vunpack.c.h.s8.bf16 %v11486_v26 }
 0x754   : > { %19483 = vmatprep.subr.bf16.mxu1 %v19482_v46  ;;  %v11492_v46 = vld [vmem:[%s21287_s16 + $0x208] sm:$0xff] }
 0x755   : > { %v19262_v37 = vunpack.c.l.s8.bf16 %v11492_v46  ;;  %v19266_v22 = vunpack.c.h.s8.bf16 %v11492_v46  ;;  %v11526_v46 = vld [vmem:[%s21287_s16 + $0x318] sm:$0xff] }
 0x756   : > { %19229 = vmatpush1.bf16.msra.mxu0 %v19228_v15  ;;  %v11494_v15 = vld [vmem:[%s21287_s16 + $0x218] sm:$0xff] }
 0x757   : > { %19485 = vmatpush1.bf16.msra.mxu1 %v19484_v1  ;;  %19231 = vmatprep.subr.bf16.mxu0 %v19230_v51  ;;  %v11411_v1 = vadd.f32 %v11374_v32, %v11361_v30  ;;  %v19516_v51 = vunpack.c.h.s8.bf16 %v11485_v38  ;;  %v19518_v3 = vunpack.c.l.s8.bf16 %v11494_v15  ;;  %v11515_v38 = vld [vmem:[%s21287_s16 + $0x2c0] sm:$0xff] }
 0x758   : > { %19487 = vmatprep.subr.bf16.mxu1 %v19486_v45  ;;  %v11491_v45 = vld [vmem:[%s21287_s16 + $0x200] sm:$0xff]  ;;  %v19288_v30 = vunpack.c.l.s8.bf16 %v11515_v38 }
 0x759   : > { %v19264_v27 = vunpack.c.l.s8.bf16 %v11491_v45  ;;  %v19268_v63 = vunpack.c.h.s8.bf16 %v11491_v45 }
 0x75a   : > { %19233 = vmatpush1.bf16.msra.mxu0 %v19232_v24  ;;  %v11493_v24 = vld [vmem:[%s21287_s16 + $0x210] sm:$0xff] }
 0x75b   : > { %19489 = vmatpush1.bf16.msra.mxu1 %v19488_v13  ;;  %19235 = vmatprep.subr.bf16.mxu0 %v19234_v6  ;;  %v11414_v13 = vadd.f32 %v11386_v12, %v11364_v54  ;;  %v22891_v6 = vmax.f32 %v11411_v1, 0.0  ;;  %v19292_v54 = vunpack.c.h.s8.bf16 %v11515_v38  ;;  %v19550_v1 = vunpack.c.l.s8.bf16 %v11526_v46 }
 0x75c   : > { %19491 = vmatprep.subr.bf16.mxu1 %v19490_v39  ;;  %v19520_v39 = vunpack.c.l.s8.bf16 %v11493_v24 }
 0x75e   : > { %19237 = vmatpush1.bf16.msra.mxu0 %v19236_v61  ;;  %v22894_v61 = vmax.f32 %v11414_v13, 0.0  ;;  %v11532_v13 = vld [vmem:[%s21287_s16 + $0x348] sm:$0xff] }
 0x75f   : > { %19493 = vmatpush1.bf16.msra.mxu1 %v19492_v9  ;;  %19239 = vmatprep.subr.bf16.mxu0 %v19238_v50  ;;  %v19522_v9 = vunpack.c.h.s8.bf16 %v11494_v15  ;;  %v11502_v50 = vld [vmem:[%s21287_s16 + $0x258] sm:$0xff]  ;;  %v19302_v48 = vunpack.c.l.s8.bf16 %v11532_v13 }
 0x760   : > { %19495 = vmatprep.subr.bf16.mxu1 %v19494_v23  ;;  %v19524_v23 = vunpack.c.h.s8.bf16 %v11493_v24  ;;  %v19554_v24 = vunpack.c.h.s8.bf16 %v11526_v46 }
 0x762   : > { %19241 = vmatpush1.bf16.msra.mxu0 %v19240_v7  ;;  %v11499_v7 = vld [vmem:[%s21287_s16 + $0x240] sm:$0xff] }
 0x763   : > { %19497 = vmatpush1.bf16.msra.mxu1 %v19496_v59  ;;  %19243 = vmatprep.subr.bf16.mxu0 %v19242_v41  ;;  %v19526_v59 = vunpack.c.l.s8.bf16 %v11502_v50  ;;  %v11501_v41 = vld [vmem:[%s21287_s16 + $0x250] sm:$0xff]  ;;  %v19276_v28 = vunpack.c.h.s8.bf16 %v11499_v7 }
 0x764   : > { %19499 = vmatprep.subr.bf16.mxu1 %v19498_v35  ;;  %v19272_v35 = vunpack.c.l.s8.bf16 %v11499_v7  ;;  %v19528_v21 = vunpack.c.l.s8.bf16 %v11501_v41  ;;  %v19306_v7 = vunpack.c.h.s8.bf16 %v11532_v13 }
 0x766   : > { %19245 = vmatpush1.bf16.msra.mxu0 %v19244_v14  ;;  %v19530_v14 = vunpack.c.h.s8.bf16 %v11502_v50 }
 0x767   : > { %19501 = vmatpush1.bf16.msra.mxu1 %v19500_v44  ;;  %19247 = vmatprep.subr.bf16.mxu0 %v19246_v42  ;;  %v11508_v44 = vld [vmem:[%s21287_s16 + $0x288] sm:$0xff]  ;;  %v11510_v42 = vld [vmem:[%s21287_s16 + $0x298] sm:$0xff] }
 0x768   : > { %19503 = vmatprep.subr.bf16.mxu1 %v19502_v58  ;;  %v19532_v58 = vunpack.c.h.s8.bf16 %v11501_v41  ;;  %v19278_v56 = vunpack.c.l.s8.bf16 %v11508_v44  ;;  %v19282_v26 = vunpack.c.h.s8.bf16 %v11508_v44  ;;  %v11540_v41 = vld [vmem:[%s21287_s16 + $0x388] sm:$0xff]  ;;  %v11539_v44 = vld [vmem:[%s21287_s16 + $0x380] sm:$0xff] }
 0x76a   : > { %19249 = vmatpush1.bf16.msra.mxu0 %v19248_v4  ;;  %v11507_v4 = vld [vmem:[%s21287_s16 + $0x280] sm:$0xff] }
 0x76b   : > { %19505 = vmatpush1.bf16.msra.mxu1 %v19504_v34  ;;  %19251 = vmatprep.subr.bf16.mxu0 %v19250_v0  ;;  %v19534_v34 = vunpack.c.l.s8.bf16 %v11510_v42  ;;  %v11509_v0 = vld [vmem:[%s21287_s16 + $0x290] sm:$0xff] }
 0x76c   : > { %19507 = vmatprep.subr.bf16.mxu1 %v19506_v52  ;;  %v19280_v52 = vunpack.c.l.s8.bf16 %v11507_v4  ;;  %v19536_v49 = vunpack.c.l.s8.bf16 %v11509_v0  ;;  %v19540_v40 = vunpack.c.h.s8.bf16 %v11509_v0 }
 0x76e   : > { %19253 = vmatpush1.bf16.msra.mxu0 %v19252_v60  ;;  %v19538_v60 = vunpack.c.h.s8.bf16 %v11510_v42 }
 0x76f   : > { %19509 = vmatpush1.bf16.msra.mxu1 %v19508_v18  ;;  %19255 = vmatprep.subr.bf16.mxu0 %v19254_v8  ;;  %v11518_v18 = vld [vmem:[%s21287_s16 + $0x2d8] sm:$0xff]  ;;  %v19284_v8 = vunpack.c.h.s8.bf16 %v11507_v4 }
 0x770   : > { %19511 = vmatprep.subr.bf16.mxu1 %v19510_v17  ;;  %v19286_v17 = vunpack.c.l.s8.bf16 %v11516_v53  ;;  %v19542_v20 = vunpack.c.l.s8.bf16 %v11518_v18 }
 0x772   : > { %19257 = vmatpush1.bf16.msra.mxu0 %v19256_v16  ;;  %v11517_v16 = vld [vmem:[%s21287_s16 + $0x2d0] sm:$0xff] }
 0x773   : > { %19513 = vmatpush1.bf16.msra.mxu1 %v19512_v10  ;;  %19259 = vmatprep.subr.bf16.mxu0 %v19258_v62  ;;  %v19544_v32 = vunpack.c.l.s8.bf16 %v11517_v16  ;;  %v19290_v10 = vunpack.c.h.s8.bf16 %v11516_v53  ;;  %v19546_v62 = vunpack.c.h.s8.bf16 %v11518_v18  ;;  %v19548_v12 = vunpack.c.h.s8.bf16 %v11517_v16 }
 0x774   : > { %19515 = vmatprep.subr.bf16.mxu1 %v19514_v47  ;;  %v11524_v47 = vld [vmem:[%s21287_s16 + $0x308] sm:$0xff] }
 0x775   : > { %v19294_v15 = vunpack.c.l.s8.bf16 %v11524_v47 }
 0x776   : > { %19261 = vmatpush1.bf16.msra.mxu0 %v19260_v11  ;;  %v11523_v11 = vld [vmem:[%s21287_s16 + $0x300] sm:$0xff] }
 0x777   : > { %19517 = vmatpush1.bf16.msra.mxu1 %v19516_v51  ;;  %19263 = vmatprep.subr.bf16.mxu0 %v19262_v37  ;;  %v11525_v51 = vld [vmem:[%s21287_s16 + $0x310] sm:$0xff]  ;;  %v19296_v37 = vunpack.c.l.s8.bf16 %v11523_v11 }
 0x778   : > { %19519 = vmatprep.subr.bf16.mxu1 %v19518_v3  ;;  %v19552_v45 = vunpack.c.l.s8.bf16 %v11525_v51  ;;  %v19298_v3 = vunpack.c.h.s8.bf16 %v11524_v47 }
 0x779   : > { %13798 = vmatmul.mubr.f32.vlgmr.msra.gmra.mrb[4].mxu0 %v22891_v6 }
 0x77a   : > { %14082 = vmatmul.mubr.f32.vlgmr.msra.gmra.mrb[4].mxu1 %v22891_v6  ;;  %19265 = vmatpush1.bf16.msra.mxu0 %v19264_v27  ;;  %v11534_v27 = vld [vmem:[%s21287_s16 + $0x358] sm:$0xff] }
 0x77b   : > { %13868 = vmatprep.mubr.f32.mxu0 %v22894_v61  ;;  %19521 = vmatpush1.bf16.msra.mxu1 %v19520_v39  ;;  %v19300_v39 = vunpack.c.h.s8.bf16 %v11523_v11  ;;  %v19558_v50 = vunpack.c.l.s8.bf16 %v11534_v27 }
 0x77c   : > { %14152 = vmatprep.mubr.f32.mxu1 %v22894_v61  ;;  %19267 = vmatprep.subr.bf16.mxu0 %v19266_v22  ;;  %v19556_v22 = vunpack.c.h.s8.bf16 %v11525_v51 }
 0x77d   : > { %19523 = vmatprep.subr.bf16.mxu1 %v19522_v9  ;;  %v11531_v9 = vld [vmem:[%s21287_s16 + $0x340] sm:$0xff] }
 0x77e   : > { %19269 = vmatpush1.bf16.msra.mxu0 %v19268_v63  ;;  %v11533_v63 = vld [vmem:[%s21287_s16 + $0x350] sm:$0xff] }
 0x77f   : > { %19525 = vmatpush1.bf16.msra.mxu1 %v19524_v23  ;;  %19271 = vmatprep.subr.bf16.mxu0 %v19270_v57  ;;  %v19304_v23 = vunpack.c.l.s8.bf16 %v11531_v9  ;;  %v19560_v57 = vunpack.c.l.s8.bf16 %v11533_v63 }
 0x780   : > { %19527 = vmatprep.subr.bf16.mxu1 %v19526_v59  ;;  %v19562_v59 = vunpack.c.h.s8.bf16 %v11534_v27 }
 0x782   : > { %19273 = vmatpush1.bf16.msra.mxu0 %v19272_v35  ;;  %v11542_v35 = vld [vmem:[%s21287_s16 + $0x398] sm:$0xff] }
 0x783   : > { %19529 = vmatpush1.bf16.msra.mxu1 %v19528_v21  ;;  %19275 = vmatprep.subr.bf16.mxu0 %v19274_v29  ;;  %v19308_v21 = vunpack.c.h.s8.bf16 %v11531_v9  ;;  %v19564_v29 = vunpack.c.h.s8.bf16 %v11533_v63  ;;  %v19566_v42 = vunpack.c.l.s8.bf16 %v11542_v35  ;;  %v19570_v0 = vunpack.c.h.s8.bf16 %v11542_v35  ;;  %v11565_v9 = vld [vmem:[%s21287_s16 + $0x450] sm:$0xff] }
 0x784   : > { %19531 = vmatprep.subr.bf16.mxu1 %v19530_v14  ;;  %v19310_v14 = vunpack.c.l.s8.bf16 %v11540_v41  ;;  %v19592_v63 = vunpack.c.l.s8.bf16 %v11565_v9  ;;  %v19596_v35 = vunpack.c.h.s8.bf16 %v11565_v9  ;;  %v11606_v9 = vld [vmem:[%s21287_s16 + $0x598] sm:$0xff] }
 0x786   : > { %19277 = vmatpush1.bf16.msra.mxu0 %v19276_v28  ;;  %v11541_v28 = vld [vmem:[%s21287_s16 + $0x390] sm:$0xff] }
 0x787   : > { %19533 = vmatpush1.bf16.msra.mxu1 %v19532_v58  ;;  %19279 = vmatprep.subr.bf16.mxu0 %v19278_v56  ;;  %v19312_v58 = vunpack.c.l.s8.bf16 %v11539_v44  ;;  %v22924_v56 = vsub.s32 2, %v21890_v43  ;;  %v19568_v4 = vunpack.c.l.s8.bf16 %v11541_v28  ;;  %v19572_v53 = vunpack.c.h.s8.bf16 %v11541_v28 }
 0x788   : > { %19535 = vmatprep.subr.bf16.mxu1 %v19534_v34  ;;  %v19314_v34 = vunpack.c.h.s8.bf16 %v11540_v41 }
 0x789   : > { %v11382_v16 = vrot.slane %v22826_v25, %v22924_v56  ;;  %v11555_v25 = vld [vmem:[%s21287_s16 + $0x400] sm:$0xff] }
 0x78a   : > { %19281 = vmatpush1.bf16.msra.mxu0 %v19280_v52  ;;  %v11548_v52 = vld [vmem:[%s21287_s16 + $0x3c8] sm:$0xff]  ;;  %v19328_v11 = vunpack.c.l.s8.bf16 %v11555_v25  ;;  %v19332_v13 = vunpack.c.h.s8.bf16 %v11555_v25 }
 0x78b   : > { %19537 = vmatpush1.bf16.msra.mxu1 %v19536_v49  ;;  %19283 = vmatprep.subr.bf16.mxu0 %v19282_v26  ;;  %v11550_v49 = vld [vmem:[%s21287_s16 + $0x3d8] sm:$0xff]  ;;  %v19316_v26 = vunpack.c.h.s8.bf16 %v11539_v44  ;;  %v19318_v18 = vunpack.c.l.s8.bf16 %v11548_v52  ;;  %v11573_v44 = vld [vmem:[%s21287_s16 + $0x490] sm:$0xff] }
 0x78c   : > { %19539 = vmatprep.subr.bf16.mxu1 %v19538_v60  ;;  %v11332_v60 = vrot.slane %v22815_v5, %v22924_v56  ;;  %v19600_v28 = vunpack.c.l.s8.bf16 %v11573_v44 }
 0x78e   : > { %19285 = vmatpush1.bf16.msra.mxu0 %v19284_v8  ;;  %v11547_v8 = vld [vmem:[%s21287_s16 + $0x3c0] sm:$0xff] }
 0x78f   : > { %19541 = vmatpush1.bf16.msra.mxu1 %v19540_v40  ;;  %19287 = vmatprep.subr.bf16.mxu0 %v19286_v17  ;;  %v19574_v40 = vunpack.c.l.s8.bf16 %v11550_v49  ;;  %v11549_v17 = vld [vmem:[%s21287_s16 + $0x3d0] sm:$0xff]  ;;  %v19320_v38 = vunpack.c.l.s8.bf16 %v11547_v8  ;;  %v19324_v47 = vunpack.c.h.s8.bf16 %v11547_v8 }
 0x790   : > { %19543 = vmatprep.subr.bf16.mxu1 %v19542_v20  ;;  %v11363_v20 = vmul.f32 %v11332_v60, %v22531_v19  ;;  %v19576_v5 = vunpack.c.l.s8.bf16 %v11549_v17  ;;  %v19580_v19 = vunpack.c.h.s8.bf16 %v11549_v17  ;;  %v11579_v60 = vld [vmem:[%s21287_s16 + $0x4c0] sm:$0xff] }
 0x791   : > { %v19352_v8 = vunpack.c.l.s8.bf16 %v11579_v60 }
 0x792   : > { %19289 = vmatpush1.bf16.msra.mxu0 %v19288_v30  ;;  %v19322_v30 = vunpack.c.h.s8.bf16 %v11548_v52  ;;  %v11413_v46 = vadd.f32 %v11382_v16, %v11363_v20  ;;  %v11588_v20 = vld [vmem:[%s21287_s16 + $0x508] sm:$0xff]  ;;  %v11590_v16 = vld [vmem:[%s21287_s16 + $0x518] sm:$0xff] }
 0x793   : > { %19545 = vmatpush1.bf16.msra.mxu1 %v19544_v32  ;;  %19291 = vmatprep.subr.bf16.mxu0 %v19290_v10  ;;  %v19578_v32 = vunpack.c.h.s8.bf16 %v11550_v49  ;;  %v11556_v10 = vld [vmem:[%s21287_s16 + $0x408] sm:$0xff]  ;;  %v19604_v49 = vunpack.c.h.s8.bf16 %v11573_v44  ;;  %v19618_v25 = vunpack.c.h.s8.bf16 %v11590_v16  ;;  %v11614_v44 = vld [vmem:[%s21287_s16 + $0x5d8] sm:$0xff] }
 0x794   : > { %19547 = vmatprep.subr.bf16.mxu1 %v19546_v62  ;;  %v11558_v62 = vld [vmem:[%s21287_s16 + $0x418] sm:$0xff] }
 0x796   : > { %19293 = vmatpush1.bf16.msra.mxu0 %v19292_v54  ;;  %v19326_v54 = vunpack.c.l.s8.bf16 %v11556_v10 }
 0x797   : > { %19549 = vmatpush1.bf16.msra.mxu1 %v19548_v12  ;;  %19295 = vmatprep.subr.bf16.mxu0 %v19294_v15  ;;  %v19582_v12 = vunpack.c.l.s8.bf16 %v11558_v62  ;;  %v11557_v15 = vld [vmem:[%s21287_s16 + $0x410] sm:$0xff] }
 0x798   : > { %19551 = vmatprep.subr.bf16.mxu1 %v19550_v1  ;;  %v22939_v1 = vmax.f32 %v11413_v46, 0.0  ;;  %v19584_v51 = vunpack.c.l.s8.bf16 %v11557_v15  ;;  %v19588_v27 = vunpack.c.h.s8.bf16 %v11557_v15  ;;  %v11598_v15 = vld [vmem:[%s21287_s16 + $0x558] sm:$0xff] }
 0x79a   : > { %19297 = vmatpush1.bf16.msra.mxu0 %v19296_v37  ;;  %v19330_v37 = vunpack.c.h.s8.bf16 %v11556_v10  ;;  %v11587_v10 = vld [vmem:[%s21287_s16 + $0x500] sm:$0xff] }
 0x79b   : > { %19553 = vmatpush1.bf16.msra.mxu1 %v19552_v45  ;;  %19299 = vmatprep.subr.bf16.mxu0 %v19298_v3  ;;  %v19586_v45 = vunpack.c.h.s8.bf16 %v11558_v62  ;;  %v11564_v3 = vld [vmem:[%s21287_s16 + $0x448] sm:$0xff]  ;;  %v19614_v62 = vunpack.c.l.s8.bf16 %v11590_v16  ;;  %v19360_v46 = vunpack.c.l.s8.bf16 %v11587_v10  ;;  %v22977_v16 = vsub.s32 5, %v21890_v43 }
 0x79c   : > { %19555 = vmatprep.subr.bf16.mxu1 %v19554_v24  ;;  %v11566_v24 = vld [vmem:[%s21287_s16 + $0x458] sm:$0xff] }
 0x79e   : > { %19301 = vmatpush1.bf16.msra.mxu0 %v19300_v39  ;;  %v19334_v39 = vunpack.c.l.s8.bf16 %v11564_v3 }
 0x79f   : > { %19557 = vmatpush1.bf16.msra.mxu1 %v19556_v22  ;;  %19303 = vmatprep.subr.bf16.mxu0 %v19302_v48  ;;  %v11563_v22 = vld [vmem:[%s21287_s16 + $0x440] sm:$0xff]  ;;  %v19590_v48 = vunpack.c.l.s8.bf16 %v11566_v24 }
 0x7a0   : > { %19559 = vmatprep.subr.bf16.mxu1 %v19558_v50  ;;  %v19336_v50 = vunpack.c.l.s8.bf16 %v11563_v22  ;;  %v19340_v41 = vunpack.c.h.s8.bf16 %v11563_v22  ;;  %v19626_v22 = vunpack.c.h.s8.bf16 %v11598_v15 }
 0x7a2   : > { %19305 = vmatpush1.bf16.msra.mxu0 %v19304_v23  ;;  %v19338_v23 = vunpack.c.h.s8.bf16 %v11564_v3  ;;  %v19622_v3 = vunpack.c.l.s8.bf16 %v11598_v15 }
 0x7a3   : > { %19561 = vmatpush1.bf16.msra.mxu1 %v19560_v57  ;;  %19307 = vmatprep.subr.bf16.mxu0 %v19306_v7  ;;  %v19594_v57 = vunpack.c.h.s8.bf16 %v11566_v24  ;;  %v11572_v7 = vld [vmem:[%s21287_s16 + $0x488] sm:$0xff]  ;;  %v11597_v24 = vld [vmem:[%s21287_s16 + $0x550] sm:$0xff] }
 0x7a4   : > { %19563 = vmatprep.subr.bf16.mxu1 %v19562_v59  ;;  %v11574_v59 = vld [vmem:[%s21287_s16 + $0x498] sm:$0xff] }
 0x7a6   : > { %19309 = vmatpush1.bf16.msra.mxu0 %v19308_v21  ;;  %v19342_v21 = vunpack.c.l.s8.bf16 %v11572_v7 }
 0x7a7   : > { %19565 = vmatpush1.bf16.msra.mxu1 %v19564_v29  ;;  %19311 = vmatprep.subr.bf16.mxu0 %v19310_v14  ;;  %v11571_v29 = vld [vmem:[%s21287_s16 + $0x480] sm:$0xff]  ;;  %v19598_v14 = vunpack.c.l.s8.bf16 %v11574_v59 }
 0x7a8   : > { %19567 = vmatprep.subr.bf16.mxu1 %v19566_v42  ;;  %v19344_v42 = vunpack.c.l.s8.bf16 %v11571_v29  ;;  %v19348_v52 = vunpack.c.h.s8.bf16 %v11571_v29  ;;  %v19634_v29 = vunpack.c.h.s8.bf16 %v11606_v9 }
 0x7aa   : > { %19313 = vmatpush1.bf16.msra.mxu0 %v19312_v58  ;;  %v19346_v58 = vunpack.c.h.s8.bf16 %v11572_v7  ;;  %v19630_v7 = vunpack.c.l.s8.bf16 %v11606_v9 }
 0x7ab   : > { %19569 = vmatpush1.bf16.msra.mxu1 %v19568_v4  ;;  %19315 = vmatprep.subr.bf16.mxu0 %v19314_v34  ;;  %v19602_v4 = vunpack.c.h.s8.bf16 %v11574_v59  ;;  %v11580_v34 = vld [vmem:[%s21287_s16 + $0x4c8] sm:$0xff]  ;;  %v11605_v59 = vld [vmem:[%s21287_s16 + $0x590] sm:$0xff] }
 0x7ac   : > { %19571 = vmatprep.subr.bf16.mxu1 %v19570_v0  ;;  %v11582_v0 = vld [vmem:[%s21287_s16 + $0x4d8] sm:$0xff]  ;;  %v19354_v17 = vunpack.c.h.s8.bf16 %v11580_v34 }
 0x7ae   : > { %19317 = vmatpush1.bf16.msra.mxu0 %v19316_v26  ;;  %v19350_v26 = vunpack.c.l.s8.bf16 %v11580_v34  ;;  %v19638_v34 = vunpack.c.l.s8.bf16 %v11614_v44 }
 0x7af   : > { %19573 = vmatpush1.bf16.msra.mxu1 %v19572_v53  ;;  %19319 = vmatprep.subr.bf16.mxu0 %v19318_v18  ;;  %v19606_v53 = vunpack.c.l.s8.bf16 %v11582_v0  ;;  %v11581_v18 = vld [vmem:[%s21287_s16 + $0x4d0] sm:$0xff] }
 0x7b0   : > { %19575 = vmatprep.subr.bf16.mxu1 %v19574_v40  ;;  %v19608_v40 = vunpack.c.l.s8.bf16 %v11581_v18 }
 0x7b2   : > { %19321 = vmatpush1.bf16.msra.mxu0 %v19320_v38  ;;  %v19610_v38 = vunpack.c.h.s8.bf16 %v11582_v0  ;;  %v11613_v0 = vld [vmem:[%s21287_s16 + $0x5d0] sm:$0xff] }
 0x7b3   : > { %19577 = vmatpush1.bf16.msra.mxu1 %v19576_v5  ;;  %19323 = vmatprep.subr.bf16.mxu0 %v19322_v30  ;;  %v19356_v5 = vunpack.c.h.s8.bf16 %v11579_v60  ;;  %v19612_v30 = vunpack.c.h.s8.bf16 %v11581_v18  ;;  %v19642_v60 = vunpack.c.h.s8.bf16 %v11614_v44  ;;  %v11622_v18 = vld [vmem:[%s21287_s16 + $0x618] sm:$0xff]  ;;  %v11629_v44 = vld [vmem:[%s21287_s16 + $0x650] sm:$0xff] }
 0x7b4   : > { %19579 = vmatprep.subr.bf16.mxu1 %v19578_v32  ;;  %v19358_v32 = vunpack.c.l.s8.bf16 %v11588_v20 }
 0x7b6   : > { %19325 = vmatpush1.bf16.msra.mxu0 %v19324_v47  ;;  %v11589_v47 = vld [vmem:[%s21287_s16 + $0x510] sm:$0xff] }
 0x7b7   : > { %19581 = vmatpush1.bf16.msra.mxu1 %v19580_v19  ;;  %19327 = vmatprep.subr.bf16.mxu0 %v19326_v54  ;;  %v19616_v19 = vunpack.c.l.s8.bf16 %v11589_v47  ;;  %v19362_v54 = vunpack.c.h.s8.bf16 %v11588_v20  ;;  %v22974_v20 = vsub.s32 4, %v21890_v43 }
 0x7b8   : > { %19583 = vmatprep.subr.bf16.mxu1 %v19582_v12  ;;  %v11596_v12 = vld [vmem:[%s21287_s16 + $0x548] sm:$0xff] }
 0x7b9   : > { %13869 = vmatmul.mubr.f32.vlgmr.msra.gmra.mrb[4].mxu0 %v22939_v1 }
 0x7ba   : > { %14153 = vmatmul.mubr.f32.vlgmr.msra.gmra.mrb[4].mxu1 %v22939_v1  ;;  %19329 = vmatpush1.bf16.msra.mxu0 %v19328_v11  ;;  %v19364_v11 = vunpack.c.h.s8.bf16 %v11587_v10 }
 0x7bb   : > { %19585 = vmatpush1.bf16.msra.mxu1 %v19584_v51  ;;  %19331 = vmatprep.subr.bf16.mxu0 %v19330_v37  ;;  %v19620_v51 = vunpack.c.h.s8.bf16 %v11589_v47  ;;  %v19366_v37 = vunpack.c.l.s8.bf16 %v11596_v12  ;;  %v22992_v47 = vld [vmem:[%s21285_s22] sm:$0xff] }
 0x7bc   : > { %19587 = vmatprep.subr.bf16.mxu1 %v19586_v45  ;;  %v11595_v45 = vld [vmem:[%s21287_s16 + $0x540] sm:$0xff] }
 0x7be   : > { %19333 = vmatpush1.bf16.msra.mxu0 %v19332_v13  ;;  %v19368_v13 = vunpack.c.l.s8.bf16 %v11595_v45 }
 0x7bf   : > { %19589 = vmatpush1.bf16.msra.mxu1 %v19588_v27  ;;  %19335 = vmatprep.subr.bf16.mxu0 %v19334_v39  ;;  %v19624_v27 = vunpack.c.l.s8.bf16 %v11597_v24  ;;  %v19370_v39 = vunpack.c.h.s8.bf16 %v11596_v12 }
 0x7c0   : > { %19591 = vmatprep.subr.bf16.mxu1 %v19590_v48  ;;  %v11604_v48 = vld [vmem:[%s21287_s16 + $0x588] sm:$0xff] }
 0x7c2   : > { %19337 = vmatpush1.bf16.msra.mxu0 %v19336_v50  ;;  %v19372_v50 = vunpack.c.h.s8.bf16 %v11595_v45 }
 0x7c3   : > { %19593 = vmatpush1.bf16.msra.mxu1 %v19592_v63  ;;  %19339 = vmatprep.subr.bf16.mxu0 %v19338_v23  ;;  %v19628_v63 = vunpack.c.h.s8.bf16 %v11597_v24  ;;  %v19374_v23 = vunpack.c.l.s8.bf16 %v11604_v48  ;;  %v11619_v24 = vld [vmem:[%s21287_s16 + $0x600] sm:$0xff] }
 0x7c4   : > { %19595 = vmatprep.subr.bf16.mxu1 %v19594_v57  ;;  %v11603_v57 = vld [vmem:[%s21287_s16 + $0x580] sm:$0xff] }
 0x7c6   : > { %19341 = vmatpush1.bf16.msra.mxu0 %v19340_v41  ;;  %v19376_v41 = vunpack.c.l.s8.bf16 %v11603_v57 }
 0x7c7   : > { %19597 = vmatpush1.bf16.msra.mxu1 %v19596_v35  ;;  %19343 = vmatprep.subr.bf16.mxu0 %v19342_v21  ;;  %v19632_v35 = vunpack.c.l.s8.bf16 %v11605_v59  ;;  %v19378_v21 = vunpack.c.h.s8.bf16 %v11604_v48  ;;  %v19392_v48 = vunpack.c.l.s8.bf16 %v11619_v24 }
 0x7c8   : > { %19599 = vmatprep.subr.bf16.mxu1 %v19598_v14  ;;  %v11612_v14 = vld [vmem:[%s21287_s16 + $0x5c8] sm:$0xff] }
 0x7ca   : > { %19345 = vmatpush1.bf16.msra.mxu0 %v19344_v42  ;;  %v19380_v42 = vunpack.c.h.s8.bf16 %v11603_v57  ;;  %v11628_v57 = vld [vmem:[%s21287_s16 + $0x648] sm:$0xff] }
 0x7cb   : > { %19601 = vmatpush1.bf16.msra.mxu1 %v19600_v28  ;;  %19347 = vmatprep.subr.bf16.mxu0 %v19346_v58  ;;  %v19636_v28 = vunpack.c.h.s8.bf16 %v11605_v59  ;;  %v19382_v58 = vunpack.c.l.s8.bf16 %v11612_v14 }
 0x7cc   : > { %19603 = vmatprep.subr.bf16.mxu1 %v19602_v4  ;;  %v11611_v4 = vld [vmem:[%s21287_s16 + $0x5c0] sm:$0xff] }
 0x7ce   : > { %19349 = vmatpush1.bf16.msra.mxu0 %v19348_v52  ;;  %v19384_v52 = vunpack.c.l.s8.bf16 %v11611_v4 }
 0x7cf   : > { %19605 = vmatpush1.bf16.msra.mxu1 %v19604_v49  ;;  %19351 = vmatprep.subr.bf16.mxu0 %v19350_v26  ;;  %v19640_v49 = vunpack.c.l.s8.bf16 %v11613_v0  ;;  %v19386_v26 = vunpack.c.h.s8.bf16 %v11612_v14  ;;  %v11627_v14 = vld [vmem:[%s21287_s16 + $0x640] sm:$0xff] }
 0x7d0   : > { %19607 = vmatprep.subr.bf16.mxu1 %v19606_v53  ;;  %v11620_v53 = vld [vmem:[%s21287_s16 + $0x608] sm:$0xff] }
 0x7d2   : > { %19353 = vmatpush1.bf16.msra.mxu0 %v19352_v8  ;;  %v19388_v8 = vunpack.c.h.s8.bf16 %v11611_v4 }
 0x7d3   : > { %19609 = vmatpush1.bf16.msra.mxu1 %v19608_v40  ;;  %19355 = vmatprep.subr.bf16.mxu0 %v19354_v17  ;;  %v19644_v40 = vunpack.c.h.s8.bf16 %v11613_v0  ;;  %v19390_v17 = vunpack.c.l.s8.bf16 %v11620_v53  ;;  %v11638_v0 = vld [vmem:[%s21287_s16 + $0x698] sm:$0xff] }
 0x7d4   : > { %19611 = vmatprep.subr.bf16.mxu1 %v19610_v38  ;;  %v19646_v38 = vunpack.c.l.s8.bf16 %v11622_v18 }
 0x7d6   : > { %19357 = vmatpush1.bf16.msra.mxu0 %v19356_v5  ;;  %v22980_v5 = vsub.s32 7, %v21890_v43 }
 0x7d7   : > { %19613 = vmatpush1.bf16.msra.mxu1 %v19612_v30  ;;  %19359 = vmatprep.subr.bf16.mxu0 %v19358_v32  ;;  %v22983_v30 = vld [vmem:[%s21279_s13] sm:$0xff] }
 0x7d8   : > { %19615 = vmatprep.subr.bf16.mxu1 %v19614_v62  ;;  %v11340_v32 = vrot.slane %v22983_v30, %v22974_v20  ;;  %v11344_v10 = vrot.slane %v22983_v30, %v22977_v16  ;;  %v11352_v62 = vrot.slane %v22983_v30, %v22980_v5 }
 0x7da   : > { %19361 = vmatpush1.bf16.msra.mxu0 %v19360_v46  ;;  %v11390_v46 = vrot.slane %v22992_v47, %v22974_v20 }
 0x7db   : > { %19617 = vmatpush1.bf16.msra.mxu1 %v19616_v19  ;;  %19363 = vmatprep.subr.bf16.mxu0 %v19362_v54 }
 0x7dc   : > { %19619 = vmatprep.subr.bf16.mxu1 %v19618_v25  ;;  %v11394_v25 = vrot.slane %v22992_v47, %v22977_v16 }
 0x7de   : > { %19365 = vmatpush1.bf16.msra.mxu0 %v19364_v11 }
 0x7df   : > { %19621 = vmatpush1.bf16.msra.mxu1 %v19620_v51  ;;  %19367 = vmatprep.subr.bf16.mxu0 %v19366_v37  ;;  %v11402_v51 = vrot.slane %v22992_v47, %v22980_v5 }
 0x7e0   : > { %19623 = vmatprep.subr.bf16.mxu1 %v19622_v3 }
 0x7e2   : > { %19369 = vmatpush1.bf16.msra.mxu0 %v19368_v13  ;;  %v11621_v13 = vld [vmem:[%s21287_s16 + $0x610] sm:$0xff] }
 0x7e3   : > { %19625 = vmatpush1.bf16.msra.mxu1 %v19624_v27  ;;  %19371 = vmatprep.subr.bf16.mxu0 %v19370_v39  ;;  %v19648_v9 = vunpack.c.l.s8.bf16 %v11621_v13 }
 0x7e4   : > { %19627 = vmatprep.subr.bf16.mxu1 %v19626_v22 }
 0x7e6   : > { %19373 = vmatpush1.bf16.msra.mxu0 %v19372_v50 }
 0x7e7   : > { %19629 = vmatpush1.bf16.msra.mxu1 %v19628_v63  ;;  %19375 = vmatprep.subr.bf16.mxu0 %v19374_v23  ;;  %v19394_v63 = vunpack.c.h.s8.bf16 %v11620_v53  ;;  %v19650_v23 = vunpack.c.h.s8.bf16 %v11622_v18  ;;  %v11635_v53 = vld [vmem:[%s21287_s16 + $0x680] sm:$0xff]  ;;  %v11637_v18 = vld [vmem:[%s21287_s16 + $0x690] sm:$0xff] }
 0x7e8   : > { %19631 = vmatprep.subr.bf16.mxu1 %v19630_v7  ;;  %v11630_v7 = vld [vmem:[%s21287_s16 + $0x658] sm:$0xff] }
 0x7e9   : > { %v19658_v4 = vunpack.c.h.s8.bf16 %v11630_v7 }
 0x7ea   : > { %19377 = vmatpush1.bf16.msra.mxu0 %v19376_v41  ;;  %v19396_v41 = vunpack.c.h.s8.bf16 %v11619_v24  ;;  %v11654_v24 = vld [vmem:[%s21287_s16 + $0x718] sm:$0xff] }
 0x7eb   : > { %19633 = vmatpush1.bf16.msra.mxu1 %v19632_v35  ;;  %19379 = vmatprep.subr.bf16.mxu0 %v19378_v21  ;;  %v19652_v35 = vunpack.c.h.s8.bf16 %v11621_v13  ;;  %v19398_v21 = vunpack.c.l.s8.bf16 %v11628_v57 }
 0x7ec   : > { %19635 = vmatprep.subr.bf16.mxu1 %v19634_v29  ;;  %v19654_v29 = vunpack.c.l.s8.bf16 %v11630_v7 }
 0x7ee   : > { %19381 = vmatpush1.bf16.msra.mxu0 %v19380_v42  ;;  %v19400_v42 = vunpack.c.l.s8.bf16 %v11627_v14 }
 0x7ef   : > { %19637 = vmatpush1.bf16.msra.mxu1 %v19636_v28  ;;  %19383 = vmatprep.subr.bf16.mxu0 %v19382_v58  ;;  %v19656_v28 = vunpack.c.l.s8.bf16 %v11629_v44  ;;  %v19402_v58 = vunpack.c.h.s8.bf16 %v11628_v57 }
 0x7f0   : > { %19639 = vmatprep.subr.bf16.mxu1 %v19638_v34  ;;  %v11636_v34 = vld [vmem:[%s21287_s16 + $0x688] sm:$0xff] }
 0x7f2   : > { %19385 = vmatpush1.bf16.msra.mxu0 %v19384_v52  ;;  %v19404_v52 = vunpack.c.h.s8.bf16 %v11627_v14 }
 0x7f3   : > { %19641 = vmatpush1.bf16.msra.mxu1 %v19640_v49  ;;  %19387 = vmatprep.subr.bf16.mxu0 %v19386_v26  ;;  %v19660_v49 = vunpack.c.h.s8.bf16 %v11629_v44  ;;  %v19406_v26 = vunpack.c.l.s8.bf16 %v11636_v34 }
 0x7f4   : > { %19643 = vmatprep.subr.bf16.mxu1 %v19642_v60  ;;  %v19662_v60 = vunpack.c.l.s8.bf16 %v11638_v0 }
 0x7f6   : > { %19389 = vmatpush1.bf16.msra.mxu0 %v19388_v8  ;;  %v19408_v8 = vunpack.c.l.s8.bf16 %v11635_v53 }
 0x7f7   : > { %19645 = vmatpush1.bf16.msra.mxu1 %v19644_v40  ;;  %19391 = vmatprep.subr.bf16.mxu0 %v19390_v17  ;;  %v19664_v40 = vunpack.c.l.s8.bf16 %v11637_v18  ;;  %v19410_v17 = vunpack.c.h.s8.bf16 %v11636_v34 }
 0x7f8   : > { %19647 = vmatprep.subr.bf16.mxu1 %v19646_v38  ;;  %v19666_v38 = vunpack.c.h.s8.bf16 %v11638_v0 }
 0x80c   : > { %v10462_v19 = vpop.f32.mrb[2].mxu0  ;;  %v22996_v54 = vpop.f32.mrb[2].mxu1 }
 0x80d   : > { %v11365_v12 = vmul.f32 %v11340_v32, %v10462_v19  ;;  %v10464_v15 = vpop.f32.mrb[3].mxu0  ;;  %v11316_v11 = vpop.f32.mrb[3].mxu1  ;;  %v11644_v32 = vld [vmem:[%s21287_s16 + $0x6c8] sm:$0xff] }
 0x80e   : > { %v11366_v37 = vmul.f32 %v11344_v10, %v10464_v15  ;;  %v11368_v45 = vmul.f32 %v11352_v62, %v11316_v11  ;;  %v11646_v10 = vld [vmem:[%s21287_s16 + $0x6d8] sm:$0xff]  ;;  %v19412_v62 = vunpack.c.h.s8.bf16 %v11635_v53  ;;  %v19414_v19 = vunpack.c.l.s8.bf16 %v11644_v32  ;;  %v11645_v15 = vld [vmem:[%s21287_s16 + $0x6d0] sm:$0xff] }
 0x80f   : > { %v11415_v3 = vadd.f32 %v11390_v46, %v11365_v12  ;;  %v19668_v46 = vunpack.c.h.s8.bf16 %v11637_v18  ;;  %v11643_v12 = vld [vmem:[%s21287_s16 + $0x6c0] sm:$0xff] }
 0x810   : > { %v11416_v27 = vadd.f32 %v11394_v25, %v11366_v37  ;;  %v11418_v39 = vadd.f32 %v11402_v51, %v11368_v45  ;;  %v19670_v25 = vunpack.c.l.s8.bf16 %v11646_v10  ;;  %v19416_v11 = vunpack.c.l.s8.bf16 %v11643_v12 }
 0x811   : > { %v23006_v50 = vmax.f32 %v11415_v3, 0.0  ;;  %v19672_v51 = vunpack.c.l.s8.bf16 %v11645_v15  ;;  %v19418_v37 = vunpack.c.h.s8.bf16 %v11644_v32  ;;  %v19674_v45 = vunpack.c.h.s8.bf16 %v11646_v10  ;;  %v11652_v3 = vld [vmem:[%s21287_s16 + $0x708] sm:$0xff] }
 0x812   : > { %v23004_v22 = vmax.f32 %v11416_v27, 0.0  ;;  %v23012_v59 = vmax.f32 %v11418_v39, 0.0  ;;  %v19420_v13 = vunpack.c.h.s8.bf16 %v11643_v12  ;;  %v19676_v27 = vunpack.c.h.s8.bf16 %v11645_v15 }
 0x813   : > { %v19422_v39 = vunpack.c.l.s8.bf16 %v11652_v3  ;;  %v19426_v7 = vunpack.c.h.s8.bf16 %v11652_v3  ;;  %v23041_v10 = vsub.s32 6, %v21890_v43 }
 0x814   : > { %13939 = vmatprep.mubr.f32.mxu0 %v23004_v22  ;;  %14223 = vmatprep.mubr.f32.mxu1 %v23004_v22 }
 0x815   : > { %13940 = vmatmul.mubr.f32.vlgmr.msra.gmra.mrb[4].mxu0 %v23006_v50  ;;  %14224 = vmatmul.mubr.f32.vlgmr.msra.gmra.mrb[4].mxu1 %v23006_v50 }
 0x816   : > { %19393 = vmatpush1.bf16.msra.mxu0 %v19392_v48  ;;  %19649 = vmatpush1.bf16.msra.mxu1 %v19648_v9  ;;  %v19678_v48 = vunpack.c.l.s8.bf16 %v11654_v24  ;;  %v11651_v9 = vld [vmem:[%s21287_s16 + $0x700] sm:$0xff] }
 0x817   : > { %14010 = vmatprep.mubr.f32.mxu0 %v23012_v59  ;;  %14294 = vmatprep.mubr.f32.mxu1 %v23012_v59 }
 0x818   : > { %19395 = vmatprep.subr.bf16.mxu0 %v19394_v63  ;;  %19651 = vmatprep.subr.bf16.mxu1 %v19650_v23  ;;  %v11653_v63 = vld [vmem:[%s21287_s16 + $0x710] sm:$0xff]  ;;  %v19424_v23 = vunpack.c.l.s8.bf16 %v11651_v9 }
 0x819   : > { %v19680_v57 = vunpack.c.l.s8.bf16 %v11653_v63  ;;  %v19684_v14 = vunpack.c.h.s8.bf16 %v11653_v63 }
 0x81a   : > { %19397 = vmatpush1.bf16.msra.mxu0 %v19396_v41  ;;  %19653 = vmatpush1.bf16.msra.mxu1 %v19652_v35  ;;  %v19682_v41 = vunpack.c.h.s8.bf16 %v11654_v24  ;;  %v11660_v35 = vld [vmem:[%s21287_s16 + $0x748] sm:$0xff] }
 0x81b   : > { %19399 = vmatprep.subr.bf16.mxu0 %v19398_v21  ;;  %19655 = vmatprep.subr.bf16.mxu1 %v19654_v29  ;;  %v11662_v21 = vld [vmem:[%s21287_s16 + $0x758] sm:$0xff]  ;;  %v19428_v29 = vunpack.c.h.s8.bf16 %v11651_v9  ;;  %v19430_v44 = vunpack.c.l.s8.bf16 %v11660_v35  ;;  %v19434_v0 = vunpack.c.h.s8.bf16 %v11660_v35 }
 0x81c   : > { %v11434_v9 = vld [vmem:[%s21287_s16 + $0x38] sm:$0xff] }
 0x81e   : > { %19401 = vmatpush1.bf16.msra.mxu0 %v19400_v42  ;;  %19657 = vmatpush1.bf16.msra.mxu1 %v19656_v28  ;;  %v19686_v42 = vunpack.c.l.s8.bf16 %v11662_v21  ;;  %v11659_v28 = vld [vmem:[%s21287_s16 + $0x740] sm:$0xff] }
 0x81f   : > { %19403 = vmatprep.subr.bf16.mxu0 %v19402_v58  ;;  %19659 = vmatprep.subr.bf16.mxu1 %v19658_v4  ;;  %v11661_v58 = vld [vmem:[%s21287_s16 + $0x750] sm:$0xff]  ;;  %v19432_v4 = vunpack.c.l.s8.bf16 %v11659_v28 }
 0x820   : > { %v19688_v34 = vunpack.c.l.s8.bf16 %v11661_v58  ;;  %v19692_v53 = vunpack.c.h.s8.bf16 %v11661_v58 }
 0x822   : > { %19405 = vmatpush1.bf16.msra.mxu0 %v19404_v52  ;;  %19661 = vmatpush1.bf16.msra.mxu1 %v19660_v49  ;;  %v19690_v52 = vunpack.c.h.s8.bf16 %v11662_v21  ;;  %v11668_v49 = vld [vmem:[%s21287_s16 + $0x788] sm:$0xff] }
 0x823   : > { %19407 = vmatprep.subr.bf16.mxu0 %v19406_v26  ;;  %19663 = vmatprep.subr.bf16.mxu1 %v19662_v60  ;;  %v11670_v26 = vld [vmem:[%s21287_s16 + $0x798] sm:$0xff]  ;;  %v19436_v60 = vunpack.c.h.s8.bf16 %v11659_v28  ;;  %v19438_v18 = vunpack.c.l.s8.bf16 %v11668_v49 }
 0x824   : > { %v11442_v28 = vld [vmem:[%s21287_s16 + $0x78] sm:$0xff] }
 0x826   : > { %19409 = vmatpush1.bf16.msra.mxu0 %v19408_v8  ;;  %19665 = vmatpush1.bf16.msra.mxu1 %v19664_v40  ;;  %v19694_v8 = vunpack.c.l.s8.bf16 %v11670_v26  ;;  %v11667_v40 = vld [vmem:[%s21287_s16 + $0x780] sm:$0xff] }
 0x827   : > { %19411 = vmatprep.subr.bf16.mxu0 %v19410_v17  ;;  %19667 = vmatprep.subr.bf16.mxu1 %v19666_v38  ;;  %v11669_v17 = vld [vmem:[%s21287_s16 + $0x790] sm:$0xff]  ;;  %v19440_v38 = vunpack.c.l.s8.bf16 %v11667_v40  ;;  %v19444_v12 = vunpack.c.h.s8.bf16 %v11667_v40 }
 0x828   : > { %v19696_v32 = vunpack.c.l.s8.bf16 %v11669_v17  ;;  %v19700_v15 = vunpack.c.h.s8.bf16 %v11669_v17 }
 0x82a   : > { %19413 = vmatpush1.bf16.msra.mxu0 %v19412_v62  ;;  %19669 = vmatpush1.bf16.msra.mxu1 %v19668_v46  ;;  %v19442_v62 = vunpack.c.h.s8.bf16 %v11668_v49  ;;  %v19698_v46 = vunpack.c.h.s8.bf16 %v11670_v26  ;;  %v11441_v49 = vld [vmem:[%s21287_s16 + $0x70] sm:$0xff] }
 0x82b   : > { %19415 = vmatprep.subr.bf16.mxu0 %v19414_v19  ;;  %19671 = vmatprep.subr.bf16.mxu1 %v19670_v25  ;;  %v11676_v19 = vld [vmem:[%s21287_s16 + $0x7c8] sm:$0xff]  ;;  %v11678_v25 = vld [vmem:[%s21287_s16 + $0x7d8] sm:$0xff]  ;;  %v19980_v17 = vunpack.c.h.s8.bf16 %v11441_v49 }
 0x82c   : > { %v19446_v43 = vunpack.c.l.s8.bf16 %v11676_v19 }
 0x82e   : > { %19417 = vmatpush1.bf16.msra.mxu0 %v19416_v11  ;;  %19673 = vmatpush1.bf16.msra.mxu1 %v19672_v51  ;;  %v11348_v11 = vrot.slane %v22983_v30, %v23041_v10  ;;  %v19702_v51 = vunpack.c.l.s8.bf16 %v11678_v25  ;;  %v19450_v30 = vunpack.c.h.s8.bf16 %v11676_v19 }
 0x82f   : > { %19419 = vmatprep.subr.bf16.mxu0 %v19418_v37  ;;  %19675 = vmatprep.subr.bf16.mxu1 %v19674_v45  ;;  %v11675_v37 = vld [vmem:[%s21287_s16 + $0x7c0] sm:$0xff]  ;;  %v11677_v45 = vld [vmem:[%s21287_s16 + $0x7d0] sm:$0xff] }
 0x830   : > { %v19448_v3 = vunpack.c.l.s8.bf16 %v11675_v37  ;;  %v19704_v24 = vunpack.c.l.s8.bf16 %v11677_v45  ;;  %v19452_v63 = vunpack.c.h.s8.bf16 %v11675_v37 }
 0x832   : > { %19421 = vmatpush1.bf16.msra.mxu0 %v19420_v13  ;;  %19677 = vmatpush1.bf16.msra.mxu1 %v19676_v27  ;;  %v11367_v13 = vmul.f32 %v11348_v11, %v22996_v54  ;;  %v11398_v27 = vrot.slane %v22992_v47, %v23041_v10  ;;  %v11431_v47 = vld [vmem:[%s21287_s16 + $0x20] sm:$0xff]  ;;  %v11456_v11 = vld [vmem:[%s21287_s16 + $0xe8] sm:$0xff] }
 0x833   : > { %19423 = vmatprep.subr.bf16.mxu0 %v19422_v39  ;;  %19679 = vmatprep.subr.bf16.mxu1 %v19678_v48  ;;  %v19706_v39 = vunpack.c.h.s8.bf16 %v11678_v25  ;;  %v11432_v48 = vld [vmem:[%s21287_s16 + $0x28] sm:$0xff]  ;;  %v19712_v35 = vunpack.c.l.s8.bf16 %v11431_v47  ;;  %v19716_v58 = vunpack.c.h.s8.bf16 %v11431_v47 }
 0x834   : > { %v19710_v54 = vunpack.c.l.s8.bf16 %v11432_v48 }
 0x836   : > { %19425 = vmatpush1.bf16.msra.mxu0 %v19424_v23  ;;  %19681 = vmatpush1.bf16.msra.mxu1 %v19680_v57  ;;  %v19708_v23 = vunpack.c.h.s8.bf16 %v11677_v45  ;;  %v11417_v57 = vadd.f32 %v11398_v27, %v11367_v13  ;;  %v19734_v45 = vunpack.c.l.s8.bf16 %v11456_v11  ;;  %v11457_v13 = vld [vmem:[%s21287_s16 + $0xf0] sm:$0xff] }
 0x837   : > { %19427 = vmatprep.subr.bf16.mxu0 %v19426_v7  ;;  %19683 = vmatprep.subr.bf16.mxu1 %v19682_v41  ;;  %v19966_v7 = vunpack.c.l.s8.bf16 %v11434_v9  ;;  %v11433_v41 = vld [vmem:[%s21287_s16 + $0x30] sm:$0xff] }
 0x838   : > { %v23056_v21 = vmax.f32 %v11417_v57, 0.0  ;;  %v19996_v57 = vunpack.c.h.s8.bf16 %v11457_v13 }
 0x83a   : > { %19429 = vmatpush1.bf16.msra.mxu0 %v19428_v29  ;;  %19685 = vmatpush1.bf16.msra.mxu1 %v19684_v14  ;;  %v19968_v29 = vunpack.c.l.s8.bf16 %v11433_v41  ;;  %v19714_v14 = vunpack.c.h.s8.bf16 %v11432_v48 }
 0x83b   : > { %19431 = vmatprep.subr.bf16.mxu0 %v19430_v44  ;;  %19687 = vmatprep.subr.bf16.mxu1 %v19686_v42  ;;  %v19970_v44 = vunpack.c.h.s8.bf16 %v11434_v9  ;;  %v11440_v42 = vld [vmem:[%s21287_s16 + $0x68] sm:$0xff] }
 0x83c   : > { %v11464_v9 = vld [vmem:[%s21287_s16 + $0x128] sm:$0xff] }
 0x83e   : > { %19433 = vmatpush1.bf16.msra.mxu0 %v19432_v4  ;;  %19689 = vmatpush1.bf16.msra.mxu1 %v19688_v34  ;;  %v19972_v4 = vunpack.c.h.s8.bf16 %v11433_v41  ;;  %v19718_v34 = vunpack.c.l.s8.bf16 %v11440_v42  ;;  %v11465_v41 = vld [vmem:[%s21287_s16 + $0x130] sm:$0xff] }
 0x83f   : > { %19435 = vmatprep.subr.bf16.mxu0 %v19434_v0  ;;  %19691 = vmatprep.subr.bf16.mxu1 %v19690_v52  ;;  %v11439_v0 = vld [vmem:[%s21287_s16 + $0x60] sm:$0xff]  ;;  %v19974_v52 = vunpack.c.l.s8.bf16 %v11442_v28 }
 0x840   : > { %v19720_v26 = vunpack.c.l.s8.bf16 %v11439_v0  ;;  %v19724_v40 = vunpack.c.h.s8.bf16 %v11439_v0  ;;  %v11471_v0 = vld [vmem:[%s21287_s16 + $0x160] sm:$0xff] }
 0x842   : > { %19437 = vmatpush1.bf16.msra.mxu0 %v19436_v60  ;;  %19693 = vmatpush1.bf16.msra.mxu1 %v19692_v53  ;;  %v19976_v60 = vunpack.c.l.s8.bf16 %v11441_v49  ;;  %v19722_v53 = vunpack.c.h.s8.bf16 %v11440_v42  ;;  %v11472_v42 = vld [vmem:[%s21287_s16 + $0x168] sm:$0xff]  ;;  %v11473_v49 = vld [vmem:[%s21287_s16 + $0x170] sm:$0xff] }
 0x843   : > { %19439 = vmatprep.subr.bf16.mxu0 %v19438_v18  ;;  %19695 = vmatprep.subr.bf16.mxu1 %v19694_v8  ;;  %v19978_v18 = vunpack.c.h.s8.bf16 %v11442_v28  ;;  %v11450_v8 = vld [vmem:[%s21287_s16 + $0xb8] sm:$0xff] }
 0x844   : > { %v11474_v28 = vld [vmem:[%s21287_s16 + $0x178] sm:$0xff] }
 0x846   : > { %19441 = vmatpush1.bf16.msra.mxu0 %v19440_v38  ;;  %19697 = vmatpush1.bf16.msra.mxu1 %v19696_v32  ;;  %v11447_v32 = vld [vmem:[%s21287_s16 + $0xa0] sm:$0xff] }
 0x847   : > { %19443 = vmatprep.subr.bf16.mxu0 %v19442_v62  ;;  %19699 = vmatprep.subr.bf16.mxu1 %v19698_v46  ;;  %v19982_v62 = vunpack.c.l.s8.bf16 %v11450_v8  ;;  %v11449_v46 = vld [vmem:[%s21287_s16 + $0xb0] sm:$0xff]  ;;  %v19728_v19 = vunpack.c.l.s8.bf16 %v11447_v32 }
 0x848   : > { %v19984_v25 = vunpack.c.l.s8.bf16 %v11449_v46  ;;  %v19988_v37 = vunpack.c.h.s8.bf16 %v11449_v46  ;;  %v11481_v46 = vld [vmem:[%s21287_s16 + $0x1b0] sm:$0xff] }
 0x84a   : > { %19445 = vmatpush1.bf16.msra.mxu0 %v19444_v12  ;;  %19701 = vmatpush1.bf16.msra.mxu1 %v19700_v15  ;;  %v19986_v15 = vunpack.c.h.s8.bf16 %v11450_v8  ;;  %v11482_v8 = vld [vmem:[%s21287_s16 + $0x1b8] sm:$0xff] }
 0x84b   : > { %19447 = vmatprep.subr.bf16.mxu0 %v19446_v43  ;;  %19703 = vmatprep.subr.bf16.mxu1 %v19702_v51  ;;  %v11458_v43 = vld [vmem:[%s21287_s16 + $0xf8] sm:$0xff]  ;;  %v19732_v51 = vunpack.c.h.s8.bf16 %v11447_v32  ;;  %v11479_v32 = vld [vmem:[%s21287_s16 + $0x1a0] sm:$0xff] }
 0x84c   : > { %v19994_v48 = vunpack.c.h.s8.bf16 %v11458_v43 }
 0x84e   : > { %19449 = vmatpush1.bf16.msra.mxu0 %v19448_v3  ;;  %19705 = vmatpush1.bf16.msra.mxu1 %v19704_v24  ;;  %v11455_v3 = vld [vmem:[%s21287_s16 + $0xe0] sm:$0xff]  ;;  %v19990_v24 = vunpack.c.l.s8.bf16 %v11458_v43  ;;  %v11490_v43 = vld [vmem:[%s21287_s16 + $0x1f8] sm:$0xff] }
 0x84f   : > { %19451 = vmatprep.subr.bf16.mxu0 %v19450_v30  ;;  %19707 = vmatprep.subr.bf16.mxu1 %v19706_v39  ;;  %v19736_v27 = vunpack.c.l.s8.bf16 %v11455_v3  ;;  %v19992_v30 = vunpack.c.l.s8.bf16 %v11457_v13  ;;  %v19738_v39 = vunpack.c.h.s8.bf16 %v11456_v11  ;;  %v11488_v11 = vld [vmem:[%s21287_s16 + $0x1e8] sm:$0xff]  ;;  %v11489_v13 = vld [vmem:[%s21287_s16 + $0x1f0] sm:$0xff] }
 0x852   : > { %19453 = vmatpush1.bf16.msra.mxu0 %v19452_v63  ;;  %19709 = vmatpush1.bf16.msra.mxu1 %v19708_v23  ;;  %v11466_v63 = vld [vmem:[%s21287_s16 + $0x138] sm:$0xff]  ;;  %v19740_v23 = vunpack.c.h.s8.bf16 %v11455_v3  ;;  %v11487_v3 = vld [vmem:[%s21287_s16 + $0x1e0] sm:$0xff] }
 0x853   : > { %19711 = vmatprep.subr.bf16.mxu0 %v19710_v54  ;;  %19967 = vmatprep.subr.bf16.mxu1 %v19966_v7  ;;  %v19742_v54 = vunpack.c.l.s8.bf16 %v11464_v9  ;;  %v11463_v7 = vld [vmem:[%s21287_s16 + $0x120] sm:$0xff]  ;;  %v19998_v47 = vunpack.c.l.s8.bf16 %v11466_v63 }
 0x855   : > { %14011 = vmatmul.mubr.f32.vlgmr.msra.gmra.mrb[4].mxu0 %v23056_v21  ;;  %14295 = vmatmul.mubr.f32.vlgmr.msra.gmra.mrb[4].mxu1 %v23056_v21 }
 0x856   : > { %19713 = vmatpush1.bf16.msra.mxu0 %v19712_v35  ;;  %14365 = vmatprep.mubr.f32.mxu0 %v22835_v33  ;;  %v19744_v35 = vunpack.c.l.s8.bf16 %v11463_v7 }
 0x857   : > { %19969 = vmatpush1.bf16.msra.mxu1 %v19968_v29  ;;  %14649 = vmatprep.mubr.f32.mxu1 %v22835_v33  ;;  %v11448_v33 = vld [vmem:[%s21287_s16 + $0xa8] sm:$0xff]  ;;  %v20000_v29 = vunpack.c.l.s8.bf16 %v11465_v41 }
 0x858   : > { %19715 = vmatprep.subr.bf16.mxu0 %v19714_v14  ;;  %19971 = vmatprep.subr.bf16.mxu1 %v19970_v44  ;;  %v19726_v38 = vunpack.c.l.s8.bf16 %v11448_v33  ;;  %v19730_v12 = vunpack.c.h.s8.bf16 %v11448_v33  ;;  %v19746_v14 = vunpack.c.h.s8.bf16 %v11464_v9  ;;  %v20002_v44 = vunpack.c.h.s8.bf16 %v11466_v63  ;;  %v11480_v33 = vld [vmem:[%s21287_s16 + $0x1a8] sm:$0xff]  ;;  %v11498_v63 = vld [vmem:[%s21287_s16 + $0x238] sm:$0xff] }
 0x859   : > { %v11496_v9 = vld [vmem:[%s21287_s16 + $0x228] sm:$0xff] }
 0x85a   : > { %19717 = vmatpush1.bf16.msra.mxu0 %v19716_v58  ;;  %v19748_v58 = vunpack.c.h.s8.bf16 %v11463_v7  ;;  %v11495_v7 = vld [vmem:[%s21287_s16 + $0x220] sm:$0xff] }
 0x85b   : > { %19973 = vmatpush1.bf16.msra.mxu1 %v19972_v4  ;;  %19719 = vmatprep.subr.bf16.mxu0 %v19718_v34  ;;  %v20004_v4 = vunpack.c.h.s8.bf16 %v11465_v41  ;;  %v19750_v34 = vunpack.c.l.s8.bf16 %v11472_v42  ;;  %v11497_v41 = vld [vmem:[%s21287_s16 + $0x230] sm:$0xff] }
 0x85c   : > { %19975 = vmatprep.subr.bf16.mxu1 %v19974_v52  ;;  %v20006_v52 = vunpack.c.l.s8.bf16 %v11474_v28 }
 0x85e   : > { %19721 = vmatpush1.bf16.msra.mxu0 %v19720_v26  ;;  %v19752_v26 = vunpack.c.l.s8.bf16 %v11471_v0 }
 0x85f   : > { %19977 = vmatpush1.bf16.msra.mxu1 %v19976_v60  ;;  %19723 = vmatprep.subr.bf16.mxu0 %v19722_v53  ;;  %v20008_v60 = vunpack.c.l.s8.bf16 %v11473_v49  ;;  %v19754_v53 = vunpack.c.h.s8.bf16 %v11472_v42  ;;  %v20034_v42 = vunpack.c.h.s8.bf16 %v11498_v63 }
 0x860   : > { %19979 = vmatprep.subr.bf16.mxu1 %v19978_v18  ;;  %v20010_v18 = vunpack.c.h.s8.bf16 %v11474_v28  ;;  %v11506_v28 = vld [vmem:[%s21287_s16 + $0x278] sm:$0xff] }
 0x862   : > { %19725 = vmatpush1.bf16.msra.mxu0 %v19724_v40  ;;  %v19756_v40 = vunpack.c.h.s8.bf16 %v11471_v0  ;;  %v11503_v0 = vld [vmem:[%s21287_s16 + $0x260] sm:$0xff] }
 0x863   : > { %19981 = vmatpush1.bf16.msra.mxu1 %v19980_v17  ;;  %19727 = vmatprep.subr.bf16.mxu0 %v19726_v38  ;;  %v20012_v17 = vunpack.c.h.s8.bf16 %v11473_v49  ;;  %v19758_v38 = vunpack.c.l.s8.bf16 %v11480_v33  ;;  %v11505_v49 = vld [vmem:[%s21287_s16 + $0x270] sm:$0xff] }
 0x864   : > { %19983 = vmatprep.subr.bf16.mxu1 %v19982_v62  ;;  %v20014_v62 = vunpack.c.l.s8.bf16 %v11482_v8 }
 0x866   : > { %19729 = vmatpush1.bf16.msra.mxu0 %v19728_v19  ;;  %v19760_v19 = vunpack.c.l.s8.bf16 %v11479_v32 }
 0x867   : > { %19985 = vmatpush1.bf16.msra.mxu1 %v19984_v25  ;;  %19731 = vmatprep.subr.bf16.mxu0 %v19730_v12  ;;  %v20016_v25 = vunpack.c.l.s8.bf16 %v11481_v46  ;;  %v19762_v12 = vunpack.c.h.s8.bf16 %v11480_v33  ;;  %v11514_v33 = vld [vmem:[%s21287_s16 + $0x2b8] sm:$0xff] }
 0x868   : > { %19987 = vmatprep.subr.bf16.mxu1 %v19986_v15  ;;  %v20018_v15 = vunpack.c.h.s8.bf16 %v11482_v8  ;;  %v19788_v8 = vunpack.c.h.s8.bf16 %v11503_v0 }
 0x86a   : > { %19733 = vmatpush1.bf16.msra.mxu0 %v19732_v51  ;;  %v19764_v51 = vunpack.c.h.s8.bf16 %v11479_v32  ;;  %v11513_v32 = vld [vmem:[%s21287_s16 + $0x2b0] sm:$0xff] }
 0x86b   : > { %19989 = vmatpush1.bf16.msra.mxu1 %v19988_v37  ;;  %19735 = vmatprep.subr.bf16.mxu0 %v19734_v45  ;;  %v20020_v37 = vunpack.c.h.s8.bf16 %v11481_v46  ;;  %v19766_v45 = vunpack.c.l.s8.bf16 %v11488_v11  ;;  %v20048_v46 = vunpack.c.l.s8.bf16 %v11513_v32 }
 0x86c   : > { %19991 = vmatprep.subr.bf16.mxu1 %v19990_v24  ;;  %v20022_v24 = vunpack.c.l.s8.bf16 %v11490_v43 }
 0x86e   : > { %19737 = vmatpush1.bf16.msra.mxu0 %v19736_v27  ;;  %v19768_v27 = vunpack.c.l.s8.bf16 %v11487_v3 }
 0x86f   : > { %19993 = vmatpush1.bf16.msra.mxu1 %v19992_v30  ;;  %19739 = vmatprep.subr.bf16.mxu0 %v19738_v39  ;;  %v20024_v30 = vunpack.c.l.s8.bf16 %v11489_v13  ;;  %v19770_v39 = vunpack.c.h.s8.bf16 %v11488_v11 }
 0x870   : > { %19995 = vmatprep.subr.bf16.mxu1 %v19994_v48  ;;  %v20026_v48 = vunpack.c.h.s8.bf16 %v11490_v43  ;;  %v20052_v43 = vunpack.c.h.s8.bf16 %v11513_v32 }
 0x872   : > { %19741 = vmatpush1.bf16.msra.mxu0 %v19740_v23  ;;  %v19772_v23 = vunpack.c.h.s8.bf16 %v11487_v3  ;;  %v11521_v3 = vld [vmem:[%s21287_s16 + $0x2f0] sm:$0xff] }
 0x873   : > { %19997 = vmatpush1.bf16.msra.mxu1 %v19996_v57  ;;  %19743 = vmatprep.subr.bf16.mxu0 %v19742_v54  ;;  %v20028_v57 = vunpack.c.h.s8.bf16 %v11489_v13  ;;  %v19774_v54 = vunpack.c.l.s8.bf16 %v11496_v9  ;;  %v20056_v13 = vunpack.c.l.s8.bf16 %v11521_v3 }
 0x874   : > { %19999 = vmatprep.subr.bf16.mxu1 %v19998_v47  ;;  %v20030_v47 = vunpack.c.l.s8.bf16 %v11498_v63  ;;  %v20060_v63 = vunpack.c.h.s8.bf16 %v11521_v3 }
 0x876   : > { %19745 = vmatpush1.bf16.msra.mxu0 %v19744_v35  ;;  %v19776_v35 = vunpack.c.l.s8.bf16 %v11495_v7 }
 0x877   : > { %20001 = vmatpush1.bf16.msra.mxu1 %v20000_v29  ;;  %19747 = vmatprep.subr.bf16.mxu0 %v19746_v14  ;;  %v20032_v29 = vunpack.c.l.s8.bf16 %v11497_v41  ;;  %v19778_v14 = vunpack.c.h.s8.bf16 %v11496_v9 }
 0x878   : > { %20003 = vmatprep.subr.bf16.mxu1 %v20002_v44  ;;  %v11504_v44 = vld [vmem:[%s21287_s16 + $0x268] sm:$0xff] }
 0x87a   : > { %19749 = vmatpush1.bf16.msra.mxu0 %v19748_v58  ;;  %v19780_v58 = vunpack.c.h.s8.bf16 %v11495_v7  ;;  %v11529_v7 = vld [vmem:[%s21287_s16 + $0x330] sm:$0xff] }
 0x87b   : > { %20005 = vmatpush1.bf16.msra.mxu1 %v20004_v4  ;;  %19751 = vmatprep.subr.bf16.mxu0 %v19750_v34  ;;  %v20036_v4 = vunpack.c.h.s8.bf16 %v11497_v41  ;;  %v19782_v34 = vunpack.c.l.s8.bf16 %v11504_v44  ;;  %v20064_v41 = vunpack.c.l.s8.bf16 %v11529_v7 }
 0x87c   : > { %20007 = vmatprep.subr.bf16.mxu1 %v20006_v52  ;;  %v20038_v52 = vunpack.c.l.s8.bf16 %v11506_v28 }
 0x87e   : > { %19753 = vmatpush1.bf16.msra.mxu0 %v19752_v26  ;;  %v19784_v26 = vunpack.c.l.s8.bf16 %v11503_v0  ;;  %v11537_v0 = vld [vmem:[%s21287_s16 + $0x370] sm:$0xff] }
 0x87f   : > { %20009 = vmatpush1.bf16.msra.mxu1 %v20008_v60  ;;  %19755 = vmatprep.subr.bf16.mxu0 %v19754_v53  ;;  %v19786_v60 = vunpack.c.h.s8.bf16 %v11504_v44  ;;  %v20042_v53 = vunpack.c.h.s8.bf16 %v11506_v28  ;;  %v11538_v44 = vld [vmem:[%s21287_s16 + $0x378] sm:$0xff]  ;;  %v20068_v28 = vunpack.c.h.s8.bf16 %v11529_v7 }
 0x880   : > { %20011 = vmatprep.subr.bf16.mxu1 %v20010_v18  ;;  %v11512_v18 = vld [vmem:[%s21287_s16 + $0x2a8] sm:$0xff] }
 0x882   : > { %19757 = vmatpush1.bf16.msra.mxu0 %v19756_v40  ;;  %v19790_v40 = vunpack.c.l.s8.bf16 %v11512_v18 }
 0x883   : > { %20013 = vmatpush1.bf16.msra.mxu1 %v20012_v17  ;;  %19759 = vmatprep.subr.bf16.mxu0 %v19758_v38  ;;  %v11511_v17 = vld [vmem:[%s21287_s16 + $0x2a0] sm:$0xff]  ;;  %v20046_v38 = vunpack.c.l.s8.bf16 %v11514_v33 }
 0x884   : > { %20015 = vmatprep.subr.bf16.mxu1 %v20014_v62  ;;  %v19792_v62 = vunpack.c.l.s8.bf16 %v11511_v17  ;;  %v19796_v11 = vunpack.c.h.s8.bf16 %v11511_v17  ;;  %v11545_v17 = vld [vmem:[%s21287_s16 + $0x3b0] sm:$0xff] }
 0x885   : > { %v20080_v32 = vunpack.c.l.s8.bf16 %v11545_v17 }
 0x886   : > { %19761 = vmatpush1.bf16.msra.mxu0 %v19760_v19  ;;  %v19794_v19 = vunpack.c.h.s8.bf16 %v11512_v18 }
 0x887   : > { %20017 = vmatpush1.bf16.msra.mxu1 %v20016_v25  ;;  %19763 = vmatprep.subr.bf16.mxu0 %v19762_v12  ;;  %v20050_v25 = vunpack.c.h.s8.bf16 %v11514_v33  ;;  %v11520_v12 = vld [vmem:[%s21287_s16 + $0x2e8] sm:$0xff]  ;;  %v20076_v33 = vunpack.c.h.s8.bf16 %v11537_v0 }
 0x888   : > { %20019 = vmatprep.subr.bf16.mxu1 %v20018_v15  ;;  %v11522_v15 = vld [vmem:[%s21287_s16 + $0x2f8] sm:$0xff] }
 0x88a   : > { %19765 = vmatpush1.bf16.msra.mxu0 %v19764_v51  ;;  %v19798_v51 = vunpack.c.l.s8.bf16 %v11520_v12 }
 0x88b   : > { %20021 = vmatpush1.bf16.msra.mxu1 %v20020_v37  ;;  %19767 = vmatprep.subr.bf16.mxu0 %v19766_v45  ;;  %v11519_v37 = vld [vmem:[%s21287_s16 + $0x2e0] sm:$0xff]  ;;  %v20054_v45 = vunpack.c.l.s8.bf16 %v11522_v15 }
 0x88c   : > { %20023 = vmatprep.subr.bf16.mxu1 %v20022_v24  ;;  %v19800_v24 = vunpack.c.l.s8.bf16 %v11519_v37  ;;  %v19804_v9 = vunpack.c.h.s8.bf16 %v11519_v37  ;;  %v11553_v37 = vld [vmem:[%s21287_s16 + $0x3f0] sm:$0xff] }
 0x88d   : > { %v20088_v3 = vunpack.c.l.s8.bf16 %v11553_v37 }
 0x88e   : > { %19769 = vmatpush1.bf16.msra.mxu0 %v19768_v27  ;;  %v19802_v27 = vunpack.c.h.s8.bf16 %v11520_v12 }
 0x88f   : > { %20025 = vmatpush1.bf16.msra.mxu1 %v20024_v30  ;;  %19771 = vmatprep.subr.bf16.mxu0 %v19770_v39  ;;  %v20058_v30 = vunpack.c.h.s8.bf16 %v11522_v15  ;;  %v11528_v39 = vld [vmem:[%s21287_s16 + $0x328] sm:$0xff]  ;;  %v20084_v15 = vunpack.c.h.s8.bf16 %v11545_v17 }
 0x890   : > { %20027 = vmatprep.subr.bf16.mxu1 %v20026_v48  ;;  %v11530_v48 = vld [vmem:[%s21287_s16 + $0x338] sm:$0xff] }
 0x892   : > { %19773 = vmatpush1.bf16.msra.mxu0 %v19772_v23  ;;  %v19806_v23 = vunpack.c.l.s8.bf16 %v11528_v39 }
 0x893   : > { %20029 = vmatpush1.bf16.msra.mxu1 %v20028_v57  ;;  %19775 = vmatprep.subr.bf16.mxu0 %v19774_v54  ;;  %v11527_v57 = vld [vmem:[%s21287_s16 + $0x320] sm:$0xff]  ;;  %v20062_v54 = vunpack.c.l.s8.bf16 %v11530_v48 }
 0x894   : > { %20031 = vmatprep.subr.bf16.mxu1 %v20030_v47  ;;  %v19808_v47 = vunpack.c.l.s8.bf16 %v11527_v57 }
 0x895   : > { %14366 = vmatmul.mubr.f32.vlgmr.msra.gmra.mrb[6].mxu0 %v22891_v6 }
 0x896   : > { %14650 = vmatmul.mubr.f32.vlgmr.msra.gmra.mrb[6].mxu1 %v22891_v6  ;;  %19777 = vmatpush1.bf16.msra.mxu0 %v19776_v35  ;;  %v20040_v6 = vunpack.c.l.s8.bf16 %v11505_v49  ;;  %v19810_v35 = vunpack.c.h.s8.bf16 %v11528_v39 }
 0x897   : > { %14436 = vmatprep.mubr.f32.mxu0 %v22894_v61  ;;  %20033 = vmatpush1.bf16.msra.mxu1 %v20032_v29  ;;  %v20066_v29 = vunpack.c.h.s8.bf16 %v11530_v48  ;;  %v20092_v48 = vunpack.c.h.s8.bf16 %v11553_v37 }
 0x898   : > { %14720 = vmatprep.mubr.f32.mxu1 %v22894_v61  ;;  %19779 = vmatprep.subr.bf16.mxu0 %v19778_v14  ;;  %v20044_v61 = vunpack.c.h.s8.bf16 %v11505_v49  ;;  %v11536_v14 = vld [vmem:[%s21287_s16 + $0x368] sm:$0xff]  ;;  %v20072_v49 = vunpack.c.l.s8.bf16 %v11537_v0 }
 0x899   : > { %20035 = vmatprep.subr.bf16.mxu1 %v20034_v42  ;;  %v19812_v42 = vunpack.c.h.s8.bf16 %v11527_v57  ;;  %v11561_v57 = vld [vmem:[%s21287_s16 + $0x430] sm:$0xff] }
 0x89a   : > { %19781 = vmatpush1.bf16.msra.mxu0 %v19780_v58  ;;  %v19814_v58 = vunpack.c.l.s8.bf16 %v11536_v14  ;;  %v20096_v7 = vunpack.c.l.s8.bf16 %v11561_v57 }
 0x89b   : > { %20037 = vmatpush1.bf16.msra.mxu1 %v20036_v4  ;;  %19783 = vmatprep.subr.bf16.mxu0 %v19782_v34  ;;  %v11535_v4 = vld [vmem:[%s21287_s16 + $0x360] sm:$0xff]  ;;  %v20070_v34 = vunpack.c.l.s8.bf16 %v11538_v44 }
 0x89c   : > { %20039 = vmatprep.subr.bf16.mxu1 %v20038_v52  ;;  %v19816_v52 = vunpack.c.l.s8.bf16 %v11535_v4  ;;  %v19820_v18 = vunpack.c.h.s8.bf16 %v11535_v4  ;;  %v11569_v4 = vld [vmem:[%s21287_s16 + $0x470] sm:$0xff] }
 0x89e   : > { %19785 = vmatpush1.bf16.msra.mxu0 %v19784_v26  ;;  %v19818_v26 = vunpack.c.h.s8.bf16 %v11536_v14 }
 0x89f   : > { %20041 = vmatpush1.bf16.msra.mxu1 %v20040_v6  ;;  %19787 = vmatprep.subr.bf16.mxu0 %v19786_v60  ;;  %v20074_v6 = vunpack.c.h.s8.bf16 %v11538_v44  ;;  %v11544_v60 = vld [vmem:[%s21287_s16 + $0x3a8] sm:$0xff]  ;;  %v20100_v44 = vunpack.c.h.s8.bf16 %v11561_v57 }
 0x8a0   : > { %20043 = vmatprep.subr.bf16.mxu1 %v20042_v53  ;;  %v11546_v53 = vld [vmem:[%s21287_s16 + $0x3b8] sm:$0xff] }
 0x8a2   : > { %19789 = vmatpush1.bf16.msra.mxu0 %v19788_v8  ;;  %v19822_v8 = vunpack.c.l.s8.bf16 %v11544_v60 }
 0x8a3   : > { %20045 = vmatpush1.bf16.msra.mxu1 %v20044_v61  ;;  %19791 = vmatprep.subr.bf16.mxu0 %v19790_v40  ;;  %v11543_v61 = vld [vmem:[%s21287_s16 + $0x3a0] sm:$0xff]  ;;  %v20078_v40 = vunpack.c.l.s8.bf16 %v11546_v53 }
 0x8a4   : > { %20047 = vmatprep.subr.bf16.mxu1 %v20046_v38  ;;  %v19824_v38 = vunpack.c.l.s8.bf16 %v11543_v61  ;;  %v19828_v12 = vunpack.c.h.s8.bf16 %v11543_v61 }
 0x8a6   : > { %19793 = vmatpush1.bf16.msra.mxu0 %v19792_v62  ;;  %v19826_v62 = vunpack.c.h.s8.bf16 %v11544_v60 }
 0x8a7   : > { %20049 = vmatpush1.bf16.msra.mxu1 %v20048_v46  ;;  %19795 = vmatprep.subr.bf16.mxu0 %v19794_v19  ;;  %v20082_v46 = vunpack.c.h.s8.bf16 %v11546_v53  ;;  %v11552_v19 = vld [vmem:[%s21287_s16 + $0x3e8] sm:$0xff]  ;;  %v11575_v53 = vld [vmem:[%s21287_s16 + $0x4a0] sm:$0xff] }
 0x8a8   : > { %20051 = vmatprep.subr.bf16.mxu1 %v20050_v25  ;;  %v11554_v25 = vld [vmem:[%s21287_s16 + $0x3f8] sm:$0xff] }
 0x8aa   : > { %19797 = vmatpush1.bf16.msra.mxu0 %v19796_v11  ;;  %v19830_v11 = vunpack.c.l.s8.bf16 %v11552_v19 }
 0x8ab   : > { %20053 = vmatpush1.bf16.msra.mxu1 %v20052_v43  ;;  %19799 = vmatprep.subr.bf16.mxu0 %v19798_v51  ;;  %v11551_v43 = vld [vmem:[%s21287_s16 + $0x3e0] sm:$0xff]  ;;  %v20086_v51 = vunpack.c.l.s8.bf16 %v11554_v25 }
 0x8ac   : > { %20055 = vmatprep.subr.bf16.mxu1 %v20054_v45  ;;  %v19832_v45 = vunpack.c.l.s8.bf16 %v11551_v43  ;;  %v19836_v39 = vunpack.c.h.s8.bf16 %v11551_v43 }
 0x8ae   : > { %19801 = vmatpush1.bf16.msra.mxu0 %v19800_v24  ;;  %v19834_v24 = vunpack.c.h.s8.bf16 %v11552_v19 }
 0x8af   : > { %20057 = vmatpush1.bf16.msra.mxu1 %v20056_v13  ;;  %19803 = vmatprep.subr.bf16.mxu0 %v19802_v27  ;;  %v20090_v13 = vunpack.c.h.s8.bf16 %v11554_v25  ;;  %v11560_v27 = vld [vmem:[%s21287_s16 + $0x428] sm:$0xff]  ;;  %v11583_v25 = vld [vmem:[%s21287_s16 + $0x4e0] sm:$0xff] }
 0x8b0   : > { %20059 = vmatprep.subr.bf16.mxu1 %v20058_v30  ;;  %v11562_v30 = vld [vmem:[%s21287_s16 + $0x438] sm:$0xff] }
 0x8b2   : > { %19805 = vmatpush1.bf16.msra.mxu0 %v19804_v9  ;;  %v19838_v9 = vunpack.c.l.s8.bf16 %v11560_v27 }
 0x8b3   : > { %20061 = vmatpush1.bf16.msra.mxu1 %v20060_v63  ;;  %19807 = vmatprep.subr.bf16.mxu0 %v19806_v23  ;;  %v11559_v63 = vld [vmem:[%s21287_s16 + $0x420] sm:$0xff]  ;;  %v20094_v23 = vunpack.c.l.s8.bf16 %v11562_v30 }
 0x8b4   : > { %20063 = vmatprep.subr.bf16.mxu1 %v20062_v54  ;;  %v19840_v54 = vunpack.c.l.s8.bf16 %v11559_v63  ;;  %v19844_v14 = vunpack.c.h.s8.bf16 %v11559_v63 }
 0x8b6   : > { %19809 = vmatpush1.bf16.msra.mxu0 %v19808_v47  ;;  %v19842_v47 = vunpack.c.h.s8.bf16 %v11560_v27 }
 0x8b7   : > { %20065 = vmatpush1.bf16.msra.mxu1 %v20064_v41  ;;  %19811 = vmatprep.subr.bf16.mxu0 %v19810_v35  ;;  %v11568_v41 = vld [vmem:[%s21287_s16 + $0x468] sm:$0xff]  ;;  %v20098_v35 = vunpack.c.h.s8.bf16 %v11562_v30  ;;  %v11591_v30 = vld [vmem:[%s21287_s16 + $0x520] sm:$0xff] }
 0x8b8   : > { %20067 = vmatprep.subr.bf16.mxu1 %v20066_v29  ;;  %v11570_v29 = vld [vmem:[%s21287_s16 + $0x478] sm:$0xff]  ;;  %v19850_v0 = vunpack.c.h.s8.bf16 %v11568_v41 }
 0x8ba   : > { %19813 = vmatpush1.bf16.msra.mxu0 %v19812_v42  ;;  %v19846_v42 = vunpack.c.l.s8.bf16 %v11568_v41 }
 0x8bb   : > { %20069 = vmatpush1.bf16.msra.mxu1 %v20068_v28  ;;  %19815 = vmatprep.subr.bf16.mxu0 %v19814_v58  ;;  %v11567_v28 = vld [vmem:[%s21287_s16 + $0x460] sm:$0xff]  ;;  %v20102_v58 = vunpack.c.l.s8.bf16 %v11570_v29 }
 0x8bc   : > { %20071 = vmatprep.subr.bf16.mxu1 %v20070_v34  ;;  %v19848_v34 = vunpack.c.l.s8.bf16 %v11567_v28 }
 0x8be   : > { %19817 = vmatpush1.bf16.msra.mxu0 %v19816_v52  ;;  %v20106_v52 = vunpack.c.h.s8.bf16 %v11570_v29  ;;  %v11599_v29 = vld [vmem:[%s21287_s16 + $0x560] sm:$0xff] }
 0x8bf   : > { %20073 = vmatpush1.bf16.msra.mxu1 %v20072_v49  ;;  %19819 = vmatprep.subr.bf16.mxu0 %v19818_v26  ;;  %v11576_v49 = vld [vmem:[%s21287_s16 + $0x4a8] sm:$0xff]  ;;  %v11578_v26 = vld [vmem:[%s21287_s16 + $0x4b8] sm:$0xff] }
 0x8c0   : > { %20075 = vmatprep.subr.bf16.mxu1 %v20074_v6  ;;  %v19852_v6 = vunpack.c.h.s8.bf16 %v11567_v28  ;;  %v19854_v60 = vunpack.c.l.s8.bf16 %v11576_v49  ;;  %v20114_v17 = vunpack.c.h.s8.bf16 %v11578_v26 }
 0x8c2   : > { %19821 = vmatpush1.bf16.msra.mxu0 %v19820_v18  ;;  %v20110_v18 = vunpack.c.l.s8.bf16 %v11578_v26  ;;  %v11607_v26 = vld [vmem:[%s21287_s16 + $0x5a0] sm:$0xff] }
 0x8c3   : > { %20077 = vmatpush1.bf16.msra.mxu1 %v20076_v33  ;;  %19823 = vmatprep.subr.bf16.mxu0 %v19822_v8  ;;  %v11577_v33 = vld [vmem:[%s21287_s16 + $0x4b0] sm:$0xff]  ;;  %v19856_v8 = vunpack.c.l.s8.bf16 %v11575_v53 }
 0x8c4   : > { %20079 = vmatprep.subr.bf16.mxu1 %v20078_v40  ;;  %v20112_v61 = vunpack.c.l.s8.bf16 %v11577_v33  ;;  %v19858_v40 = vunpack.c.h.s8.bf16 %v11576_v49 }
 0x8c6   : > { %19825 = vmatpush1.bf16.msra.mxu0 %v19824_v38  ;;  %v11584_v38 = vld [vmem:[%s21287_s16 + $0x4e8] sm:$0xff] }
 0x8c7   : > { %20081 = vmatpush1.bf16.msra.mxu1 %v20080_v32  ;;  %19827 = vmatprep.subr.bf16.mxu0 %v19826_v62  ;;  %v11586_v32 = vld [vmem:[%s21287_s16 + $0x4f8] sm:$0xff]  ;;  %v19860_v62 = vunpack.c.h.s8.bf16 %v11575_v53  ;;  %v19862_v19 = vunpack.c.l.s8.bf16 %v11584_v38 }
 0x8c8   : > { %20083 = vmatprep.subr.bf16.mxu1 %v20082_v46  ;;  %v20116_v46 = vunpack.c.h.s8.bf16 %v11577_v33  ;;  %v20122_v37 = vunpack.c.h.s8.bf16 %v11586_v32 }
 0x8ca   : > { %19829 = vmatpush1.bf16.msra.mxu0 %v19828_v12  ;;  %v20118_v12 = vunpack.c.l.s8.bf16 %v11586_v32  ;;  %v11615_v32 = vld [vmem:[%s21287_s16 + $0x5e0] sm:$0xff] }
 0x8cb   : > { %20085 = vmatpush1.bf16.msra.mxu1 %v20084_v15  ;;  %19831 = vmatprep.subr.bf16.mxu0 %v19830_v11  ;;  %v11585_v15 = vld [vmem:[%s21287_s16 + $0x4f0] sm:$0xff]  ;;  %v19864_v11 = vunpack.c.l.s8.bf16 %v11583_v25 }
 0x8cc   : > { %20087 = vmatprep.subr.bf16.mxu1 %v20086_v51  ;;  %v20120_v43 = vunpack.c.l.s8.bf16 %v11585_v15  ;;  %v19866_v51 = vunpack.c.h.s8.bf16 %v11584_v38 }
 0x8ce   : > { %19833 = vmatpush1.bf16.msra.mxu0 %v19832_v45  ;;  %v11592_v45 = vld [vmem:[%s21287_s16 + $0x528] sm:$0xff] }
 0x8cf   : > { %20089 = vmatpush1.bf16.msra.mxu1 %v20088_v3  ;;  %19835 = vmatprep.subr.bf16.mxu0 %v19834_v24  ;;  %v11594_v3 = vld [vmem:[%s21287_s16 + $0x538] sm:$0xff]  ;;  %v19868_v24 = vunpack.c.h.s8.bf16 %v11583_v25  ;;  %v19870_v27 = vunpack.c.l.s8.bf16 %v11592_v45 }
 0x8d0   : > { %20091 = vmatprep.subr.bf16.mxu1 %v20090_v13  ;;  %v20124_v13 = vunpack.c.h.s8.bf16 %v11585_v15  ;;  %v20130_v57 = vunpack.c.h.s8.bf16 %v11594_v3 }
 0x8d2   : > { %19837 = vmatpush1.bf16.msra.mxu0 %v19836_v39  ;;  %v20126_v39 = vunpack.c.l.s8.bf16 %v11594_v3  ;;  %v11623_v3 = vld [vmem:[%s21287_s16 + $0x620] sm:$0xff] }
 0x8d3   : > { %20093 = vmatpush1.bf16.msra.mxu1 %v20092_v48  ;;  %19839 = vmatprep.subr.bf16.mxu0 %v19838_v9  ;;  %v11593_v48 = vld [vmem:[%s21287_s16 + $0x530] sm:$0xff]  ;;  %v19872_v9 = vunpack.c.l.s8.bf16 %v11591_v30 }
 0x8d4   : > { %20095 = vmatprep.subr.bf16.mxu1 %v20094_v23  ;;  %v20128_v63 = vunpack.c.l.s8.bf16 %v11593_v48  ;;  %v19874_v23 = vunpack.c.h.s8.bf16 %v11592_v45  ;;  %v20132_v41 = vunpack.c.h.s8.bf16 %v11593_v48  ;;  %v11632_v48 = vld [vmem:[%s21287_s16 + $0x668] sm:$0xff] }
 0x8d5   : > { %14437 = vmatmul.mubr.f32.vlgmr.msra.gmra.mrb[6].mxu0 %v22939_v1 }
 0x8d6   : > { %14721 = vmatmul.mubr.f32.vlgmr.msra.gmra.mrb[6].mxu1 %v22939_v1  ;;  %19841 = vmatpush1.bf16.msra.mxu0 %v19840_v54  ;;  %v20104_v1 = vunpack.c.l.s8.bf16 %v11569_v4  ;;  %v11600_v54 = vld [vmem:[%s21287_s16 + $0x568] sm:$0xff] }
 0x8d7   : > { %14507 = vmatprep.mubr.f32.mxu0 %v23004_v22  ;;  %20097 = vmatpush1.bf16.msra.mxu1 %v20096_v7  ;;  %v11602_v7 = vld [vmem:[%s21287_s16 + $0x578] sm:$0xff] }
 0x8d8   : > { %14791 = vmatprep.mubr.f32.mxu1 %v23004_v22  ;;  %19843 = vmatprep.subr.bf16.mxu0 %v19842_v47  ;;  %v20108_v22 = vunpack.c.h.s8.bf16 %v11569_v4  ;;  %v19876_v47 = vunpack.c.h.s8.bf16 %v11591_v30  ;;  %v20138_v4 = vunpack.c.h.s8.bf16 %v11602_v7 }
 0x8d9   : > { %20099 = vmatprep.subr.bf16.mxu1 %v20098_v35  ;;  %v19878_v35 = vunpack.c.l.s8.bf16 %v11600_v54 }
 0x8da   : > { %19845 = vmatpush1.bf16.msra.mxu0 %v19844_v14  ;;  %v20134_v14 = vunpack.c.l.s8.bf16 %v11602_v7  ;;  %v11631_v7 = vld [vmem:[%s21287_s16 + $0x660] sm:$0xff] }
 0x8db   : > { %20101 = vmatpush1.bf16.msra.mxu1 %v20100_v44  ;;  %19847 = vmatprep.subr.bf16.mxu0 %v19846_v42  ;;  %v11601_v44 = vld [vmem:[%s21287_s16 + $0x570] sm:$0xff]  ;;  %v19880_v42 = vunpack.c.l.s8.bf16 %v11599_v29 }
 0x8dc   : > { %20103 = vmatprep.subr.bf16.mxu1 %v20102_v58  ;;  %v20136_v28 = vunpack.c.l.s8.bf16 %v11601_v44  ;;  %v19882_v58 = vunpack.c.h.s8.bf16 %v11600_v54  ;;  %v19910_v54 = vunpack.c.l.s8.bf16 %v11632_v48 }
 0x8de   : > { %19849 = vmatpush1.bf16.msra.mxu0 %v19848_v34  ;;  %v11608_v34 = vld [vmem:[%s21287_s16 + $0x5a8] sm:$0xff] }
 0x8df   : > { %20105 = vmatpush1.bf16.msra.mxu1 %v20104_v1  ;;  %19851 = vmatprep.subr.bf16.mxu0 %v19850_v0  ;;  %v11610_v1 = vld [vmem:[%s21287_s16 + $0x5b8] sm:$0xff]  ;;  %v19884_v0 = vunpack.c.h.s8.bf16 %v11599_v29  ;;  %v19886_v49 = vunpack.c.l.s8.bf16 %v11608_v34  ;;  %v19914_v29 = vunpack.c.h.s8.bf16 %v11632_v48 }
 0x8e0   : > { %20107 = vmatprep.subr.bf16.mxu1 %v20106_v52  ;;  %v20140_v52 = vunpack.c.h.s8.bf16 %v11601_v44  ;;  %v20146_v33 = vunpack.c.h.s8.bf16 %v11610_v1  ;;  %v11640_v44 = vld [vmem:[%s21287_s16 + $0x6a8] sm:$0xff] }
 0x8e2   : > { %19853 = vmatpush1.bf16.msra.mxu0 %v19852_v6  ;;  %v20142_v6 = vunpack.c.l.s8.bf16 %v11610_v1  ;;  %v11641_v1 = vld [vmem:[%s21287_s16 + $0x6b0] sm:$0xff] }
 0x8e3   : > { %20109 = vmatpush1.bf16.msra.mxu1 %v20108_v22  ;;  %19855 = vmatprep.subr.bf16.mxu0 %v19854_v60  ;;  %v11609_v22 = vld [vmem:[%s21287_s16 + $0x5b0] sm:$0xff]  ;;  %v19888_v60 = vunpack.c.l.s8.bf16 %v11607_v26 }
 0x8e4   : > { %20111 = vmatprep.subr.bf16.mxu1 %v20110_v18  ;;  %v20144_v53 = vunpack.c.l.s8.bf16 %v11609_v22  ;;  %v19890_v18 = vunpack.c.h.s8.bf16 %v11608_v34 }
 0x8e6   : > { %19857 = vmatpush1.bf16.msra.mxu0 %v19856_v8  ;;  %v11616_v8 = vld [vmem:[%s21287_s16 + $0x5e8] sm:$0xff] }
 0x8e7   : > { %20113 = vmatpush1.bf16.msra.mxu1 %v20112_v61  ;;  %19859 = vmatprep.subr.bf16.mxu0 %v19858_v40  ;;  %v11618_v61 = vld [vmem:[%s21287_s16 + $0x5f8] sm:$0xff]  ;;  %v19892_v40 = vunpack.c.h.s8.bf16 %v11607_v26  ;;  %v19894_v38 = vunpack.c.l.s8.bf16 %v11616_v8 }
 0x8e8   : > { %20115 = vmatprep.subr.bf16.mxu1 %v20114_v17  ;;  %v20148_v17 = vunpack.c.h.s8.bf16 %v11609_v22  ;;  %v20154_v15 = vunpack.c.h.s8.bf16 %v11618_v61  ;;  %v11650_v22 = vld [vmem:[%s21287_s16 + $0x6f8] sm:$0xff] }
 0x8ea   : > { %19861 = vmatpush1.bf16.msra.mxu0 %v19860_v62  ;;  %v20150_v62 = vunpack.c.l.s8.bf16 %v11618_v61 }
 0x8eb   : > { %20117 = vmatpush1.bf16.msra.mxu1 %v20116_v46  ;;  %19863 = vmatprep.subr.bf16.mxu0 %v19862_v19  ;;  %v11617_v46 = vld [vmem:[%s21287_s16 + $0x5f0] sm:$0xff]  ;;  %v19896_v19 = vunpack.c.l.s8.bf16 %v11615_v32 }
 0x8ec   : > { %20119 = vmatprep.subr.bf16.mxu1 %v20118_v12  ;;  %v20152_v25 = vunpack.c.l.s8.bf16 %v11617_v46  ;;  %v19898_v12 = vunpack.c.h.s8.bf16 %v11616_v8 }
 0x8ee   : > { %19865 = vmatpush1.bf16.msra.mxu0 %v19864_v11  ;;  %v11624_v11 = vld [vmem:[%s21287_s16 + $0x628] sm:$0xff] }
 0x8ef   : > { %20121 = vmatpush1.bf16.msra.mxu1 %v20120_v43  ;;  %19867 = vmatprep.subr.bf16.mxu0 %v19866_v51  ;;  %v11626_v43 = vld [vmem:[%s21287_s16 + $0x638] sm:$0xff]  ;;  %v19900_v51 = vunpack.c.h.s8.bf16 %v11615_v32  ;;  %v19902_v45 = vunpack.c.l.s8.bf16 %v11624_v11 }
 0x8f0   : > { %20123 = vmatprep.subr.bf16.mxu1 %v20122_v37  ;;  %v20156_v37 = vunpack.c.h.s8.bf16 %v11617_v46 }
 0x8f2   : > { %19869 = vmatpush1.bf16.msra.mxu0 %v19868_v24  ;;  %v20158_v24 = vunpack.c.l.s8.bf16 %v11626_v43 }
 0x8f3   : > { %20125 = vmatpush1.bf16.msra.mxu1 %v20124_v13  ;;  %19871 = vmatprep.subr.bf16.mxu0 %v19870_v27  ;;  %v11625_v13 = vld [vmem:[%s21287_s16 + $0x630] sm:$0xff]  ;;  %v19904_v27 = vunpack.c.l.s8.bf16 %v11623_v3 }
 0x8f4   : > { %20127 = vmatprep.subr.bf16.mxu1 %v20126_v39  ;;  %v20160_v30 = vunpack.c.l.s8.bf16 %v11625_v13  ;;  %v19906_v39 = vunpack.c.h.s8.bf16 %v11624_v11 }
 0x8f6   : > { %19873 = vmatpush1.bf16.msra.mxu0 %v19872_v9  ;;  %v20162_v9 = vunpack.c.h.s8.bf16 %v11626_v43  ;;  %v20186_v43 = vunpack.c.h.s8.bf16 %v11650_v22 }
 0x8f7   : > { %20129 = vmatpush1.bf16.msra.mxu1 %v20128_v63  ;;  %19875 = vmatprep.subr.bf16.mxu0 %v19874_v23  ;;  %v11634_v63 = vld [vmem:[%s21287_s16 + $0x678] sm:$0xff]  ;;  %v19908_v23 = vunpack.c.h.s8.bf16 %v11623_v3 }
 0x8f8   : > { %20131 = vmatprep.subr.bf16.mxu1 %v20130_v57  ;;  %v20164_v57 = vunpack.c.h.s8.bf16 %v11625_v13 }
 0x8fa   : > { %19877 = vmatpush1.bf16.msra.mxu0 %v19876_v47  ;;  %v20166_v47 = vunpack.c.l.s8.bf16 %v11634_v63 }
 0x8fb   : > { %20133 = vmatpush1.bf16.msra.mxu1 %v20132_v41  ;;  %19879 = vmatprep.subr.bf16.mxu0 %v19878_v35  ;;  %v11633_v41 = vld [vmem:[%s21287_s16 + $0x670] sm:$0xff]  ;;  %v19912_v35 = vunpack.c.l.s8.bf16 %v11631_v7 }
 0x8fc   : > { %20135 = vmatprep.subr.bf16.mxu1 %v20134_v14  ;;  %v20170_v14 = vunpack.c.h.s8.bf16 %v11634_v63 }
 0x8fe   : > { %19881 = vmatpush1.bf16.msra.mxu0 %v19880_v42  ;;  %v11642_v42 = vld [vmem:[%s21287_s16 + $0x6b8] sm:$0xff] }
 0x8ff   : > { %20137 = vmatpush1.bf16.msra.mxu1 %v20136_v28  ;;  %19883 = vmatprep.subr.bf16.mxu0 %v19882_v58  ;;  %v19916_v28 = vunpack.c.h.s8.bf16 %v11631_v7  ;;  %v19918_v58 = vunpack.c.l.s8.bf16 %v11640_v44  ;;  %v20174_v34 = vunpack.c.l.s8.bf16 %v11642_v42  ;;  %v20178_v26 = vunpack.c.h.s8.bf16 %v11642_v42  ;;  %v11664_v7 = vld [vmem:[%s21287_s16 + $0x768] sm:$0xff] }
 0x900   : > { %20139 = vmatprep.subr.bf16.mxu1 %v20138_v4  ;;  %v11639_v4 = vld [vmem:[%s21287_s16 + $0x6a0] sm:$0xff] }
 0x902   : > { %19885 = vmatpush1.bf16.msra.mxu0 %v19884_v0  ;;  %v19920_v0 = vunpack.c.l.s8.bf16 %v11639_v4 }
 0x903   : > { %20141 = vmatpush1.bf16.msra.mxu1 %v20140_v52  ;;  %19887 = vmatprep.subr.bf16.mxu0 %v19886_v49  ;;  %v20176_v52 = vunpack.c.l.s8.bf16 %v11641_v1  ;;  %v19922_v49 = vunpack.c.h.s8.bf16 %v11640_v44  ;;  %v11665_v44 = vld [vmem:[%s21287_s16 + $0x770] sm:$0xff] }
 0x904   : > { %20143 = vmatprep.subr.bf16.mxu1 %v20142_v6  ;;  %v11648_v6 = vld [vmem:[%s21287_s16 + $0x6e8] sm:$0xff] }
 0x906   : > { %19889 = vmatpush1.bf16.msra.mxu0 %v19888_v60  ;;  %v19924_v60 = vunpack.c.h.s8.bf16 %v11639_v4  ;;  %v11672_v4 = vld [vmem:[%s21287_s16 + $0x7a8] sm:$0xff] }
 0x907   : > { %20145 = vmatpush1.bf16.msra.mxu1 %v20144_v53  ;;  %19891 = vmatprep.subr.bf16.mxu0 %v19890_v18  ;;  %v20180_v53 = vunpack.c.h.s8.bf16 %v11641_v1  ;;  %v19926_v18 = vunpack.c.l.s8.bf16 %v11648_v6 }
 0x908   : > { %20147 = vmatprep.subr.bf16.mxu1 %v20146_v33  ;;  %v11647_v33 = vld [vmem:[%s21287_s16 + $0x6e0] sm:$0xff] }
 0x90a   : > { %19893 = vmatpush1.bf16.msra.mxu0 %v19892_v40  ;;  %v20182_v40 = vunpack.c.l.s8.bf16 %v11650_v22 }
 0x90b   : > { %20149 = vmatpush1.bf16.msra.mxu1 %v20148_v17  ;;  %19895 = vmatprep.subr.bf16.mxu0 %v19894_v38  ;;  %v11649_v17 = vld [vmem:[%s21287_s16 + $0x6f0] sm:$0xff] }
 0x90c   : > { %20151 = vmatprep.subr.bf16.mxu1 %v20150_v62  ;;  %v20188_v13 = vunpack.c.h.s8.bf16 %v11649_v17 }
 0x90e   : > { %19897 = vmatpush1.bf16.msra.mxu0 %v19896_v19  ;;  %v19928_v19 = vunpack.c.l.s8.bf16 %v11647_v33 }
 0x90f   : > { %20153 = vmatpush1.bf16.msra.mxu1 %v20152_v25  ;;  %19899 = vmatprep.subr.bf16.mxu0 %v19898_v12  ;;  %v20184_v25 = vunpack.c.l.s8.bf16 %v11649_v17  ;;  %v19930_v12 = vunpack.c.h.s8.bf16 %v11648_v6  ;;  %v11673_v6 = vld [vmem:[%s21287_s16 + $0x7b0] sm:$0xff] }
 0x910   : > { %20155 = vmatprep.subr.bf16.mxu1 %v20154_v15 }
 0x912   : > { %19901 = vmatpush1.bf16.msra.mxu0 %v19900_v51  ;;  %v11656_v51 = vld [vmem:[%s21287_s16 + $0x728] sm:$0xff] }
 0x913   : > { %20157 = vmatpush1.bf16.msra.mxu1 %v20156_v37  ;;  %19903 = vmatprep.subr.bf16.mxu0 %v19902_v45  ;;  %v13731_v37 = vld [vmem:[#allocation3] sm:$0xff]  ;;  %v11658_v45 = vld [vmem:[%s21287_s16 + $0x738] sm:$0xff] }
 0x914   : > { %20159 = vmatprep.subr.bf16.mxu1 %v20158_v24  ;;  %v19932_v24 = vunpack.c.h.s8.bf16 %v11647_v33  ;;  %v20190_v48 = vunpack.c.l.s8.bf16 %v11658_v45  ;;  %v11680_v33 = vld [vmem:[%s21287_s16 + $0x7e8] sm:$0xff] }
 0x915   : > { %14508 = vmatmul.mubr.f32.vlgmr.msra.gmra.mrb[6].mxu0 %v23006_v50  ;;  %v19958_v17 = vunpack.c.l.s8.bf16 %v11680_v33 }
 0x916   : > { %14792 = vmatmul.mubr.f32.vlgmr.msra.gmra.mrb[6].mxu1 %v23006_v50  ;;  %19905 = vmatpush1.bf16.msra.mxu0 %v19904_v27  ;;  %v20168_v50 = vunpack.c.l.s8.bf16 %v11633_v41  ;;  %v19934_v27 = vunpack.c.l.s8.bf16 %v11656_v51 }
 0x917   : > { %14578 = vmatprep.mubr.f32.mxu0 %v23012_v59  ;;  %20161 = vmatpush1.bf16.msra.mxu1 %v20160_v30  ;;  %v11655_v30 = vld [vmem:[%s21287_s16 + $0x720] sm:$0xff] }
 0x918   : > { %14862 = vmatprep.mubr.f32.mxu1 %v23012_v59  ;;  %19907 = vmatprep.subr.bf16.mxu0 %v19906_v39  ;;  %v20172_v59 = vunpack.c.h.s8.bf16 %v11633_v41  ;;  %v19936_v63 = vunpack.c.l.s8.bf16 %v11655_v30  ;;  %v19940_v41 = vunpack.c.h.s8.bf16 %v11655_v30  ;;  %v13732_v30 = vld [vmem:[#allocation3 + $0x8] sm:$0xff] }
 0x919   : > { %20163 = vmatprep.subr.bf16.mxu1 %v20162_v9  ;;  %v11657_v9 = vld [vmem:[%s21287_s16 + $0x730] sm:$0xff] }
 0x91a   : > { %19909 = vmatpush1.bf16.msra.mxu0 %v19908_v23  ;;  %v20192_v23 = vunpack.c.l.s8.bf16 %v11657_v9 }
 0x91b   : > { %20165 = vmatpush1.bf16.msra.mxu1 %v20164_v57  ;;  %19911 = vmatprep.subr.bf16.mxu0 %v19910_v54  ;;  %v19938_v57 = vunpack.c.h.s8.bf16 %v11656_v51  ;;  %v20194_v54 = vunpack.c.h.s8.bf16 %v11658_v45 }
 0x91c   : > { %20167 = vmatprep.subr.bf16.mxu1 %v20166_v47  ;;  %v11666_v47 = vld [vmem:[%s21287_s16 + $0x778] sm:$0xff] }
 0x91e   : > { %19913 = vmatpush1.bf16.msra.mxu0 %v19912_v35  ;;  %v20196_v35 = vunpack.c.h.s8.bf16 %v11657_v9  ;;  %v16122_v9 = vld [vmem:[#allocation15 + $0x40] sm:$0xff] (!%p15849_p4)  }
 0x91f   : > { %20169 = vmatpush1.bf16.msra.mxu1 %v20168_v50  ;;  %19915 = vmatprep.subr.bf16.mxu0 %v19914_v29  ;;  %v19942_v50 = vunpack.c.l.s8.bf16 %v11664_v7  ;;  %v11663_v29 = vld [vmem:[%s21287_s16 + $0x760] sm:$0xff] }
 0x920   : > { %20171 = vmatprep.subr.bf16.mxu1 %v20170_v14  ;;  %v20198_v14 = vunpack.c.l.s8.bf16 %v11666_v47  ;;  %v19944_v42 = vunpack.c.l.s8.bf16 %v11663_v29  ;;  %v19948_v1 = vunpack.c.h.s8.bf16 %v11663_v29  ;;  %v16132_v29 = vld [vmem:[#allocation15 + $0x90] sm:$0xff] (!%p15849_p4)  }
 0x922   : > { %19917 = vmatpush1.bf16.msra.mxu0 %v19916_v28  ;;  %v20200_v28 = vunpack.c.l.s8.bf16 %v11665_v44 }
 0x923   : > { %20173 = vmatpush1.bf16.msra.mxu1 %v20172_v59  ;;  %19919 = vmatprep.subr.bf16.mxu0 %v19918_v58  ;;  %v19946_v59 = vunpack.c.h.s8.bf16 %v11664_v7  ;;  %v20202_v58 = vunpack.c.h.s8.bf16 %v11666_v47  ;;  %v16115_v7 = vld [vmem:[#allocation15 + $0x8] sm:$0xff] (!%p15849_p4)  }
 0x924   : > { %20175 = vmatprep.subr.bf16.mxu1 %v20174_v34  ;;  %v11674_v34 = vld [vmem:[%s21287_s16 + $0x7b8] sm:$0xff] }
 0x925   : > { %v16131_v47 = vld [vmem:[#allocation15 + $0x88] sm:$0xff] (!%p15849_p4)  }
 0x926   : > { %19921 = vmatpush1.bf16.msra.mxu0 %v19920_v0  ;;  %v20204_v0 = vunpack.c.h.s8.bf16 %v11665_v44  ;;  %v16141_v44 = vld [vmem:[#allocation15 + $0xd8] sm:$0xff] (!%p15849_p4)  }
 0x927   : > { %20177 = vmatpush1.bf16.msra.mxu1 %v20176_v52  ;;  %19923 = vmatprep.subr.bf16.mxu0 %v19922_v49  ;;  %v19950_v52 = vunpack.c.l.s8.bf16 %v11672_v4  ;;  %v11671_v49 = vld [vmem:[%s21287_s16 + $0x7a0] sm:$0xff] }
 0x928   : > { %v14012_v8 = vpop.f32.mrb[4].mxu0  ;;  %v14296_v61 = vpop.f32.mrb[4].mxu1  ;;  %20179 = vmatprep.subr.bf16.mxu1 %v20178_v26  ;;  %v20206_v26 = vunpack.c.l.s8.bf16 %v11674_v34  ;;  %v19952_v22 = vunpack.c.l.s8.bf16 %v11671_v49 }
 0x929   : > { %v14014_v38 = vpop.f32.mrb[5].mxu0  ;;  %v14298_v32 = vpop.f32.mrb[5].mxu1 }
 0x92a   : > { %v14877_v62 = vcombine.low %v14012_v8, %v14014_v38  ;;  %v14878_v46 = vcombine.low %v14296_v61, %v14298_v32  ;;  %19925 = vmatpush1.bf16.msra.mxu0 %v19924_v60  ;;  %v20208_v60 = vunpack.c.l.s8.bf16 %v11673_v6  ;;  %v11682_v8 = vld [vmem:[%s21287_s16 + $0x7f8] sm:$0xff]  ;;  %v19956_v61 = vunpack.c.h.s8.bf16 %v11671_v49  ;;  %v11679_v38 = vld [vmem:[%s21287_s16 + $0x7e0] sm:$0xff] }
 0x92b   : > { %20181 = vmatpush1.bf16.msra.mxu1 %v20180_v53  ;;  %19927 = vmatprep.subr.bf16.mxu0 %v19926_v18  ;;  %v19954_v53 = vunpack.c.h.s8.bf16 %v11672_v4  ;;  %v20210_v18 = vunpack.c.h.s8.bf16 %v11674_v34  ;;  %v20214_v32 = vunpack.c.l.s8.bf16 %v11682_v8  ;;  %v16126_v4 = vld [vmem:[#allocation15 + $0x60] sm:$0xff] (!%p15849_p4)  }
 0x92c   : > { %v14885_v15 = vrot.slane %v14877_v62, %v21899_v55  ;;  %v14892_v11 = vrot.slane %v14878_v46, %v21899_v55  ;;  %20183 = vmatprep.subr.bf16.mxu1 %v20182_v40  ;;  %v20212_v40 = vunpack.c.h.s8.bf16 %v11673_v6  ;;  %v11681_v62 = vld [vmem:[%s21287_s16 + $0x7f0] sm:$0xff]  ;;  %v19960_v46 = vunpack.c.l.s8.bf16 %v11679_v38 }
 0x92d   : > { %v16142_v34 = vld [vmem:[#allocation15 + $0xe0] sm:$0xff] (!%p15849_p4)  }
 0x92e   : > { %v14893_v3 = vcombine.low %v14885_v15, %v14892_v11  ;;  %19929 = vmatpush1.bf16.msra.mxu0 %v19928_v19  ;;  %v20216_v19 = vunpack.c.l.s8.bf16 %v11681_v62  ;;  %v19964_v15 = vunpack.c.h.s8.bf16 %v11679_v38  ;;  %v20220_v11 = vunpack.c.h.s8.bf16 %v11681_v62  ;;  %v16127_v38 = vld [vmem:[#allocation15 + $0x68] sm:$0xff] (!%p15849_p4)  }
 0x92f   : > { %20185 = vmatpush1.bf16.msra.mxu1 %v20184_v25  ;;  %19931 = vmatprep.subr.bf16.mxu0 %v19930_v12  ;;  %v19962_v25 = vunpack.c.h.s8.bf16 %v11680_v33  ;;  %v20218_v12 = vunpack.c.h.s8.bf16 %v11682_v8  ;;  %v16118_v8 = vld [vmem:[#allocation15 + $0x20] sm:$0xff] (!%p15849_p4)  }
 0x930   : > { %v14913_v39 = vadd.f32 %v14893_v3, %v13731_v37  ;;  %20187 = vmatprep.subr.bf16.mxu1 %v20186_v43 }
 0x932   : > { %14915 = vst [vmem:[#allocation3] sm:$0xff] %v14913_v39  ;;  %19933 = vmatpush1.bf16.msra.mxu0 %v19932_v24 }
 0x933   : > { %20189 = vmatpush1.bf16.msra.mxu1 %v20188_v13  ;;  %19935 = vmatprep.subr.bf16.mxu0 %v19934_v27 }
 0x934   : > { %20191 = vmatprep.subr.bf16.mxu1 %v20190_v48 }
 0x936   : > { %19937 = vmatpush1.bf16.msra.mxu0 %v19936_v63  ;;  %v15860_v63 = vld [vmem:[#allocation15] sm:$0xff] (!%p15849_p4)  }
 0x937   : > { %20193 = vmatpush1.bf16.msra.mxu1 %v20192_v23  ;;  %19939 = vmatprep.subr.bf16.mxu0 %v19938_v57  ;;  %v16130_v23 = vld [vmem:[#allocation15 + $0x80] sm:$0xff] (!%p15849_p4)   ;;  %v16123_v57 = vld [vmem:[#allocation15 + $0x48] sm:$0xff] (!%p15849_p4)  }
 0x938   : > { %20195 = vmatprep.subr.bf16.mxu1 %v20194_v54  ;;  %v16139_v54 = vld [vmem:[#allocation15 + $0xc8] sm:$0xff] (!%p15849_p4)  }
 0x93a   : > { %19941 = vmatpush1.bf16.msra.mxu0 %v19940_v41  ;;  %v16124_v41 = vld [vmem:[#allocation15 + $0x50] sm:$0xff] (!%p15849_p4)  }
 0x93b   : > { %20197 = vmatpush1.bf16.msra.mxu1 %v20196_v35  ;;  %19943 = vmatprep.subr.bf16.mxu0 %v19942_v50  ;;  %v16140_v35 = vld [vmem:[#allocation15 + $0xd0] sm:$0xff] (!%p15849_p4)  }
 0x93c   : > { %20199 = vmatprep.subr.bf16.mxu1 %v20198_v14  ;;  %v16116_v50 = vld [vmem:[#allocation15 + $0x10] sm:$0xff] (!%p15849_p4)   ;;  %v16125_v14 = vld [vmem:[#allocation15 + $0x58] sm:$0xff] (!%p15849_p4)  }
 0x93e   : > { %19945 = vmatpush1.bf16.msra.mxu0 %v19944_v42  ;;  %v16117_v42 = vld [vmem:[#allocation15 + $0x18] sm:$0xff] (!%p15849_p4)  }
 0x93f   : > { %20201 = vmatpush1.bf16.msra.mxu1 %v20200_v28  ;;  %19947 = vmatprep.subr.bf16.mxu0 %v19946_v59  ;;  %v16133_v28 = vld [vmem:[#allocation15 + $0x98] sm:$0xff] (!%p15849_p4)   ;;  %v14923_v59 = vld [vmem:[#allocation12] sm:$0xff] (!%p15849_p4) }
 0x940   : > { %20203 = vmatprep.subr.bf16.mxu1 %v20202_v58  ;;  %v14995_v58 = vld [vmem:[#allocation13] sm:$0xff] (!%p15849_p4)  ;;  %v14940_v49 = vrot.slane (!%p15849_p4), %v14923_v59, %v22872_v2  ;;  %v14944_v33 = vrot.slane (!%p15849_p4), %v14923_v59, %v22974_v20  ;;  %v14956_v62 = vrot.slane (!%p15849_p4), %v14923_v59, %v22980_v5 }
 0x941   : > { %v15004_v6 = vrot.slane (!%p15849_p4), %v14995_v58, %v22810_v31 }
 0x942   : > { %19949 = vmatpush1.bf16.msra.mxu0 %v19948_v1  ;;  %v14928_v1 = vrot.slane (!%p15849_p4), %v14923_v59, %v22868_v36 }
 0x943   : > { %20205 = vmatpush1.bf16.msra.mxu1 %v20204_v0  ;;  %19951 = vmatprep.subr.bf16.mxu0 %v19950_v52  ;;  %v14932_v0 = vrot.slane (!%p15849_p4), %v14923_v59, %v22810_v31  ;;  %v14936_v52 = vrot.slane (!%p15849_p4), %v14923_v59, %v22924_v56  ;;  %v16143_v31 = vld [vmem:[#allocation15 + $0xe8] sm:$0xff] (!%p15849_p4)  }
 0x944   : > { %20207 = vmatprep.subr.bf16.mxu1 %v20206_v26  ;;  %v15000_v26 = vrot.slane (!%p15849_p4), %v14995_v58, %v22868_v36  ;;  %v14948_v36 = vrot.slane (!%p15849_p4), %v14923_v59, %v22977_v16 }
 0x946   : > { %19953 = vmatpush1.bf16.msra.mxu0 %v19952_v22  ;;  %v15008_v22 = vrot.slane (!%p15849_p4), %v14995_v58, %v22924_v56 }
 0x947   : > { %20209 = vmatpush1.bf16.msra.mxu1 %v20208_v60  ;;  %19955 = vmatprep.subr.bf16.mxu0 %v19954_v53  ;;  %v15012_v60 = vrot.slane (!%p15849_p4), %v14995_v58, %v22872_v2  ;;  %v14957_v53 = vcombine.low (!%p15849_p4), %v14928_v1, %v14932_v0 }
 0x948   : > { %20211 = vmatprep.subr.bf16.mxu1 %v20210_v18  ;;  %v14958_v18 = vcombine.low (!%p15849_p4), %v14936_v52, %v14940_v49  ;;  %v16146_v52 = vld [vmem:[#allocation15 + $0x100] sm:$0xff] (!%p15849_p4)  }
 0x949   : > { %v14965_v56 = vrot.slane (!%p15849_p4), %v14957_v53, %v21899_v55  ;;  %v16162_v49 = vld [vmem:[#allocation15 + $0x180] sm:$0xff] (!%p15849_p4)  }
 0x94a   : > { %19957 = vmatpush1.bf16.msra.mxu0 %v19956_v61  ;;  %v16134_v61 = vld [vmem:[#allocation15 + $0xa0] sm:$0xff] (!%p15849_p4)   ;;  %v14972_v2 = vrot.slane (!%p15849_p4), %v14958_v18, %v21899_v55 }
 0x94b   : > { %20213 = vmatpush1.bf16.msra.mxu1 %v20212_v40  ;;  %19959 = vmatprep.subr.bf16.mxu0 %v19958_v17  ;;  %v15029_v40 = vcombine.low (!%p15849_p4), %v15000_v26, %v15004_v6  ;;  %v15030_v17 = vcombine.low (!%p15849_p4), %v15008_v22, %v15012_v60  ;;  %v16155_v26 = vld [vmem:[#allocation15 + $0x148] sm:$0xff] (!%p15849_p4)  }
 0x94c   : > { %20215 = vmatprep.subr.bf16.mxu1 %v20214_v32  ;;  %v14952_v32 = vrot.slane (!%p15849_p4), %v14923_v59, %v23041_v10  ;;  %v16154_v59 = vld [vmem:[#allocation15 + $0x140] sm:$0xff] (!%p15849_p4)   ;;  %v16171_v6 = vld [vmem:[#allocation15 + $0x1c8] sm:$0xff] (!%p15849_p4)  }
 0x94e   : > { %19961 = vmatpush1.bf16.msra.mxu0 %v19960_v46  ;;  %v14921_v46 = vld [vmem:[#allocation3] sm:$0xff] (!%p15849_p4) }
 0x94f   : > { %20217 = vmatpush1.bf16.msra.mxu1 %v20216_v19  ;;  %19963 = vmatprep.subr.bf16.mxu0 %v19962_v25  ;;  %v15037_v19 = vrot.slane (!%p15849_p4), %v15029_v40, %v21899_v55  ;;  %v15044_v25 = vrot.slane (!%p15849_p4), %v15030_v17, %v21899_v55  ;;  %v16172_v40 = vld [vmem:[#allocation15 + $0x1d0] sm:$0xff] (!%p15849_p4)  }
 0x950   : > { %20219 = vmatprep.subr.bf16.mxu1 %v20218_v12  ;;  %v14974_v12 = vcombine.low (!%p15849_p4), %v14944_v33, %v14948_v36  ;;  %v16147_v33 = vld [vmem:[#allocation15 + $0x108] sm:$0xff] (!%p15849_p4)   ;;  %v16148_v36 = vld [vmem:[#allocation15 + $0x110] sm:$0xff] (!%p15849_p4)  }
 0x952   : > { %19965 = vmatpush1.bf16.msra.mxu0 %v19964_v15  ;;  %v15016_v15 = vrot.slane (!%p15849_p4), %v14995_v58, %v22974_v20 }
 0x953   : > { %20221 = vmatpush1.bf16.msra.mxu1 %v20220_v11  ;;  %20223 = vmatprep.subr.bf16.mxu0 (!%p15849_p4), %v16122_v9  ;;  %v14973_v11 = vcombine.low (!%p15849_p4), %v14965_v56, %v14972_v2  ;;  %v16173_v56 = vld [vmem:[#allocation15 + $0x1d8] sm:$0xff] (!%p15849_p4)  }
 0x954   : > { %v16165_v2 = vld [vmem:[#allocation15 + $0x198] sm:$0xff] (!%p15849_p4)  }
 0x955   : > { %14579 = vmatmul.mubr.f32.vlgmr.msra.gmra.mrb[6].mxu0 %v23056_v21 }
 0x956   : > { %14863 = vmatmul.mubr.f32.vlgmr.msra.gmra.mrb[6].mxu1 %v23056_v21  ;;  %v16138_v21 = vld [vmem:[#allocation15 + $0xc0] sm:$0xff] (!%p15849_p4)   ;;  %20225 = vmatpush3.bf16.msra.mxu0 (!%p15849_p4), %v15860_v63 }
 0x957   : > { %20255 = vmatprep.subr.bf16.mxu1 (!%p15849_p4), %v16138_v21  ;;  %20227 = vmatprep.subr.bf16.mxu0 (!%p15849_p4), %v16123_v57  ;;  %v16120_v57 = vld [vmem:[#allocation15 + $0x30] sm:$0xff] (!%p15849_p4)  }
 0x958   : > { %20257 = vmatpush3.bf16.msra.mxu1 (!%p15849_p4), %v16130_v23 }
 0x959   : > { %20259 = vmatprep.subr.bf16.mxu1 (!%p15849_p4), %v16139_v54  ;;  %v16136_v54 = vld [vmem:[#allocation15 + $0xb0] sm:$0xff] (!%p15849_p4)  }
 0x95a   : > { %20229 = vmatpush3.bf16.msra.mxu0 (!%p15849_p4), %v16115_v7  ;;  %v16129_v7 = vld [vmem:[#allocation15 + $0x78] sm:$0xff] (!%p15849_p4)  }
 0x95b   : > { %20231 = vmatprep.subr.bf16.mxu0 (!%p15849_p4), %v16124_v41 }
 0x95c   : > { %20261 = vmatpush3.bf16.msra.mxu1 (!%p15849_p4), %v16131_v47  ;;  %v16145_v47 = vld [vmem:[#allocation15 + $0xf8] sm:$0xff] (!%p15849_p4)  }
 0x95d   : > { %20263 = vmatprep.subr.bf16.mxu1 (!%p15849_p4), %v16140_v35 }
 0x95e   : > { %20233 = vmatpush3.bf16.msra.mxu0 (!%p15849_p4), %v16116_v50 }
 0x95f   : > { %20235 = vmatprep.subr.bf16.mxu0 (!%p15849_p4), %v16125_v14 }
 0x960   : > { %20265 = vmatpush3.bf16.msra.mxu1 (!%p15849_p4), %v16132_v29 }
 0x961   : > { %20267 = vmatprep.subr.bf16.mxu1 (!%p15849_p4), %v16141_v44  ;;  %v16121_v44 = vld [vmem:[#allocation15 + $0x38] sm:$0xff] (!%p15849_p4)  }
 0x962   : > { %20237 = vmatpush3.bf16.msra.mxu0 (!%p15849_p4), %v16117_v42  ;;  %v16137_v42 = vld [vmem:[#allocation15 + $0xb8] sm:$0xff] (!%p15849_p4)  }
 0x963   : > { %20239 = vmatprep.subr.bf16.mxu0 (!%p15849_p4), %v16126_v4 }
 0x964   : > { %20269 = vmatpush3.bf16.msra.mxu1 (!%p15849_p4), %v16133_v28 }
 0x965   : > { %20271 = vmatprep.subr.bf16.mxu1 (!%p15849_p4), %v16142_v34  ;;  %v16170_v34 = vld [vmem:[#allocation15 + $0x1c0] sm:$0xff] (!%p15849_p4)  }
 0x966   : > { %20241 = vmatpush3.bf16.msra.mxu0 (!%p15849_p4), %v16118_v8  ;;  %v16163_v8 = vld [vmem:[#allocation15 + $0x188] sm:$0xff] (!%p15849_p4)  }
 0x967   : > { %20243 = vmatprep.subr.bf16.mxu0 (!%p15849_p4), %v16127_v38  ;;  %v16164_v38 = vld [vmem:[#allocation15 + $0x190] sm:$0xff] (!%p15849_p4)  }
 0x968   : > { %20273 = vmatpush3.bf16.msra.mxu1 (!%p15849_p4), %v16134_v61  ;;  %v16156_v61 = vld [vmem:[#allocation15 + $0x150] sm:$0xff] (!%p15849_p4)  }
 0x969   : > { %20275 = vmatprep.subr.bf16.mxu1 (!%p15849_p4), %v16143_v31  ;;  %v16157_v31 = vld [vmem:[#allocation15 + $0x158] sm:$0xff] (!%p15849_p4)  }
 0xa28   : > { %v14580_v43 = vpop.f32.mrb[6].mxu0 }
 0xa29   : > { %v14864_v51 = vpop.f32.mrb[6].mxu1  ;;  %v14582_v37 = vpop.f32.mrb[7].mxu0 }
 0xa2a   : > { %v14894_v45 = vcombine.low %v14580_v43, %v14582_v37  ;;  %v14866_v3 = vpop.f32.mrb[7].mxu1  ;;  %v14975_v43 = vcombine.low (!%p15849_p4), %v14952_v32, %v14956_v62  ;;  %v16119_v37 = vld [vmem:[#allocation15 + $0x28] sm:$0xff] (!%p15849_p4)   ;;  %v16158_v32 = vld [vmem:[#allocation15 + $0x160] sm:$0xff] (!%p15849_p4)  }
 0xa2b   : > { %v14895_v24 = vcombine.low %v14864_v51, %v14866_v3  ;;  %v15020_v51 = vrot.slane (!%p15849_p4), %v14995_v58, %v22977_v16  ;;  %v15045_v3 = vcombine.low (!%p15849_p4), %v15037_v19, %v15044_v25  ;;  %20245 = vmatpush3.bf16.msra.mxu0 (!%p15849_p4), %v16119_v37  ;;  %v16174_v62 = vld [vmem:[#allocation15 + $0x1e0] sm:$0xff] (!%p15849_p4)   ;;  %v16159_v25 = vld [vmem:[#allocation15 + $0x168] sm:$0xff] (!%p15849_p4)   ;;  %v16152_v37 = vld [vmem:[#allocation15 + $0x130] sm:$0xff] (!%p15849_p4)  }
 0xa2c   : > { %v14902_v13 = vrot.slane %v14894_v45, %v21899_v55  ;;  %v16135_v45 = vld [vmem:[#allocation15 + $0xa8] sm:$0xff] (!%p15849_p4)   ;;  %v14989_v20 = vrot.slane (!%p15849_p4), %v14975_v43, %v21899_v55  ;;  %v16166_v19 = vld [vmem:[#allocation15 + $0x1a0] sm:$0xff] (!%p15849_p4)   ;;  %v16160_v43 = vld [vmem:[#allocation15 + $0x170] sm:$0xff] (!%p15849_p4)  }
 0xa2d   : > { %v14909_v27 = vrot.slane %v14895_v24, %v21899_v55  ;;  %14920 = sbr.rel (%p15849_p4) target bundleno = 2872 (0xb38), region = 96  ;;  %v14982_v24 = vrot.slane (!%p15849_p4), %v14974_v12, %v21899_v55  ;;  %v15046_v9 = vcombine.low (!%p15849_p4), %v15016_v15, %v15020_v51  ;;  %20277 = vmatpush3.bf16.msra.mxu1 (!%p15849_p4), %v16135_v45  ;;  %v16175_v12 = vld [vmem:[#allocation15 + $0x1e8] sm:$0xff] (!%p15849_p4)   ;;  %v16176_v51 = vld [vmem:[#allocation15 + $0x1f0] sm:$0xff] (!%p15849_p4)  }
 0xa2e   : > { %v16151_v15 = vld [vmem:[#allocation15 + $0x128] sm:$0xff] (!%p15849_p4)   ;;  %v16168_v45 = vld [vmem:[#allocation15 + $0x1b0] sm:$0xff] (!%p15849_p4)  }
 0xa2f   : > { %v14910_v39 = vcombine.low %v14902_v13, %v14909_v27  ;;  %v15024_v13 = vrot.slane (!%p15849_p4), %v14995_v58, %v23041_v10  ;;  %v16128_v27 = vld [vmem:[#allocation15 + $0x70] sm:$0xff] (!%p15849_p4)   ;;  %v14990_v21 = vcombine.low (!%p15849_p4), %v14982_v24, %v14989_v20  ;;  %v15054_v10 = vrot.slane (!%p15849_p4), %v15046_v9, %v21899_v55  ;;  %v16177_v24 = vld [vmem:[#allocation15 + $0x1f8] sm:$0xff] (!%p15849_p4)   ;;  %v15850_v20 = vld [vmem:[#allocation16] ss:$0 sm:$0xff] (!%p15849_p4) }
 0xa30   : > { %20247 = vmatprep.subr.bf16.mxu0 (!%p15849_p4), %v16128_v27  ;;  %v16169_v27 = vld [vmem:[#allocation15 + $0x1b8] sm:$0xff] (!%p15849_p4)  }
 0xa31   : > { %v14914_v48 = vadd.f32 %v14910_v39, %v13732_v30  ;;  %v16144_v30 = vld [vmem:[#allocation15 + $0xf0] sm:$0xff] (!%p15849_p4)   ;;  %v14993_v39 = vmul.f32 (!%p15849_p4), %v14973_v11, %v14921_v46  ;;  %20249 = vmatpush3.bf16.msra.mxu0 (!%p15849_p4), %v16120_v57  ;;  %v16150_v46 = vld [vmem:[#allocation15 + $0x120] sm:$0xff] (!%p15849_p4)   ;;  %v16167_v11 = vld [vmem:[#allocation15 + $0x1a8] sm:$0xff] (!%p15849_p4)  }
 0xa32   : > { %20279 = vmatprep.subr.bf16.mxu1 (!%p15849_p4), %v16144_v30  ;;  %20251 = vmatprep.subr.bf16.mxu0 (!%p15849_p4), %v16129_v7 }
 0xa33   : > { %14916 = vst [vmem:[#allocation3 + $0x8] sm:$0xff] %v14914_v48  ;;  %v15028_v48 = vrot.slane (!%p15849_p4), %v14995_v58, %v22980_v5  ;;  %v15065_v16 = vadd.f32 (!%p15849_p4), %v15045_v3, %v14993_v39  ;;  %20281 = vmatpush3.bf16.msra.mxu1 (!%p15849_p4), %v16136_v54  ;;  %v16161_v3 = vld [vmem:[#allocation15 + $0x178] sm:$0xff] (!%p15849_p4)  }
 0xa34   : > { %20283 = vmatprep.subr.bf16.mxu1 %v16145_v47 }
 0xa35   : > { %v15047_v23 = vcombine.low %v15024_v13, %v15028_v48  ;;  %v15067_v41 = vmax.f32 %v15065_v16, 0.0  ;;  %20253 = vmatpush3.bf16.msra.mxu0 %v16121_v44  ;;  %v16153_v13 = vld [vmem:[#allocation15 + $0x138] sm:$0xff]  }
 0xa36   : > { %20287 = vmatprep.subr.bf16.mxu0 %v16154_v59 }
 0xa37   : > { %v15061_v50 = vrot.slane %v15047_v23, %v21899_v55  ;;  %v15341_v5 = vrot.slane %v15067_v41, %v21899_v55  ;;  %v15334_v29 = vcombine.high %v15067_v41, %v15067_v41  ;;  %20285 = vmatpush3.bf16.msra.mxu1 %v16137_v42 }
 0xa38   : > { %20319 = vmatprep.subr.bf16.mxu1 %v16170_v34 }
 0xa39   : > { %v15062_v14 = vcombine.low %v15054_v10, %v15061_v50  ;;  %v15349_v28 = vcombine.high %v15341_v5, %v15341_v5  ;;  %v15348_v58 = vrot.slane %v15334_v29, %v21899_v55 }
 0xa3a   : > { %v14922_v63 = vld [vmem:[#allocation3 + $0x8] sm:$0xff] }
 0xa3b   : > { %v14994_v35 = vmul.f32 %v14990_v21, %v14922_v63  ;;  %v15350_v1 = vcombine.high %v15348_v58, %v15348_v58  ;;  %15440 = vmatprep.mubr.f32.mxu0 %v15349_v28 }
 0xa3c   : > { %15441 = vmatmul.mubr.f32.vlgmr.msra.gmra.mrb[0].mxu0 %v15341_v5 }
 0xa3d   : > { %v15066_v4 = vadd.f32 %v15062_v14, %v14994_v35  ;;  %15510 = vmatprep.mubr.f32.mxu1 %v15350_v1  ;;  %20289 = vmatpush3.bf16.msra.mxu0 %v16146_v52 }
 0xa3e   : > { %15511 = vmatmul.mubr.f32.vlgmr.msra.gmra.mrb[0].mxu1 %v15348_v58  ;;  %20291 = vmatprep.subr.bf16.mxu0 %v16155_v26 }
 0xa3f   : > { %v15068_v0 = vmax.f32 %v15066_v4, 0.0  ;;  %20321 = vmatpush3.bf16.msra.mxu1 %v16162_v49 }
 0xa40   : > { %20323 = vmatprep.subr.bf16.mxu1 %v16171_v6 }
 0xa41   : > { %v23232_v22 = vrot.slane %v15068_v0, %v21899_v55  ;;  %v15351_v60 = vcombine.high %v15068_v0, %v15068_v0  ;;  %20293 = vmatpush3.bf16.msra.mxu0 %v16147_v33 }
 0xa42   : > { %20295 = vmatprep.subr.bf16.mxu0 %v16156_v61 }
 0xa43   : > { %v15366_v53 = vcombine.high %v23232_v22, %v23232_v22  ;;  %v15365_v18 = vrot.slane %v15351_v60, %v21899_v55  ;;  %20325 = vmatpush3.bf16.msra.mxu1 %v16163_v8  ;;  %v16149_v55 = vld [vmem:[#allocation15 + $0x118] sm:$0xff]  }
 0xa44   : > { %20327 = vmatprep.subr.bf16.mxu1 %v16172_v40 }
 0xa45   : > { %15580 = vmatprep.mubr.f32.mxu0 %v15366_v53  ;;  %v15367_v17 = vcombine.high %v15365_v18, %v15365_v18  ;;  %20297 = vmatpush3.bf16.msra.mxu0 %v16148_v36 }
 0xa46   : > { %20299 = vmatprep.subr.bf16.mxu0 %v16157_v31 }
 0xa47   : > { %15650 = vmatprep.mubr.f32.mxu1 %v15367_v17  ;;  %20329 = vmatpush3.bf16.msra.mxu1 %v16164_v38 }
 0xa48   : > { %20331 = vmatprep.subr.bf16.mxu1 %v16173_v56 }
 0xa49   : > { %20301 = vmatpush3.bf16.msra.mxu0 %v16149_v55 }
 0xa4a   : > { %20303 = vmatprep.subr.bf16.mxu0 %v16158_v32 }
 0xa4b   : > { %20333 = vmatpush3.bf16.msra.mxu1 %v16165_v2 }
 0xa4c   : > { %20335 = vmatprep.subr.bf16.mxu1 %v16174_v62 }
 0xa4d   : > { %20305 = vmatpush3.bf16.msra.mxu0 %v16150_v46 }
 0xa4e   : > { %20307 = vmatprep.subr.bf16.mxu0 %v16159_v25 }
 0xa4f   : > { %20337 = vmatpush3.bf16.msra.mxu1 %v16166_v19 }
 0xa50   : > { %20339 = vmatprep.subr.bf16.mxu1 %v16175_v12 }
 0xa51   : > { %20309 = vmatpush3.bf16.msra.mxu0 %v16151_v15 }
 0xa52   : > { %20311 = vmatprep.subr.bf16.mxu0 %v16160_v43 }
 0xa53   : > { %20341 = vmatpush3.bf16.msra.mxu1 %v16167_v11 }
 0xa54   : > { %20343 = vmatprep.subr.bf16.mxu1 %v16176_v51 }
 0xa55   : > { %20313 = vmatpush3.bf16.msra.mxu0 %v16152_v37 }
 0xa56   : > { %20315 = vmatprep.subr.bf16.mxu0 %v16161_v3 }
 0xa57   : > { %20345 = vmatpush3.bf16.msra.mxu1 %v16168_v45 }
 0xa58   : > { %20347 = vmatprep.subr.bf16.mxu1 %v16177_v24 }
 0xa59   : > { %20317 = vmatpush3.bf16.msra.mxu0 %v16153_v13 }
 0xa5b   : > { %20349 = vmatpush3.bf16.msra.mxu1 %v16169_v27 }
 0xa5c   : > { %15581 = vmatmul.mubr.f32.vlgmr.msra.gmra.mrb[2].mxu0 %v23232_v22 }
 0xa5e   : > { %15651 = vmatmul.mubr.f32.vlgmr.msra.gmra.mrb[2].mxu1 %v15365_v18 }
 0xb0f   : > { %v16210_v30 = vpop.f32.mrb[0].mxu0 }
 0xb10   : > { %v16211_v48 = vpop.f32.mrb[1].mxu0 }
 0xb11   : > { %v16245_v39 = vpop.f32.mrb[0].mxu1  ;;  %v16212_v16 = vadd.f32 %v16211_v48, %v16210_v30 }
 0xb12   : > { %v16246_v9 = vpop.f32.mrb[1].mxu1 }
 0xb13   : > { %v16247_v63 = vadd.f32 %v16246_v9, %v16245_v39  ;;  %v15443_v21 = vadd.f32 %v16212_v16, %v15850_v20 }
 0xb15   : > { %v15513_v23 = vadd.f32 %v16247_v63, %v15443_v21 }
 0xb2f   : > { %v16280_v57 = vpop.f32.mrb[2].mxu0 }
 0xb30   : > { %v16281_v10 = vpop.f32.mrb[3].mxu0 }
 0xb31   : > { %v16315_v54 = vpop.f32.mrb[2].mxu1  ;;  %v16282_v47 = vadd.f32 %v16281_v10, %v16280_v57 }
 0xb32   : > { %v16316_v7 = vpop.f32.mrb[3].mxu1 }
 0xb33   : > { %v16317_v41 = vadd.f32 %v16316_v7, %v16315_v54  ;;  %v15583_v35 = vadd.f32 %v16282_v47, %v15513_v23 }
 0xb35   : > { %v15653_v50 = vadd.f32 %v16317_v41, %v15583_v35 }
 0xb37   : > { %15656 = vst [vmem:[#allocation18] sm:$0x3] %v15653_v50 }
 0xb38 PF: > { %s23359_s13 = sld [smem:[#allocation27_spill]]  ;;  %s20915_s22 = smov [#allocation18]  }
 0xb39   : > { %s15664_s16 = sshll.u32 %s20915_s22, 4  ;;  %s15665_s16 = int_to_ptr.vmem [resolvable:$true] %s15664_s16 }
 0xb3a   : > { %s20814_s30 = scalar_lea.vmem %s15665_s16, 32  ;;  %p20821_p10 = scmp.lt.s32.totalorder %s15665_s16, %s15665_s16 }
 0xb3b   : > { %p20815_p1 = scmp.ne.s32.totalorder %s15665_s16, %s20814_s30  ;;  %p20822_p12 = scmp.lt.s32.totalorder %s20814_s30, %s20814_s30 }
 0xb3d   : > { %p20823_p5 = por %p20822_p12, %p20821_p10 }
 0xb3e   : > { %p20528_p8 = scmp.eq.s32.totalorder %s23359_s13, 1 }
 0xb40   : > { %p20816_p0 = pnand %p20815_p1, %p20528_p8 }
 0xb42   : > { %p20817_p3 = pneg %p20816_p0 }
 0xb44   : > { %p20824_p7 = pnand %p20823_p5, %p20817_p3 }
 0xb46   : > { %20827 = shalt.err (!%p20824_p7)
}
 0xb47   : > { %s23360_s12 = sld [smem:[#allocation41_spill]] }
 0xb4d   : > { %s23361_s28 = smov %s23360_s12  ;;  %s20828_s19 = scalar_lea.hbm %s23360_s12, 32 }
 0xb4e   : > { %p20829_p13 = scmp.ne.s32.totalorder %s23361_s28, %s20828_s19  ;;  %p20834_p9 = scmp.lt.u32.totalorder %s20828_s19, %s23361_s28 }
 0xb50   : > { %p20830_p6 = pnand %p20829_p13, %p20528_p8 }
 0xb52   : > { %p20831_p2 = pneg %p20830_p6 }
 0xb54   : > { %p20836_p11 = pnand %p20834_p9, %p20831_p2 }
 0xb56   : > { %20839 = shalt.err (!%p20836_p11)
}
 0xb57   : > { %20490 = dma.vmem_to_hbm [thread:$0]  (%p20528_p8), %s15665_s16, 32, %s23361_s28, [#allocation6]  }
 0xb58   : > { %20881 = dma.done.wait (%p20528_p8), [#allocation6], 32  }
 0xb59   : > { %20883 = vsyncadd (%p20528_p8), [#allocation6], 4294967264 }
 0xb5a PF: > { %s23362_s12 = sld [smem:[#allocation28_spill]]  ;;  %s23363_s23 = sld [smem:[#allocation26_spill]] }
 0xb5b   : > { %s23364_s11 = sld [smem:[#allocation29_spill]]  ;;  %s23365_s30 = smov %s20890_s10 }
 0xb60   : > { %p28_p4 = scmp.ge.s32.totalorder %s23362_s12, 4   ;;  %s23366_s10 = smov %s23363_s23 }
 0xb62   :  { %30 = sbr.rel (!%p28_p4) target bundleno = 16 (0x10), region = 154 }
 0xb69   :  { %15677 = vsyncpa [#allocation5], 1 }
 0xb6a   :  { %15679 = vsyncpa [#allocation5 + $0x1], 1 }
 0xb6b   :  { %15680 = vsyncpa [#allocation8], 1 }
 0xb6c   :  { %15682 = vsyncpa [#allocation8 + $0x1], 1 }
 0xb6d   :  { %15683 = vsyncpa [#allocation11], 1 }
 0xb6e   :  { %15685 = vsyncpa [#allocation11 + $0x1], 1 }
 0xb6f   :  { %15686 = vsyncpa [#allocation14], 1 }
 0xb70   :  { %15687 = vsyncpa [#allocation17], 1 }
 0xb71   :  { %15688 = vsyncpa [#allocation6], 1 }
 0xb72   :  { %15690 = vsyncpa [#allocation6 + $0x1], 1 }

</bundles_post_ra>
